<compile_context>
chip_gen: v6e
topology: v6e:2x2x1
jax: 0.10.0
libtpu: 0.0.40
codegen_flags: <defaults>
</compile_context>

<pallas_src>
import math
from functools import partial

import jax
import jax.numpy as jnp
from jax import lax
from jax.experimental import pallas as pl
from jax.experimental.pallas import tpu as pltpu

_DN = (((1,), (1,)), ((), ()))      # contract last axes of both: x @ W^T for (out,in) W
_DN_T = (((1,), (0,)), ((), ()))    # standard matmul: x @ W for already-transposed W
_LN_EPS = 1e-5
_F32 = jnp.float32
_BF16 = jnp.bfloat16


# --------------------------------------------------------------------------
# Shared math (used by the Pallas kernel body AND by the XLA mirror reference)
# --------------------------------------------------------------------------

def _layer_norm(x, w, b):
    """x: (N, C) f32; w, b: (1, C) f32."""
    mean = jnp.mean(x, axis=-1, keepdims=True)
    cen = x - mean
    var = jnp.mean(cen * cen, axis=-1, keepdims=True)
    return cen * lax.rsqrt(var + _LN_EPS) * w + b


def _softmax_last(s):
    m = jnp.max(s, axis=-1, keepdims=True)
    p = jnp.exp(s - m)
    return p / jnp.sum(p, axis=-1, keepdims=True)     # exact division (review note)


def _attention(q_in, k_in, v_in, w_slab, b_slab, *, num_heads, batch,
               rows_q, rows_kv, fuse_qk):
    """One SAM Attention layer (projections -> MHA -> out-proj).

    q_in: (batch*rows_q, C) f32; k_in/v_in: (batch*rows_kv, C) f32.
    w_slab: (4I, C) bf16 with rows [Wq; Wk; Wv; Wo^T].
    b_slab: (1, 3I + C) f32 = [bq | bk | bv | bo].
    Returns (batch*rows_q, C) f32.
    """
    internal = w_slab.shape[0] // 4
    dh = internal // num_heads
    scale = 1.0 / math.sqrt(dh)

    bv = b_slab[:, 2 * internal:3 * internal]
    bo = b_slab[:, 3 * internal:]

    q_bf = q_in.astype(_BF16)
    if fuse_qk:
        # q_in is k_in: a single (N, C) x (C, 2I) MXU pass yields qp|kp.
        qk = lax.dot_general(q_bf, w_slab[0:2 * internal], _DN,
                             preferred_element_type=_F32)
        qk = qk + b_slab[:, 0:2 * internal]
        qp = qk[:, 0:internal]
        kp = qk[:, internal:2 * internal]
    else:
        bq = b_slab[:, 0:internal]
        bk = b_slab[:, internal:2 * internal]
        qp = lax.dot_general(q_bf, w_slab[0:internal], _DN,
                             preferred_element_type=_F32) + bq
        kp = lax.dot_general(k_in.astype(_BF16), w_slab[internal:2 * internal], _DN,
                             preferred_element_type=_F32) + bk
    vp = lax.dot_general(v_in.astype(_BF16), w_slab[2 * internal:3 * internal], _DN,
                         preferred_element_type=_F32) + bv
    qp = qp * scale                       # fold 1/sqrt(dh) once for all heads

    # Per-(batch, head) softmax(Q K^T) V.  Heads are gathered lane-wise and batches
    # row-wise so the output projection below is a single MXU contraction per layer.
    batch_outs = []
    for b in range(batch):                # tiny static loops (score/PV need per-b,h tiles)
        qb = qp[b * rows_q:(b + 1) * rows_q]
        kb = kp[b * rows_kv:(b + 1) * rows_kv]
        vb = vp[b * rows_kv:(b + 1) * rows_kv].astype(_BF16)
        head_outs = []
        for h in range(num_heads):
            hs = slice(h * dh, (h + 1) * dh)
            s = lax.dot_general(qb[:, hs].astype(_BF16), kb[:, hs].astype(_BF16),
                                _DN, preferred_element_type=_F32)
            p = _softmax_last(s)
            head_outs.append(lax.dot_general(p.astype(_BF16), vb[:, hs], _DN_T,
                                             preferred_element_type=_F32))
        batch_outs.append(jnp.concatenate(head_outs, axis=-1))
    attn_o = jnp.concatenate(batch_outs, axis=0)               # (batch*rows_q, I)

    wo_t = w_slab[3 * internal:4 * internal]                   # (I, C) == Wo^T
    return lax.dot_general(attn_o.astype(_BF16), wo_t, _DN_T,
                           preferred_element_type=_F32) + bo


def _mlp(x, w_slab, b_slab, *, mlp_dim):
    """Linear -> ReLU -> Linear.  w_slab: (2*mlp_dim, C) bf16 rows [W1; W2^T]."""
    w1 = w_slab[0:mlp_dim]
    w2_t = w_slab[mlp_dim:2 * mlp_dim]
    b1 = b_slab[:, 0:mlp_dim]
    b2 = b_slab[:, mlp_dim:]
    h = lax.dot_general(x.astype(_BF16), w1, _DN, preferred_element_type=_F32) + b1
    h = jnp.maximum(h, 0.0)
    return lax.dot_general(h.astype(_BF16), w2_t, _DN_T,
                           preferred_element_type=_F32) + b2


def _block_forward(queries, keys, qpe, kpe,
                   sa_t_w, sa_t_b, sa_i_w, sa_i_b,
                   ca_ti_w, ca_ti_b, ca_it_w, ca_it_b,
                   mlp_w, mlp_b, ln_w, ln_b,
                   *, num_heads, batch, nq, nk, mlp_dim, skip_first_layer_pe):
    """Whole TwoWayAttentionBlock2 on flattened (batch*rows, C) activations."""
    attn = partial(_attention, num_heads=num_heads, batch=batch)

    # (1) self-attention on each stream
    if skip_first_layer_pe:
        queries = attn(queries, queries, queries, sa_t_w, sa_t_b,
                       rows_q=nq, rows_kv=nq, fuse_qk=True)
        keys = attn(keys, keys, keys, sa_i_w, sa_i_b,
                    rows_q=nk, rows_kv=nk, fuse_qk=True)
    else:
        q_pe = queries + qpe
        queries = queries + attn(q_pe, q_pe, queries, sa_t_w, sa_t_b,
                                 rows_q=nq, rows_kv=nq, fuse_qk=True)
        k_pe = keys + kpe
        keys = keys + attn(k_pe, k_pe, keys, sa_i_w, sa_i_b,
                           rows_q=nk, rows_kv=nk, fuse_qk=True)
    queries = _layer_norm(queries, ln_w[0:1], ln_b[0:1])
    keys = _layer_norm(keys, ln_w[1:2], ln_b[1:2])

    # (2) cross-attention: tokens attend to image
    q_pe = queries + qpe
    k_pe = keys + kpe
    queries = queries + attn(q_pe, k_pe, keys, ca_ti_w, ca_ti_b,
                             rows_q=nq, rows_kv=nk, fuse_qk=False)
    queries = _layer_norm(queries, ln_w[2:3], ln_b[2:3])

    # (3) MLP on tokens
    queries = queries + _mlp(queries, mlp_w, mlp_b, mlp_dim=mlp_dim)
    queries = _layer_norm(queries, ln_w[3:4], ln_b[3:4])

    # (4) cross-attention: image attends to tokens
    q_pe = queries + qpe
    k_pe = keys + kpe
    keys = keys + attn(k_pe, q_pe, queries, ca_it_w, ca_it_b,
                       rows_q=nk, rows_kv=nq, fuse_qk=False)
    keys = _layer_norm(keys, ln_w[4:5], ln_b[4:5])
    return queries, keys


# --------------------------------------------------------------------------
# The single fused Pallas kernel + wrapper
# --------------------------------------------------------------------------

def _two_way_block_kernel(q_ref, k_ref, qpe_ref, kpe_ref,
                          sa_t_w_ref, sa_t_b_ref, sa_i_w_ref, sa_i_b_ref,
                          ca_ti_w_ref, ca_ti_b_ref, ca_it_w_ref, ca_it_b_ref,
                          mlp_w_ref, mlp_b_ref, ln_w_ref, ln_b_ref,
                          q_out_ref, k_out_ref,
                          *, num_heads, batch, nq, nk, mlp_dim, skip_first_layer_pe):
    q_out, k_out = _block_forward(
        q_ref[...], k_ref[...], qpe_ref[...], kpe_ref[...],
        sa_t_w_ref[...], sa_t_b_ref[...], sa_i_w_ref[...], sa_i_b_ref[...],
        ca_ti_w_ref[...], ca_ti_b_ref[...], ca_it_w_ref[...], ca_it_b_ref[...],
        mlp_w_ref[...], mlp_b_ref[...], ln_w_ref[...], ln_b_ref[...],
        num_heads=num_heads, batch=batch, nq=nq, nk=nk, mlp_dim=mlp_dim,
        skip_first_layer_pe=skip_first_layer_pe)
    q_out_ref[...] = q_out
    k_out_ref[...] = k_out


def two_way_attention_block2(packed, queries, keys, query_pe, key_pe, *,
                             num_heads, skip_first_layer_pe=False):
    B, Nq, C = queries.shape
    Nk = keys.shape[1]
    mlp_dim = packed["mlp_w"].shape[0] // 2

    kernel = partial(_two_way_block_kernel, num_heads=num_heads, batch=B,
                     nq=Nq, nk=Nk, mlp_dim=mlp_dim,
                     skip_first_layer_pe=skip_first_layer_pe)

    # Flatten batch into rows outside the kernel (free), keep lane-dense (.., C) layout.
    q2 = queries.reshape(B * Nq, C)
    k2 = keys.reshape(B * Nk, C)
    qpe2 = query_pe.reshape(B * Nq, C)
    kpe2 = key_pe.reshape(B * Nk, C)

    out_q, out_k = pl.pallas_call(
        kernel,
        out_shape=(jax.ShapeDtypeStruct((B * Nq, C), jnp.float32),
                   jax.ShapeDtypeStruct((B * Nk, C), jnp.float32)),
        compiler_params=pltpu.CompilerParams(vmem_limit_bytes=32 * 1024 * 1024),
    )(q2, k2, qpe2, kpe2,
      packed["sa_tok_w"], packed["sa_tok_b"],
      packed["sa_img_w"], packed["sa_img_b"],
      packed["ca_t2i_w"], packed["ca_t2i_b"],
      packed["ca_i2t_w"], packed["ca_i2t_b"],
      packed["mlp_w"], packed["mlp_b"],
      packed["ln_w"], packed["ln_b"])
    return out_q.reshape(B, Nq, C), out_k.reshape(B, Nk, C)


# XLA mirror of the exact kernel math (same packing / bf16 casts) for a tight check.
def xla_mirror_block(packed, queries, keys, query_pe, key_pe, *,
                     num_heads, skip_first_layer_pe=False):
    B, Nq, C = queries.shape
    Nk = keys.shape[1]
    mlp_dim = packed["mlp_w"].shape[0] // 2
    q, k = _block_forward(
        queries.reshape(B * Nq, C), keys.reshape(B * Nk, C),
        query_pe.reshape(B * Nq, C), key_pe.reshape(B * Nk, C),
        packed["sa_tok_w"], packed["sa_tok_b"],
        packed["sa_img_w"], packed["sa_img_b"],
        packed["ca_t2i_w"], packed["ca_t2i_b"],
        packed["ca_i2t_w"], packed["ca_i2t_b"],
        packed["mlp_w"], packed["mlp_b"], packed["ln_w"], packed["ln_b"],
        num_heads=num_heads, batch=B, nq=Nq, nk=Nk, mlp_dim=mlp_dim,
        skip_first_layer_pe=skip_first_layer_pe)
    return q.reshape(B, Nq, C), k.reshape(B, Nk, C)


# --------------------------------------------------------------------------
# Parameter construction (mimics nn.Linear / nn.LayerNorm; PyTorch layouts) + packing
# --------------------------------------------------------------------------

def init_linear(key, in_dim, out_dim):
    kw, kb = jax.random.split(key)
    bound = 1.0 / math.sqrt(in_dim)
    w = jax.random.uniform(kw, (out_dim, in_dim), jnp.float32, -bound, bound)
    b = jax.random.uniform(kb, (1, out_dim), jnp.float32, -bound, bound)
    return w, b


def init_attention(key, embedding_dim, downsample_rate):
    internal = embedding_dim // downsample_rate
    ks = jax.random.split(key, 4)
    qw, qb = init_linear(ks[0], embedding_dim, internal)
    kw, kb = init_linear(ks[1], embedding_dim, internal)
    vw, vb = init_linear(ks[2], embedding_dim, internal)
    ow, ob = init_linear(ks[3], internal, embedding_dim)
    return dict(qw=qw, qb=qb, kw=kw, kb=kb, vw=vw, vb=vb, ow=ow, ob=ob)


def init_layernorm(dim):
    return dict(w=jnp.ones((1, dim), jnp.float32), b=jnp.zeros((1, dim), jnp.float32))


def init_block(key, embedding_dim, mlp_dim, attention_downsample_rate):
    ks = jax.random.split(key, 6)
    w1, b1 = init_linear(ks[4], embedding_dim, mlp_dim)
    w2, b2 = init_linear(ks[5], mlp_dim, embedding_dim)
    return dict(
        self_attn_token=init_attention(ks[0], embedding_dim, 1),
        self_attn_image=init_attention(ks[1], embedding_dim, 1),
        cross_attn_token_to_image=init_attention(ks[2], embedding_dim,
                                                 attention_downsample_rate),
        cross_attn_image_to_token=init_attention(ks[3], embedding_dim,
                                                 attention_downsample_rate),
        norm1_token=init_layernorm(embedding_dim),
        norm1_image=init_layernorm(embedding_dim),
        norm2=init_layernorm(embedding_dim),
        norm3=init_layernorm(embedding_dim),
        norm4=init_layernorm(embedding_dim),
        mlp=dict(w1=w1, b1=b1, w2=w2, b2=b2),
    )


def _pack_attention(p):
    w = jnp.concatenate([p["qw"], p["kw"], p["vw"], p["ow"].T], axis=0).astype(_BF16)
    b = jnp.concatenate([p["qb"], p["kb"], p["vb"], p["ob"]], axis=-1)      # f32
    return w, b


def pack_block(params):
    sa_t_w, sa_t_b = _pack_attention(params["self_attn_token"])
    sa_i_w, sa_i_b = _pack_attention(params["self_attn_image"])
    ca_ti_w, ca_ti_b = _pack_attention(params["cross_attn_token_to_image"])
    ca_it_w, ca_it_b = _pack_attention(params["cross_attn_image_to_token"])
    mlp_w = jnp.concatenate([params["mlp"]["w1"], params["mlp"]["w2"].T],
                            axis=0).astype(_BF16)
    mlp_b = jnp.concatenate([params["mlp"]["b1"], params["mlp"]["b2"]], axis=-1)
    ln_names = ("norm1_token", "norm1_image", "norm2", "norm3", "norm4")
    ln_w = jnp.concatenate([params[n]["w"] for n in ln_names], axis=0)
    ln_b = jnp.concatenate([params[n]["b"] for n in ln_names], axis=0)
    return dict(sa_tok_w=sa_t_w, sa_tok_b=sa_t_b,
                sa_img_w=sa_i_w, sa_img_b=sa_i_b,
                ca_t2i_w=ca_ti_w, ca_t2i_b=ca_ti_b,
                ca_i2t_w=ca_it_w, ca_i2t_b=ca_it_b,
                mlp_w=mlp_w, mlp_b=mlp_b, ln_w=ln_w, ln_b=ln_b)


# --------------------------------------------------------------------------
# Pure-f32 reference faithful to the PyTorch module (unpacked params)
# --------------------------------------------------------------------------

def _ref_attention(q, k, v, p, num_heads):
    B, Nq, _ = q.shape
    Nk = k.shape[1]
    internal = p["qw"].shape[0]
    dh = internal // num_heads
    qp = jnp.einsum("bnc,ic->bni", q, p["qw"]) + p["qb"][0]
    kp = jnp.einsum("bnc,ic->bni", k, p["kw"]) + p["kb"][0]
    vp = jnp.einsum("bnc,ic->bni", v, p["vw"]) + p["vb"][0]
    qh = qp.reshape(B, Nq, num_heads, dh).transpose(0, 2, 1, 3)
    kh = kp.reshape(B, Nk, num_heads, dh).transpose(0, 2, 1, 3)
    vh = vp.reshape(B, Nk, num_heads, dh).transpose(0, 2, 1, 3)
    s = jnp.einsum("bhqd,bhkd->bhqk", qh, kh) / math.sqrt(dh)
    a = jax.nn.softmax(s, axis=-1)
    o = jnp.einsum("bhqk,bhkd->bhqd", a, vh)
    o = o.transpose(0, 2, 1, 3).reshape(B, Nq, internal)
    return jnp.einsum("bni,ci->bnc", o, p["ow"]) + p["ob"][0]


def _ref_ln(x, p):
    mean = x.mean(-1, keepdims=True)
    var = ((x - mean) ** 2).mean(-1, keepdims=True)
    return (x - mean) / jnp.sqrt(var + _LN_EPS) * p["w"][0] + p["b"][0]


def _ref_mlp(x, p):
    h = jnp.einsum("bnc,hc->bnh", x, p["w1"]) + p["b1"][0]
    h = jnp.maximum(h, 0.0)
    return jnp.einsum("bnh,ch->bnc", h, p["w2"]) + p["b2"][0]


def _ref_block(params, queries, keys, query_pe, key_pe, *, num_heads,
               skip_first_layer_pe=False):
    if skip_first_layer_pe:
        queries = _ref_attention(queries, queries, queries,
                                 params["self_attn_token"], num_heads)
        keys = _ref_attention(keys, keys, keys, params["self_attn_image"], num_heads)
    else:
        q = queries + query_pe
        queries = queries + _ref_attention(q, q, queries,
                                           params["self_attn_token"], num_heads)
        k = keys + key_pe
        keys = keys + _ref_attention(k, k, keys, params["self_attn_image"], num_heads)
    queries = _ref_ln(queries, params["norm1_token"])
    keys = _ref_ln(keys, params["norm1_image"])
    q = queries + query_pe
    k = keys + key_pe
    queries = queries + _ref_attention(q, k, keys,
                                       params["cross_attn_token_to_image"], num_heads)
    queries = _ref_ln(queries, params["norm2"])
    queries = _ref_ln(queries + _ref_mlp(queries, params["mlp"]), params["norm3"])
    q = queries + query_pe
    k = keys + key_pe
    keys = keys + _ref_attention(k, q, queries,
                                 params["cross_attn_image_to_token"], num_heads)
    keys = _ref_ln(keys, params["norm4"])
    return queries, keys


# --------------------------------------------------------------------------
# Main
# --------------------------------------------------------------------------

if __name__ == "__main__":
    embedding_dim = 32
    num_heads = 2
    mlp_dim = 64
    attention_downsample_rate = 2
    B, Nq, Nk = 2, 8, 64      # 2 batches, 8 sparse tokens, 8x8=64 dense (image) tokens

    root = jax.random.PRNGKey(0)
    k_p, k_q, k_k, k_qpe, k_kpe = jax.random.split(root, 5)

    params = init_block(k_p, embedding_dim, mlp_dim, attention_downsample_rate)
    packed = pack_block(params)

    queries = jax.random.normal(k_q, (B, Nq, embedding_dim), jnp.float32)
    keys = jax.random.normal(k_k, (B, Nk, embedding_dim), jnp.float32)
    query_pe = jax.random.normal(k_qpe, (B, Nq, embedding_dim), jnp.float32)
    key_pe = jax.random.normal(k_kpe, (B, Nk, embedding_dim), jnp.float32)

    for skip in (False, True):
        fwd = jax.jit(partial(two_way_attention_block2, num_heads=num_heads,
                              skip_first_layer_pe=skip))
        out_q, out_k = fwd(packed, queries, keys, query_pe, key_pe)
        jax.block_until_ready((out_q, out_k))
        assert out_q.shape == (B, Nq, embedding_dim)
        assert out_k.shape == (B, Nk, embedding_dim)

        # Tight gate: XLA mirror of the exact kernel math (same slabs / bf16 casts).
        # Catches Pallas layout / slicing / indexing regressions.
        mir_q, mir_k = jax.jit(partial(xla_mirror_block, num_heads=num_heads,
                                       skip_first_layer_pe=skip))(
            packed, queries, keys, query_pe, key_pe)
        err_tight = max(float(jnp.max(jnp.abs(out_q - mir_q))),
                        float(jnp.max(jnp.abs(out_k - mir_k))))
        assert err_tight < 1e-3, f"[skip={skip}] kernel vs XLA mirror: {err_tight}"

        # Loose sanity vs the exact-f32 PyTorch-faithful reference; the gap is the
        # bf16 MXU-operand rounding introduced deliberately for performance.
        ref_q, ref_k = _ref_block(params, queries, keys, query_pe, key_pe,
                                  num_heads=num_heads, skip_first_layer_pe=skip)
        err_loose = max(float(jnp.max(jnp.abs(out_q - ref_q))),
                        float(jnp.max(jnp.abs(out_k - ref_k))))
        assert err_loose < 8e-2, f"[skip={skip}] kernel vs f32 reference: {err_loose}"

    print("KERNEL_OK")
</pallas_src>

<mosaic_0001>
module attributes {stable_mosaic.version = 11 : i64} {
  func.func @_two_way_block_kernel(%arg0: memref<16x32xf32, #tpu.memory_space<vmem>>, %arg1: memref<128x32xf32, #tpu.memory_space<vmem>>, %arg2: memref<16x32xf32, #tpu.memory_space<vmem>>, %arg3: memref<128x32xf32, #tpu.memory_space<vmem>>, %arg4: memref<128x32xbf16, #tpu.memory_space<vmem>>, %arg5: memref<1x128xf32, #tpu.memory_space<vmem>>, %arg6: memref<128x32xbf16, #tpu.memory_space<vmem>>, %arg7: memref<1x128xf32, #tpu.memory_space<vmem>>, %arg8: memref<64x32xbf16, #tpu.memory_space<vmem>>, %arg9: memref<1x80xf32, #tpu.memory_space<vmem>>, %arg10: memref<64x32xbf16, #tpu.memory_space<vmem>>, %arg11: memref<1x80xf32, #tpu.memory_space<vmem>>, %arg12: memref<128x32xbf16, #tpu.memory_space<vmem>>, %arg13: memref<1x96xf32, #tpu.memory_space<vmem>>, %arg14: memref<5x32xf32, #tpu.memory_space<vmem>>, %arg15: memref<5x32xf32, #tpu.memory_space<vmem>>, %arg16: memref<16x32xf32, #tpu.memory_space<vmem>>, %arg17: memref<128x32xf32, #tpu.memory_space<vmem>>) attributes {dimension_semantics = [], scalar_prefetch = 0 : i64, scratch_operands = 0 : i64, tpu.core_type = #tpu.core_type<tc>} {
    %c0 = arith.constant 0 : index
    %c0_0 = arith.constant 0 : index
    %0 = vector.load %arg0[%c0, %c0_0] : memref<16x32xf32, #tpu.memory_space<vmem>>, vector<16x32xf32>
    %c0_1 = arith.constant 0 : index
    %c0_2 = arith.constant 0 : index
    %1 = vector.load %arg1[%c0_1, %c0_2] : memref<128x32xf32, #tpu.memory_space<vmem>>, vector<128x32xf32>
    %c0_3 = arith.constant 0 : index
    %c0_4 = arith.constant 0 : index
    %2 = vector.load %arg2[%c0_3, %c0_4] : memref<16x32xf32, #tpu.memory_space<vmem>>, vector<16x32xf32>
    %c0_5 = arith.constant 0 : index
    %c0_6 = arith.constant 0 : index
    %3 = vector.load %arg3[%c0_5, %c0_6] : memref<128x32xf32, #tpu.memory_space<vmem>>, vector<128x32xf32>
    %c0_7 = arith.constant 0 : index
    %c0_8 = arith.constant 0 : index
    %4 = vector.load %arg4[%c0_7, %c0_8] : memref<128x32xbf16, #tpu.memory_space<vmem>>, vector<128x32xbf16>
    %c0_9 = arith.constant 0 : index
    %c0_10 = arith.constant 0 : index
    %5 = vector.load %arg5[%c0_9, %c0_10] : memref<1x128xf32, #tpu.memory_space<vmem>>, vector<1x128xf32>
    %c0_11 = arith.constant 0 : index
    %c0_12 = arith.constant 0 : index
    %6 = vector.load %arg6[%c0_11, %c0_12] : memref<128x32xbf16, #tpu.memory_space<vmem>>, vector<128x32xbf16>
    %c0_13 = arith.constant 0 : index
    %c0_14 = arith.constant 0 : index
    %7 = vector.load %arg7[%c0_13, %c0_14] : memref<1x128xf32, #tpu.memory_space<vmem>>, vector<1x128xf32>
    %c0_15 = arith.constant 0 : index
    %c0_16 = arith.constant 0 : index
    %8 = vector.load %arg8[%c0_15, %c0_16] : memref<64x32xbf16, #tpu.memory_space<vmem>>, vector<64x32xbf16>
    %c0_17 = arith.constant 0 : index
    %c0_18 = arith.constant 0 : index
    %9 = vector.load %arg9[%c0_17, %c0_18] : memref<1x80xf32, #tpu.memory_space<vmem>>, vector<1x80xf32>
    %c0_19 = arith.constant 0 : index
    %c0_20 = arith.constant 0 : index
    %10 = vector.load %arg10[%c0_19, %c0_20] : memref<64x32xbf16, #tpu.memory_space<vmem>>, vector<64x32xbf16>
    %c0_21 = arith.constant 0 : index
    %c0_22 = arith.constant 0 : index
    %11 = vector.load %arg11[%c0_21, %c0_22] : memref<1x80xf32, #tpu.memory_space<vmem>>, vector<1x80xf32>
    %c0_23 = arith.constant 0 : index
    %c0_24 = arith.constant 0 : index
    %12 = vector.load %arg12[%c0_23, %c0_24] : memref<128x32xbf16, #tpu.memory_space<vmem>>, vector<128x32xbf16>
    %c0_25 = arith.constant 0 : index
    %c0_26 = arith.constant 0 : index
    %13 = vector.load %arg13[%c0_25, %c0_26] : memref<1x96xf32, #tpu.memory_space<vmem>>, vector<1x96xf32>
    %c0_27 = arith.constant 0 : index
    %c0_28 = arith.constant 0 : index
    %14 = vector.load %arg14[%c0_27, %c0_28] : memref<5x32xf32, #tpu.memory_space<vmem>>, vector<5x32xf32>
    %c0_29 = arith.constant 0 : index
    %c0_30 = arith.constant 0 : index
    %15 = vector.load %arg15[%c0_29, %c0_30] : memref<5x32xf32, #tpu.memory_space<vmem>>, vector<5x32xf32>
    %16 = arith.addf %0, %2 : vector<16x32xf32>
    %17 = vector.extract_strided_slice %5 {offsets = [0, 64], sizes = [1, 32], strides = [1, 1]} : vector<1x128xf32> to vector<1x32xf32>
    %18 = vector.extract_strided_slice %5 {offsets = [0, 96], sizes = [1, 32], strides = [1, 1]} : vector<1x128xf32> to vector<1x32xf32>
    %19 = arith.truncf %16 : vector<16x32xf32> to vector<16x32xbf16>
    %20 = vector.extract_strided_slice %4 {offsets = [0, 0], sizes = [64, 32], strides = [1, 1]} : vector<128x32xbf16> to vector<64x32xbf16>
    %cst = arith.constant dense<0.000000e+00> : vector<16x64xf32>
    %21 = tpu.matmul %19, %20, %cst {dimension_numbers = #tpu.dot_dimension_numbers<[1], [1], [0], [0], [0, 0, 1, 0], [], []>} : vector<16x32xbf16>, vector<64x32xbf16>, vector<16x64xf32> -> vector<16x64xf32>
    %22 = vector.extract_strided_slice %5 {offsets = [0, 0], sizes = [1, 64], strides = [1, 1]} : vector<1x128xf32> to vector<1x64xf32>
    %23 = vector.broadcast %22 : vector<1x64xf32> to vector<16x64xf32>
    %24 = arith.addf %21, %23 : vector<16x64xf32>
    %25 = vector.extract_strided_slice %24 {offsets = [0, 0], sizes = [16, 32], strides = [1, 1]} : vector<16x64xf32> to vector<16x32xf32>
    %26 = vector.extract_strided_slice %24 {offsets = [0, 32], sizes = [16, 32], strides = [1, 1]} : vector<16x64xf32> to vector<16x32xf32>
    %27 = arith.truncf %0 : vector<16x32xf32> to vector<16x32xbf16>
    %28 = vector.extract_strided_slice %4 {offsets = [64, 0], sizes = [32, 32], strides = [1, 1]} : vector<128x32xbf16> to vector<32x32xbf16>
    %cst_31 = arith.constant dense<0.000000e+00> : vector<16x32xf32>
    %29 = tpu.matmul %27, %28, %cst_31 {dimension_numbers = #tpu.dot_dimension_numbers<[1], [1], [0], [0], [0, 0, 1, 0], [], []>} : vector<16x32xbf16>, vector<32x32xbf16>, vector<16x32xf32> -> vector<16x32xf32>
    %30 = vector.broadcast %17 : vector<1x32xf32> to vector<16x32xf32>
    %31 = arith.addf %29, %30 : vector<16x32xf32>
    %cst_32 = arith.constant 2.500000e-01 : f32
    %32 = vector.broadcast %cst_32 : f32 to vector<16x32xf32>
    %33 = arith.mulf %25, %32 : vector<16x32xf32>
    %34 = vector.extract_strided_slice %33 {offsets = [0, 0], sizes = [8, 32], strides = [1, 1]} : vector<16x32xf32> to vector<8x32xf32>
    %35 = vector.extract_strided_slice %26 {offsets = [0, 0], sizes = [8, 32], strides = [1, 1]} : vector<16x32xf32> to vector<8x32xf32>
    %36 = vector.extract_strided_slice %31 {offsets = [0, 0], sizes = [8, 32], strides = [1, 1]} : vector<16x32xf32> to vector<8x32xf32>
    %37 = arith.truncf %36 : vector<8x32xf32> to vector<8x32xbf16>
    %38 = vector.extract_strided_slice %34 {offsets = [0, 0], sizes = [8, 16], strides = [1, 1]} : vector<8x32xf32> to vector<8x16xf32>
    %39 = arith.truncf %38 : vector<8x16xf32> to vector<8x16xbf16>
    %40 = vector.extract_strided_slice %35 {offsets = [0, 0], sizes = [8, 16], strides = [1, 1]} : vector<8x32xf32> to vector<8x16xf32>
    %41 = arith.truncf %40 : vector<8x16xf32> to vector<8x16xbf16>
    %cst_33 = arith.constant dense<0.000000e+00> : vector<8x8xf32>
    %42 = tpu.matmul %39, %41, %cst_33 {dimension_numbers = #tpu.dot_dimension_numbers<[1], [1], [0], [0], [0, 0, 1, 0], [], []>} : vector<8x16xbf16>, vector<8x16xbf16>, vector<8x8xf32> -> vector<8x8xf32>
    %cst_34 = arith.constant dense<0xFF800000> : vector<8xf32>
    %43 = vector.multi_reduction <maximumf>, %42, %cst_34 [1] : vector<8x8xf32> to vector<8xf32>
    %44 = vector.shape_cast %43 : vector<8xf32> to vector<8x1xf32>
    %45 = vector.broadcast %44 : vector<8x1xf32> to vector<8x8xf32>
    %46 = arith.subf %42, %45 : vector<8x8xf32>
    %47 = math.exp %46 : vector<8x8xf32>
    %cst_35 = arith.constant dense<0.000000e+00> : vector<8xf32>
    %48 = vector.multi_reduction <add>, %47, %cst_35 [1] : vector<8x8xf32> to vector<8xf32>
    %49 = vector.shape_cast %48 : vector<8xf32> to vector<8x1xf32>
    %50 = vector.broadcast %49 : vector<8x1xf32> to vector<8x8xf32>
    %51 = arith.divf %47, %50 : vector<8x8xf32>
    %52 = arith.truncf %51 : vector<8x8xf32> to vector<8x8xbf16>
    %53 = vector.extract_strided_slice %37 {offsets = [0, 0], sizes = [8, 16], strides = [1, 1]} : vector<8x32xbf16> to vector<8x16xbf16>
    %cst_36 = arith.constant dense<0.000000e+00> : vector<8x16xf32>
    %54 = tpu.matmul %52, %53, %cst_36 {dimension_numbers = #tpu.dot_dimension_numbers<[1], [0], [0], [1], [0, 0, 1, 1], [], []>} : vector<8x8xbf16>, vector<8x16xbf16>, vector<8x16xf32> -> vector<8x16xf32>
    %55 = vector.extract_strided_slice %34 {offsets = [0, 16], sizes = [8, 16], strides = [1, 1]} : vector<8x32xf32> to vector<8x16xf32>
    %56 = arith.truncf %55 : vector<8x16xf32> to vector<8x16xbf16>
    %57 = vector.extract_strided_slice %35 {offsets = [0, 16], sizes = [8, 16], strides = [1, 1]} : vector<8x32xf32> to vector<8x16xf32>
    %58 = arith.truncf %57 : vector<8x16xf32> to vector<8x16xbf16>
    %cst_37 = arith.constant dense<0.000000e+00> : vector<8x8xf32>
    %59 = tpu.matmul %56, %58, %cst_37 {dimension_numbers = #tpu.dot_dimension_numbers<[1], [1], [0], [0], [0, 0, 1, 0], [], []>} : vector<8x16xbf16>, vector<8x16xbf16>, vector<8x8xf32> -> vector<8x8xf32>
    %cst_38 = arith.constant dense<0xFF800000> : vector<8xf32>
    %60 = vector.multi_reduction <maximumf>, %59, %cst_38 [1] : vector<8x8xf32> to vector<8xf32>
    %61 = vector.shape_cast %60 : vector<8xf32> to vector<8x1xf32>
    %62 = vector.broadcast %61 : vector<8x1xf32> to vector<8x8xf32>
    %63 = arith.subf %59, %62 : vector<8x8xf32>
    %64 = math.exp %63 : vector<8x8xf32>
    %cst_39 = arith.constant dense<0.000000e+00> : vector<8xf32>
    %65 = vector.multi_reduction <add>, %64, %cst_39 [1] : vector<8x8xf32> to vector<8xf32>
    %66 = vector.shape_cast %65 : vector<8xf32> to vector<8x1xf32>
    %67 = vector.broadcast %66 : vector<8x1xf32> to vector<8x8xf32>
    %68 = arith.divf %64, %67 : vector<8x8xf32>
    %69 = arith.truncf %68 : vector<8x8xf32> to vector<8x8xbf16>
    %70 = vector.extract_strided_slice %37 {offsets = [0, 16], sizes = [8, 16], strides = [1, 1]} : vector<8x32xbf16> to vector<8x16xbf16>
    %cst_40 = arith.constant dense<0.000000e+00> : vector<8x16xf32>
    %71 = tpu.matmul %69, %70, %cst_40 {dimension_numbers = #tpu.dot_dimension_numbers<[1], [0], [0], [1], [0, 0, 1, 1], [], []>} : vector<8x8xbf16>, vector<8x16xbf16>, vector<8x16xf32> -> vector<8x16xf32>
    %72 = tpu.concatenate %54, %71 in 1 : vector<8x16xf32>, vector<8x16xf32> -> vector<8x32xf32>
    %73 = vector.extract_strided_slice %33 {offsets = [8, 0], sizes = [8, 32], strides = [1, 1]} : vector<16x32xf32> to vector<8x32xf32>
    %74 = vector.extract_strided_slice %26 {offsets = [8, 0], sizes = [8, 32], strides = [1, 1]} : vector<16x32xf32> to vector<8x32xf32>
    %75 = vector.extract_strided_slice %31 {offsets = [8, 0], sizes = [8, 32], strides = [1, 1]} : vector<16x32xf32> to vector<8x32xf32>
    %76 = arith.truncf %75 : vector<8x32xf32> to vector<8x32xbf16>
    %77 = vector.extract_strided_slice %73 {offsets = [0, 0], sizes = [8, 16], strides = [1, 1]} : vector<8x32xf32> to vector<8x16xf32>
    %78 = arith.truncf %77 : vector<8x16xf32> to vector<8x16xbf16>
    %79 = vector.extract_strided_slice %74 {offsets = [0, 0], sizes = [8, 16], strides = [1, 1]} : vector<8x32xf32> to vector<8x16xf32>
    %80 = arith.truncf %79 : vector<8x16xf32> to vector<8x16xbf16>
    %cst_41 = arith.constant dense<0.000000e+00> : vector<8x8xf32>
    %81 = tpu.matmul %78, %80, %cst_41 {dimension_numbers = #tpu.dot_dimension_numbers<[1], [1], [0], [0], [0, 0, 1, 0], [], []>} : vector<8x16xbf16>, vector<8x16xbf16>, vector<8x8xf32> -> vector<8x8xf32>
    %cst_42 = arith.constant dense<0xFF800000> : vector<8xf32>
    %82 = vector.multi_reduction <maximumf>, %81, %cst_42 [1] : vector<8x8xf32> to vector<8xf32>
    %83 = vector.shape_cast %82 : vector<8xf32> to vector<8x1xf32>
    %84 = vector.broadcast %83 : vector<8x1xf32> to vector<8x8xf32>
    %85 = arith.subf %81, %84 : vector<8x8xf32>
    %86 = math.exp %85 : vector<8x8xf32>
    %cst_43 = arith.constant dense<0.000000e+00> : vector<8xf32>
    %87 = vector.multi_reduction <add>, %86, %cst_43 [1] : vector<8x8xf32> to vector<8xf32>
    %88 = vector.shape_cast %87 : vector<8xf32> to vector<8x1xf32>
    %89 = vector.broadcast %88 : vector<8x1xf32> to vector<8x8xf32>
    %90 = arith.divf %86, %89 : vector<8x8xf32>
    %91 = arith.truncf %90 : vector<8x8xf32> to vector<8x8xbf16>
    %92 = vector.extract_strided_slice %76 {offsets = [0, 0], sizes = [8, 16], strides = [1, 1]} : vector<8x32xbf16> to vector<8x16xbf16>
    %cst_44 = arith.constant dense<0.000000e+00> : vector<8x16xf32>
    %93 = tpu.matmul %91, %92, %cst_44 {dimension_numbers = #tpu.dot_dimension_numbers<[1], [0], [0], [1], [0, 0, 1, 1], [], []>} : vector<8x8xbf16>, vector<8x16xbf16>, vector<8x16xf32> -> vector<8x16xf32>
    %94 = vector.extract_strided_slice %73 {offsets = [0, 16], sizes = [8, 16], strides = [1, 1]} : vector<8x32xf32> to vector<8x16xf32>
    %95 = arith.truncf %94 : vector<8x16xf32> to vector<8x16xbf16>
    %96 = vector.extract_strided_slice %74 {offsets = [0, 16], sizes = [8, 16], strides = [1, 1]} : vector<8x32xf32> to vector<8x16xf32>
    %97 = arith.truncf %96 : vector<8x16xf32> to vector<8x16xbf16>
    %cst_45 = arith.constant dense<0.000000e+00> : vector<8x8xf32>
    %98 = tpu.matmul %95, %97, %cst_45 {dimension_numbers = #tpu.dot_dimension_numbers<[1], [1], [0], [0], [0, 0, 1, 0], [], []>} : vector<8x16xbf16>, vector<8x16xbf16>, vector<8x8xf32> -> vector<8x8xf32>
    %cst_46 = arith.constant dense<0xFF800000> : vector<8xf32>
    %99 = vector.multi_reduction <maximumf>, %98, %cst_46 [1] : vector<8x8xf32> to vector<8xf32>
    %100 = vector.shape_cast %99 : vector<8xf32> to vector<8x1xf32>
    %101 = vector.broadcast %100 : vector<8x1xf32> to vector<8x8xf32>
    %102 = arith.subf %98, %101 : vector<8x8xf32>
    %103 = math.exp %102 : vector<8x8xf32>
    %cst_47 = arith.constant dense<0.000000e+00> : vector<8xf32>
    %104 = vector.multi_reduction <add>, %103, %cst_47 [1] : vector<8x8xf32> to vector<8xf32>
    %105 = vector.shape_cast %104 : vector<8xf32> to vector<8x1xf32>
    %106 = vector.broadcast %105 : vector<8x1xf32> to vector<8x8xf32>
    %107 = arith.divf %103, %106 : vector<8x8xf32>
    %108 = arith.truncf %107 : vector<8x8xf32> to vector<8x8xbf16>
    %109 = vector.extract_strided_slice %76 {offsets = [0, 16], sizes = [8, 16], strides = [1, 1]} : vector<8x32xbf16> to vector<8x16xbf16>
    %cst_48 = arith.constant dense<0.000000e+00> : vector<8x16xf32>
    %110 = tpu.matmul %108, %109, %cst_48 {dimension_numbers = #tpu.dot_dimension_numbers<[1], [0], [0], [1], [0, 0, 1, 1], [], []>} : vector<8x8xbf16>, vector<8x16xbf16>, vector<8x16xf32> -> vector<8x16xf32>
    %111 = tpu.concatenate %93, %110 in 1 : vector<8x16xf32>, vector<8x16xf32> -> vector<8x32xf32>
    %112 = tpu.concatenate %72, %111 in 0 : vector<8x32xf32>, vector<8x32xf32> -> vector<16x32xf32>
    %113 = vector.extract_strided_slice %4 {offsets = [96, 0], sizes = [32, 32], strides = [1, 1]} : vector<128x32xbf16> to vector<32x32xbf16>
    %114 = arith.truncf %112 : vector<16x32xf32> to vector<16x32xbf16>
    %cst_49 = arith.constant dense<0.000000e+00> : vector<16x32xf32>
    %115 = tpu.matmul %114, %113, %cst_49 {dimension_numbers = #tpu.dot_dimension_numbers<[1], [0], [0], [1], [0, 0, 1, 1], [], []>} : vector<16x32xbf16>, vector<32x32xbf16>, vector<16x32xf32> -> vector<16x32xf32>
    %116 = vector.broadcast %18 : vector<1x32xf32> to vector<16x32xf32>
    %117 = arith.addf %115, %116 : vector<16x32xf32>
    %118 = arith.addf %0, %117 : vector<16x32xf32>
    %119 = arith.addf %1, %3 : vector<128x32xf32>
    %120 = vector.extract_strided_slice %7 {offsets = [0, 64], sizes = [1, 32], strides = [1, 1]} : vector<1x128xf32> to vector<1x32xf32>
    %121 = vector.extract_strided_slice %7 {offsets = [0, 96], sizes = [1, 32], strides = [1, 1]} : vector<1x128xf32> to vector<1x32xf32>
    %122 = arith.truncf %119 : vector<128x32xf32> to vector<128x32xbf16>
    %123 = vector.extract_strided_slice %6 {offsets = [0, 0], sizes = [64, 32], strides = [1, 1]} : vector<128x32xbf16> to vector<64x32xbf16>
    %cst_50 = arith.constant dense<0.000000e+00> : vector<128x64xf32>
    %124 = tpu.matmul %122, %123, %cst_50 {dimension_numbers = #tpu.dot_dimension_numbers<[1], [1], [0], [0], [0, 0, 1, 0], [], []>} : vector<128x32xbf16>, vector<64x32xbf16>, vector<128x64xf32> -> vector<128x64xf32>
    %125 = vector.extract_strided_slice %7 {offsets = [0, 0], sizes = [1, 64], strides = [1, 1]} : vector<1x128xf32> to vector<1x64xf32>
    %126 = vector.broadcast %125 : vector<1x64xf32> to vector<128x64xf32>
    %127 = arith.addf %124, %126 : vector<128x64xf32>
    %128 = vector.extract_strided_slice %127 {offsets = [0, 0], sizes = [128, 32], strides = [1, 1]} : vector<128x64xf32> to vector<128x32xf32>
    %129 = vector.extract_strided_slice %127 {offsets = [0, 32], sizes = [128, 32], strides = [1, 1]} : vector<128x64xf32> to vector<128x32xf32>
    %130 = arith.truncf %1 : vector<128x32xf32> to vector<128x32xbf16>
    %131 = vector.extract_strided_slice %6 {offsets = [64, 0], sizes = [32, 32], strides = [1, 1]} : vector<128x32xbf16> to vector<32x32xbf16>
    %cst_51 = arith.constant dense<0.000000e+00> : vector<128x32xf32>
    %132 = tpu.matmul %130, %131, %cst_51 {dimension_numbers = #tpu.dot_dimension_numbers<[1], [1], [0], [0], [0, 0, 1, 0], [], []>} : vector<128x32xbf16>, vector<32x32xbf16>, vector<128x32xf32> -> vector<128x32xf32>
    %133 = vector.broadcast %120 : vector<1x32xf32> to vector<128x32xf32>
    %134 = arith.addf %132, %133 : vector<128x32xf32>
    %cst_52 = arith.constant 2.500000e-01 : f32
    %135 = vector.broadcast %cst_52 : f32 to vector<128x32xf32>
    %136 = arith.mulf %128, %135 : vector<128x32xf32>
    %137 = vector.extract_strided_slice %136 {offsets = [0, 0], sizes = [64, 32], strides = [1, 1]} : vector<128x32xf32> to vector<64x32xf32>
    %138 = vector.extract_strided_slice %129 {offsets = [0, 0], sizes = [64, 32], strides = [1, 1]} : vector<128x32xf32> to vector<64x32xf32>
    %139 = vector.extract_strided_slice %134 {offsets = [0, 0], sizes = [64, 32], strides = [1, 1]} : vector<128x32xf32> to vector<64x32xf32>
    %140 = arith.truncf %139 : vector<64x32xf32> to vector<64x32xbf16>
    %141 = vector.extract_strided_slice %137 {offsets = [0, 0], sizes = [64, 16], strides = [1, 1]} : vector<64x32xf32> to vector<64x16xf32>
    %142 = arith.truncf %141 : vector<64x16xf32> to vector<64x16xbf16>
    %143 = vector.extract_strided_slice %138 {offsets = [0, 0], sizes = [64, 16], strides = [1, 1]} : vector<64x32xf32> to vector<64x16xf32>
    %144 = arith.truncf %143 : vector<64x16xf32> to vector<64x16xbf16>
    %cst_53 = arith.constant dense<0.000000e+00> : vector<64x64xf32>
    %145 = tpu.matmul %142, %144, %cst_53 {dimension_numbers = #tpu.dot_dimension_numbers<[1], [1], [0], [0], [0, 0, 1, 0], [], []>} : vector<64x16xbf16>, vector<64x16xbf16>, vector<64x64xf32> -> vector<64x64xf32>
    %cst_54 = arith.constant dense<0xFF800000> : vector<64xf32>
    %146 = vector.multi_reduction <maximumf>, %145, %cst_54 [1] : vector<64x64xf32> to vector<64xf32>
    %147 = vector.shape_cast %146 : vector<64xf32> to vector<64x1xf32>
    %148 = vector.broadcast %147 : vector<64x1xf32> to vector<64x64xf32>
    %149 = arith.subf %145, %148 : vector<64x64xf32>
    %150 = math.exp %149 : vector<64x64xf32>
    %cst_55 = arith.constant dense<0.000000e+00> : vector<64xf32>
    %151 = vector.multi_reduction <add>, %150, %cst_55 [1] : vector<64x64xf32> to vector<64xf32>
    %152 = vector.shape_cast %151 : vector<64xf32> to vector<64x1xf32>
    %153 = vector.broadcast %152 : vector<64x1xf32> to vector<64x64xf32>
    %154 = arith.divf %150, %153 : vector<64x64xf32>
    %155 = arith.truncf %154 : vector<64x64xf32> to vector<64x64xbf16>
    %156 = vector.extract_strided_slice %140 {offsets = [0, 0], sizes = [64, 16], strides = [1, 1]} : vector<64x32xbf16> to vector<64x16xbf16>
    %cst_56 = arith.constant dense<0.000000e+00> : vector<64x16xf32>
    %157 = tpu.matmul %155, %156, %cst_56 {dimension_numbers = #tpu.dot_dimension_numbers<[1], [0], [0], [1], [0, 0, 1, 1], [], []>} : vector<64x64xbf16>, vector<64x16xbf16>, vector<64x16xf32> -> vector<64x16xf32>
    %158 = vector.extract_strided_slice %137 {offsets = [0, 16], sizes = [64, 16], strides = [1, 1]} : vector<64x32xf32> to vector<64x16xf32>
    %159 = arith.truncf %158 : vector<64x16xf32> to vector<64x16xbf16>
    %160 = vector.extract_strided_slice %138 {offsets = [0, 16], sizes = [64, 16], strides = [1, 1]} : vector<64x32xf32> to vector<64x16xf32>
    %161 = arith.truncf %160 : vector<64x16xf32> to vector<64x16xbf16>
    %cst_57 = arith.constant dense<0.000000e+00> : vector<64x64xf32>
    %162 = tpu.matmul %159, %161, %cst_57 {dimension_numbers = #tpu.dot_dimension_numbers<[1], [1], [0], [0], [0, 0, 1, 0], [], []>} : vector<64x16xbf16>, vector<64x16xbf16>, vector<64x64xf32> -> vector<64x64xf32>
    %cst_58 = arith.constant dense<0xFF800000> : vector<64xf32>
    %163 = vector.multi_reduction <maximumf>, %162, %cst_58 [1] : vector<64x64xf32> to vector<64xf32>
    %164 = vector.shape_cast %163 : vector<64xf32> to vector<64x1xf32>
    %165 = vector.broadcast %164 : vector<64x1xf32> to vector<64x64xf32>
    %166 = arith.subf %162, %165 : vector<64x64xf32>
    %167 = math.exp %166 : vector<64x64xf32>
    %cst_59 = arith.constant dense<0.000000e+00> : vector<64xf32>
    %168 = vector.multi_reduction <add>, %167, %cst_59 [1] : vector<64x64xf32> to vector<64xf32>
    %169 = vector.shape_cast %168 : vector<64xf32> to vector<64x1xf32>
    %170 = vector.broadcast %169 : vector<64x1xf32> to vector<64x64xf32>
    %171 = arith.divf %167, %170 : vector<64x64xf32>
    %172 = arith.truncf %171 : vector<64x64xf32> to vector<64x64xbf16>
    %173 = vector.extract_strided_slice %140 {offsets = [0, 16], sizes = [64, 16], strides = [1, 1]} : vector<64x32xbf16> to vector<64x16xbf16>
    %cst_60 = arith.constant dense<0.000000e+00> : vector<64x16xf32>
    %174 = tpu.matmul %172, %173, %cst_60 {dimension_numbers = #tpu.dot_dimension_numbers<[1], [0], [0], [1], [0, 0, 1, 1], [], []>} : vector<64x64xbf16>, vector<64x16xbf16>, vector<64x16xf32> -> vector<64x16xf32>
    %175 = tpu.concatenate %157, %174 in 1 : vector<64x16xf32>, vector<64x16xf32> -> vector<64x32xf32>
    %176 = vector.extract_strided_slice %136 {offsets = [64, 0], sizes = [64, 32], strides = [1, 1]} : vector<128x32xf32> to vector<64x32xf32>
    %177 = vector.extract_strided_slice %129 {offsets = [64, 0], sizes = [64, 32], strides = [1, 1]} : vector<128x32xf32> to vector<64x32xf32>
    %178 = vector.extract_strided_slice %134 {offsets = [64, 0], sizes = [64, 32], strides = [1, 1]} : vector<128x32xf32> to vector<64x32xf32>
    %179 = arith.truncf %178 : vector<64x32xf32> to vector<64x32xbf16>
    %180 = vector.extract_strided_slice %176 {offsets = [0, 0], sizes = [64, 16], strides = [1, 1]} : vector<64x32xf32> to vector<64x16xf32>
    %181 = arith.truncf %180 : vector<64x16xf32> to vector<64x16xbf16>
    %182 = vector.extract_strided_slice %177 {offsets = [0, 0], sizes = [64, 16], strides = [1, 1]} : vector<64x32xf32> to vector<64x16xf32>
    %183 = arith.truncf %182 : vector<64x16xf32> to vector<64x16xbf16>
    %cst_61 = arith.constant dense<0.000000e+00> : vector<64x64xf32>
    %184 = tpu.matmul %181, %183, %cst_61 {dimension_numbers = #tpu.dot_dimension_numbers<[1], [1], [0], [0], [0, 0, 1, 0], [], []>} : vector<64x16xbf16>, vector<64x16xbf16>, vector<64x64xf32> -> vector<64x64xf32>
    %cst_62 = arith.constant dense<0xFF800000> : vector<64xf32>
    %185 = vector.multi_reduction <maximumf>, %184, %cst_62 [1] : vector<64x64xf32> to vector<64xf32>
    %186 = vector.shape_cast %185 : vector<64xf32> to vector<64x1xf32>
    %187 = vector.broadcast %186 : vector<64x1xf32> to vector<64x64xf32>
    %188 = arith.subf %184, %187 : vector<64x64xf32>
    %189 = math.exp %188 : vector<64x64xf32>
    %cst_63 = arith.constant dense<0.000000e+00> : vector<64xf32>
    %190 = vector.multi_reduction <add>, %189, %cst_63 [1] : vector<64x64xf32> to vector<64xf32>
    %191 = vector.shape_cast %190 : vector<64xf32> to vector<64x1xf32>
    %192 = vector.broadcast %191 : vector<64x1xf32> to vector<64x64xf32>
    %193 = arith.divf %189, %192 : vector<64x64xf32>
    %194 = arith.truncf %193 : vector<64x64xf32> to vector<64x64xbf16>
    %195 = vector.extract_strided_slice %179 {offsets = [0, 0], sizes = [64, 16], strides = [1, 1]} : vector<64x32xbf16> to vector<64x16xbf16>
    %cst_64 = arith.constant dense<0.000000e+00> : vector<64x16xf32>
    %196 = tpu.matmul %194, %195, %cst_64 {dimension_numbers = #tpu.dot_dimension_numbers<[1], [0], [0], [1], [0, 0, 1, 1], [], []>} : vector<64x64xbf16>, vector<64x16xbf16>, vector<64x16xf32> -> vector<64x16xf32>
    %197 = vector.extract_strided_slice %176 {offsets = [0, 16], sizes = [64, 16], strides = [1, 1]} : vector<64x32xf32> to vector<64x16xf32>
    %198 = arith.truncf %197 : vector<64x16xf32> to vector<64x16xbf16>
    %199 = vector.extract_strided_slice %177 {offsets = [0, 16], sizes = [64, 16], strides = [1, 1]} : vector<64x32xf32> to vector<64x16xf32>
    %200 = arith.truncf %199 : vector<64x16xf32> to vector<64x16xbf16>
    %cst_65 = arith.constant dense<0.000000e+00> : vector<64x64xf32>
    %201 = tpu.matmul %198, %200, %cst_65 {dimension_numbers = #tpu.dot_dimension_numbers<[1], [1], [0], [0], [0, 0, 1, 0], [], []>} : vector<64x16xbf16>, vector<64x16xbf16>, vector<64x64xf32> -> vector<64x64xf32>
    %cst_66 = arith.constant dense<0xFF800000> : vector<64xf32>
    %202 = vector.multi_reduction <maximumf>, %201, %cst_66 [1] : vector<64x64xf32> to vector<64xf32>
    %203 = vector.shape_cast %202 : vector<64xf32> to vector<64x1xf32>
    %204 = vector.broadcast %203 : vector<64x1xf32> to vector<64x64xf32>
    %205 = arith.subf %201, %204 : vector<64x64xf32>
    %206 = math.exp %205 : vector<64x64xf32>
    %cst_67 = arith.constant dense<0.000000e+00> : vector<64xf32>
    %207 = vector.multi_reduction <add>, %206, %cst_67 [1] : vector<64x64xf32> to vector<64xf32>
    %208 = vector.shape_cast %207 : vector<64xf32> to vector<64x1xf32>
    %209 = vector.broadcast %208 : vector<64x1xf32> to vector<64x64xf32>
    %210 = arith.divf %206, %209 : vector<64x64xf32>
    %211 = arith.truncf %210 : vector<64x64xf32> to vector<64x64xbf16>
    %212 = vector.extract_strided_slice %179 {offsets = [0, 16], sizes = [64, 16], strides = [1, 1]} : vector<64x32xbf16> to vector<64x16xbf16>
    %cst_68 = arith.constant dense<0.000000e+00> : vector<64x16xf32>
    %213 = tpu.matmul %211, %212, %cst_68 {dimension_numbers = #tpu.dot_dimension_numbers<[1], [0], [0], [1], [0, 0, 1, 1], [], []>} : vector<64x64xbf16>, vector<64x16xbf16>, vector<64x16xf32> -> vector<64x16xf32>
    %214 = tpu.concatenate %196, %213 in 1 : vector<64x16xf32>, vector<64x16xf32> -> vector<64x32xf32>
    %215 = tpu.concatenate %175, %214 in 0 : vector<64x32xf32>, vector<64x32xf32> -> vector<128x32xf32>
    %216 = vector.extract_strided_slice %6 {offsets = [96, 0], sizes = [32, 32], strides = [1, 1]} : vector<128x32xbf16> to vector<32x32xbf16>
    %217 = arith.truncf %215 : vector<128x32xf32> to vector<128x32xbf16>
    %cst_69 = arith.constant dense<0.000000e+00> : vector<128x32xf32>
    %218 = tpu.matmul %217, %216, %cst_69 {dimension_numbers = #tpu.dot_dimension_numbers<[1], [0], [0], [1], [0, 0, 1, 1], [], []>} : vector<128x32xbf16>, vector<32x32xbf16>, vector<128x32xf32> -> vector<128x32xf32>
    %219 = vector.broadcast %121 : vector<1x32xf32> to vector<128x32xf32>
    %220 = arith.addf %218, %219 : vector<128x32xf32>
    %221 = arith.addf %1, %220 : vector<128x32xf32>
    %222 = vector.extract_strided_slice %14 {offsets = [0, 0], sizes = [1, 32], strides = [1, 1]} : vector<5x32xf32> to vector<1x32xf32>
    %223 = vector.extract_strided_slice %15 {offsets = [0, 0], sizes = [1, 32], strides = [1, 1]} : vector<5x32xf32> to vector<1x32xf32>
    %cst_70 = arith.constant dense<0.000000e+00> : vector<16xf32>
    %224 = vector.multi_reduction <add>, %118, %cst_70 [1] : vector<16x32xf32> to vector<16xf32>
    %225 = vector.shape_cast %224 : vector<16xf32> to vector<16x1xf32>
    %cst_71 = arith.constant 3.200000e+01 : f32
    %226 = vector.broadcast %cst_71 : f32 to vector<16x1xf32>
    %227 = arith.divf %225, %226 : vector<16x1xf32>
    %228 = vector.broadcast %227 : vector<16x1xf32> to vector<16x32xf32>
    %229 = arith.subf %118, %228 : vector<16x32xf32>
    %230 = arith.mulf %229, %229 : vector<16x32xf32>
    %cst_72 = arith.constant dense<0.000000e+00> : vector<16xf32>
    %231 = vector.multi_reduction <add>, %230, %cst_72 [1] : vector<16x32xf32> to vector<16xf32>
    %232 = vector.shape_cast %231 : vector<16xf32> to vector<16x1xf32>
    %cst_73 = arith.constant 3.200000e+01 : f32
    %233 = vector.broadcast %cst_73 : f32 to vector<16x1xf32>
    %234 = arith.divf %232, %233 : vector<16x1xf32>
    %cst_74 = arith.constant 9.99999974E-6 : f32
    %235 = vector.broadcast %cst_74 : f32 to vector<16x1xf32>
    %236 = arith.addf %234, %235 : vector<16x1xf32>
    %237 = math.rsqrt %236 : vector<16x1xf32>
    %238 = vector.broadcast %237 : vector<16x1xf32> to vector<16x32xf32>
    %239 = arith.mulf %229, %238 : vector<16x32xf32>
    %240 = vector.broadcast %222 : vector<1x32xf32> to vector<16x32xf32>
    %241 = arith.mulf %239, %240 : vector<16x32xf32>
    %242 = vector.broadcast %223 : vector<1x32xf32> to vector<16x32xf32>
    %243 = arith.addf %241, %242 : vector<16x32xf32>
    %244 = vector.extract_strided_slice %14 {offsets = [1, 0], sizes = [1, 32], strides = [1, 1]} : vector<5x32xf32> to vector<1x32xf32>
    %245 = vector.extract_strided_slice %15 {offsets = [1, 0], sizes = [1, 32], strides = [1, 1]} : vector<5x32xf32> to vector<1x32xf32>
    %cst_75 = arith.constant dense<0.000000e+00> : vector<128xf32>
    %246 = vector.multi_reduction <add>, %221, %cst_75 [1] : vector<128x32xf32> to vector<128xf32>
    %247 = vector.shape_cast %246 : vector<128xf32> to vector<128x1xf32>
    %cst_76 = arith.constant 3.200000e+01 : f32
    %248 = vector.broadcast %cst_76 : f32 to vector<128x1xf32>
    %249 = arith.divf %247, %248 : vector<128x1xf32>
    %250 = vector.broadcast %249 : vector<128x1xf32> to vector<128x32xf32>
    %251 = arith.subf %221, %250 : vector<128x32xf32>
    %252 = arith.mulf %251, %251 : vector<128x32xf32>
    %cst_77 = arith.constant dense<0.000000e+00> : vector<128xf32>
    %253 = vector.multi_reduction <add>, %252, %cst_77 [1] : vector<128x32xf32> to vector<128xf32>
    %254 = vector.shape_cast %253 : vector<128xf32> to vector<128x1xf32>
    %cst_78 = arith.constant 3.200000e+01 : f32
    %255 = vector.broadcast %cst_78 : f32 to vector<128x1xf32>
    %256 = arith.divf %254, %255 : vector<128x1xf32>
    %cst_79 = arith.constant 9.99999974E-6 : f32
    %257 = vector.broadcast %cst_79 : f32 to vector<128x1xf32>
    %258 = arith.addf %256, %257 : vector<128x1xf32>
    %259 = math.rsqrt %258 : vector<128x1xf32>
    %260 = vector.broadcast %259 : vector<128x1xf32> to vector<128x32xf32>
    %261 = arith.mulf %251, %260 : vector<128x32xf32>
    %262 = vector.broadcast %244 : vector<1x32xf32> to vector<128x32xf32>
    %263 = arith.mulf %261, %262 : vector<128x32xf32>
    %264 = vector.broadcast %245 : vector<1x32xf32> to vector<128x32xf32>
    %265 = arith.addf %263, %264 : vector<128x32xf32>
    %266 = arith.addf %243, %2 : vector<16x32xf32>
    %267 = arith.addf %265, %3 : vector<128x32xf32>
    %268 = vector.extract_strided_slice %9 {offsets = [0, 32], sizes = [1, 16], strides = [1, 1]} : vector<1x80xf32> to vector<1x16xf32>
    %269 = vector.extract_strided_slice %9 {offsets = [0, 48], sizes = [1, 32], strides = [1, 1]} : vector<1x80xf32> to vector<1x32xf32>
    %270 = arith.truncf %266 : vector<16x32xf32> to vector<16x32xbf16>
    %271 = vector.extract_strided_slice %9 {offsets = [0, 0], sizes = [1, 16], strides = [1, 1]} : vector<1x80xf32> to vector<1x16xf32>
    %272 = vector.extract_strided_slice %9 {offsets = [0, 16], sizes = [1, 16], strides = [1, 1]} : vector<1x80xf32> to vector<1x16xf32>
    %273 = vector.extract_strided_slice %8 {offsets = [0, 0], sizes = [16, 32], strides = [1, 1]} : vector<64x32xbf16> to vector<16x32xbf16>
    %cst_80 = arith.constant dense<0.000000e+00> : vector<16x16xf32>
    %274 = tpu.matmul %270, %273, %cst_80 {dimension_numbers = #tpu.dot_dimension_numbers<[1], [1], [0], [0], [0, 0, 1, 0], [], []>} : vector<16x32xbf16>, vector<16x32xbf16>, vector<16x16xf32> -> vector<16x16xf32>
    %275 = vector.broadcast %271 : vector<1x16xf32> to vector<16x16xf32>
    %276 = arith.addf %274, %275 : vector<16x16xf32>
    %277 = arith.truncf %267 : vector<128x32xf32> to vector<128x32xbf16>
    %278 = vector.extract_strided_slice %8 {offsets = [16, 0], sizes = [16, 32], strides = [1, 1]} : vector<64x32xbf16> to vector<16x32xbf16>
    %cst_81 = arith.constant dense<0.000000e+00> : vector<128x16xf32>
    %279 = tpu.matmul %277, %278, %cst_81 {dimension_numbers = #tpu.dot_dimension_numbers<[1], [1], [0], [0], [0, 0, 1, 0], [], []>} : vector<128x32xbf16>, vector<16x32xbf16>, vector<128x16xf32> -> vector<128x16xf32>
    %280 = vector.broadcast %272 : vector<1x16xf32> to vector<128x16xf32>
    %281 = arith.addf %279, %280 : vector<128x16xf32>
    %282 = arith.truncf %265 : vector<128x32xf32> to vector<128x32xbf16>
    %283 = vector.extract_strided_slice %8 {offsets = [32, 0], sizes = [16, 32], strides = [1, 1]} : vector<64x32xbf16> to vector<16x32xbf16>
    %cst_82 = arith.constant dense<0.000000e+00> : vector<128x16xf32>
    %284 = tpu.matmul %282, %283, %cst_82 {dimension_numbers = #tpu.dot_dimension_numbers<[1], [1], [0], [0], [0, 0, 1, 0], [], []>} : vector<128x32xbf16>, vector<16x32xbf16>, vector<128x16xf32> -> vector<128x16xf32>
    %285 = vector.broadcast %268 : vector<1x16xf32> to vector<128x16xf32>
    %286 = arith.addf %284, %285 : vector<128x16xf32>
    %cst_83 = arith.constant 0.353553385 : f32
    %287 = vector.broadcast %cst_83 : f32 to vector<16x16xf32>
    %288 = arith.mulf %276, %287 : vector<16x16xf32>
    %289 = vector.extract_strided_slice %288 {offsets = [0, 0], sizes = [8, 16], strides = [1, 1]} : vector<16x16xf32> to vector<8x16xf32>
    %290 = vector.extract_strided_slice %281 {offsets = [0, 0], sizes = [64, 16], strides = [1, 1]} : vector<128x16xf32> to vector<64x16xf32>
    %291 = vector.extract_strided_slice %286 {offsets = [0, 0], sizes = [64, 16], strides = [1, 1]} : vector<128x16xf32> to vector<64x16xf32>
    %292 = arith.truncf %291 : vector<64x16xf32> to vector<64x16xbf16>
    %293 = vector.extract_strided_slice %289 {offsets = [0, 0], sizes = [8, 8], strides = [1, 1]} : vector<8x16xf32> to vector<8x8xf32>
    %294 = arith.truncf %293 : vector<8x8xf32> to vector<8x8xbf16>
    %295 = vector.extract_strided_slice %290 {offsets = [0, 0], sizes = [64, 8], strides = [1, 1]} : vector<64x16xf32> to vector<64x8xf32>
    %296 = arith.truncf %295 : vector<64x8xf32> to vector<64x8xbf16>
    %cst_84 = arith.constant dense<0.000000e+00> : vector<8x64xf32>
    %297 = tpu.matmul %294, %296, %cst_84 {dimension_numbers = #tpu.dot_dimension_numbers<[1], [1], [0], [0], [0, 0, 1, 0], [], []>} : vector<8x8xbf16>, vector<64x8xbf16>, vector<8x64xf32> -> vector<8x64xf32>
    %cst_85 = arith.constant dense<0xFF800000> : vector<8xf32>
    %298 = vector.multi_reduction <maximumf>, %297, %cst_85 [1] : vector<8x64xf32> to vector<8xf32>
    %299 = vector.shape_cast %298 : vector<8xf32> to vector<8x1xf32>
    %300 = vector.broadcast %299 : vector<8x1xf32> to vector<8x64xf32>
    %301 = arith.subf %297, %300 : vector<8x64xf32>
    %302 = math.exp %301 : vector<8x64xf32>
    %cst_86 = arith.constant dense<0.000000e+00> : vector<8xf32>
    %303 = vector.multi_reduction <add>, %302, %cst_86 [1] : vector<8x64xf32> to vector<8xf32>
    %304 = vector.shape_cast %303 : vector<8xf32> to vector<8x1xf32>
    %305 = vector.broadcast %304 : vector<8x1xf32> to vector<8x64xf32>
    %306 = arith.divf %302, %305 : vector<8x64xf32>
    %307 = arith.truncf %306 : vector<8x64xf32> to vector<8x64xbf16>
    %308 = vector.extract_strided_slice %292 {offsets = [0, 0], sizes = [64, 8], strides = [1, 1]} : vector<64x16xbf16> to vector<64x8xbf16>
    %cst_87 = arith.constant dense<0.000000e+00> : vector<8x8xf32>
    %309 = tpu.matmul %307, %308, %cst_87 {dimension_numbers = #tpu.dot_dimension_numbers<[1], [0], [0], [1], [0, 0, 1, 1], [], []>} : vector<8x64xbf16>, vector<64x8xbf16>, vector<8x8xf32> -> vector<8x8xf32>
    %310 = vector.extract_strided_slice %289 {offsets = [0, 8], sizes = [8, 8], strides = [1, 1]} : vector<8x16xf32> to vector<8x8xf32>
    %311 = arith.truncf %310 : vector<8x8xf32> to vector<8x8xbf16>
    %312 = vector.extract_strided_slice %290 {offsets = [0, 8], sizes = [64, 8], strides = [1, 1]} : vector<64x16xf32> to vector<64x8xf32>
    %313 = arith.truncf %312 : vector<64x8xf32> to vector<64x8xbf16>
    %cst_88 = arith.constant dense<0.000000e+00> : vector<8x64xf32>
    %314 = tpu.matmul %311, %313, %cst_88 {dimension_numbers = #tpu.dot_dimension_numbers<[1], [1], [0], [0], [0, 0, 1, 0], [], []>} : vector<8x8xbf16>, vector<64x8xbf16>, vector<8x64xf32> -> vector<8x64xf32>
    %cst_89 = arith.constant dense<0xFF800000> : vector<8xf32>
    %315 = vector.multi_reduction <maximumf>, %314, %cst_89 [1] : vector<8x64xf32> to vector<8xf32>
    %316 = vector.shape_cast %315 : vector<8xf32> to vector<8x1xf32>
    %317 = vector.broadcast %316 : vector<8x1xf32> to vector<8x64xf32>
    %318 = arith.subf %314, %317 : vector<8x64xf32>
    %319 = math.exp %318 : vector<8x64xf32>
    %cst_90 = arith.constant dense<0.000000e+00> : vector<8xf32>
    %320 = vector.multi_reduction <add>, %319, %cst_90 [1] : vector<8x64xf32> to vector<8xf32>
    %321 = vector.shape_cast %320 : vector<8xf32> to vector<8x1xf32>
    %322 = vector.broadcast %321 : vector<8x1xf32> to vector<8x64xf32>
    %323 = arith.divf %319, %322 : vector<8x64xf32>
    %324 = arith.truncf %323 : vector<8x64xf32> to vector<8x64xbf16>
    %325 = vector.extract_strided_slice %292 {offsets = [0, 8], sizes = [64, 8], strides = [1, 1]} : vector<64x16xbf16> to vector<64x8xbf16>
    %cst_91 = arith.constant dense<0.000000e+00> : vector<8x8xf32>
    %326 = tpu.matmul %324, %325, %cst_91 {dimension_numbers = #tpu.dot_dimension_numbers<[1], [0], [0], [1], [0, 0, 1, 1], [], []>} : vector<8x64xbf16>, vector<64x8xbf16>, vector<8x8xf32> -> vector<8x8xf32>
    %327 = tpu.concatenate %309, %326 in 1 : vector<8x8xf32>, vector<8x8xf32> -> vector<8x16xf32>
    %328 = vector.extract_strided_slice %288 {offsets = [8, 0], sizes = [8, 16], strides = [1, 1]} : vector<16x16xf32> to vector<8x16xf32>
    %329 = vector.extract_strided_slice %281 {offsets = [64, 0], sizes = [64, 16], strides = [1, 1]} : vector<128x16xf32> to vector<64x16xf32>
    %330 = vector.extract_strided_slice %286 {offsets = [64, 0], sizes = [64, 16], strides = [1, 1]} : vector<128x16xf32> to vector<64x16xf32>
    %331 = arith.truncf %330 : vector<64x16xf32> to vector<64x16xbf16>
    %332 = vector.extract_strided_slice %328 {offsets = [0, 0], sizes = [8, 8], strides = [1, 1]} : vector<8x16xf32> to vector<8x8xf32>
    %333 = arith.truncf %332 : vector<8x8xf32> to vector<8x8xbf16>
    %334 = vector.extract_strided_slice %329 {offsets = [0, 0], sizes = [64, 8], strides = [1, 1]} : vector<64x16xf32> to vector<64x8xf32>
    %335 = arith.truncf %334 : vector<64x8xf32> to vector<64x8xbf16>
    %cst_92 = arith.constant dense<0.000000e+00> : vector<8x64xf32>
    %336 = tpu.matmul %333, %335, %cst_92 {dimension_numbers = #tpu.dot_dimension_numbers<[1], [1], [0], [0], [0, 0, 1, 0], [], []>} : vector<8x8xbf16>, vector<64x8xbf16>, vector<8x64xf32> -> vector<8x64xf32>
    %cst_93 = arith.constant dense<0xFF800000> : vector<8xf32>
    %337 = vector.multi_reduction <maximumf>, %336, %cst_93 [1] : vector<8x64xf32> to vector<8xf32>
    %338 = vector.shape_cast %337 : vector<8xf32> to vector<8x1xf32>
    %339 = vector.broadcast %338 : vector<8x1xf32> to vector<8x64xf32>
    %340 = arith.subf %336, %339 : vector<8x64xf32>
    %341 = math.exp %340 : vector<8x64xf32>
    %cst_94 = arith.constant dense<0.000000e+00> : vector<8xf32>
    %342 = vector.multi_reduction <add>, %341, %cst_94 [1] : vector<8x64xf32> to vector<8xf32>
    %343 = vector.shape_cast %342 : vector<8xf32> to vector<8x1xf32>
    %344 = vector.broadcast %343 : vector<8x1xf32> to vector<8x64xf32>
    %345 = arith.divf %341, %344 : vector<8x64xf32>
    %346 = arith.truncf %345 : vector<8x64xf32> to vector<8x64xbf16>
    %347 = vector.extract_strided_slice %331 {offsets = [0, 0], sizes = [64, 8], strides = [1, 1]} : vector<64x16xbf16> to vector<64x8xbf16>
    %cst_95 = arith.constant dense<0.000000e+00> : vector<8x8xf32>
    %348 = tpu.matmul %346, %347, %cst_95 {dimension_numbers = #tpu.dot_dimension_numbers<[1], [0], [0], [1], [0, 0, 1, 1], [], []>} : vector<8x64xbf16>, vector<64x8xbf16>, vector<8x8xf32> -> vector<8x8xf32>
    %349 = vector.extract_strided_slice %328 {offsets = [0, 8], sizes = [8, 8], strides = [1, 1]} : vector<8x16xf32> to vector<8x8xf32>
    %350 = arith.truncf %349 : vector<8x8xf32> to vector<8x8xbf16>
    %351 = vector.extract_strided_slice %329 {offsets = [0, 8], sizes = [64, 8], strides = [1, 1]} : vector<64x16xf32> to vector<64x8xf32>
    %352 = arith.truncf %351 : vector<64x8xf32> to vector<64x8xbf16>
    %cst_96 = arith.constant dense<0.000000e+00> : vector<8x64xf32>
    %353 = tpu.matmul %350, %352, %cst_96 {dimension_numbers = #tpu.dot_dimension_numbers<[1], [1], [0], [0], [0, 0, 1, 0], [], []>} : vector<8x8xbf16>, vector<64x8xbf16>, vector<8x64xf32> -> vector<8x64xf32>
    %cst_97 = arith.constant dense<0xFF800000> : vector<8xf32>
    %354 = vector.multi_reduction <maximumf>, %353, %cst_97 [1] : vector<8x64xf32> to vector<8xf32>
    %355 = vector.shape_cast %354 : vector<8xf32> to vector<8x1xf32>
    %356 = vector.broadcast %355 : vector<8x1xf32> to vector<8x64xf32>
    %357 = arith.subf %353, %356 : vector<8x64xf32>
    %358 = math.exp %357 : vector<8x64xf32>
    %cst_98 = arith.constant dense<0.000000e+00> : vector<8xf32>
    %359 = vector.multi_reduction <add>, %358, %cst_98 [1] : vector<8x64xf32> to vector<8xf32>
    %360 = vector.shape_cast %359 : vector<8xf32> to vector<8x1xf32>
    %361 = vector.broadcast %360 : vector<8x1xf32> to vector<8x64xf32>
    %362 = arith.divf %358, %361 : vector<8x64xf32>
    %363 = arith.truncf %362 : vector<8x64xf32> to vector<8x64xbf16>
    %364 = vector.extract_strided_slice %331 {offsets = [0, 8], sizes = [64, 8], strides = [1, 1]} : vector<64x16xbf16> to vector<64x8xbf16>
    %cst_99 = arith.constant dense<0.000000e+00> : vector<8x8xf32>
    %365 = tpu.matmul %363, %364, %cst_99 {dimension_numbers = #tpu.dot_dimension_numbers<[1], [0], [0], [1], [0, 0, 1, 1], [], []>} : vector<8x64xbf16>, vector<64x8xbf16>, vector<8x8xf32> -> vector<8x8xf32>
    %366 = tpu.concatenate %348, %365 in 1 : vector<8x8xf32>, vector<8x8xf32> -> vector<8x16xf32>
    %367 = tpu.concatenate %327, %366 in 0 : vector<8x16xf32>, vector<8x16xf32> -> vector<16x16xf32>
    %368 = vector.extract_strided_slice %8 {offsets = [48, 0], sizes = [16, 32], strides = [1, 1]} : vector<64x32xbf16> to vector<16x32xbf16>
    %369 = arith.truncf %367 : vector<16x16xf32> to vector<16x16xbf16>
    %cst_100 = arith.constant dense<0.000000e+00> : vector<16x32xf32>
    %370 = tpu.matmul %369, %368, %cst_100 {dimension_numbers = #tpu.dot_dimension_numbers<[1], [0], [0], [1], [0, 0, 1, 1], [], []>} : vector<16x16xbf16>, vector<16x32xbf16>, vector<16x32xf32> -> vector<16x32xf32>
    %371 = vector.broadcast %269 : vector<1x32xf32> to vector<16x32xf32>
    %372 = arith.addf %370, %371 : vector<16x32xf32>
    %373 = arith.addf %243, %372 : vector<16x32xf32>
    %374 = vector.extract_strided_slice %14 {offsets = [2, 0], sizes = [1, 32], strides = [1, 1]} : vector<5x32xf32> to vector<1x32xf32>
    %375 = vector.extract_strided_slice %15 {offsets = [2, 0], sizes = [1, 32], strides = [1, 1]} : vector<5x32xf32> to vector<1x32xf32>
    %cst_101 = arith.constant dense<0.000000e+00> : vector<16xf32>
    %376 = vector.multi_reduction <add>, %373, %cst_101 [1] : vector<16x32xf32> to vector<16xf32>
    %377 = vector.shape_cast %376 : vector<16xf32> to vector<16x1xf32>
    %cst_102 = arith.constant 3.200000e+01 : f32
    %378 = vector.broadcast %cst_102 : f32 to vector<16x1xf32>
    %379 = arith.divf %377, %378 : vector<16x1xf32>
    %380 = vector.broadcast %379 : vector<16x1xf32> to vector<16x32xf32>
    %381 = arith.subf %373, %380 : vector<16x32xf32>
    %382 = arith.mulf %381, %381 : vector<16x32xf32>
    %cst_103 = arith.constant dense<0.000000e+00> : vector<16xf32>
    %383 = vector.multi_reduction <add>, %382, %cst_103 [1] : vector<16x32xf32> to vector<16xf32>
    %384 = vector.shape_cast %383 : vector<16xf32> to vector<16x1xf32>
    %cst_104 = arith.constant 3.200000e+01 : f32
    %385 = vector.broadcast %cst_104 : f32 to vector<16x1xf32>
    %386 = arith.divf %384, %385 : vector<16x1xf32>
    %cst_105 = arith.constant 9.99999974E-6 : f32
    %387 = vector.broadcast %cst_105 : f32 to vector<16x1xf32>
    %388 = arith.addf %386, %387 : vector<16x1xf32>
    %389 = math.rsqrt %388 : vector<16x1xf32>
    %390 = vector.broadcast %389 : vector<16x1xf32> to vector<16x32xf32>
    %391 = arith.mulf %381, %390 : vector<16x32xf32>
    %392 = vector.broadcast %374 : vector<1x32xf32> to vector<16x32xf32>
    %393 = arith.mulf %391, %392 : vector<16x32xf32>
    %394 = vector.broadcast %375 : vector<1x32xf32> to vector<16x32xf32>
    %395 = arith.addf %393, %394 : vector<16x32xf32>
    %396 = vector.extract_strided_slice %12 {offsets = [0, 0], sizes = [64, 32], strides = [1, 1]} : vector<128x32xbf16> to vector<64x32xbf16>
    %397 = vector.extract_strided_slice %12 {offsets = [64, 0], sizes = [64, 32], strides = [1, 1]} : vector<128x32xbf16> to vector<64x32xbf16>
    %398 = vector.extract_strided_slice %13 {offsets = [0, 0], sizes = [1, 64], strides = [1, 1]} : vector<1x96xf32> to vector<1x64xf32>
    %399 = vector.extract_strided_slice %13 {offsets = [0, 64], sizes = [1, 32], strides = [1, 1]} : vector<1x96xf32> to vector<1x32xf32>
    %400 = arith.truncf %395 : vector<16x32xf32> to vector<16x32xbf16>
    %cst_106 = arith.constant dense<0.000000e+00> : vector<16x64xf32>
    %401 = tpu.matmul %400, %396, %cst_106 {dimension_numbers = #tpu.dot_dimension_numbers<[1], [1], [0], [0], [0, 0, 1, 0], [], []>} : vector<16x32xbf16>, vector<64x32xbf16>, vector<16x64xf32> -> vector<16x64xf32>
    %402 = vector.broadcast %398 : vector<1x64xf32> to vector<16x64xf32>
    %403 = arith.addf %401, %402 : vector<16x64xf32>
    %cst_107 = arith.constant 0.000000e+00 : f32
    %404 = vector.broadcast %cst_107 : f32 to vector<16x64xf32>
    %405 = arith.maximumf %403, %404 : vector<16x64xf32>
    %406 = arith.truncf %405 : vector<16x64xf32> to vector<16x64xbf16>
    %cst_108 = arith.constant dense<0.000000e+00> : vector<16x32xf32>
    %407 = tpu.matmul %406, %397, %cst_108 {dimension_numbers = #tpu.dot_dimension_numbers<[1], [0], [0], [1], [0, 0, 1, 1], [], []>} : vector<16x64xbf16>, vector<64x32xbf16>, vector<16x32xf32> -> vector<16x32xf32>
    %408 = vector.broadcast %399 : vector<1x32xf32> to vector<16x32xf32>
    %409 = arith.addf %407, %408 : vector<16x32xf32>
    %410 = arith.addf %395, %409 : vector<16x32xf32>
    %411 = vector.extract_strided_slice %14 {offsets = [3, 0], sizes = [1, 32], strides = [1, 1]} : vector<5x32xf32> to vector<1x32xf32>
    %412 = vector.extract_strided_slice %15 {offsets = [3, 0], sizes = [1, 32], strides = [1, 1]} : vector<5x32xf32> to vector<1x32xf32>
    %cst_109 = arith.constant dense<0.000000e+00> : vector<16xf32>
    %413 = vector.multi_reduction <add>, %410, %cst_109 [1] : vector<16x32xf32> to vector<16xf32>
    %414 = vector.shape_cast %413 : vector<16xf32> to vector<16x1xf32>
    %cst_110 = arith.constant 3.200000e+01 : f32
    %415 = vector.broadcast %cst_110 : f32 to vector<16x1xf32>
    %416 = arith.divf %414, %415 : vector<16x1xf32>
    %417 = vector.broadcast %416 : vector<16x1xf32> to vector<16x32xf32>
    %418 = arith.subf %410, %417 : vector<16x32xf32>
    %419 = arith.mulf %418, %418 : vector<16x32xf32>
    %cst_111 = arith.constant dense<0.000000e+00> : vector<16xf32>
    %420 = vector.multi_reduction <add>, %419, %cst_111 [1] : vector<16x32xf32> to vector<16xf32>
    %421 = vector.shape_cast %420 : vector<16xf32> to vector<16x1xf32>
    %cst_112 = arith.constant 3.200000e+01 : f32
    %422 = vector.broadcast %cst_112 : f32 to vector<16x1xf32>
    %423 = arith.divf %421, %422 : vector<16x1xf32>
    %cst_113 = arith.constant 9.99999974E-6 : f32
    %424 = vector.broadcast %cst_113 : f32 to vector<16x1xf32>
    %425 = arith.addf %423, %424 : vector<16x1xf32>
    %426 = math.rsqrt %425 : vector<16x1xf32>
    %427 = vector.broadcast %426 : vector<16x1xf32> to vector<16x32xf32>
    %428 = arith.mulf %418, %427 : vector<16x32xf32>
    %429 = vector.broadcast %411 : vector<1x32xf32> to vector<16x32xf32>
    %430 = arith.mulf %428, %429 : vector<16x32xf32>
    %431 = vector.broadcast %412 : vector<1x32xf32> to vector<16x32xf32>
    %432 = arith.addf %430, %431 : vector<16x32xf32>
    %433 = arith.addf %432, %2 : vector<16x32xf32>
    %434 = arith.addf %265, %3 : vector<128x32xf32>
    %435 = vector.extract_strided_slice %11 {offsets = [0, 32], sizes = [1, 16], strides = [1, 1]} : vector<1x80xf32> to vector<1x16xf32>
    %436 = vector.extract_strided_slice %11 {offsets = [0, 48], sizes = [1, 32], strides = [1, 1]} : vector<1x80xf32> to vector<1x32xf32>
    %437 = arith.truncf %434 : vector<128x32xf32> to vector<128x32xbf16>
    %438 = vector.extract_strided_slice %11 {offsets = [0, 0], sizes = [1, 16], strides = [1, 1]} : vector<1x80xf32> to vector<1x16xf32>
    %439 = vector.extract_strided_slice %11 {offsets = [0, 16], sizes = [1, 16], strides = [1, 1]} : vector<1x80xf32> to vector<1x16xf32>
    %440 = vector.extract_strided_slice %10 {offsets = [0, 0], sizes = [16, 32], strides = [1, 1]} : vector<64x32xbf16> to vector<16x32xbf16>
    %cst_114 = arith.constant dense<0.000000e+00> : vector<128x16xf32>
    %441 = tpu.matmul %437, %440, %cst_114 {dimension_numbers = #tpu.dot_dimension_numbers<[1], [1], [0], [0], [0, 0, 1, 0], [], []>} : vector<128x32xbf16>, vector<16x32xbf16>, vector<128x16xf32> -> vector<128x16xf32>
    %442 = vector.broadcast %438 : vector<1x16xf32> to vector<128x16xf32>
    %443 = arith.addf %441, %442 : vector<128x16xf32>
    %444 = arith.truncf %433 : vector<16x32xf32> to vector<16x32xbf16>
    %445 = vector.extract_strided_slice %10 {offsets = [16, 0], sizes = [16, 32], strides = [1, 1]} : vector<64x32xbf16> to vector<16x32xbf16>
    %cst_115 = arith.constant dense<0.000000e+00> : vector<16x16xf32>
    %446 = tpu.matmul %444, %445, %cst_115 {dimension_numbers = #tpu.dot_dimension_numbers<[1], [1], [0], [0], [0, 0, 1, 0], [], []>} : vector<16x32xbf16>, vector<16x32xbf16>, vector<16x16xf32> -> vector<16x16xf32>
    %447 = vector.broadcast %439 : vector<1x16xf32> to vector<16x16xf32>
    %448 = arith.addf %446, %447 : vector<16x16xf32>
    %449 = arith.truncf %432 : vector<16x32xf32> to vector<16x32xbf16>
    %450 = vector.extract_strided_slice %10 {offsets = [32, 0], sizes = [16, 32], strides = [1, 1]} : vector<64x32xbf16> to vector<16x32xbf16>
    %cst_116 = arith.constant dense<0.000000e+00> : vector<16x16xf32>
    %451 = tpu.matmul %449, %450, %cst_116 {dimension_numbers = #tpu.dot_dimension_numbers<[1], [1], [0], [0], [0, 0, 1, 0], [], []>} : vector<16x32xbf16>, vector<16x32xbf16>, vector<16x16xf32> -> vector<16x16xf32>
    %452 = vector.broadcast %435 : vector<1x16xf32> to vector<16x16xf32>
    %453 = arith.addf %451, %452 : vector<16x16xf32>
    %cst_117 = arith.constant 0.353553385 : f32
    %454 = vector.broadcast %cst_117 : f32 to vector<128x16xf32>
    %455 = arith.mulf %443, %454 : vector<128x16xf32>
    %456 = vector.extract_strided_slice %455 {offsets = [0, 0], sizes = [64, 16], strides = [1, 1]} : vector<128x16xf32> to vector<64x16xf32>
    %457 = vector.extract_strided_slice %448 {offsets = [0, 0], sizes = [8, 16], strides = [1, 1]} : vector<16x16xf32> to vector<8x16xf32>
    %458 = vector.extract_strided_slice %453 {offsets = [0, 0], sizes = [8, 16], strides = [1, 1]} : vector<16x16xf32> to vector<8x16xf32>
    %459 = arith.truncf %458 : vector<8x16xf32> to vector<8x16xbf16>
    %460 = vector.extract_strided_slice %456 {offsets = [0, 0], sizes = [64, 8], strides = [1, 1]} : vector<64x16xf32> to vector<64x8xf32>
    %461 = arith.truncf %460 : vector<64x8xf32> to vector<64x8xbf16>
    %462 = vector.extract_strided_slice %457 {offsets = [0, 0], sizes = [8, 8], strides = [1, 1]} : vector<8x16xf32> to vector<8x8xf32>
    %463 = arith.truncf %462 : vector<8x8xf32> to vector<8x8xbf16>
    %cst_118 = arith.constant dense<0.000000e+00> : vector<64x8xf32>
    %464 = tpu.matmul %461, %463, %cst_118 {dimension_numbers = #tpu.dot_dimension_numbers<[1], [1], [0], [0], [0, 0, 1, 0], [], []>} : vector<64x8xbf16>, vector<8x8xbf16>, vector<64x8xf32> -> vector<64x8xf32>
    %cst_119 = arith.constant dense<0xFF800000> : vector<64xf32>
    %465 = vector.multi_reduction <maximumf>, %464, %cst_119 [1] : vector<64x8xf32> to vector<64xf32>
    %466 = vector.shape_cast %465 : vector<64xf32> to vector<64x1xf32>
    %467 = vector.broadcast %466 : vector<64x1xf32> to vector<64x8xf32>
    %468 = arith.subf %464, %467 : vector<64x8xf32>
    %469 = math.exp %468 : vector<64x8xf32>
    %cst_120 = arith.constant dense<0.000000e+00> : vector<64xf32>
    %470 = vector.multi_reduction <add>, %469, %cst_120 [1] : vector<64x8xf32> to vector<64xf32>
    %471 = vector.shape_cast %470 : vector<64xf32> to vector<64x1xf32>
    %472 = vector.broadcast %471 : vector<64x1xf32> to vector<64x8xf32>
    %473 = arith.divf %469, %472 : vector<64x8xf32>
    %474 = arith.truncf %473 : vector<64x8xf32> to vector<64x8xbf16>
    %475 = vector.extract_strided_slice %459 {offsets = [0, 0], sizes = [8, 8], strides = [1, 1]} : vector<8x16xbf16> to vector<8x8xbf16>
    %cst_121 = arith.constant dense<0.000000e+00> : vector<64x8xf32>
    %476 = tpu.matmul %474, %475, %cst_121 {dimension_numbers = #tpu.dot_dimension_numbers<[1], [0], [0], [1], [0, 0, 1, 1], [], []>} : vector<64x8xbf16>, vector<8x8xbf16>, vector<64x8xf32> -> vector<64x8xf32>
    %477 = vector.extract_strided_slice %456 {offsets = [0, 8], sizes = [64, 8], strides = [1, 1]} : vector<64x16xf32> to vector<64x8xf32>
    %478 = arith.truncf %477 : vector<64x8xf32> to vector<64x8xbf16>
    %479 = vector.extract_strided_slice %457 {offsets = [0, 8], sizes = [8, 8], strides = [1, 1]} : vector<8x16xf32> to vector<8x8xf32>
    %480 = arith.truncf %479 : vector<8x8xf32> to vector<8x8xbf16>
    %cst_122 = arith.constant dense<0.000000e+00> : vector<64x8xf32>
    %481 = tpu.matmul %478, %480, %cst_122 {dimension_numbers = #tpu.dot_dimension_numbers<[1], [1], [0], [0], [0, 0, 1, 0], [], []>} : vector<64x8xbf16>, vector<8x8xbf16>, vector<64x8xf32> -> vector<64x8xf32>
    %cst_123 = arith.constant dense<0xFF800000> : vector<64xf32>
    %482 = vector.multi_reduction <maximumf>, %481, %cst_123 [1] : vector<64x8xf32> to vector<64xf32>
    %483 = vector.shape_cast %482 : vector<64xf32> to vector<64x1xf32>
    %484 = vector.broadcast %483 : vector<64x1xf32> to vector<64x8xf32>
    %485 = arith.subf %481, %484 : vector<64x8xf32>
    %486 = math.exp %485 : vector<64x8xf32>
    %cst_124 = arith.constant dense<0.000000e+00> : vector<64xf32>
    %487 = vector.multi_reduction <add>, %486, %cst_124 [1] : vector<64x8xf32> to vector<64xf32>
    %488 = vector.shape_cast %487 : vector<64xf32> to vector<64x1xf32>
    %489 = vector.broadcast %488 : vector<64x1xf32> to vector<64x8xf32>
    %490 = arith.divf %486, %489 : vector<64x8xf32>
    %491 = arith.truncf %490 : vector<64x8xf32> to vector<64x8xbf16>
    %492 = vector.extract_strided_slice %459 {offsets = [0, 8], sizes = [8, 8], strides = [1, 1]} : vector<8x16xbf16> to vector<8x8xbf16>
    %cst_125 = arith.constant dense<0.000000e+00> : vector<64x8xf32>
    %493 = tpu.matmul %491, %492, %cst_125 {dimension_numbers = #tpu.dot_dimension_numbers<[1], [0], [0], [1], [0, 0, 1, 1], [], []>} : vector<64x8xbf16>, vector<8x8xbf16>, vector<64x8xf32> -> vector<64x8xf32>
    %494 = tpu.concatenate %476, %493 in 1 : vector<64x8xf32>, vector<64x8xf32> -> vector<64x16xf32>
    %495 = vector.extract_strided_slice %455 {offsets = [64, 0], sizes = [64, 16], strides = [1, 1]} : vector<128x16xf32> to vector<64x16xf32>
    %496 = vector.extract_strided_slice %448 {offsets = [8, 0], sizes = [8, 16], strides = [1, 1]} : vector<16x16xf32> to vector<8x16xf32>
    %497 = vector.extract_strided_slice %453 {offsets = [8, 0], sizes = [8, 16], strides = [1, 1]} : vector<16x16xf32> to vector<8x16xf32>
    %498 = arith.truncf %497 : vector<8x16xf32> to vector<8x16xbf16>
    %499 = vector.extract_strided_slice %495 {offsets = [0, 0], sizes = [64, 8], strides = [1, 1]} : vector<64x16xf32> to vector<64x8xf32>
    %500 = arith.truncf %499 : vector<64x8xf32> to vector<64x8xbf16>
    %501 = vector.extract_strided_slice %496 {offsets = [0, 0], sizes = [8, 8], strides = [1, 1]} : vector<8x16xf32> to vector<8x8xf32>
    %502 = arith.truncf %501 : vector<8x8xf32> to vector<8x8xbf16>
    %cst_126 = arith.constant dense<0.000000e+00> : vector<64x8xf32>
    %503 = tpu.matmul %500, %502, %cst_126 {dimension_numbers = #tpu.dot_dimension_numbers<[1], [1], [0], [0], [0, 0, 1, 0], [], []>} : vector<64x8xbf16>, vector<8x8xbf16>, vector<64x8xf32> -> vector<64x8xf32>
    %cst_127 = arith.constant dense<0xFF800000> : vector<64xf32>
    %504 = vector.multi_reduction <maximumf>, %503, %cst_127 [1] : vector<64x8xf32> to vector<64xf32>
    %505 = vector.shape_cast %504 : vector<64xf32> to vector<64x1xf32>
    %506 = vector.broadcast %505 : vector<64x1xf32> to vector<64x8xf32>
    %507 = arith.subf %503, %506 : vector<64x8xf32>
    %508 = math.exp %507 : vector<64x8xf32>
    %cst_128 = arith.constant dense<0.000000e+00> : vector<64xf32>
    %509 = vector.multi_reduction <add>, %508, %cst_128 [1] : vector<64x8xf32> to vector<64xf32>
    %510 = vector.shape_cast %509 : vector<64xf32> to vector<64x1xf32>
    %511 = vector.broadcast %510 : vector<64x1xf32> to vector<64x8xf32>
    %512 = arith.divf %508, %511 : vector<64x8xf32>
    %513 = arith.truncf %512 : vector<64x8xf32> to vector<64x8xbf16>
    %514 = vector.extract_strided_slice %498 {offsets = [0, 0], sizes = [8, 8], strides = [1, 1]} : vector<8x16xbf16> to vector<8x8xbf16>
    %cst_129 = arith.constant dense<0.000000e+00> : vector<64x8xf32>
    %515 = tpu.matmul %513, %514, %cst_129 {dimension_numbers = #tpu.dot_dimension_numbers<[1], [0], [0], [1], [0, 0, 1, 1], [], []>} : vector<64x8xbf16>, vector<8x8xbf16>, vector<64x8xf32> -> vector<64x8xf32>
    %516 = vector.extract_strided_slice %495 {offsets = [0, 8], sizes = [64, 8], strides = [1, 1]} : vector<64x16xf32> to vector<64x8xf32>
    %517 = arith.truncf %516 : vector<64x8xf32> to vector<64x8xbf16>
    %518 = vector.extract_strided_slice %496 {offsets = [0, 8], sizes = [8, 8], strides = [1, 1]} : vector<8x16xf32> to vector<8x8xf32>
    %519 = arith.truncf %518 : vector<8x8xf32> to vector<8x8xbf16>
    %cst_130 = arith.constant dense<0.000000e+00> : vector<64x8xf32>
    %520 = tpu.matmul %517, %519, %cst_130 {dimension_numbers = #tpu.dot_dimension_numbers<[1], [1], [0], [0], [0, 0, 1, 0], [], []>} : vector<64x8xbf16>, vector<8x8xbf16>, vector<64x8xf32> -> vector<64x8xf32>
    %cst_131 = arith.constant dense<0xFF800000> : vector<64xf32>
    %521 = vector.multi_reduction <maximumf>, %520, %cst_131 [1] : vector<64x8xf32> to vector<64xf32>
    %522 = vector.shape_cast %521 : vector<64xf32> to vector<64x1xf32>
    %523 = vector.broadcast %522 : vector<64x1xf32> to vector<64x8xf32>
    %524 = arith.subf %520, %523 : vector<64x8xf32>
    %525 = math.exp %524 : vector<64x8xf32>
    %cst_132 = arith.constant dense<0.000000e+00> : vector<64xf32>
    %526 = vector.multi_reduction <add>, %525, %cst_132 [1] : vector<64x8xf32> to vector<64xf32>
    %527 = vector.shape_cast %526 : vector<64xf32> to vector<64x1xf32>
    %528 = vector.broadcast %527 : vector<64x1xf32> to vector<64x8xf32>
    %529 = arith.divf %525, %528 : vector<64x8xf32>
    %530 = arith.truncf %529 : vector<64x8xf32> to vector<64x8xbf16>
    %531 = vector.extract_strided_slice %498 {offsets = [0, 8], sizes = [8, 8], strides = [1, 1]} : vector<8x16xbf16> to vector<8x8xbf16>
    %cst_133 = arith.constant dense<0.000000e+00> : vector<64x8xf32>
    %532 = tpu.matmul %530, %531, %cst_133 {dimension_numbers = #tpu.dot_dimension_numbers<[1], [0], [0], [1], [0, 0, 1, 1], [], []>} : vector<64x8xbf16>, vector<8x8xbf16>, vector<64x8xf32> -> vector<64x8xf32>
    %533 = tpu.concatenate %515, %532 in 1 : vector<64x8xf32>, vector<64x8xf32> -> vector<64x16xf32>
    %534 = tpu.concatenate %494, %533 in 0 : vector<64x16xf32>, vector<64x16xf32> -> vector<128x16xf32>
    %535 = vector.extract_strided_slice %10 {offsets = [48, 0], sizes = [16, 32], strides = [1, 1]} : vector<64x32xbf16> to vector<16x32xbf16>
    %536 = arith.truncf %534 : vector<128x16xf32> to vector<128x16xbf16>
    %cst_134 = arith.constant dense<0.000000e+00> : vector<128x32xf32>
    %537 = tpu.matmul %536, %535, %cst_134 {dimension_numbers = #tpu.dot_dimension_numbers<[1], [0], [0], [1], [0, 0, 1, 1], [], []>} : vector<128x16xbf16>, vector<16x32xbf16>, vector<128x32xf32> -> vector<128x32xf32>
    %538 = vector.broadcast %436 : vector<1x32xf32> to vector<128x32xf32>
    %539 = arith.addf %537, %538 : vector<128x32xf32>
    %540 = arith.addf %265, %539 : vector<128x32xf32>
    %541 = vector.extract_strided_slice %14 {offsets = [4, 0], sizes = [1, 32], strides = [1, 1]} : vector<5x32xf32> to vector<1x32xf32>
    %542 = vector.extract_strided_slice %15 {offsets = [4, 0], sizes = [1, 32], strides = [1, 1]} : vector<5x32xf32> to vector<1x32xf32>
    %cst_135 = arith.constant dense<0.000000e+00> : vector<128xf32>
    %543 = vector.multi_reduction <add>, %540, %cst_135 [1] : vector<128x32xf32> to vector<128xf32>
    %544 = vector.shape_cast %543 : vector<128xf32> to vector<128x1xf32>
    %cst_136 = arith.constant 3.200000e+01 : f32
    %545 = vector.broadcast %cst_136 : f32 to vector<128x1xf32>
    %546 = arith.divf %544, %545 : vector<128x1xf32>
    %547 = vector.broadcast %546 : vector<128x1xf32> to vector<128x32xf32>
    %548 = arith.subf %540, %547 : vector<128x32xf32>
    %549 = arith.mulf %548, %548 : vector<128x32xf32>
    %cst_137 = arith.constant dense<0.000000e+00> : vector<128xf32>
    %550 = vector.multi_reduction <add>, %549, %cst_137 [1] : vector<128x32xf32> to vector<128xf32>
    %551 = vector.shape_cast %550 : vector<128xf32> to vector<128x1xf32>
    %cst_138 = arith.constant 3.200000e+01 : f32
    %552 = vector.broadcast %cst_138 : f32 to vector<128x1xf32>
    %553 = arith.divf %551, %552 : vector<128x1xf32>
    %cst_139 = arith.constant 9.99999974E-6 : f32
    %554 = vector.broadcast %cst_139 : f32 to vector<128x1xf32>
    %555 = arith.addf %553, %554 : vector<128x1xf32>
    %556 = math.rsqrt %555 : vector<128x1xf32>
    %557 = vector.broadcast %556 : vector<128x1xf32> to vector<128x32xf32>
    %558 = arith.mulf %548, %557 : vector<128x32xf32>
    %559 = vector.broadcast %541 : vector<1x32xf32> to vector<128x32xf32>
    %560 = arith.mulf %558, %559 : vector<128x32xf32>
    %561 = vector.broadcast %542 : vector<1x32xf32> to vector<128x32xf32>
    %562 = arith.addf %560, %561 : vector<128x32xf32>
    %c0_140 = arith.constant 0 : index
    %c0_141 = arith.constant 0 : index
    %563 = vector.load %arg16[%c0_140, %c0_141] : memref<16x32xf32, #tpu.memory_space<vmem>>, vector<16x32xf32>
    tpu.vector_store %arg16[%c0_140, %c0_141], %432 {strides = array<i32>} : memref<16x32xf32, #tpu.memory_space<vmem>>, vector<16x32xf32>,
    %c0_142 = arith.constant 0 : index
    %c0_143 = arith.constant 0 : index
    %564 = vector.load %arg17[%c0_142, %c0_143] : memref<128x32xf32, #tpu.memory_space<vmem>>, vector<128x32xf32>
    tpu.vector_store %arg17[%c0_142, %c0_143], %562 {strides = array<i32>} : memref<128x32xf32, #tpu.memory_space<vmem>>, vector<128x32xf32>,
    return
  }
}

</mosaic_0001>

<bundles_post_ra>
// kernel: two_way_attention_block2.1
= control target key start
LH: loop header
LB: loop body
LE: loop exit
PB: predicated region body
PF: predicated region fallthrough
CT: control target
= control target key end

     0   :  { %s10113_s0 = inlined_call_operand.vmem [shape: f32[16,32], index: 0, kind: input, shape index: {}]   ;;  %s10114_s1 = inlined_call_operand.vmem [shape: f32[128,32], index: 1, kind: input, shape index: {}]   ;;  %s10115_s2 = inlined_call_operand.vmem [shape: f32[16,32], index: 2, kind: input, shape index: {}]   ;;  %s10116_s3 = inlined_call_operand.vmem [shape: f32[128,32], index: 3, kind: input, shape index: {}]   ;;  %s10117_s4 = inlined_call_operand.vmem [shape: bf16[128,32], index: 4, kind: input, shape index: {}]   ;;  %s10118_s5 = inlined_call_operand.vmem [shape: f32[1,128], index: 5, kind: input, shape index: {}]   ;;  %s10119_s6 = inlined_call_operand.vmem [shape: bf16[128,32], index: 6, kind: input, shape index: {}]   ;;  %s10120_s7 = inlined_call_operand.vmem [shape: f32[1,128], index: 7, kind: input, shape index: {}]   ;;  %s10121_s8 = inlined_call_operand.vmem [shape: bf16[64,32], index: 8, kind: input, shape index: {}]   ;;  %s10122_s9 = inlined_call_operand.vmem [shape: f32[1,80], index: 9, kind: input, shape index: {}]   ;;  %s10123_s10 = inlined_call_operand.vmem [shape: bf16[64,32], index: 10, kind: input, shape index: {}]   ;;  %s10124_s11 = inlined_call_operand.vmem [shape: f32[1,80], index: 11, kind: input, shape index: {}]   ;;  %s10125_s12 = inlined_call_operand.vmem [shape: bf16[128,32], index: 12, kind: input, shape index: {}]   ;;  %s10126_s13 = inlined_call_operand.vmem [shape: f32[1,96], index: 13, kind: input, shape index: {}]   ;;  %s10127_s14 = inlined_call_operand.vmem [shape: f32[5,32], index: 14, kind: input, shape index: {}]   ;;  %s10128_s15 = inlined_call_operand.vmem [shape: f32[5,32], index: 15, kind: input, shape index: {}]   ;;  %s10129_s16 = inlined_call_operand.hbm [shape: f32[16,32], index: 16, kind: output, shape index: {0}]   ;;  %s10130_s17 = inlined_call_operand.vmem [shape: f32[128,32], index: 17, kind: output, shape index: {1}]  }
   0x1   :  { %10138 = sst [smem:[#allocation6_spill]] %s10113_s0 }
   0x2   :  { %10139 = sst [smem:[#allocation7_spill]] %s10114_s1 }
   0x3   :  { %v6997_v0 = vld [vmem:[%s10117_s4 + $0x18] sm:$0xff]   ;;  %v10135_v1 = vmov 0.0   ;;  %vm193_vm0 = vcmask 261120   ;;  %v6998_v2 = vld [vmem:[%s10117_s4 + $0x10] sm:$0xff]   ;;  %v6999_v4 = vld [vmem:[%s10117_s4 + $0x8] sm:$0xff]   ;;  %vm7461_vm1 = vmmov 0  }
   0x4   :  { %6298 = vmatprep.subr.bf16.mxu0 %v10135_v1  ;;  %6318 = vmatprep.subr.bf16.mxu1 %v10135_v1  ;;  %v207_v3 = vsel %vm193_vm0, %v6997_v0, 0  ;;  %v204_v5 = vsel %vm193_vm0, %v6998_v2, 0  ;;  %v201_v6 = vsel %vm193_vm0, %v6999_v4, 0  ;;  %v7000_v7 = vld [vmem:[%s10117_s4] sm:$0xff]   ;;  %s10140_s1 = sld [smem:[#allocation6_spill]]  ;;  %v76_v11 = vld [vmem:[%s10115_s2 + $0x8] sm:$0xff] }
   0x5   :  { %6299 = vmatpush3.bf16.xpose.msra.mxu0 %v207_v3  ;;  %6306 = vmatprep.mubr.msk.bf16.mxu0 %vm7461_vm1, %v10135_v1  ;;  %v75_v10 = vld [vmem:[%s10115_s2] sm:$0xff]  ;;  %v198_v12 = vsel %vm193_vm0, %v7000_v7, 0 }
   0x6   :  { %6300 = vmatprep.subr.bf16.mxu0 %v10135_v1  ;;  %6320 = vmatprep.mubr.msk.bf16.mxu1 %vm7461_vm1, %v10135_v1 }
   0xa   :  { %v57_v8 = vld [vmem:[%s10140_s1] sm:$0xff]  ;;  %v58_v9 = vld [vmem:[%s10140_s1 + $0x8] sm:$0xff] }
   0xd   :  { %6301 = vmatpush3.bf16.xpose.msra.mxu0 %v204_v5 }
   0xe   :  { %6302 = vmatprep.subr.bf16.mxu0 %v10135_v1 }
  0x15   :  { %6303 = vmatpush3.bf16.xpose.msra.mxu0 %v201_v6 }
  0x16   :  { %6304 = vmatprep.subr.bf16.mxu0 %v10135_v1 }
  0x17   :  { %23 = vsyncpa [#allocation3], 0  ;;  %v164_v13 = vadd.f32 %v75_v10, %v57_v8  ;;  %v165_v14 = vadd.f32 %v76_v11, %v58_v9  ;;  %v7001_v16 = vld [vmem:[%s10117_s4 + $0x28] sm:$0xff]   ;;  %v7002_v18 = vld [vmem:[%s10117_s4 + $0x20] sm:$0xff]   ;;  %v250_v20 = vpack.c.bf16 %v58_v9, %v57_v8  ;;  %s7462_s18 = smov 96   ;;  %s7463_s19 = smov 112  }
  0x18   :  { %v271_v17 = vsel %vm193_vm0, %v7001_v16, 0  ;;  %v268_v19 = vsel %vm193_vm0, %v7002_v18, 0  ;;  %v7619_v21 = vld [vmem:[%s10118_s5] ss:$0 sm:$0xff]  ;;  %s7464_s20 = smov 80   ;;  %vm322_vm2 = vcmask 130048  }
  0x19   :  { %v166_v15 = vpack.c.bf16 %v165_v14, %v164_v13  ;;  %vm369_vm3 = vcmask 64512   ;;  %s10133_s21 = smov 64   ;;  %vm385_vm4 = vcmask 1043456   ;;  %s10141_s26 = sld [smem:[#allocation7_spill]]  ;;  %vm1295_vm5 = vcmask 523264  }
  0x1a   :  { %s7466_s28 = smov 16   ;;  %s10142_s0 = smov 64  }
  0x1b   :  { %s7467_s23 = smov 32  }
  0x1d   :  { %6305 = vmatpush3.bf16.xpose.msra.mxu0 %v198_v12 }
  0x1e   :  { %6310 = vmatprep.subr.bf16.mxu0 %v10135_v1 }
  0x24   :  { %6307 = vmatmul.mubr.msk.bf16.vlgmr.msra.gmra.mxu0 %vm193_vm0, %v166_v15 }
  0x25   :  { %6314 = vmatprep.mubr.msk.bf16.mxu0 %vm7461_vm1, %v10135_v1  ;;  %6311 = vmatpush3.bf16.xpose.msra.mxu0 %v271_v17 }
  0x26   :  { %6312 = vmatprep.subr.bf16.mxu0 %v10135_v1 }
  0x2d   :  { %6313 = vmatpush3.bf16.xpose.msra.mxu0 %v268_v19 }
  0x2e   :  { %6330 = vmatprep.subr.bf16.mxu0 %v10135_v1 }
  0x34   :  { %6315 = vmatmul.mubr.msk.bf16.vlgmr.msra.gmra.mxu0 %vm193_vm0, %v250_v20 }
  0x35   :  { %6332 = vmatprep.mubr.msk.bf16.mxu0 %vm7461_vm1, %v10135_v1 }
  0xe4   :  { %v243_v22 = vpop.f32.mrf.mxu0 }
  0xe5   :  { %v244_v23 = vadd.f32 %v7619_v21, %v243_v22 }
  0xe6   :  { %v6308_v24 = vpop.f32.mrf.mxu0 }
  0xe7   :  { %v318_v25 = vpack.c.bf16 %v244_v23, %v244_v23  ;;  %v314_v26 = vmul.f32 0.25, %v244_v23 }
  0xe8   :  { %v246_v27 = vpop.f32.mrf.mxu0 }
  0xe9   :  { %v247_v28 = vadd.f32 %v7619_v21, %v246_v27  ;;  %320 = vrot.lane.b32.xlu0 %v318_v25, %s7462_s18  ;;  %v317_v29 = vpack.c.bf16 %v314_v26, %v314_v26 }
  0xea   :  { %v6309_v30 = vpop.f32.mrf.mxu0 }
  0xeb   :  { %430 = vrot.lane.b32.xlu1 %v317_v29, %s7463_s19  ;;  %v315_v31 = vmul.f32 0.25, %v247_v28  ;;  %v548_v32 = vpack.c.bf16 %v247_v28, %v247_v28 }
  0xed   :  { %432 = vrot.lane.b32.xlu0 %v318_v25, %s7464_s20  ;;  %v547_v33 = vpack.c.bf16 %v315_v31, %v315_v31 }
  0xef   :  { %550 = vrot.lane.b32.xlu1 %v548_v32, %s7462_s18 }
  0xf1   :  { %659 = vrot.lane.b32.xlu0 %v548_v32, %s7464_s20 }
  0xf3   :  { %657 = vrot.lane.b32.xlu1 %v547_v33, %s7463_s19 }
  0xf4   :  { %v307_v44 = vpop.f32.mrf.mxu0 }
  0xf6   :  { %v6316_v45 = vpop.f32.mrf.mxu0 }
  0xf8   :  { %v7649_v46 = vpop.f32.mrf.mxu0 }
  0xfa   :  { %v6317_v47 = vpop.f32.mrf.mxu0 }
  0xfb   :  { %v7003_v47 = vld [vmem:[%s10119_s6 + $0x18] sm:$0xff]  }
 0x15b   :  { %v321_v34 = vpop.permute.xlu0 %320 }
 0x15c   :  { %v327_v35 = vsel %vm322_vm2, %v321_v34, 0 }
 0x15d   :  { %6319 = vmatpush3.bf16.xpose.msra.mxu1 %v327_v35  ;;  %v431_v36 = vpop.permute.xlu1 %430 }
 0x15e   :  { %6324 = vmatprep.subr.bf16.mxu1 %v10135_v1 }
 0x15f   :  { %v433_v37 = vpop.permute.xlu0 %432 }
 0x160   :  { %v438_v38 = vsel %vm322_vm2, %v433_v37, 0 }
 0x161   :  { %6331 = vmatpush3.bf16.xpose.msra.mxu0 %v438_v38  ;;  %v551_v39 = vpop.permute.xlu1 %550 }
 0x162   :  { %6342 = vmatprep.subr.bf16.mxu0 %v10135_v1  ;;  %v556_v40 = vsel %vm322_vm2, %v551_v39, 0 }
 0x163   :  { %v660_v41 = vpop.permute.xlu0 %659 }
 0x164   :  { %6321 = vmatmul.mubr.msk.bf16.vlgmr.msra.gmra.mxu1 %vm322_vm2, %v317_v29  ;;  %v665_v42 = vsel %vm322_vm2, %v660_v41, 0 }
 0x165   :  { %6326 = vmatprep.mubr.msk.bf16.mxu1 %vm7461_vm1, %v10135_v1  ;;  %v658_v43 = vpop.permute.xlu1 %657 }
 0x168   :  { %6333 = vmatmul.mubr.msk.bf16.vlgmr.msra.gmra.mxu0 %vm322_vm2, %v431_v36 }
 0x169   :  { %6343 = vmatpush3.bf16.xpose.msra.mxu0 %v556_v40  ;;  %6344 = vmatprep.mubr.msk.bf16.mxu0 %vm7461_vm1, %v10135_v1 }
 0x16a   :  { %6354 = vmatprep.subr.bf16.mxu0 %v10135_v1 }
 0x170   :  { %6345 = vmatmul.mubr.msk.bf16.vlgmr.msra.gmra.mxu0 %vm322_vm2, %v547_v33 }
 0x171   :  { %6355 = vmatpush3.bf16.xpose.msra.mxu0 %v665_v42  ;;  %6356 = vmatprep.mubr.msk.bf16.mxu0 %vm7461_vm1, %v10135_v1 }
 0x172   :  { %6366 = vmatprep.subr.bf16.mxu0 %v10135_v1 }
 0x178   :  { %6357 = vmatmul.mubr.msk.bf16.vlgmr.msra.gmra.mxu0 %vm322_vm2, %v658_v43 }
 0x179   :  { %6370 = vmatprep.mubr.msk.bf16.mxu0 %vm7461_vm1, %v10135_v1 }
 0x224   :  { %v363_v48 = vpop.f32.mrf.mxu1 }
 0x225   :  { %v370_v49 = vsel %vm369_vm3, %v363_v48, -inf }
 0x226   :  { %v6322_v50 = vpop.f32.mrf.mxu1  ;;  %371 = vmax.xlane.f32.xlu0 %v370_v49 }
 0x227   :  { %v7687_v50 = vld [vmem:[%s10141_s26 + $0x8] sm:$0xff] }
 0x228   :  { %v366_v51 = vpop.f32.mrf.mxu1  ;;  %v474_v52 = vpop.f32.mrf.mxu0 }
 0x229   :  { %v480_v53 = vsel %vm369_vm3, %v474_v52, -inf  ;;  %v77_v51 = vld [vmem:[%s10116_s3] sm:$0xff] }
 0x22a   :  { %v6323_v54 = vpop.f32.mrf.mxu1  ;;  %481 = vmax.xlane.f32.xlu1 %v480_v53  ;;  %v6334_v55 = vpop.f32.mrf.mxu0 }
 0x22c   :  { %v477_v56 = vpop.f32.mrf.mxu0 }
 0x22e   :  { %v6335_v57 = vpop.f32.mrf.mxu0 }
 0x230   :  { %v592_v58 = vpop.f32.mrf.mxu0 }
 0x231   :  { %v598_v59 = vsel %vm369_vm3, %v592_v58, -inf }
 0x232   :  { %599 = vmax.xlane.f32.xlu0 %v598_v59  ;;  %v6346_v60 = vpop.f32.mrf.mxu0 }
 0x233   :  { %v919_v60 = vsel %vm193_vm0, %v7003_v47, 0 }
 0x234   :  { %v595_v61 = vpop.f32.mrf.mxu0 }
 0x235   :  { %v7004_v61 = vld [vmem:[%s10119_s6 + $0x10] sm:$0xff]  }
 0x236   :  { %v6347_v62 = vpop.f32.mrf.mxu0 }
 0x237   :  { %v916_v62 = vsel %vm193_vm0, %v7004_v61, 0 }
 0x238   :  { %v701_v63 = vpop.f32.mrf.mxu0 }
 0x239   :  { %v707_v0 = vsel %vm369_vm3, %v701_v63, -inf }
 0x23a   :  { %708 = vmax.xlane.f32.xlu0 %v707_v0  ;;  %v6358_v2 = vpop.f32.mrf.mxu0 }
 0x23b   :  { %261 = vrot.lane.b32.xlu1 %v7619_v21, %s10133_s21  ;;  %v7006_v2 = vld [vmem:[%s10119_s6] sm:$0xff]  }
 0x23c   :  { %v704_v3 = vpop.f32.mrf.mxu0 }
 0x23d   :  { %v7722_v3 = vld [vmem:[%s10141_s26 + $0x10] sm:$0xff] }
 0x23e   :  { %v6359_v4 = vpop.f32.mrf.mxu0 }
 0x23f   :  { %v7727_v4 = vld [vmem:[%s10141_s26 + $0x18] sm:$0xff] }
 0x2af   :  { %v372_v5 = vpop.xlane.xlu0 %371 }
 0x2b0   :  { %v373_v6 = vsub.f32 %v363_v48, %v372_v5  ;;  %v7682_v48 = vld [vmem:[%s10141_s26] sm:$0xff]  ;;  %v79_v5 = vld [vmem:[%s10116_s3 + $0x10] sm:$0xff] }
 0x2b1   :  { %v835_v55 = vadd.f32 %v77_v51, %v7682_v48 }
 0x2b2   :  { %v374_v7 = vmul.f32 1.442695, %v373_v6  ;;  %v80_v6 = vld [vmem:[%s10116_s3 + $0x18] sm:$0xff] }
 0x2b3   :  { %v482_v8 = vpop.xlane.xlu1 %481 }
 0x2b4   :  { %7029 = vpow2.f32 %v374_v7  ;;  %v483_v9 = vsub.f32 %v474_v52, %v482_v8  ;;  %v78_v52 = vld [vmem:[%s10116_s3 + $0x8] sm:$0xff]  ;;  %v7738_v7 = vld [vmem:[%s10141_s26 + $0x20] sm:$0xff]  ;;  %v910_v8 = vsel %vm193_vm0, %v7006_v2, 0 }
 0x2b5   :  { %v836_v56 = vadd.f32 %v78_v52, %v7687_v50 }
 0x2b6   :  { %v484_v10 = vmul.f32 1.442695, %v483_v9  ;;  %v7744_v9 = vld [vmem:[%s10141_s26 + $0x28] sm:$0xff] }
 0x2b7   :  { %v262_v11 = vpop.permute.xlu1 %261 }
 0x2b8   :  { %7031 = vpow2.f32 %v484_v10  ;;  %v308_v12 = vadd.f32 %v307_v44, %v262_v11  ;;  %v311_v29 = vadd.f32 %v7649_v46, %v262_v11  ;;  %v81_v10 = vld [vmem:[%s10116_s3 + $0x20] sm:$0xff]  ;;  %v82_v11 = vld [vmem:[%s10116_s3 + $0x28] sm:$0xff] }
 0x2ba   :  { %v316_v13 = vpack.c.bf16 %v308_v12, %v308_v12  ;;  %v546_v30 = vpack.c.bf16 %v311_v29, %v311_v29  ;;  %v837_v12 = vadd.f32 %v79_v5, %v7722_v3 }
 0x2bb   :  { %v600_v14 = vpop.xlane.xlu0 %599 }
 0x2bc   :  { %v601_v15 = vsub.f32 %v592_v58, %v600_v14  ;;  %493 = vrot.lane.b32.xlu1 %v316_v13, %s7463_s19  ;;  %v387_v16 = vsel %vm385_vm4, %v316_v13, 0  ;;  %v614_v44 = vsel %vm385_vm4, %v546_v30, 0  ;;  %v851_v58 = vpack.c.bf16 %v836_v56, %v835_v55 }
 0x2bd   :  { %6325 = vmatpush3.bf16.msra.mxu1 %v387_v16  ;;  %v838_v13 = vadd.f32 %v80_v6, %v7727_v4  ;;  %v839_v14 = vadd.f32 %v81_v10, %v7738_v7 }
 0x2be   :  { %v602_v17 = vmul.f32 1.442695, %v601_v15  ;;  %6336 = vmatprep.subr.bf16.mxu1 %v10135_v1  ;;  %v840_v15 = vadd.f32 %v82_v11, %v7744_v9 }
 0x2bf   :  { %v852_v16 = vpack.c.bf16 %v838_v13, %v837_v12 }
 0x2c0   :  { %7033 = vpow2.f32 %v602_v17  ;;  %v7759_v17 = vld [vmem:[%s10141_s26 + $0x30] sm:$0xff] }
 0x2c1   :  { %v7030_v18 = vpop.eup %7029 }
 0x2c2   :  { %v376_v19 = vsel %vm369_vm3, %v7030_v18, 0.0 }
 0x2c3   :  { %377 = vadd.xlane.f32.xlu0 %v376_v19  ;;  %v709_v20 = vpop.xlane.xlu0 %708  ;;  %v7764_v19 = vld [vmem:[%s10141_s26 + $0x38] sm:$0xff] }
 0x2c4   :  { %v710_v21 = vsub.f32 %v701_v63, %v709_v20  ;;  %v7005_v63 = vld [vmem:[%s10119_s6 + $0x8] sm:$0xff]   ;;  %v83_v20 = vld [vmem:[%s10116_s3 + $0x30] sm:$0xff] }
 0x2c5   :  { %v7032_v22 = vpop.eup %7031  ;;  %v913_v0 = vsel %vm193_vm0, %v7005_v63, 0 }
 0x2c6   :  { %v711_v23 = vmul.f32 1.442695, %v710_v21  ;;  %v486_v24 = vsel %vm369_vm3, %v7032_v22, 0.0  ;;  %v84_v21 = vld [vmem:[%s10116_s3 + $0x38] sm:$0xff] }
 0x2c7   :  { %487 = vadd.xlane.f32.xlu0 %v486_v24 }
 0x2c8   :  { %7035 = vpow2.f32 %v711_v23  ;;  %v842_v23 = vadd.f32 %v84_v21, %v7764_v19 }
 0x2cd   :  { %v7034_v25 = vpop.eup %7033 }
 0x2ce   :  { %v604_v26 = vsel %vm369_vm3, %v7034_v25, 0.0 }
 0x2cf   :  { %605 = vadd.xlane.f32.xlu0 %v604_v26 }
 0x2d5   :  { %v7036_v27 = vpop.eup %7035 }
 0x2d6   :  { %v713_v28 = vsel %vm369_vm3, %v7036_v27, 0.0 }
 0x2d7   :  { %714 = vadd.xlane.f32.xlu0 %v713_v28 }
 0x2ed   :  { %720 = vrot.lane.b32.xlu0 %v546_v30, %s7463_s19 }
 0x32e   :  { %v494_v36 = vpop.permute.xlu1 %493 }
 0x32f   :  { %v499_v39 = vsel %vm385_vm4, %v494_v36, 0  ;;  %v7791_v36 = vld [vmem:[%s10119_s6 + $0x28] sm:$0xff]  }
 0x34c   :  { %v378_v31 = vpop.xlane.xlu0 %377 }
 0x34d   :  { %7037 = vrcp.f32 %v378_v31 }
 0x350   :  { %v488_v32 = vpop.xlane.xlu0 %487 }
 0x351   :  { %7039 = vrcp.f32 %v488_v32 }
 0x358   :  { %v606_v33 = vpop.xlane.xlu0 %605 }
 0x359   :  { %7041 = vrcp.f32 %v606_v33 }
 0x35a   :  { %v7038_v34 = vpop.eup %7037 }
 0x35b   :  { %v380_v35 = vmul.f32 %v7038_v34, %v7030_v18  ;;  %v853_v18 = vpack.c.bf16 %v840_v15, %v839_v14  ;;  %v7008_v34 = vld [vmem:[%s10117_s4 + $0x30] sm:$0xff]  }
 0x35d   :  { %v381_v37 = vpack.c.bf16 %v380_v35, %v380_v35 }
 0x35e   :  { %v7040_v38 = vpop.eup %7039 }
 0x35f   :  { %6327 = vmatmul.mubr.msk.bf16.vlgmr.msra.gmra.mxu1 %vm369_vm3, %v381_v37  ;;  %v490_v41 = vmul.f32 %v7040_v38, %v7032_v22  ;;  %v841_v22 = vadd.f32 %v83_v20, %v7759_v17 }
 0x360   :  { %6337 = vmatpush3.bf16.msra.mxu1 %v499_v39  ;;  %v715_v40 = vpop.xlane.xlu0 %714  ;;  %6338 = vmatprep.mubr.msk.bf16.mxu1 %vm7461_vm1, %v10135_v1 }
 0x361   :  { %7043 = vrcp.f32 %v715_v40  ;;  %6348 = vmatprep.subr.bf16.mxu1 %v10135_v1  ;;  %v491_v42 = vpack.c.bf16 %v490_v41, %v490_v41  ;;  %v854_v24 = vpack.c.bf16 %v842_v23, %v841_v22 }
 0x364   :  { %v721_v46 = vpop.permute.xlu0 %720 }
 0x365   :  { %v726_v54 = vsel %vm385_vm4, %v721_v46, 0 }
 0x366   :  { %v7042_v43 = vpop.eup %7041 }
 0x367   :  { %6339 = vmatmul.mubr.msk.bf16.vlgmr.msra.gmra.mxu1 %vm369_vm3, %v491_v42  ;;  %v608_v45 = vmul.f32 %v7042_v43, %v7034_v25  ;;  %v7007_v25 = vld [vmem:[%s10117_s4 + $0x38] sm:$0xff]  }
 0x368   :  { %6349 = vmatpush3.bf16.msra.mxu1 %v614_v44  ;;  %6350 = vmatprep.mubr.msk.bf16.mxu1 %vm7461_vm1, %v10135_v1 }
 0x369   :  { %6360 = vmatprep.subr.bf16.mxu1 %v10135_v1  ;;  %v609_v49 = vpack.c.bf16 %v608_v45, %v608_v45  ;;  %6367 = vmatpush3.bf16.msra.mxu0 %v7007_v25 }
 0x36a   :  { %6368 = vmatprep.subr.bf16.mxu0 %v10135_v1 }
 0x36d   :  { %6369 = vmatpush3.bf16.msra.mxu0 %v7008_v34  ;;  %v7858_v34 = vld [vmem:[%s10141_s26 + $0x48] sm:$0xff] }
 0x36e   :  { %v7044_v53 = vpop.eup %7043  ;;  %6866 = vmatprep.subr.msk.bf16.mxu0 %vm193_vm0, %v7791_v36 }
 0x36f   :  { %6351 = vmatmul.mubr.msk.bf16.vlgmr.msra.gmra.mxu1 %vm369_vm3, %v609_v49  ;;  %v717_v57 = vmul.f32 %v7044_v53, %v7036_v27  ;;  %v7799_v53 = vld [vmem:[%s10120_s7] ss:$0 sm:$0xff] }
 0x370   :  { %6361 = vmatpush3.bf16.msra.mxu1 %v726_v54  ;;  %6362 = vmatprep.mubr.msk.bf16.mxu1 %vm7461_vm1, %v10135_v1 }
 0x371   :  { %6862 = vmatprep.subr.msk.bf16.mxu1 %vm193_vm0, %v7003_v47  ;;  %v718_v59 = vpack.c.bf16 %v717_v57, %v717_v57 }
 0x377   :  { %6363 = vmatmul.mubr.msk.bf16.vlgmr.msra.gmra.mxu1 %vm369_vm3, %v718_v59 }
 0x378   :  { %6375 = vmatpush3.bf16.xpose.msra.mxu1 %v919_v60  ;;  %6382 = vmatprep.mubr.msk.bf16.mxu1 %vm193_vm0, %v851_v58 }
 0x379   :  { %6863 = vmatprep.subr.msk.bf16.mxu1 %vm193_vm0, %v7004_v61 }
 0x380   :  { %6377 = vmatpush3.bf16.xpose.msra.mxu1 %v916_v62 }
 0x381   :  { %6864 = vmatprep.subr.msk.bf16.mxu1 %vm193_vm0, %v7005_v63 }
 0x388   :  { %6379 = vmatpush3.bf16.xpose.msra.mxu1 %v913_v0 }
 0x389   :  { %6865 = vmatprep.subr.msk.bf16.mxu1 %vm193_vm0, %v7006_v2 }
 0x390   :  { %6381 = vmatpush3.bf16.xpose.msra.mxu1 %v910_v8 }
 0x397   :  { %6383 = vmatmul.mubr.msk.bf16.vlgmr.msra.gmra.mxu1 %vm193_vm0, %v852_v16 }
 0x398   :  { %6386 = vmatprep.mubr.msk.bf16.mxu1 %vm193_vm0, %v853_v18 }
 0x39f   :  { %6387 = vmatmul.mubr.msk.bf16.gmra.mxu1 %vm193_vm0, %v854_v24 }
 0x41f   :  { %v7781_v26 = vpop.f32.mrf.mxu1 }
 0x421   :  { %v6328_v27 = vpop.f32.mrf.mxu1 }
 0x423   :  { %v426_v28 = vpop.f32.mrf.mxu1 }
 0x425   :  { %v6329_v29 = vpop.f32.mrf.mxu1 }
 0x426   :  { %v1018_v29 = vpack.c.bf16 %v7687_v50, %v7682_v48  ;;  %v1019_v48 = vpack.c.bf16 %v7727_v4, %v7722_v3  ;;  %v1020_v50 = vpack.c.bf16 %v7744_v9, %v7738_v7  ;;  %v1021_v3 = vpack.c.bf16 %v7764_v19, %v7759_v17  ;;  %v69_v7 = vld [vmem:[%s10141_s26 + $0x50] sm:$0xff]  ;;  %v70_v9 = vld [vmem:[%s10141_s26 + $0x58] sm:$0xff]  ;;  %v7880_v17 = vld [vmem:[%s10141_s26 + $0x68] sm:$0xff] }
 0x427   :  { %v535_v30 = vpop.f32.mrf.mxu1  ;;  %v1023_v19 = vpack.c.bf16 %v70_v9, %v69_v7 }
 0x429   :  { %v6340_v31 = vpop.f32.mrf.mxu1 }
 0x42a   :  { %v1067_v31 = vsel %vm193_vm0, %v7791_v36, 0 }
 0x42b   :  { %v538_v32 = vpop.f32.mrf.mxu1 }
 0x42c   :  { %v7010_v32 = vld [vmem:[%s10119_s6 + $0x20] sm:$0xff]  }
 0x42d   :  { %v6341_v33 = vpop.f32.mrf.mxu1 }
 0x42e   :  { %v7853_v33 = vld [vmem:[%s10141_s26 + $0x40] sm:$0xff] }
 0x42f   :  { %v7786_v35 = vpop.f32.mrf.mxu1  ;;  %v1022_v4 = vpack.c.bf16 %v7858_v34, %v7853_v33 }
 0x431   :  { %v6352_v37 = vpop.f32.mrf.mxu1 }
 0x432   :  { %v7889_v37 = vld [vmem:[%s10141_s26 + $0x70] sm:$0xff] }
 0x433   :  { %v653_v38 = vpop.f32.mrf.mxu1 }
 0x434   :  { %v7894_v38 = vld [vmem:[%s10141_s26 + $0x78] sm:$0xff] }
 0x435   :  { %v6353_v39 = vpop.f32.mrf.mxu1 }
 0x436   :  { %v1025_v39 = vpack.c.bf16 %v7894_v38, %v7889_v37 }
 0x437   :  { %v762_v40 = vpop.f32.mrf.mxu1 }
 0x438   :  { %v6907_v41 = vpack.i.bf16 %v762_v40, %v535_v30 }
 0x439   :  { %v6364_v42 = vpop.f32.mrf.mxu1 }
 0x43a   :  { %6908 = vrot.lane.b32.xlu1 %v6907_v41, %s7466_s28 }
 0x43b   :  { %v765_v43 = vpop.f32.mrf.mxu1 }
 0x43d   :  { %v6365_v44 = vpop.f32.mrf.mxu1 }
 0x457   :  { %v6384_v45 = vpop.f32.mrf.mxu1 }
 0x458   :  { %v964_v62 = vadd.f32 %v6384_v45, %v7799_v53 }
 0x459   :  { %v955_v46 = vpop.f32.mrf.mxu1 }
 0x45a   :  { %v956_v63 = vadd.f32 %v7799_v53, %v955_v46  ;;  %v1168_v16 = vmul.f32 0.25, %v964_v62 }
 0x45b   :  { %v6385_v47 = vpop.f32.mrf.mxu1 }
 0x45c   :  { %v967_v58 = vadd.f32 %v6385_v47, %v7799_v53  ;;  %v1166_v8 = vmul.f32 0.25, %v956_v63 }
 0x45d   :  { %v958_v49 = vpop.f32.mrf.mxu1 }
 0x45e   :  { %v959_v59 = vadd.f32 %v7799_v53, %v958_v49  ;;  %v1191_v2 = vpack.c.bf16 %v967_v58, %v964_v62  ;;  %v1169_v15 = vmul.f32 0.25, %v967_v58 }
 0x45f   :  { %v6388_v51 = vpop.f32.mrf.mxu1 }
 0x460   :  { %v980_v55 = vadd.f32 %v6388_v51, %v7799_v53  ;;  %v1167_v5 = vmul.f32 0.25, %v959_v59  ;;  %v1190_v13 = vpack.c.bf16 %v959_v59, %v956_v63  ;;  %v1187_v20 = vpack.c.bf16 %v1169_v15, %v1168_v16  ;;  %v85_v63 = vld [vmem:[%s10116_s3 + $0x40] sm:$0xff]  ;;  %v90_v15 = vld [vmem:[%s10116_s3 + $0x68] sm:$0xff] }
 0x461   :  { %v971_v52 = vpop.f32.mrf.mxu1 }
 0x462   :  { %v972_v0 = vadd.f32 %v7799_v53, %v971_v52  ;;  %v1186_v11 = vpack.c.bf16 %v1167_v5, %v1166_v8  ;;  %v1172_v21 = vmul.f32 0.25, %v980_v55  ;;  %v88_v8 = vld [vmem:[%s10116_s3 + $0x58] sm:$0xff] }
 0x463   :  { %v6389_v54 = vpop.f32.mrf.mxu1 }
 0x464   :  { %v983_v56 = vadd.f32 %v6389_v54, %v7799_v53  ;;  %v1170_v12 = vmul.f32 0.25, %v972_v0 }
 0x465   :  { %v974_v57 = vpop.f32.mrf.mxu1 }
 0x466   :  { %v1193_v60 = vpack.c.bf16 %v983_v56, %v980_v55  ;;  %v975_v61 = vadd.f32 %v7799_v53, %v974_v57  ;;  %v1173_v18 = vmul.f32 0.25, %v983_v56 }
 0x468   :  { %1483 = vrot.lane.b32.xlu0 %v1193_v60, %s7464_s20  ;;  %1204 = vrot.lane.b32.xlu1 %v1193_v60, %s7462_s18  ;;  %v1192_v6 = vpack.c.bf16 %v975_v61, %v972_v0  ;;  %v1171_v10 = vmul.f32 0.25, %v975_v61  ;;  %v7823_v22 = vpack.c.bf16 %v1173_v18, %v1172_v21  ;;  %v86_v0 = vld [vmem:[%s10116_s3 + $0x48] sm:$0xff]  ;;  %v848_v18 = vadd.f32 %v90_v15, %v7880_v17  ;;  %v92_v21 = vld [vmem:[%s10116_s3 + $0x78] sm:$0xff] }
 0x469   :  { %v844_v5 = vadd.f32 %v86_v0, %v7858_v34 }
 0x46a   :  { %v7815_v14 = vpack.c.bf16 %v1171_v10, %v1170_v12 }
 0x46c   :  { %1479 = vrot.lane.b32.xlu0 %v1191_v2, %s7464_s20  ;;  %1202 = vrot.lane.b32.xlu1 %v1192_v6, %s7462_s18 }
 0x470   :  { %1200 = vrot.lane.b32.xlu1 %v1191_v2, %s7462_s18  ;;  %1469 = vrot.lane.b32.xlu0 %v1186_v11, %s7463_s19  ;;  %v843_v2 = vadd.f32 %v85_v63, %v7853_v33 }
 0x472   :  { %v855_v12 = vpack.c.bf16 %v844_v5, %v843_v2 }
 0x474   :  { %1198 = vrot.lane.b32.xlu1 %v1190_v13, %s7462_s18  ;;  %1473 = vrot.lane.b32.xlu0 %v7815_v14, %s7463_s19 }
 0x475   :  { %6390 = vmatprep.mubr.msk.bf16.mxu1 %vm193_vm0, %v855_v12 }
 0x478   :  { %1481 = vrot.lane.b32.xlu1 %v1192_v6, %s7464_s20  ;;  %v87_v6 = vld [vmem:[%s10116_s3 + $0x50] sm:$0xff] }
 0x479   :  { %v845_v10 = vadd.f32 %v87_v6, %v69_v7 }
 0x47c   :  { %1477 = vrot.lane.b32.xlu1 %v1190_v13, %s7464_s20 }
 0x480   :  { %1471 = vrot.lane.b32.xlu1 %v1187_v20, %s7463_s19 }
 0x484   :  { %1475 = vrot.lane.b32.xlu1 %v7823_v22, %s7463_s19 }
 0x488   :  { %1036 = vrot.lane.b32.xlu1 %v7799_v53, %s10142_s0 }
 0x4ac   :  { %v6909_v23 = vpop.permute.xlu1 %6908 }
 0x4ad   :  { %v6911_v24 = vunpack.i.h.bf16 %v6909_v23  ;;  %v6910_v25 = vunpack.i.l.bf16 %v6909_v23  ;;  %v850_v23 = vadd.f32 %v92_v21, %v7894_v38 }
 0x4af   :  { %v772_v27 = vsel %vm322_vm2, %v7786_v35, %v6911_v24  ;;  %v545_v28 = vsel %vm322_vm2, %v7781_v26, %v6910_v25  ;;  %v1064_v26 = vsel %vm193_vm0, %v7010_v32, 0  ;;  %v7875_v35 = vld [vmem:[%s10141_s26 + $0x60] sm:$0xff] }
 0x4b0   :  { %v773_v30 = vpack.c.bf16 %v772_v27, %v545_v28  ;;  %v1024_v36 = vpack.c.bf16 %v7880_v17, %v7875_v35 }
 0x4b2   :  { %6371 = vmatmul.mubr.msk.bf16.vlgmr.msra.gmra.mxu0 %vm193_vm0, %v773_v30 }
 0x4b3   :  { %6399 = vmatpush3.bf16.xpose.msra.mxu0 %v1067_v31  ;;  %6402 = vmatprep.mubr.msk.bf16.mxu0 %vm193_vm0, %v1018_v29 }
 0x4b4   :  { %6867 = vmatprep.subr.msk.bf16.mxu0 %vm193_vm0, %v7010_v32 }
 0x4bb   :  { %6401 = vmatpush3.bf16.xpose.msra.mxu0 %v1064_v26 }
 0x4c2   :  { %6403 = vmatmul.mubr.msk.bf16.vlgmr.msra.gmra.mxu0 %vm193_vm0, %v1019_v48 }
 0x4c3   :  { %6406 = vmatprep.mubr.msk.bf16.mxu0 %vm193_vm0, %v1020_v50 }
 0x4ca   :  { %6407 = vmatmul.mubr.msk.bf16.gmra.mxu0 %vm193_vm0, %v1021_v3 }
 0x4cb   :  { %6410 = vmatprep.mubr.msk.bf16.mxu0 %vm193_vm0, %v1022_v4 }
 0x4d2   :  { %6411 = vmatmul.mubr.msk.bf16.gmra.mxu0 %vm193_vm0, %v1023_v19 }
 0x4d3   :  { %6414 = vmatprep.mubr.msk.bf16.mxu0 %vm193_vm0, %v1024_v36 }
 0x4da   :  { %6415 = vmatmul.mubr.msk.bf16.gmra.mxu0 %vm193_vm0, %v1025_v39  ;;  %v1205_v40 = vpop.permute.xlu1 %1204  ;;  %v1484_v49 = vpop.permute.xlu0 %1483 }
 0x4db   :  { %6868 = vmatprep.subr.msk.bf16.mxu0 %vm322_vm2, %v1205_v40  ;;  %6426 = vmatprep.mubr.msk.bf16.mxu0 %vm322_vm2, %v1186_v11  ;;  %v1228_v41 = vsel %vm322_vm2, %v1205_v40, 0  ;;  %v1507_v51 = vsel %vm322_vm2, %v1484_v49, 0  ;;  %v846_v11 = vadd.f32 %v88_v8, %v70_v9 }
 0x4dc   :  { %6419 = vmatpush3.bf16.xpose.msra.mxu0 %v1228_v41 }
 0x4dd   :  { %v856_v13 = vpack.c.bf16 %v846_v11, %v845_v10 }
 0x4de   :  { %v1203_v42 = vpop.permute.xlu1 %1202  ;;  %v1480_v54 = vpop.permute.xlu0 %1479 }
 0x4df   :  { %6869 = vmatprep.subr.msk.bf16.mxu0 %vm322_vm2, %v1203_v42  ;;  %v1225_v43 = vsel %vm322_vm2, %v1203_v42, 0  ;;  %v1501_v57 = vsel %vm322_vm2, %v1480_v54, 0  ;;  %6391 = vmatmul.mubr.msk.bf16.gmra.mxu1 %vm193_vm0, %v856_v13 }
 0x4e2   :  { %v1201_v44 = vpop.permute.xlu1 %1200  ;;  %v1470_v55 = vpop.permute.xlu0 %1469 }
 0x4e3   :  { %v1222_v45 = vsel %vm322_vm2, %v1201_v44, 0 }
 0x4e4   :  { %6421 = vmatpush3.bf16.xpose.msra.mxu0 %v1225_v43 }
 0x4e5   :  { %6870 = vmatprep.subr.msk.bf16.mxu0 %vm322_vm2, %v1201_v44 }
 0x4e6   :  { %v1199_v46 = vpop.permute.xlu1 %1198  ;;  %v1474_v61 = vpop.permute.xlu0 %1473 }
 0x4e7   :  { %v1219_v47 = vsel %vm322_vm2, %v1199_v46, 0 }
 0x4ea   :  { %v1482_v52 = vpop.permute.xlu1 %1481 }
 0x4eb   :  { %v1504_v56 = vsel %vm322_vm2, %v1482_v52, 0 }
 0x4ec   :  { %6423 = vmatpush3.bf16.xpose.msra.mxu0 %v1222_v45 }
 0x4ed   :  { %6871 = vmatprep.subr.msk.bf16.mxu0 %vm322_vm2, %v1199_v46 }
 0x4ee   :  { %v1478_v58 = vpop.permute.xlu1 %1477 }
 0x4ef   :  { %v1498_v59 = vsel %vm322_vm2, %v1478_v58, 0 }
 0x4f2   :  { %v1472_v60 = vpop.permute.xlu1 %1471 }
 0x4f4   :  { %6425 = vmatpush3.bf16.xpose.msra.mxu0 %v1219_v47 }
 0x4f5   :  { %6872 = vmatprep.subr.msk.bf16.mxu0 %vm322_vm2, %v1484_v49 }
 0x4f6   :  { %v1476_v62 = vpop.permute.xlu1 %1475 }
 0x4fa   :  { %v1037_v33 = vpop.permute.xlu1 %1036 }
 0x4fb   :  { %6427 = vmatmul.mubr.msk.bf16.vlgmr.msra.gmra.mxu0 %vm322_vm2, %v1187_v20  ;;  %v91_v20 = vld [vmem:[%s10116_s3 + $0x70] sm:$0xff] }
 0x4fc   :  { %6430 = vmatprep.mubr.msk.bf16.mxu0 %vm322_vm2, %v7815_v14  ;;  %6451 = vmatpush3.bf16.xpose.msra.mxu0 %v1507_v51  ;;  %v89_v14 = vld [vmem:[%s10116_s3 + $0x60] sm:$0xff] }
 0x4fd   :  { %6873 = vmatprep.subr.msk.bf16.mxu0 %vm322_vm2, %v1482_v52  ;;  %v847_v16 = vadd.f32 %v89_v14, %v7875_v35 }
 0x4ff   :  { %v857_v24 = vpack.c.bf16 %v848_v18, %v847_v16 }
 0x501   :  { %6394 = vmatprep.mubr.msk.bf16.mxu1 %vm193_vm0, %v857_v24 }
 0x503   :  { %6431 = vmatmul.mubr.msk.bf16.gmra.mxu0 %vm322_vm2, %v7823_v22  ;;  %v849_v22 = vadd.f32 %v91_v20, %v7889_v37 }
 0x504   :  { %6453 = vmatpush3.bf16.xpose.msra.mxu0 %v1504_v56  ;;  %6458 = vmatprep.mubr.msk.bf16.mxu0 %vm322_vm2, %v1470_v55 }
 0x505   :  { %6874 = vmatprep.subr.msk.bf16.mxu0 %vm322_vm2, %v1480_v54  ;;  %v858_v25 = vpack.c.bf16 %v850_v23, %v849_v22 }
 0x507   :  { %6395 = vmatmul.mubr.msk.bf16.gmra.mxu1 %vm193_vm0, %v858_v25 }
 0x50c   :  { %6455 = vmatpush3.bf16.xpose.msra.mxu0 %v1501_v57 }
 0x50d   :  { %6875 = vmatprep.subr.msk.bf16.mxu0 %vm322_vm2, %v1478_v58 }
 0x514   :  { %6457 = vmatpush3.bf16.xpose.msra.mxu0 %v1498_v59 }
 0x51b   :  { %6459 = vmatmul.mubr.msk.bf16.vlgmr.msra.gmra.mxu0 %vm322_vm2, %v1472_v60 }
 0x51c   :  { %6462 = vmatprep.mubr.msk.bf16.mxu0 %vm322_vm2, %v1474_v61 }
 0x523   :  { %6463 = vmatmul.mubr.msk.bf16.gmra.mxu0 %vm322_vm2, %v1476_v62 }
 0x572   :  { %v7959_v27 = vpop.f32.mrf.mxu0 }
 0x574   :  { %v6372_v28 = vpop.f32.mrf.mxu0 }
 0x576   :  { %v7961_v29 = vpop.f32.mrf.mxu0 }
 0x578   :  { %v6373_v30 = vpop.f32.mrf.mxu0 }
 0x582   :  { %v6404_v31 = vpop.f32.mrf.mxu0 }
 0x583   :  { %v1112_v38 = vadd.f32 %v6404_v31, %v1037_v33 }
 0x584   :  { %v1103_v32 = vpop.f32.mrf.mxu0 }
 0x585   :  { %v1104_v43 = vadd.f32 %v1103_v32, %v1037_v33 }
 0x586   :  { %v6405_v26 = vpop.f32.mrf.mxu0 }
 0x587   :  { %v1115_v39 = vadd.f32 %v6405_v26, %v1037_v33 }
 0x588   :  { %v1106_v48 = vpop.f32.mrf.mxu0 }
 0x589   :  { %v7967_v42 = vpack.c.bf16 %v1115_v39, %v1112_v38  ;;  %v1107_v44 = vadd.f32 %v1106_v48, %v1037_v33 }
 0x58a   :  { %v6408_v50 = vpop.f32.mrf.mxu0 }
 0x58b   :  { %v1128_v3 = vadd.f32 %v6408_v50, %v1037_v33  ;;  %v7971_v47 = vpack.c.bf16 %v1107_v44, %v1104_v43 }
 0x58c   :  { %v1119_v34 = vpop.f32.mrf.mxu0 }
 0x58d   :  { %v1120_v9 = vadd.f32 %v1119_v34, %v1037_v33 }
 0x58e   :  { %v6409_v4 = vpop.f32.mrf.mxu0 }
 0x58f   :  { %v1131_v7 = vadd.f32 %v6409_v4, %v1037_v33 }
 0x590   :  { %v1122_v35 = vpop.f32.mrf.mxu0 }
 0x591   :  { %v1185_v17 = vpack.c.bf16 %v1131_v7, %v1128_v3  ;;  %v1123_v19 = vadd.f32 %v1122_v35, %v1037_v33 }
 0x592   :  { %v6412_v36 = vpop.f32.mrf.mxu0 }
 0x593   :  { %v7963_v37 = vpack.c.bf16 %v1123_v19, %v1120_v9  ;;  %6434 = vmatprep.subr.bf16.mxu1 %v1185_v17  ;;  %1676 = vrot.lane.b32.xlu0 %v1185_v17, %s7463_s19  ;;  %v1144_v59 = vadd.f32 %v6412_v36, %v1037_v33 }
 0x594   :  { %v1135_v40 = vpop.f32.mrf.mxu0  ;;  %6435 = vmatpush3.bf16.msra.mxu1 %v1185_v17 }
 0x595   :  { %6436 = vmatprep.subr.bf16.mxu1 %v7963_v37  ;;  %v1136_v62 = vadd.f32 %v1135_v40, %v1037_v33 }
 0x596   :  { %v6413_v41 = vpop.f32.mrf.mxu0 }
 0x597   :  { %v1147_v60 = vadd.f32 %v6413_v41, %v1037_v33 }
 0x598   :  { %v1138_v45 = vpop.f32.mrf.mxu0  ;;  %6437 = vmatpush3.bf16.msra.mxu1 %v7963_v37 }
 0x599   :  { %6438 = vmatprep.subr.bf16.mxu1 %v7967_v42  ;;  %v7983_v63 = vpack.c.bf16 %v1147_v60, %v1144_v59  ;;  %v1139_v0 = vadd.f32 %v1138_v45, %v1037_v33 }
 0x59a   :  { %v6416_v46 = vpop.f32.mrf.mxu0 }
 0x59b   :  { %v1160_v51 = vadd.f32 %v6416_v46, %v1037_v33  ;;  %v7987_v2 = vpack.c.bf16 %v1139_v0, %v1136_v62 }
 0x59c   :  { %v1151_v49 = vpop.f32.mrf.mxu0  ;;  %6439 = vmatpush3.bf16.msra.mxu1 %v7967_v42 }
 0x59d   :  { %6440 = vmatprep.subr.bf16.mxu1 %v7971_v47  ;;  %v1152_v56 = vadd.f32 %v1151_v49, %v1037_v33 }
 0x59e   :  { %v6417_v52 = vpop.f32.mrf.mxu0 }
 0x59f   :  { %v1163_v54 = vadd.f32 %v6417_v52, %v1037_v33  ;;  %v6392_v7 = vpop.f32.mrf.mxu1 }
 0x5a0   :  { %v1154_v55 = vpop.f32.mrf.mxu0  ;;  %6441 = vmatpush3.bf16.msra.mxu1 %v7971_v47  ;;  %v996_v35 = vadd.f32 %v6392_v7, %v7799_v53 }
 0x5a1   :  { %v7976_v57 = vpack.c.bf16 %v1163_v54, %v1160_v51  ;;  %v1155_v58 = vadd.f32 %v1154_v55, %v1037_v33  ;;  %v987_v9 = vpop.f32.mrf.mxu1 }
 0x5a2   :  { %v8050_v17 = vadd.f32 %v7799_v53, %v987_v9  ;;  %v1176_v38 = vmul.f32 0.25, %v996_v35 }
 0x5a3   :  { %v7978_v61 = vpack.c.bf16 %v1155_v58, %v1152_v56  ;;  %6498 = vmatprep.subr.bf16.mxu0 %v7976_v57  ;;  %v6393_v19 = vpop.f32.mrf.mxu1 }
 0x5a4   :  { %6499 = vmatpush3.bf16.msra.mxu0 %v7976_v57  ;;  %v1174_v39 = vmul.f32 0.25, %v8050_v17  ;;  %v999_v40 = vadd.f32 %v6393_v19, %v7799_v53 }
 0x5a5   :  { %6500 = vmatprep.subr.bf16.mxu0 %v7978_v61  ;;  %v990_v36 = vpop.f32.mrf.mxu1 }
 0x5a6   :  { %v8055_v41 = vadd.f32 %v7799_v53, %v990_v36  ;;  %v1177_v44 = vmul.f32 0.25, %v999_v40  ;;  %v8057_v45 = vpack.c.bf16 %v999_v40, %v996_v35 }
 0x5a8   :  { %6501 = vmatpush3.bf16.msra.mxu0 %v7978_v61  ;;  %v1175_v46 = vmul.f32 0.25, %v8055_v41  ;;  %v8060_v51 = vpack.c.bf16 %v1177_v44, %v1176_v38 }
 0x5a9   :  { %6502 = vmatprep.subr.bf16.mxu0 %v7983_v63 }
 0x5aa   :  { %v8062_v52 = vpack.c.bf16 %v1175_v46, %v1174_v39 }
 0x5ac   :  { %6503 = vmatpush3.bf16.msra.mxu0 %v7983_v63 }
 0x5ad   :  { %6504 = vmatprep.subr.bf16.mxu0 %v7987_v2 }
 0x5b0   :  { %6505 = vmatpush3.bf16.msra.mxu0 %v7987_v2 }
 0x5bb   :  { %v7992_v5 = vpop.f32.mrf.mxu0 }
 0x5bc   :  { %v1302_v6 = vsel %vm1295_vm5, %v7992_v5, -inf }
 0x5bd   :  { %1303 = vmax.xlane.f32.xlu0 %v1302_v6  ;;  %v7996_v8 = vpop.f32.mrf.mxu0 }
 0x5be   :  { %v1296_v11 = vsel %vm1295_vm5, %v7996_v8, -inf }
 0x5bf   :  { %v7998_v10 = vpop.f32.mrf.mxu0 }
 0x5c0   :  { %v1305_v15 = vsel %vm1295_vm5, %v7998_v10, -inf }
 0x5c1   :  { %1297 = vmax.xlane.f32.xlu0 %v1296_v11  ;;  %v8002_v12 = vpop.f32.mrf.mxu0 }
 0x5c2   :  { %v1299_v13 = vsel %vm1295_vm5, %v8002_v12, -inf }
 0x5c3   :  { %1300 = vmax.xlane.f32.xlu1 %v1299_v13  ;;  %v8006_v14 = vpop.f32.mrf.mxu0 }
 0x5c4   :  { %v1314_v18 = vsel %vm1295_vm5, %v8006_v14, -inf }
 0x5c5   :  { %1306 = vmax.xlane.f32.xlu0 %v1305_v15  ;;  %v8010_v16 = vpop.f32.mrf.mxu0 }
 0x5c6   :  { %v1308_v23 = vsel %vm1295_vm5, %v8010_v16, -inf }
 0x5c7   :  { %1315 = vmax.xlane.f32.xlu1 %v1314_v18  ;;  %v8014_v20 = vpop.f32.mrf.mxu0  ;;  %v6396_v43 = vpop.f32.mrf.mxu1 }
 0x5c8   :  { %v1317_v21 = vsel %vm1295_vm5, %v8014_v20, -inf  ;;  %v8065_v54 = vadd.f32 %v6396_v43, %v7799_v53 }
 0x5c9   :  { %1318 = vmax.xlane.f32.xlu0 %v1317_v21  ;;  %v8018_v22 = vpop.f32.mrf.mxu0  ;;  %v1003_v49 = vpop.f32.mrf.mxu1 }
 0x5ca   :  { %v1311_v24 = vsel %vm1295_vm5, %v8018_v22, -inf  ;;  %v1180_v56 = vmul.f32 0.25, %v8065_v54  ;;  %v8069_v58 = vadd.f32 %v7799_v53, %v1003_v49 }
 0x5cb   :  { %1309 = vmax.xlane.f32.xlu1 %v1308_v23  ;;  %v6397_v55 = vpop.f32.mrf.mxu1 }
 0x5cc   :  { %v8072_v59 = vadd.f32 %v6397_v55, %v7799_v53  ;;  %v1178_v62 = vmul.f32 0.25, %v8069_v58 }
 0x5cd   :  { %1312 = vmax.xlane.f32.xlu0 %v1311_v24  ;;  %v1006_v60 = vpop.f32.mrf.mxu1 }
 0x5ce   :  { %v1181_v0 = vmul.f32 0.25, %v8072_v59  ;;  %v8077_v6 = vadd.f32 %v7799_v53, %v1006_v60 }
 0x5d0   :  { %v8081_v11 = vpack.c.bf16 %v1181_v0, %v1180_v56  ;;  %v1179_v13 = vmul.f32 0.25, %v8077_v6 }
 0x5d2   :  { %v8086_v15 = vpack.c.bf16 %v1179_v13, %v1178_v62 }
 0x5db   :  { %v8024_v25 = vpop.f32.mrf.mxu0 }
 0x5dc   :  { %v1580_v28 = vsel %vm1295_vm5, %v8024_v25, -inf }
 0x5dd   :  { %1581 = vmax.xlane.f32.xlu1 %v1580_v28  ;;  %v8028_v30 = vpop.f32.mrf.mxu0 }
 0x5de   :  { %v1574_v32 = vsel %vm1295_vm5, %v8028_v30, -inf }
 0x5df   :  { %v8030_v31 = vpop.f32.mrf.mxu0 }
 0x5e0   :  { %v1583_v26 = vsel %vm1295_vm5, %v8030_v31, -inf }
 0x5e1   :  { %1575 = vmax.xlane.f32.xlu1 %v1574_v32  ;;  %v8036_v48 = vpop.f32.mrf.mxu0  ;;  %1584 = vmax.xlane.f32.xlu0 %v1583_v26 }
 0x5e2   :  { %v1577_v34 = vsel %vm1295_vm5, %v8036_v48, -inf }
 0x5e3   :  { %v8038_v50 = vpop.f32.mrf.mxu0 }
 0x5e4   :  { %v1592_v33 = vsel %vm1295_vm5, %v8038_v50, -inf }
 0x5e5   :  { %1593 = vmax.xlane.f32.xlu1 %v1592_v33  ;;  %v8044_v3 = vpop.f32.mrf.mxu0  ;;  %1578 = vmax.xlane.f32.xlu0 %v1577_v34 }
 0x5e6   :  { %v1586_v4 = vsel %vm1295_vm5, %v8044_v3, -inf }
 0x5e7   :  { %v8091_v21 = vpop.f32.mrf.mxu0 }
 0x5e8   :  { %v1595_v53 = vsel %vm1295_vm5, %v8091_v21, -inf }
 0x5e9   :  { %1587 = vmax.xlane.f32.xlu1 %v1586_v4  ;;  %v8095_v23 = vpop.f32.mrf.mxu0 }
 0x5fa   :  { %1674 = vrot.lane.b32.xlu1 %v7963_v37, %s7463_s19  ;;  %v1589_v37 = vsel %vm1295_vm5, %v8095_v23, -inf }
 0x5fb   :  { %1672 = vrot.lane.b32.xlu0 %v7967_v42, %s7463_s19 }
 0x605   :  { %v8088_v18 = vpop.permute.xlu0 %1676 }
 0x606   :  { %6466 = vmatprep.subr.bf16.mxu1 %v8088_v18 }
 0x61a   :  { %1596 = vmax.xlane.f32.xlu0 %v1595_v53 }
 0x61e   :  { %1590 = vmax.xlane.f32.xlu0 %v1589_v37 }
 0x646   :  { %v1304_v24 = vpop.xlane.xlu0 %1303 }
 0x647   :  { %v1322_v42 = vsub.f32 %v7992_v5, %v1304_v24 }
 0x649   :  { %v1332_v28 = vmul.f32 1.442695, %v1322_v42 }
 0x64a   :  { %v1298_v32 = vpop.xlane.xlu0 %1297 }
 0x64b   :  { %7045 = vpow2.f32 %v1332_v28  ;;  %v1320_v26 = vsub.f32 %v7996_v8, %v1298_v32 }
 0x64c   :  { %v1301_v33 = vpop.xlane.xlu1 %1300 }
 0x64d   :  { %v1328_v34 = vmul.f32 1.442695, %v1320_v26  ;;  %v1321_v4 = vsub.f32 %v8002_v12, %v1301_v33 }
 0x64e   :  { %v1307_v7 = vpop.xlane.xlu0 %1306 }
 0x64f   :  { %7047 = vpow2.f32 %v1328_v34  ;;  %v1323_v9 = vsub.f32 %v7998_v10, %v1307_v7  ;;  %v1330_v19 = vmul.f32 1.442695, %v1321_v4 }
 0x650   :  { %v1316_v35 = vpop.xlane.xlu1 %1315 }
 0x651   :  { %v1334_v36 = vmul.f32 1.442695, %v1323_v9  ;;  %v1326_v38 = vsub.f32 %v8006_v14, %v1316_v35 }
 0x652   :  { %v1319_v39 = vpop.xlane.xlu0 %1318 }
 0x653   :  { %7049 = vpow2.f32 %v1334_v36  ;;  %v1340_v5 = vmul.f32 1.442695, %v1326_v38  ;;  %v1327_v8 = vsub.f32 %v8014_v20, %v1319_v39 }
 0x654   :  { %v1310_v40 = vpop.xlane.xlu1 %1309  ;;  %7051 = vpow2.f32 %v1330_v19 }
 0x655   :  { %v1324_v43 = vsub.f32 %v8010_v16, %v1310_v40  ;;  %7053 = vpow2.f32 %v1340_v5  ;;  %v1342_v10 = vmul.f32 1.442695, %v1327_v8  ;;  %v8151_v5 = vpack.c.bf16 %v8077_v6, %v8069_v58 }
 0x656   :  { %v1313_v44 = vpop.xlane.xlu0 %1312 }
 0x657   :  { %v1336_v12 = vmul.f32 1.442695, %v1324_v43  ;;  %v1325_v49 = vsub.f32 %v8018_v22, %v1313_v44 }
 0x658   :  { %v8106_v46 = vpop.eup %7045 }
 0x659   :  { %7055 = vpow2.f32 %v1336_v12  ;;  %v1350_v14 = vsel %vm1295_vm5, %v8106_v46, 0.0  ;;  %v1338_v56 = vmul.f32 1.442695, %v1325_v49 }
 0x65a   :  { %1351 = vadd.xlane.f32.xlu0 %v1350_v14  ;;  %7057 = vpow2.f32 %v1342_v10 }
 0x65b   :  { %7059 = vpow2.f32 %v1338_v56 }
 0x65c   :  { %v8111_v55 = vpop.eup %7047 }
 0x65d   :  { %v1344_v16 = vsel %vm1295_vm5, %v8111_v55, 0.0 }
 0x65e   :  { %1345 = vadd.xlane.f32.xlu0 %v1344_v16 }
 0x660   :  { %v8115_v20 = vpop.eup %7049 }
 0x661   :  { %v1353_v60 = vsel %vm1295_vm5, %v8115_v20, 0.0  ;;  %v8119_v62 = vpop.eup %7051 }
 0x662   :  { %1354 = vadd.xlane.f32.xlu0 %v1353_v60  ;;  %v8121_v22 = vpop.eup %7053  ;;  %v1347_v0 = vsel %vm1295_vm5, %v8119_v62, 0.0 }
 0x663   :  { %v1362_v28 = vsel %vm1295_vm5, %v8121_v22, 0.0 }
 0x666   :  { %v8125_v13 = vpop.eup %7055  ;;  %v1582_v53 = vpop.xlane.xlu1 %1581  ;;  %1348 = vadd.xlane.f32.xlu0 %v1347_v0 }
 0x667   :  { %v1600_v37 = vsub.f32 %v8024_v25, %v1582_v53  ;;  %v1356_v24 = vsel %vm1295_vm5, %v8125_v13, 0.0  ;;  %v8132_v32 = vpop.eup %7057 }
 0x668   :  { %1357 = vadd.xlane.f32.xlu1 %v1356_v24  ;;  %v1365_v9 = vsel %vm1295_vm5, %v8132_v32, 0.0  ;;  %v8138_v35 = vpop.eup %7059 }
 0x669   :  { %v1610_v42 = vmul.f32 1.442695, %v1600_v37  ;;  %v1359_v39 = vsel %vm1295_vm5, %v8138_v35, 0.0 }
 0x66a   :  { %v1576_v26 = vpop.xlane.xlu1 %1575  ;;  %1363 = vadd.xlane.f32.xlu0 %v1362_v28  ;;  %v1585_v33 = vpop.xlane.xlu0 %1584 }
 0x66b   :  { %7061 = vpow2.f32 %v1610_v42  ;;  %v1598_v34 = vsub.f32 %v8028_v30, %v1576_v26  ;;  %v1601_v4 = vsub.f32 %v8030_v31, %v1585_v33  ;;  %v8145_v30 = vpack.c.bf16 %v8072_v59, %v8065_v54 }
 0x66c   :  { %v8197_v33 = vpack.c.bf16 %v8055_v41, %v8050_v17 }
 0x66d   :  { %v1606_v7 = vmul.f32 1.442695, %v1598_v34  ;;  %v1612_v25 = vmul.f32 1.442695, %v1601_v4 }
 0x66e   :  { %1366 = vadd.xlane.f32.xlu0 %v1365_v9  ;;  %v1579_v19 = vpop.xlane.xlu0 %1578  ;;  %v1594_v58 = vpop.xlane.xlu1 %1593 }
 0x66f   :  { %7063 = vpow2.f32 %v1606_v7  ;;  %v1599_v36 = vsub.f32 %v8036_v48, %v1579_v19  ;;  %v1604_v16 = vsub.f32 %v8038_v50, %v1594_v58 }
 0x670   :  { %7065 = vpow2.f32 %v1612_v25 }
 0x671   :  { %v1608_v38 = vmul.f32 1.442695, %v1599_v36  ;;  %v1618_v53 = vmul.f32 1.442695, %v1604_v16 }
 0x672   :  { %1360 = vadd.xlane.f32.xlu0 %v1359_v39  ;;  %v1588_v43 = vpop.xlane.xlu1 %1587  ;;  %v8176_v14 = vpop.permute.xlu0 %1672 }
 0x673   :  { %7067 = vpow2.f32 %v1608_v38  ;;  %v1602_v12 = vsub.f32 %v8044_v3, %v1588_v43 }
 0x675   :  { %v1614_v10 = vmul.f32 1.442695, %v1602_v12 }
 0x676   :  { %v1675_v9 = vpop.permute.xlu1 %1674 }
 0x677   :  { %7069 = vpow2.f32 %v1614_v10 }
 0x678   :  { %v8147_v31 = vpop.eup %7061 }
 0x679   :  { %1821 = vrot.lane.b32.xlu1 %v8145_v30, %s7462_s18  ;;  %v1628_v48 = vsel %vm1295_vm5, %v8147_v31, 0.0 }
 0x67a   :  { %1629 = vadd.xlane.f32.xlu0 %v1628_v48 }
 0x67c   :  { %v8157_v40 = vpop.eup %7063 }
 0x67d   :  { %1819 = vrot.lane.b32.xlu1 %v8151_v5, %s7462_s18  ;;  %v1622_v54 = vsel %vm1295_vm5, %v8157_v40, 0.0  ;;  %v8163_v59 = vpop.eup %7065 }
 0x67e   :  { %1623 = vadd.xlane.f32.xlu0 %v1622_v54  ;;  %v1631_v6 = vsel %vm1295_vm5, %v8163_v59, 0.0 }
 0x680   :  { %v8167_v8 = vpop.eup %7067 }
 0x681   :  { %v1625_v44 = vsel %vm1295_vm5, %v8167_v8, 0.0 }
 0x682   :  { %1632 = vadd.xlane.f32.xlu0 %v1631_v6 }
 0x684   :  { %v8174_v49 = vpop.eup %7069 }
 0x685   :  { %v1634_v56 = vsel %vm1295_vm5, %v8174_v49, 0.0 }
 0x686   :  { %1626 = vadd.xlane.f32.xlu0 %v1625_v44 }
 0x69c   :  { %1670 = vrot.lane.b32.xlu0 %v7971_v47, %s7463_s19 }
 0x6a1   :  { %1635 = vadd.xlane.f32.xlu1 %v1634_v56 }
 0x6a3   :  { %v1597_v60 = vpop.xlane.xlu0 %1596 }
 0x6a4   :  { %v1605_v0 = vsub.f32 %v8091_v21, %v1597_v60 }
 0x6a6   :  { %v1620_v3 = vmul.f32 1.442695, %v1605_v0 }
 0x6a7   :  { %v1591_v37 = vpop.xlane.xlu0 %1590 }
 0x6a8   :  { %7071 = vpow2.f32 %v1620_v3  ;;  %v1603_v24 = vsub.f32 %v8095_v23, %v1591_v37 }
 0x6a9   :  { %7073 = vpow2.f32 %v1618_v53 }
 0x6aa   :  { %v1616_v47 = vmul.f32 1.442695, %v1603_v24 }
 0x6ac   :  { %7075 = vpow2.f32 %v1616_v47 }
 0x6b5   :  { %v8183_v42 = vpop.eup %7071 }
 0x6b6   :  { %v1643_v28 = vsel %vm1295_vm5, %v8183_v42, 0.0  ;;  %v8187_v26 = vpop.eup %7073 }
 0x6b7   :  { %1644 = vadd.xlane.f32.xlu1 %v1643_v28  ;;  %v1640_v50 = vsel %vm1295_vm5, %v8187_v26, 0.0 }
 0x6b9   :  { %v8191_v21 = vpop.eup %7075 }
 0x6ba   :  { %v1637_v23 = vsel %vm1295_vm5, %v8191_v21, 0.0 }
 0x6bb   :  { %1641 = vadd.xlane.f32.xlu0 %v1640_v50 }
 0x6bf   :  { %1638 = vadd.xlane.f32.xlu0 %v1637_v23 }
 0x6c8   :  { %1815 = vrot.lane.b32.xlu1 %v8197_v33, %s7462_s18 }
 0x6d5   :  { %1817 = vrot.lane.b32.xlu0 %v8057_v45, %s7462_s18 }
 0x6e3   :  { %v1352_v34 = vpop.xlane.xlu0 %1351 }
 0x6e7   :  { %v1346_v4 = vpop.xlane.xlu0 %1345 }
 0x6eb   :  { %v1355_v7 = vpop.xlane.xlu0 %1354 }
 0x6ec   :  { %7077 = vrcp.f32 %v1355_v7 }
 0x6ed   :  { %7079 = vrcp.f32 %v1346_v4 }
 0x6ee   :  { %7081 = vrcp.f32 %v1352_v34 }
 0x6ef   :  { %v1349_v25 = vpop.xlane.xlu0 %1348 }
 0x6f0   :  { %7083 = vrcp.f32 %v1349_v25 }
 0x6f1   :  { %v1358_v36 = vpop.xlane.xlu1 %1357 }
 0x6f3   :  { %v1364_v19 = vpop.xlane.xlu0 %1363 }
 0x6f7   :  { %v1367_v38 = vpop.xlane.xlu0 %1366 }
 0x6f8   :  { %7085 = vrcp.f32 %v1367_v38 }
 0x6f9   :  { %v7078_v17 = vpop.eup %7077  ;;  %7087 = vrcp.f32 %v1358_v36 }
 0x6fa   :  { %v7080_v41 = vpop.eup %7079  ;;  %7089 = vrcp.f32 %v1364_v19  ;;  %v1375_v58 = vmul.f32 %v7078_v17, %v8115_v20 }
 0x6fb   :  { %v1361_v39 = vpop.xlane.xlu0 %1360  ;;  %v7082_v48 = vpop.eup %7081  ;;  %v1369_v6 = vmul.f32 %v7080_v41, %v8111_v55 }
 0x6fc   :  { %7091 = vrcp.f32 %v1361_v39  ;;  %v1373_v44 = vmul.f32 %v7082_v48, %v8106_v46 }
 0x6fd   :  { %v7084_v54 = vpop.eup %7083 }
 0x6fe   :  { %v1371_v43 = vmul.f32 %v7084_v54, %v8119_v62  ;;  %v1385_v10 = vpack.c.bf16 %v1375_v58, %v1373_v44 }
 0x700   :  { %v1384_v12 = vpack.c.bf16 %v1371_v43, %v1369_v6 }
 0x702   :  { %6442 = vmatprep.mubr.msk.bf16.mxu1 %vm1295_vm5, %v1384_v12 }
 0x703   :  { %v1630_v56 = vpop.xlane.xlu0 %1629  ;;  %6443 = vmatmul.mubr.msk.bf16.vlgmr.msra.gmra.mxu1 %vm1295_vm5, %v1385_v10 }
 0x704   :  { %6467 = vmatpush3.bf16.msra.mxu1 %v8088_v18 }
 0x705   :  { %6468 = vmatprep.subr.bf16.mxu1 %v1675_v9  ;;  %v7086_v16 = vpop.eup %7085 }
 0x706   :  { %v7088_v60 = vpop.eup %7087  ;;  %v1383_v46 = vmul.f32 %v7086_v16, %v8132_v32 }
 0x707   :  { %v1624_v0 = vpop.xlane.xlu0 %1623  ;;  %v7090_v20 = vpop.eup %7089  ;;  %v1377_v62 = vmul.f32 %v7088_v60, %v8125_v13 }
 0x708   :  { %6469 = vmatpush3.bf16.msra.mxu1 %v1675_v9  ;;  %v1381_v37 = vmul.f32 %v7090_v20, %v8121_v22  ;;  %v1822_v13 = vpop.permute.xlu1 %1821 }
 0x709   :  { %v7092_v55 = vpop.eup %7091  ;;  %6470 = vmatprep.subr.bf16.mxu1 %v8176_v14  ;;  %v1845_v9 = vsel %vm322_vm2, %v1822_v13, 0 }
 0x70a   :  { %v1379_v53 = vmul.f32 %v7092_v55, %v8138_v35  ;;  %v1387_v24 = vpack.c.bf16 %v1383_v46, %v1381_v37 }
 0x70b   :  { %v1633_v3 = vpop.xlane.xlu0 %1632 }
 0x70c   :  { %6471 = vmatpush3.bf16.msra.mxu1 %v8176_v14  ;;  %v1386_v18 = vpack.c.bf16 %v1379_v53, %v1377_v62  ;;  %7093 = vrcp.f32 %v1633_v3  ;;  %v1820_v19 = vpop.permute.xlu1 %1819 }
 0x70d   :  { %7095 = vrcp.f32 %v1624_v0 }
 0x70e   :  { %6446 = vmatprep.mubr.msk.bf16.mxu1 %vm1295_vm5, %v1386_v18  ;;  %7097 = vrcp.f32 %v1630_v56 }
 0x70f   :  { %v1627_v47 = vpop.xlane.xlu0 %1626  ;;  %6447 = vmatmul.mubr.msk.bf16.gmra.mxu1 %vm1295_vm5, %v1387_v24 }
 0x710   :  { %7099 = vrcp.f32 %v1627_v47 }
 0x713   :  { %v1671_v32 = vpop.permute.xlu0 %1670 }
 0x714   :  { %6472 = vmatprep.subr.bf16.mxu1 %v1671_v32 }
 0x715   :  { %6473 = vmatpush3.bf16.msra.mxu1 %v1671_v32 }
 0x716   :  { %6876 = vmatprep.subr.msk.bf16.mxu1 %vm322_vm2, %v1822_v13 }
 0x719   :  { %v7094_v22 = vpop.eup %7093 }
 0x71a   :  { %v7096_v35 = vpop.eup %7095  ;;  %v1653_v50 = vmul.f32 %v7094_v22, %v8163_v59  ;;  %v1842_v59 = vsel %vm322_vm2, %v1820_v19, 0 }
 0x71b   :  { %v7098_v14 = vpop.eup %7097  ;;  %v1647_v23 = vmul.f32 %v7096_v35, %v8157_v40 }
 0x71c   :  { %v1651_v4 = vmul.f32 %v7098_v14, %v8147_v31 }
 0x71d   :  { %v7100_v28 = vpop.eup %7099 }
 0x71e   :  { %v1649_v34 = vmul.f32 %v7100_v28, %v8167_v8  ;;  %v1663_v25 = vpack.c.bf16 %v1653_v50, %v1651_v4 }
 0x720   :  { %v1662_v7 = vpack.c.bf16 %v1649_v34, %v1647_v23 }
 0x722   :  { %6474 = vmatprep.mubr.msk.bf16.mxu1 %vm1295_vm5, %v1662_v7 }
 0x723   :  { %6475 = vmatmul.mubr.msk.bf16.vlgmr.msra.gmra.mxu1 %vm1295_vm5, %v1663_v25 }
 0x724   :  { %6483 = vmatpush3.bf16.xpose.msra.mxu1 %v1845_v9 }
 0x725   :  { %6877 = vmatprep.subr.msk.bf16.mxu1 %vm322_vm2, %v1820_v19 }
 0x72a   :  { %v1636_v40 = vpop.xlane.xlu1 %1635 }
 0x72c   :  { %6485 = vmatpush3.bf16.xpose.msra.mxu1 %v1842_v59 }
 0x740   :  { %v1645_v8 = vpop.xlane.xlu1 %1644 }
 0x744   :  { %v1642_v36 = vpop.xlane.xlu0 %1641  ;;  %v1816_v41 = vpop.permute.xlu1 %1815 }
 0x745   :  { %7101 = vrcp.f32 %v1642_v36  ;;  %v1836_v58 = vsel %vm322_vm2, %v1816_v41, 0 }
 0x746   :  { %7103 = vrcp.f32 %v1636_v40 }
 0x747   :  { %7105 = vrcp.f32 %v1645_v8 }
 0x748   :  { %v1639_v31 = vpop.xlane.xlu0 %1638 }
 0x749   :  { %7107 = vrcp.f32 %v1639_v31 }
 0x74c   :  { %v1818_v38 = vpop.permute.xlu0 %1817 }
 0x74d   :  { %6878 = vmatprep.subr.msk.bf16.mxu1 %vm322_vm2, %v1818_v38  ;;  %v1839_v17 = vsel %vm322_vm2, %v1818_v38, 0 }
 0x74e   :  { %6487 = vmatpush3.bf16.xpose.msra.mxu1 %v1839_v17 }
 0x74f   :  { %6879 = vmatprep.subr.msk.bf16.mxu1 %vm322_vm2, %v1816_v41 }
 0x752   :  { %v7102_v39 = vpop.eup %7101 }
 0x753   :  { %v7104_v48 = vpop.eup %7103  ;;  %v1659_v43 = vmul.f32 %v7102_v39, %v8187_v26 }
 0x754   :  { %v7106_v54 = vpop.eup %7105  ;;  %v1655_v44 = vmul.f32 %v7104_v48, %v8174_v49 }
 0x755   :  { %v1661_v10 = vmul.f32 %v7106_v54, %v8183_v42 }
 0x756   :  { %v7108_v6 = vpop.eup %7107  ;;  %6489 = vmatpush3.bf16.xpose.msra.mxu1 %v1836_v58 }
 0x757   :  { %v1657_v12 = vmul.f32 %v7108_v6, %v8191_v21  ;;  %v1665_v16 = vpack.c.bf16 %v1661_v10, %v1659_v43 }
 0x759   :  { %v1664_v56 = vpack.c.bf16 %v1657_v12, %v1655_v44 }
 0x75b   :  { %6478 = vmatprep.mubr.msk.bf16.mxu1 %vm1295_vm5, %v1664_v56 }
 0x75c   :  { %6479 = vmatmul.mubr.msk.bf16.gmra.mxu1 %vm1295_vm5, %v1665_v16 }
 0x75d   :  { %6490 = vmatprep.mubr.msk.bf16.mxu1 %vm322_vm2, %v8062_v52 }
 0x764   :  { %6491 = vmatmul.mubr.msk.bf16.vlgmr.msra.gmra.mxu1 %vm322_vm2, %v8060_v51 }
 0x765   :  { %6494 = vmatprep.mubr.msk.bf16.mxu1 %vm322_vm2, %v8086_v15 }
 0x76c   :  { %6495 = vmatmul.mubr.msk.bf16.gmra.mxu1 %vm322_vm2, %v8081_v11 }
 0x7c3   :  { %v8246_v49 = vpop.f32.mrf.mxu1 }
 0x7c5   :  { %v8248_v42 = vpop.f32.mrf.mxu1 }
 0x7c7   :  { %v8250_v26 = vpop.f32.mrf.mxu1 }
 0x7c9   :  { %v8252_v21 = vpop.f32.mrf.mxu1 }
 0x7cf   :  { %v8254_v60 = vpop.f32.mrf.mxu1 }
 0x7d1   :  { %v8256_v0 = vpop.f32.mrf.mxu1 }
 0x7d3   :  { %v8258_v20 = vpop.f32.mrf.mxu1 }
 0x7d5   :  { %v8260_v55 = vpop.f32.mrf.mxu1 }
 0x7e3   :  { %v8262_v46 = vpop.f32.mrf.mxu1 }
 0x7e5   :  { %v8264_v62 = vpop.f32.mrf.mxu1 }
 0x7e7   :  { %v8266_v53 = vpop.f32.mrf.mxu1 }
 0x7e8   :  { %v6917_v3 = vpack.i.bf16 %v8266_v53, %v8262_v46 }
 0x7e9   :  { %v8270_v37 = vpop.f32.mrf.mxu1 }
 0x81c   :  { %v8272_v18 = vpop.f32.mrf.mxu1 }
 0x81e   :  { %v8274_v24 = vpop.f32.mrf.mxu1 }
 0x820   :  { %v8276_v47 = vpop.f32.mrf.mxu1 }
 0x821   :  { %v6927_v32 = vpack.i.bf16 %v8276_v47, %v8272_v18 }
 0x822   :  { %v8280_v13 = vpop.f32.mrf.mxu1 }
 0x824   :  { %v6492_v22 = vpop.f32.mrf.mxu1 }
 0x825   :  { %v1918_v23 = vsel %vm1295_vm5, %v6492_v22, -inf }
 0x826   :  { %v1881_v35 = vpop.f32.mrf.mxu1 }
 0x827   :  { %v1912_v14 = vsel %vm1295_vm5, %v1881_v35, -inf }
 0x828   :  { %1913 = vmax.xlane.f32.xlu0 %v1912_v14  ;;  %v6493_v28 = vpop.f32.mrf.mxu1 }
 0x829   :  { %v1921_v25 = vsel %vm1295_vm5, %v6493_v28, -inf }
 0x82a   :  { %v1884_v50 = vpop.f32.mrf.mxu1 }
 0x82b   :  { %v1915_v34 = vsel %vm1295_vm5, %v1884_v50, -inf }
 0x82c   :  { %1919 = vmax.xlane.f32.xlu0 %v1918_v23  ;;  %1916 = vmax.xlane.f32.xlu1 %v1915_v34  ;;  %v6496_v4 = vpop.f32.mrf.mxu1 }
 0x82d   :  { %v1930_v40 = vsel %vm1295_vm5, %v6496_v4, -inf }
 0x82e   :  { %v1897_v7 = vpop.f32.mrf.mxu1 }
 0x82f   :  { %v1924_v9 = vsel %vm1295_vm5, %v1897_v7, -inf }
 0x830   :  { %1922 = vmax.xlane.f32.xlu0 %v1921_v25  ;;  %1925 = vmax.xlane.f32.xlu1 %v1924_v9  ;;  %v6497_v19 = vpop.f32.mrf.mxu1 }
 0x831   :  { %v1933_v8 = vsel %vm1295_vm5, %v6497_v19, -inf }
 0x832   :  { %v1900_v59 = vpop.f32.mrf.mxu1 }
 0x833   :  { %v1927_v36 = vsel %vm1295_vm5, %v1900_v59, -inf }
 0x834   :  { %1931 = vmax.xlane.f32.xlu1 %v1930_v40  ;;  %1928 = vmax.xlane.f32.xlu0 %v1927_v36 }
 0x838   :  { %1934 = vmax.xlane.f32.xlu0 %v1933_v8 }
 0x8b1   :  { %v1914_v31 = vpop.xlane.xlu0 %1913 }
 0x8b2   :  { %v1936_v38 = vsub.f32 %v1881_v35, %v1914_v31 }
 0x8b4   :  { %v1944_v48 = vmul.f32 1.442695, %v1936_v38 }
 0x8b5   :  { %v1920_v17 = vpop.xlane.xlu0 %1919  ;;  %v1917_v41 = vpop.xlane.xlu1 %1916 }
 0x8b6   :  { %v1938_v39 = vsub.f32 %v6492_v22, %v1920_v17  ;;  %v1937_v58 = vsub.f32 %v1884_v50, %v1917_v41 }
 0x8b8   :  { %v1948_v54 = vmul.f32 1.442695, %v1938_v39  ;;  %v1946_v44 = vmul.f32 1.442695, %v1937_v58 }
 0x8b9   :  { %v1923_v6 = vpop.xlane.xlu0 %1922  ;;  %v1926_v38 = vpop.xlane.xlu1 %1925 }
 0x8ba   :  { %7109 = vpow2.f32 %v1948_v54  ;;  %v1939_v43 = vsub.f32 %v6493_v28, %v1923_v6  ;;  %v1940_v39 = vsub.f32 %v1897_v7, %v1926_v38 }
 0x8bb   :  { %7111 = vpow2.f32 %v1944_v48 }
 0x8bc   :  { %v1950_v12 = vmul.f32 1.442695, %v1939_v43  ;;  %v1952_v54 = vmul.f32 1.442695, %v1940_v39 }
 0x8bd   :  { %v1929_v10 = vpop.xlane.xlu0 %1928  ;;  %v1932_v17 = vpop.xlane.xlu1 %1931 }
 0x8be   :  { %7113 = vpow2.f32 %v1950_v12  ;;  %v1941_v56 = vsub.f32 %v1900_v59, %v1929_v10  ;;  %v1942_v41 = vsub.f32 %v6496_v4, %v1932_v17 }
 0x8bf   :  { %7115 = vpow2.f32 %v1946_v44 }
 0x8c0   :  { %v1954_v23 = vmul.f32 1.442695, %v1941_v56  ;;  %v1956_v48 = vmul.f32 1.442695, %v1942_v41 }
 0x8c1   :  { %v1935_v16 = vpop.xlane.xlu0 %1934 }
 0x8c2   :  { %v1943_v14 = vsub.f32 %v6497_v19, %v1935_v16 }
 0x8c4   :  { %v1958_v35 = vmul.f32 1.442695, %v1943_v14 }
 0x8c6   :  { %7117 = vpow2.f32 %v1958_v35 }
 0x8c7   :  { %v7110_v34 = vpop.eup %7109  ;;  %7119 = vpow2.f32 %v1954_v23 }
 0x8c8   :  { %v1966_v22 = vsel %vm1295_vm5, %v7110_v34, 0.0  ;;  %v7112_v50 = vpop.eup %7111  ;;  %7121 = vpow2.f32 %v1956_v48 }
 0x8c9   :  { %1967 = vadd.xlane.f32.xlu1 %v1966_v22  ;;  %v1960_v28 = vsel %vm1295_vm5, %v7112_v50, 0.0  ;;  %7123 = vpow2.f32 %v1952_v54 }
 0x8cb   :  { %v7114_v25 = vpop.eup %7113 }
 0x8cc   :  { %v1969_v9 = vsel %vm1295_vm5, %v7114_v25, 0.0  ;;  %v7116_v40 = vpop.eup %7115 }
 0x8cd   :  { %1961 = vadd.xlane.f32.xlu1 %v1960_v28  ;;  %1970 = vadd.xlane.f32.xlu0 %v1969_v9  ;;  %v1963_v59 = vsel %vm1295_vm5, %v7116_v40, 0.0 }
 0x8d1   :  { %1964 = vadd.xlane.f32.xlu0 %v1963_v59 }
 0x8d3   :  { %v8294_v19 = vpop.eup %7117 }
 0x8d4   :  { %v1981_v36 = vsel %vm1295_vm5, %v8294_v19, 0.0  ;;  %v8298_v8 = vpop.eup %7119 }
 0x8d5   :  { %1982 = vadd.xlane.f32.xlu0 %v1981_v36  ;;  %v1975_v31 = vsel %vm1295_vm5, %v8298_v8, 0.0  ;;  %v7122_v58 = vpop.eup %7121 }
 0x8d6   :  { %v7124_v6 = vpop.eup %7123 }
 0x8d7   :  { %v1972_v4 = vsel %vm1295_vm5, %v7124_v6, 0.0 }
 0x8d9   :  { %1976 = vadd.xlane.f32.xlu0 %v1975_v31 }
 0x8de   :  { %2099 = vrot.lane.b32.xlu1 %v8145_v30, %s7464_s20  ;;  %v1978_v30 = vsel %vm1295_vm5, %v7122_v58, 0.0 }
 0x8ef   :  { %2097 = vrot.lane.b32.xlu0 %v8151_v5, %s7464_s20 }
 0x8f3   :  { %2085 = vrot.lane.b32.xlu0 %v8062_v52, %s7463_s19 }
 0x8f7   :  { %2089 = vrot.lane.b32.xlu0 %v8086_v15, %s7463_s19 }
 0x902   :  { %1979 = vadd.xlane.f32.xlu1 %v1978_v30 }
 0x906   :  { %1973 = vadd.xlane.f32.xlu1 %v1972_v4 }
 0x917   :  { %2095 = vrot.lane.b32.xlu1 %v8057_v45, %s7464_s20 }
 0x91b   :  { %2093 = vrot.lane.b32.xlu1 %v8197_v33, %s7464_s20 }
 0x91f   :  { %2087 = vrot.lane.b32.xlu1 %v8060_v51, %s7463_s19 }
 0x923   :  { %2091 = vrot.lane.b32.xlu1 %v8081_v11, %s7463_s19 }
 0x952   :  { %v1968_v52 = vpop.xlane.xlu1 %1967 }
 0x956   :  { %v1962_v15 = vpop.xlane.xlu1 %1961  ;;  %v1971_v5 = vpop.xlane.xlu0 %1970 }
 0x957   :  { %7125 = vrcp.f32 %v1971_v5 }
 0x958   :  { %7127 = vrcp.f32 %v1962_v15 }
 0x959   :  { %7129 = vrcp.f32 %v1968_v52 }
 0x95a   :  { %v2100_v7 = vpop.permute.xlu1 %2099  ;;  %v1965_v43 = vpop.xlane.xlu0 %1964 }
 0x95b   :  { %7131 = vrcp.f32 %v1965_v43  ;;  %6880 = vmatprep.subr.msk.bf16.mxu0 %vm322_vm2, %v2100_v7  ;;  %v2123_v22 = vsel %vm322_vm2, %v2100_v7, 0 }
 0x95e   :  { %v1983_v45 = vpop.xlane.xlu0 %1982 }
 0x962   :  { %v1977_v56 = vpop.xlane.xlu0 %1976 }
 0x964   :  { %v7126_v44 = vpop.eup %7125 }
 0x965   :  { %v7128_v33 = vpop.eup %7127  ;;  %v1991_v51 = vmul.f32 %v7126_v44, %v7114_v25 }
 0x966   :  { %v7130_v12 = vpop.eup %7129  ;;  %v1985_v16 = vmul.f32 %v7128_v33, %v7112_v50  ;;  %v2098_v28 = vpop.permute.xlu0 %2097 }
 0x967   :  { %v1989_v14 = vmul.f32 %v7130_v12, %v7110_v34  ;;  %v2120_v9 = vsel %vm322_vm2, %v2098_v28, 0 }
 0x968   :  { %v7132_v10 = vpop.eup %7131 }
 0x969   :  { %v1987_v11 = vmul.f32 %v7132_v10, %v7116_v40  ;;  %v2001_v35 = vpack.c.bf16 %v1991_v51, %v1989_v14 }
 0x96a   :  { %v2086_v15 = vpop.permute.xlu0 %2085 }
 0x96b   :  { %v2000_v23 = vpack.c.bf16 %v1987_v11, %v1985_v16 }
 0x96d   :  { %6506 = vmatprep.mubr.msk.bf16.mxu0 %vm1295_vm5, %v2000_v23 }
 0x96e   :  { %6507 = vmatmul.mubr.msk.bf16.vlgmr.msra.gmra.mxu0 %vm1295_vm5, %v2001_v35  ;;  %v2090_v7 = vpop.permute.xlu0 %2089 }
 0x96f   :  { %6515 = vmatpush3.bf16.xpose.msra.mxu0 %v2123_v22 }
 0x970   :  { %6881 = vmatprep.subr.msk.bf16.mxu0 %vm322_vm2, %v2098_v28 }
 0x977   :  { %6517 = vmatpush3.bf16.xpose.msra.mxu0 %v2120_v9 }
 0x98b   :  { %v1980_v25 = vpop.xlane.xlu1 %1979 }
 0x98c   :  { %7133 = vrcp.f32 %v1980_v25 }
 0x98d   :  { %7135 = vrcp.f32 %v1977_v56 }
 0x98e   :  { %7137 = vrcp.f32 %v1983_v45 }
 0x98f   :  { %v1974_v34 = vpop.xlane.xlu1 %1973 }
 0x990   :  { %7139 = vrcp.f32 %v1974_v34 }
 0x993   :  { %v2096_v50 = vpop.permute.xlu1 %2095 }
 0x994   :  { %6882 = vmatprep.subr.msk.bf16.mxu0 %vm322_vm2, %v2096_v50  ;;  %v2117_v40 = vsel %vm322_vm2, %v2096_v50, 0 }
 0x995   :  { %6519 = vmatpush3.bf16.xpose.msra.mxu0 %v2117_v40 }
 0x997   :  { %v2094_v59 = vpop.permute.xlu1 %2093 }
 0x998   :  { %6883 = vmatprep.subr.msk.bf16.mxu0 %vm322_vm2, %v2094_v59  ;;  %v2114_v17 = vsel %vm322_vm2, %v2094_v59, 0 }
 0x999   :  { %v7134_v36 = vpop.eup %7133 }
 0x99a   :  { %v7136_v31 = vpop.eup %7135  ;;  %v1997_v39 = vmul.f32 %v7134_v36, %v7122_v58 }
 0x99b   :  { %v7138_v38 = vpop.eup %7137  ;;  %v1995_v54 = vmul.f32 %v7136_v31, %v8298_v8  ;;  %v2088_v5 = vpop.permute.xlu1 %2087 }
 0x99c   :  { %v1999_v30 = vmul.f32 %v7138_v38, %v8294_v19 }
 0x99d   :  { %v7140_v41 = vpop.eup %7139  ;;  %6521 = vmatpush3.bf16.xpose.msra.mxu0 %v2114_v17 }
 0x99e   :  { %v1993_v48 = vmul.f32 %v7140_v41, %v7124_v6  ;;  %6566 = vmatprep.subr.bf16.mxu0 %v10135_v1  ;;  %v2003_v52 = vpack.c.bf16 %v1999_v30, %v1997_v39 }
 0x99f   :  { %v2092_v8 = vpop.permute.xlu1 %2091 }
 0x9a0   :  { %v2002_v4 = vpack.c.bf16 %v1995_v54, %v1993_v48 }
 0x9a2   :  { %6510 = vmatprep.mubr.msk.bf16.mxu0 %vm1295_vm5, %v2002_v4 }
 0x9a3   :  { %6511 = vmatmul.mubr.msk.bf16.gmra.mxu0 %vm1295_vm5, %v2003_v52 }
 0x9a4   :  { %6522 = vmatprep.mubr.msk.bf16.mxu0 %vm322_vm2, %v2086_v15 }
 0x9ab   :  { %6523 = vmatmul.mubr.msk.bf16.vlgmr.msra.gmra.mxu0 %vm322_vm2, %v2088_v5 }
 0x9ac   :  { %6526 = vmatprep.mubr.msk.bf16.mxu0 %vm322_vm2, %v2090_v7 }
 0x9b3   :  { %6527 = vmatmul.mubr.msk.bf16.gmra.mxu0 %vm322_vm2, %v2092_v8 }
 0x9b4   :  { %6568 = vmatprep.mubr.msk.bf16.mxu0 %vm7461_vm1, %v10135_v1 }
 0xa2e   :  { %v8341_v19 = vpop.f32.mrf.mxu0 }
 0xa30   :  { %v8343_v58 = vpop.f32.mrf.mxu0 }
 0xa32   :  { %v8345_v6 = vpop.f32.mrf.mxu0 }
 0xa34   :  { %v8347_v43 = vpop.f32.mrf.mxu0 }
 0xa63   :  { %v8349_v45 = vpop.f32.mrf.mxu0 }
 0xa65   :  { %v8351_v44 = vpop.f32.mrf.mxu0 }
 0xa67   :  { %v8353_v33 = vpop.f32.mrf.mxu0 }
 0xa69   :  { %v8355_v12 = vpop.f32.mrf.mxu0 }
 0xa6b   :  { %v6524_v10 = vpop.f32.mrf.mxu0 }
 0xa6c   :  { %v2196_v14 = vsel %vm1295_vm5, %v6524_v10, -inf }
 0xa6d   :  { %v2159_v51 = vpop.f32.mrf.mxu0 }
 0xa6e   :  { %v2190_v56 = vsel %vm1295_vm5, %v2159_v51, -inf }
 0xa6f   :  { %2191 = vmax.xlane.f32.xlu0 %v2190_v56  ;;  %v6525_v16 = vpop.f32.mrf.mxu0 }
 0xa70   :  { %v2199_v28 = vsel %vm1295_vm5, %v6525_v16, -inf }
 0xa71   :  { %v2162_v11 = vpop.f32.mrf.mxu0 }
 0xa72   :  { %v2193_v23 = vsel %vm1295_vm5, %v2162_v11, -inf }
 0xa73   :  { %2197 = vmax.xlane.f32.xlu0 %v2196_v14  ;;  %2194 = vmax.xlane.f32.xlu1 %v2193_v23  ;;  %v6528_v35 = vpop.f32.mrf.mxu0 }
 0xa74   :  { %v2208_v50 = vsel %vm1295_vm5, %v6528_v35, -inf }
 0xa75   :  { %v2175_v22 = vpop.f32.mrf.mxu0 }
 0xa76   :  { %v2202_v9 = vsel %vm1295_vm5, %v2175_v22, -inf }
 0xa77   :  { %2200 = vmax.xlane.f32.xlu0 %v2199_v28  ;;  %2203 = vmax.xlane.f32.xlu1 %v2202_v9  ;;  %v6529_v25 = vpop.f32.mrf.mxu0 }
 0xa78   :  { %v2211_v59 = vsel %vm1295_vm5, %v6529_v25, -inf }
 0xa79   :  { %v2178_v34 = vpop.f32.mrf.mxu0 }
 0xa7a   :  { %v2205_v40 = vsel %vm1295_vm5, %v2178_v34, -inf }
 0xa7b   :  { %2209 = vmax.xlane.f32.xlu1 %v2208_v50  ;;  %2206 = vmax.xlane.f32.xlu0 %v2205_v40 }
 0xa7f   :  { %2212 = vmax.xlane.f32.xlu0 %v2211_v59 }
 0xa8c   :  { %2292 = vrot.lane.b32.xlu1 %v7976_v57, %s7463_s19 }
 0xaf8   :  { %v2192_v36 = vpop.xlane.xlu0 %2191 }
 0xaf9   :  { %v2214_v31 = vsub.f32 %v2159_v51, %v2192_v36 }
 0xafb   :  { %v2222_v48 = vmul.f32 1.442695, %v2214_v31 }
 0xafc   :  { %v2195_v38 = vpop.xlane.xlu1 %2194  ;;  %v2198_v17 = vpop.xlane.xlu0 %2197 }
 0xafd   :  { %v2216_v41 = vsub.f32 %v6524_v10, %v2198_v17  ;;  %v2215_v54 = vsub.f32 %v2162_v11, %v2195_v38 }
 0xaff   :  { %v2226_v39 = vmul.f32 1.442695, %v2216_v41  ;;  %v2224_v5 = vmul.f32 1.442695, %v2215_v54 }
 0xb00   :  { %v2204_v30 = vpop.xlane.xlu1 %2203  ;;  %v2201_v4 = vpop.xlane.xlu0 %2200 }
 0xb01   :  { %v2217_v52 = vsub.f32 %v6525_v16, %v2201_v4  ;;  %7141 = vpow2.f32 %v2226_v39  ;;  %v2218_v7 = vsub.f32 %v2175_v22, %v2204_v30  ;;  %v6912_v4 = vpack.i.bf16 %v8270_v37, %v8264_v62 }
 0xb02   :  { %7143 = vpow2.f32 %v2222_v48 }
 0xb03   :  { %v2228_v15 = vmul.f32 1.442695, %v2217_v52  ;;  %v2230_v51 = vmul.f32 1.442695, %v2218_v7 }
 0xb04   :  { %v2210_v8 = vpop.xlane.xlu1 %2209  ;;  %v2207_v56 = vpop.xlane.xlu0 %2206 }
 0xb05   :  { %v2220_v14 = vsub.f32 %v6528_v35, %v2210_v8  ;;  %7145 = vpow2.f32 %v2228_v15  ;;  %v2219_v23 = vsub.f32 %v2178_v34, %v2207_v56 }
 0xb06   :  { %7147 = vpow2.f32 %v2224_v5 }
 0xb07   :  { %v2234_v57 = vmul.f32 1.442695, %v2220_v14  ;;  %v2232_v9 = vmul.f32 1.442695, %v2219_v23 }
 0xb08   :  { %v2293_v10 = vpop.permute.xlu1 %2292  ;;  %v2213_v28 = vpop.xlane.xlu0 %2212 }
 0xb09   :  { %7149 = vpow2.f32 %v2234_v57  ;;  %v2221_v11 = vsub.f32 %v6529_v25, %v2213_v28  ;;  %6530 = vmatprep.subr.bf16.mxu1 %v2293_v10  ;;  %v7011_v57 = vld [vmem:[%s10119_s6 + $0x38] sm:$0xff]  }
 0xb0a   :  { %6531 = vmatpush3.bf16.msra.mxu1 %v2293_v10  ;;  %7151 = vpow2.f32 %v2230_v51 }
 0xb0b   :  { %v2236_v16 = vmul.f32 1.442695, %v2221_v11 }
 0xb0d   :  { %7153 = vpow2.f32 %v2236_v16  ;;  %v7012_v16 = vld [vmem:[%s10119_s6 + $0x30] sm:$0xff]  }
 0xb0e   :  { %v8367_v50 = vpop.eup %7141  ;;  %7155 = vpow2.f32 %v2232_v9 }
 0xb0f   :  { %v2244_v35 = vsel %vm1295_vm5, %v8367_v50, 0.0  ;;  %v7144_v22 = vpop.eup %7143 }
 0xb10   :  { %2245 = vadd.xlane.f32.xlu1 %v2244_v35  ;;  %v2238_v34 = vsel %vm1295_vm5, %v7144_v22, 0.0 }
 0xb12   :  { %v7146_v40 = vpop.eup %7145 }
 0xb13   :  { %v2247_v59 = vsel %vm1295_vm5, %v7146_v40, 0.0  ;;  %v7148_v25 = vpop.eup %7147 }
 0xb14   :  { %2239 = vadd.xlane.f32.xlu1 %v2238_v34  ;;  %2248 = vadd.xlane.f32.xlu0 %v2247_v59  ;;  %v2241_v38 = vsel %vm1295_vm5, %v7148_v25, 0.0 }
 0xb16   :  { %v8373_v36 = vpop.eup %7149 }
 0xb17   :  { %v2256_v31 = vsel %vm1295_vm5, %v8373_v36, 0.0  ;;  %v8378_v17 = vpop.eup %7151 }
 0xb18   :  { %2257 = vadd.xlane.f32.xlu1 %v2256_v31  ;;  %2242 = vadd.xlane.f32.xlu0 %v2241_v38  ;;  %v2250_v48 = vsel %vm1295_vm5, %v8378_v17, 0.0 }
 0xb1a   :  { %v8380_v41 = vpop.eup %7153 }
 0xb1b   :  { %v2259_v39 = vsel %vm1295_vm5, %v8380_v41, 0.0  ;;  %v7156_v54 = vpop.eup %7155 }
 0xb1c   :  { %2251 = vadd.xlane.f32.xlu1 %v2250_v48  ;;  %2260 = vadd.xlane.f32.xlu0 %v2259_v39  ;;  %v2253_v30 = vsel %vm1295_vm5, %v7156_v54, 0.0 }
 0xb20   :  { %2254 = vadd.xlane.f32.xlu0 %v2253_v30 }
 0xb2d   :  { %2288 = vrot.lane.b32.xlu1 %v7983_v63, %s7463_s19  ;;  %v6922_v63 = vpack.i.bf16 %v8280_v13, %v8274_v24 }
 0xb31   :  { %2286 = vrot.lane.b32.xlu1 %v7987_v2, %s7463_s19 }
 0xb35   :  { %6918 = vrot.lane.b32.xlu1 %v6917_v3, %s7466_s28 }
 0xb36   :  { %2290 = vrot.lane.b32.xlu0 %v7978_v61, %s7463_s19 }
 0xb39   :  { %6928 = vrot.lane.b32.xlu1 %v6927_v32, %s7466_s28 }
 0xb3a   :  { %6913 = vrot.lane.b32.xlu0 %v6912_v4, %s7466_s28 }
 0xb3e   :  { %6923 = vrot.lane.b32.xlu0 %v6922_v63, %s7466_s28 }
 0xb99   :  { %v2246_v2 = vpop.xlane.xlu1 %2245 }
 0xb9d   :  { %v2240_v46 = vpop.xlane.xlu1 %2239  ;;  %v2249_v53 = vpop.xlane.xlu0 %2248 }
 0xb9e   :  { %7157 = vrcp.f32 %v2240_v46 }
 0xba1   :  { %v2258_v61 = vpop.xlane.xlu1 %2257  ;;  %v2243_v3 = vpop.xlane.xlu0 %2242 }
 0xba2   :  { %7159 = vrcp.f32 %v2243_v3 }
 0xba3   :  { %7161 = vrcp.f32 %v2249_v53 }
 0xba4   :  { %7163 = vrcp.f32 %v2246_v2 }
 0xba5   :  { %v2261_v62 = vpop.xlane.xlu0 %2260  ;;  %v2252_v37 = vpop.xlane.xlu1 %2251 }
 0xba6   :  { %7165 = vrcp.f32 %v2252_v37 }
 0xba9   :  { %v2255_v18 = vpop.xlane.xlu0 %2254  ;;  %v2289_v47 = vpop.permute.xlu1 %2288 }
 0xbaa   :  { %7167 = vrcp.f32 %v2255_v18 }
 0xbab   :  { %7169 = vrcp.f32 %v2261_v62  ;;  %v7158_v24 = vpop.eup %7157 }
 0xbac   :  { %7171 = vrcp.f32 %v2258_v61  ;;  %v2263_v15 = vmul.f32 %v7158_v24, %v7144_v22 }
 0xbad   :  { %v2291_v32 = vpop.permute.xlu0 %2290  ;;  %v2287_v8 = vpop.permute.xlu1 %2286 }
 0xbae   :  { %6532 = vmatprep.subr.bf16.mxu1 %v2291_v32 }
 0xbaf   :  { %6533 = vmatpush3.bf16.msra.mxu1 %v2291_v32  ;;  %v7160_v13 = vpop.eup %7159 }
 0xbb0   :  { %6534 = vmatprep.subr.bf16.mxu1 %v2289_v47  ;;  %v7162_v52 = vpop.eup %7161  ;;  %v2265_v5 = vmul.f32 %v7160_v13, %v7148_v25 }
 0xbb1   :  { %v7164_v7 = vpop.eup %7163  ;;  %v2269_v14 = vmul.f32 %v7162_v52, %v7146_v40  ;;  %v6914_v28 = vpop.permute.xlu0 %6913 }
 0xbb2   :  { %v2278_v56 = vpack.c.bf16 %v2265_v5, %v2263_v15  ;;  %v2267_v23 = vmul.f32 %v7164_v7, %v8367_v50  ;;  %v6916_v40 = vunpack.i.h.bf16 %v6914_v28  ;;  %v6915_v34 = vunpack.i.l.bf16 %v6914_v28  ;;  %v6919_v31 = vpop.permute.xlu1 %6918 }
 0xbb3   :  { %6535 = vmatpush3.bf16.msra.mxu1 %v2289_v47  ;;  %v7166_v51 = vpop.eup %7165  ;;  %v6921_v30 = vunpack.i.h.bf16 %v6919_v31  ;;  %v6920_v4 = vunpack.i.l.bf16 %v6919_v31 }
 0xbb4   :  { %6536 = vmatprep.subr.bf16.mxu1 %v2287_v8  ;;  %6538 = vmatprep.mubr.msk.bf16.mxu1 %vm1295_vm5, %v2278_v56  ;;  %v2279_v11 = vpack.c.bf16 %v2269_v14, %v2267_v23  ;;  %v2271_v35 = vmul.f32 %v7166_v51, %v8378_v17  ;;  %v1792_v38 = vsel %vm322_vm2, %v8252_v21, %v6916_v40  ;;  %v7394_v56 = vld [vmem:[%s10118_s5] ss:$0 sm:$0xff] }
 0xbb5   :  { %v1791_v17 = vsel %vm322_vm2, %v8248_v42, %v6915_v34  ;;  %v6924_v48 = vpop.permute.xlu0 %6923  ;;  %v1794_v21 = vsel %vm322_vm2, %v8250_v26, %v6921_v30  ;;  %v1793_v42 = vsel %vm322_vm2, %v8246_v49, %v6920_v4 }
 0xbb6   :  { %v2415_v63 = vpack.c.bf16 %v1792_v38, %v1791_v17  ;;  %v6926_v2 = vunpack.i.h.bf16 %v6924_v48  ;;  %v6929_v46 = vpop.permute.xlu1 %6928  ;;  %v2416_v61 = vpack.c.bf16 %v1794_v21, %v1793_v42 }
 0xbb7   :  { %v7168_v10 = vpop.eup %7167  ;;  %6537 = vmatpush3.bf16.msra.mxu1 %v2287_v8  ;;  %v6931_v3 = vunpack.i.h.bf16 %v6929_v46  ;;  %v6930_v62 = vunpack.i.l.bf16 %v6929_v46 }
 0xbb8   :  { %6546 = vmatprep.subr.bf16.mxu1 %v7011_v57  ;;  %v7170_v9 = vpop.eup %7169  ;;  %v2273_v22 = vmul.f32 %v7168_v10, %v7156_v54 }
 0xbb9   :  { %v7172_v59 = vpop.eup %7171  ;;  %v2277_v50 = vmul.f32 %v7170_v9, %v8380_v41  ;;  %v6925_v41 = vunpack.i.l.bf16 %v6924_v48  ;;  %v1798_v26 = vsel %vm322_vm2, %v8258_v20, %v6931_v3  ;;  %v1797_v49 = vsel %vm322_vm2, %v8254_v60, %v6930_v62  ;;  %v7393_v60 = vld [vmem:[%s10120_s7] ss:$0 sm:$0xff]  ;;  %v7397_v62 = vld [vmem:[%s10141_s26 + $0x10] sm:$0xff] }
 0xbba   :  { %6539 = vmatmul.mubr.msk.bf16.vlgmr.msra.gmra.mxu1 %vm1295_vm5, %v2279_v11  ;;  %v2280_v25 = vpack.c.bf16 %v2273_v22, %v2271_v35  ;;  %v2275_v39 = vmul.f32 %v7172_v59, %v8373_v36  ;;  %v1796_v36 = vsel %vm322_vm2, %v8260_v55, %v6926_v2  ;;  %v2418_v18 = vpack.c.bf16 %v1798_v26, %v1797_v49  ;;  %v7398_v26 = vld [vmem:[%s10141_s26] sm:$0xff] }
 0xbbb   :  { %6547 = vmatpush3.bf16.msra.mxu1 %v7011_v57  ;;  %v1795_v53 = vsel %vm322_vm2, %v8256_v0, %v6925_v41 }
 0xbbc   :  { %6548 = vmatprep.subr.bf16.mxu1 %v7012_v16  ;;  %6542 = vmatprep.mubr.msk.bf16.mxu1 %vm1295_vm5, %v2280_v25  ;;  %v2281_v54 = vpack.c.bf16 %v2277_v50, %v2275_v39  ;;  %v2417_v37 = vpack.c.bf16 %v1796_v36, %v1795_v53 }
 0xbbf   :  { %6549 = vmatpush3.bf16.msra.mxu1 %v7012_v16 }
 0xbc2   :  { %6543 = vmatmul.mubr.msk.bf16.gmra.mxu1 %vm1295_vm5, %v2281_v54 }
 0xbc3   :  { %6550 = vmatprep.mubr.msk.bf16.mxu1 %vm193_vm0, %v2415_v63 }
 0xbca   :  { %6551 = vmatmul.mubr.msk.bf16.vlgmr.msra.gmra.mxu1 %vm193_vm0, %v2416_v61 }
 0xbcb   :  { %6554 = vmatprep.mubr.msk.bf16.mxu1 %vm193_vm0, %v2417_v37 }
 0xbd2   :  { %6555 = vmatmul.mubr.msk.bf16.gmra.mxu1 %vm193_vm0, %v2418_v18 }
 0xc7a   :  { %v6540_v55 = vpop.f32.mrf.mxu1 }
 0xc7c   :  { %v2344_v47 = vpop.f32.mrf.mxu1 }
 0xc7e   :  { %v6541_v0 = vpop.f32.mrf.mxu1 }
 0xc7f   :  { %v6937_v32 = vpack.i.bf16 %v6541_v0, %v6540_v55  ;;  %v7399_v55 = vld [vmem:[%s10141_s26 + $0x20] sm:$0xff] }
 0xc80   :  { %v2347_v24 = vpop.f32.mrf.mxu1 }
 0xc81   :  { %v6932_v13 = vpack.i.bf16 %v2347_v24, %v2344_v47  ;;  %6938 = vrot.lane.b32.xlu1 %v6937_v32, %s7466_s28 }
 0xc82   :  { %v6544_v52 = vpop.f32.mrf.mxu1 }
 0xc83   :  { %6933 = vrot.lane.b32.xlu0 %v6932_v13, %s7466_s28  ;;  %v7400_v13 = vld [vmem:[%s10141_s26 + $0x8] sm:$0xff] }
 0xc84   :  { %v2360_v15 = vpop.f32.mrf.mxu1 }
 0xc86   :  { %v6545_v5 = vpop.f32.mrf.mxu1 }
 0xc87   :  { %v6947_v20 = vpack.i.bf16 %v6545_v5, %v6544_v52 }
 0xc88   :  { %v2363_v7 = vpop.f32.mrf.mxu1 }
 0xc89   :  { %v6942_v8 = vpack.i.bf16 %v2363_v7, %v2360_v15  ;;  %6948 = vrot.lane.b32.xlu1 %v6947_v20, %s7466_s28  ;;  %v7401_v20 = vld [vmem:[%s10141_s26 + $0x30] sm:$0xff] }
 0xc8a   :  { %v6552_v14 = vpop.f32.mrf.mxu1 }
 0xc8b   :  { %6943 = vrot.lane.b32.xlu0 %v6942_v8, %s7466_s28 }
 0xc8c   :  { %v2496_v51 = vpop.f32.mrf.mxu1 }
 0xc8d   :  { %2435 = vrot.lane.b32.xlu1 %v7393_v60, %s7467_s23 }
 0xc8e   :  { %v6553_v22 = vpop.f32.mrf.mxu1 }
 0xc8f   :  { %786 = vrot.lane.b32.xlu0 %v7394_v56, %s7467_s23  ;;  %v7402_v56 = vld [vmem:[%s10141_s26 + $0x18] sm:$0xff]  ;;  %s7469_s23 = smov 8  }
 0xc90   :  { %v2499_v31 = vpop.f32.mrf.mxu1 }
 0xc92   :  { %v6556_v54 = vpop.f32.mrf.mxu1 }
 0xc94   :  { %v2512_v46 = vpop.f32.mrf.mxu1 }
 0xc96   :  { %v6557_v18 = vpop.f32.mrf.mxu1 }
 0xc98   :  { %v2515_v5 = vpop.f32.mrf.mxu1 }
 0xcf3   :  { %v6939_v57 = vpop.permute.xlu1 %6938 }
 0xcf4   :  { %v6941_v23 = vunpack.i.h.bf16 %v6939_v57  ;;  %v6940_v10 = vunpack.i.l.bf16 %v6939_v57 }
 0xcf5   :  { %v6934_v28 = vpop.permute.xlu0 %6933 }
 0xcf6   :  { %v6936_v11 = vunpack.i.h.bf16 %v6934_v28  ;;  %v6935_v16 = vunpack.i.l.bf16 %v6934_v28  ;;  %v2410_v9 = vsel %vm322_vm2, %v8345_v6, %v6941_v23  ;;  %v2409_v35 = vsel %vm322_vm2, %v8341_v19, %v6940_v10  ;;  %v7403_v10 = vld [vmem:[%s10141_s26 + $0x28] sm:$0xff] }
 0xcf7   :  { %v2420_v25 = vpack.c.bf16 %v2410_v9, %v2409_v35  ;;  %v7404_v9 = vld [vmem:[%s10141_s26 + $0x38] sm:$0xff] }
 0xcf8   :  { %v2408_v40 = vsel %vm322_vm2, %v8347_v43, %v6936_v11  ;;  %v2407_v34 = vsel %vm322_vm2, %v8343_v58, %v6935_v16 }
 0xcf9   :  { %v2419_v59 = vpack.c.bf16 %v2408_v40, %v2407_v34 }
 0xcfb   :  { %v6949_v50 = vpop.permute.xlu1 %6948  ;;  %6558 = vmatprep.mubr.msk.bf16.mxu1 %vm193_vm0, %v2419_v59 }
 0xcfc   :  { %v6951_v38 = vunpack.i.h.bf16 %v6949_v50  ;;  %v6950_v17 = vunpack.i.l.bf16 %v6949_v50  ;;  %6559 = vmatmul.mubr.msk.bf16.gmra.mxu1 %vm193_vm0, %v2420_v25 }
 0xcfd   :  { %v6944_v6 = vpop.permute.xlu0 %6943 }
 0xcfe   :  { %v2414_v19 = vsel %vm322_vm2, %v8353_v33, %v6951_v38  ;;  %v2413_v43 = vsel %vm322_vm2, %v8349_v45, %v6950_v17  ;;  %v6946_v39 = vunpack.i.h.bf16 %v6944_v6  ;;  %v6945_v48 = vunpack.i.l.bf16 %v6944_v6 }
 0xcff   :  { %v8465_v58 = vpop.permute.xlu1 %2435  ;;  %v2422_v41 = vpack.c.bf16 %v2414_v19, %v2413_v43 }
 0xd00   :  { %v2412_v30 = vsel %vm322_vm2, %v8355_v12, %v6946_v39  ;;  %v2411_v4 = vsel %vm322_vm2, %v8351_v44, %v6945_v48  ;;  %v2505_v45 = vadd.f32 %v6552_v14, %v8465_v58  ;;  %v2497_v42 = vadd.f32 %v2496_v51, %v8465_v58  ;;  %v7395_v44 = vld [vmem:[%s10140_s1 + $0x8] sm:$0xff] }
 0xd01   :  { %v787_v63 = vpop.permute.xlu0 %786  ;;  %v2421_v2 = vpack.c.bf16 %v2412_v30, %v2411_v4  ;;  %v2500_v53 = vadd.f32 %v2499_v31, %v8465_v58  ;;  %v2521_v0 = vadd.f32 %v6556_v54, %v8465_v58  ;;  %v2508_v15 = vadd.f32 %v6553_v22, %v8465_v58 }
 0xd02   :  { %v827_v21 = vadd.f32 %v7959_v27, %v787_v63  ;;  %v830_v33 = vadd.f32 %v7961_v29, %v787_v63  ;;  %v7396_v27 = vld [vmem:[%s10140_s1] sm:$0xff]  ;;  %v2513_v29 = vadd.f32 %v2512_v46, %v8465_v58  ;;  %v2561_v37 = vadd.f32 %v7397_v62, %v2505_v45 }
 0xd03   :  { %6562 = vmatprep.mubr.msk.bf16.mxu1 %vm193_vm0, %v2421_v2  ;;  %v2559_v49 = vadd.f32 %v7398_v26, %v2497_v42  ;;  %v2560_v52 = vadd.f32 %v7400_v13, %v2500_v53  ;;  %v2565_v7 = vadd.f32 %v7401_v20, %v2521_v0  ;;  %v2562_v14 = vadd.f32 %v7402_v56, %v2508_v15  ;;  %v7013_v56 = vld [vmem:[%s10121_s8] sm:$0xff]  }
 0xd04   :  { %6563 = vmatmul.mubr.msk.bf16.gmra.mxu1 %vm193_vm0, %v2422_v41  ;;  %v834_v12 = vadd.f32 %v7395_v44, %v830_v33  ;;  %v833_v36 = vadd.f32 %v7396_v27, %v827_v21  ;;  %v2563_v47 = vadd.f32 %v7399_v55, %v2513_v29  ;;  %v2620_v32 = vsel %vm193_vm0, %v2561_v37, 0.0 }
 0xd05   :  { %v2614_v24 = vsel %vm193_vm0, %v2559_v49, 0.0  ;;  %v2617_v60 = vsel %vm193_vm0, %v2560_v52, 0.0  ;;  %v2516_v57 = vadd.f32 %v2515_v5, %v8465_v58  ;;  %v2632_v51 = vsel %vm193_vm0, %v2565_v7, 0.0 }
 0xd06   :  { %v2578_v61 = vsel %vm193_vm0, %v834_v12, 0.0  ;;  %v2575_v3 = vsel %vm193_vm0, %v833_v36, 0.0  ;;  %v2626_v8 = vsel %vm193_vm0, %v2563_v47, 0.0  ;;  %v2623_v23 = vsel %vm193_vm0, %v2562_v14, 0.0 }
 0xd07   :  { %2579 = vadd.xlane.f32.xlu1 %v2578_v61  ;;  %2576 = vadd.xlane.f32.xlu0 %v2575_v3  ;;  %v2564_v28 = vadd.f32 %v7403_v10, %v2516_v57  ;;  %v2524_v11 = vadd.f32 %v6557_v18, %v8465_v58  ;;  %v2896_v57 = vsel %vm193_vm0, %v7013_v56, 0 }
 0xd08   :  { %6567 = vmatpush3.bf16.xpose.msra.mxu0 %v2896_v57 }
 0xd09   :  { %v2629_v16 = vsel %vm193_vm0, %v2564_v28, 0.0  ;;  %v2566_v35 = vadd.f32 %v7404_v9, %v2524_v11  ;;  %v7405_v11 = vld [vmem:[%s10141_s26 + $0x40] sm:$0xff]  ;;  %v7406_v9 = vld [vmem:[%s10141_s26 + $0x50] sm:$0xff] }
 0xd0b   :  { %2621 = vadd.xlane.f32.xlu1 %v2620_v32  ;;  %2615 = vadd.xlane.f32.xlu0 %v2614_v24  ;;  %v2635_v22 = vsel %vm193_vm0, %v2566_v35, 0.0 }
 0xd0f   :  { %2627 = vadd.xlane.f32.xlu1 %v2626_v8  ;;  %2618 = vadd.xlane.f32.xlu0 %v2617_v60 }
 0xd13   :  { %2633 = vadd.xlane.f32.xlu1 %v2632_v51  ;;  %2624 = vadd.xlane.f32.xlu0 %v2623_v23 }
 0xd17   :  { %2630 = vadd.xlane.f32.xlu0 %v2629_v16 }
 0xd1b   :  { %2636 = vadd.xlane.f32.xlu0 %v2635_v22 }
 0xd90   :  { %v2580_v40 = vpop.xlane.xlu1 %2579  ;;  %v2577_v34 = vpop.xlane.xlu0 %2576 }
 0xd91   :  { %v2583_v59 = vmul.f32 0.03125, %v2580_v40  ;;  %v2582_v25 = vmul.f32 0.03125, %v2577_v34 }
 0xd93   :  { %v8523_v50 = vsub.f32 %v834_v12, %v2583_v59  ;;  %v8525_v31 = vsub.f32 %v833_v36, %v2582_v25 }
 0xd94   :  { %v2622_v38 = vpop.xlane.xlu1 %2621  ;;  %v2616_v17 = vpop.xlane.xlu0 %2615 }
 0xd95   :  { %v2664_v6 = vmul.f32 0.03125, %v2622_v38  ;;  %v2662_v19 = vmul.f32 0.03125, %v2616_v17  ;;  %v2586_v43 = vmul.f32 %v8525_v31, %v8525_v31  ;;  %v2587_v39 = vmul.f32 %v8523_v50, %v8523_v50  ;;  %v7407_v38 = vld [vmem:[%s10141_s26 + $0x48] sm:$0xff] }
 0xd97   :  { %v8531_v48 = vsub.f32 %v2561_v37, %v2664_v6  ;;  %v8533_v54 = vsub.f32 %v2559_v49, %v2662_v19  ;;  %v2588_v30 = vsel %vm193_vm0, %v2586_v43, 0.0  ;;  %v2591_v4 = vsel %vm193_vm0, %v2587_v39, 0.0  ;;  %v7014_v6 = vld [vmem:[%s10121_s8 + $0x10] sm:$0xff]   ;;  %v8604_v19 = vld [vmem:[%s10121_s8 + $0x8] sm:$0xff]   ;;  %v7408_v43 = vld [vmem:[%s10141_s26 + $0x58] sm:$0xff] }
 0xd98   :  { %2589 = vadd.xlane.f32.xlu1 %v2588_v30  ;;  %v2628_v63 = vpop.xlane.xlu1 %2627  ;;  %2592 = vadd.xlane.f32.xlu0 %v2591_v4  ;;  %v2619_v2 = vpop.xlane.xlu0 %2618 }
 0xd99   :  { %v2696_v41 = vmul.f32 %v8531_v48, %v8531_v48  ;;  %v2666_v21 = vmul.f32 0.03125, %v2628_v63  ;;  %v2663_v33 = vmul.f32 0.03125, %v2619_v2  ;;  %v2694_v42 = vmul.f32 %v8533_v54, %v8533_v54  ;;  %6885 = vmatprep.subr.msk.bf16.mxu1 %vm193_vm0, %v7014_v6  ;;  %6884 = vmatprep.subr.msk.bf16.mxu0 %vm193_vm0, %v8604_v19 }
 0xd9b   :  { %v2716_v45 = vsel %vm193_vm0, %v2696_v41, 0.0  ;;  %v8542_v36 = vsub.f32 %v2563_v47, %v2666_v21  ;;  %v8544_v29 = vsub.f32 %v2560_v52, %v2663_v33  ;;  %v2710_v3 = vsel %vm193_vm0, %v2694_v42, 0.0 }
 0xd9c   :  { %2717 = vadd.xlane.f32.xlu1 %v2716_v45  ;;  %v2634_v46 = vpop.xlane.xlu1 %2633  ;;  %v2625_v44 = vpop.xlane.xlu0 %2624  ;;  %v3120_v21 = vsel %vm193_vm0, %v7014_v6, 0  ;;  %v7409_v45 = vld [vmem:[%s10141_s26 + $0x60] sm:$0xff] }
 0xd9d   :  { %v2668_v12 = vmul.f32 0.03125, %v2634_v46  ;;  %v2665_v27 = vmul.f32 0.03125, %v2625_v44  ;;  %v2698_v49 = vmul.f32 %v8542_v36, %v8542_v36  ;;  %v2695_v0 = vmul.f32 %v8544_v29, %v8544_v29  ;;  %6591 = vmatpush3.bf16.xpose.msra.mxu1 %v3120_v21 }
 0xd9e   :  { %6632 = vmatprep.subr.bf16.mxu1 %v10135_v1 }
 0xd9f   :  { %v8546_v53 = vsub.f32 %v2565_v7, %v2668_v12  ;;  %v8548_v61 = vsub.f32 %v2562_v14, %v2665_v27  ;;  %v2722_v15 = vsel %vm193_vm0, %v2698_v49, 0.0  ;;  %v2713_v5 = vsel %vm193_vm0, %v2695_v0, 0.0  ;;  %v7410_v12 = vld [vmem:[%s10141_s26 + $0x70] sm:$0xff] }
 0xda0   :  { %2711 = vadd.xlane.f32.xlu1 %v2710_v3  ;;  %v2631_v62 = vpop.xlane.xlu0 %2630 }
 0xda1   :  { %v2700_v37 = vmul.f32 %v8546_v53, %v8546_v53  ;;  %v2697_v26 = vmul.f32 %v8548_v61, %v8548_v61  ;;  %v2667_v18 = vmul.f32 0.03125, %v2631_v62 }
 0xda3   :  { %v2728_v55 = vsel %vm193_vm0, %v2700_v37, 0.0  ;;  %v2719_v47 = vsel %vm193_vm0, %v2697_v26, 0.0  ;;  %v8561_v13 = vsub.f32 %v2564_v28, %v2667_v18  ;;  %v7411_v26 = vld [vmem:[%s10141_s26 + $0x68] sm:$0xff]  ;;  %v7412_v18 = vld [vmem:[%s10141_s26 + $0x78] sm:$0xff] }
 0xda4   :  { %2729 = vadd.xlane.f32.xlu1 %v2728_v55  ;;  %2720 = vadd.xlane.f32.xlu0 %v2719_v47  ;;  %v2637_v32 = vpop.xlane.xlu0 %2636 }
 0xda5   :  { %v2669_v24 = vmul.f32 0.03125, %v2637_v32  ;;  %v2699_v8 = vmul.f32 %v8561_v13, %v8561_v13 }
 0xda7   :  { %v8563_v52 = vsub.f32 %v2566_v35, %v2669_v24  ;;  %v2725_v60 = vsel %vm193_vm0, %v2699_v8, 0.0 }
 0xda8   :  { %2723 = vadd.xlane.f32.xlu1 %v2722_v15  ;;  %2714 = vadd.xlane.f32.xlu0 %v2713_v5 }
 0xda9   :  { %v2701_v20 = vmul.f32 %v8563_v52, %v8563_v52 }
 0xdab   :  { %v2731_v7 = vsel %vm193_vm0, %v2701_v20, 0.0 }
 0xdac   :  { %2732 = vadd.xlane.f32.xlu0 %v2731_v7 }
 0xdb0   :  { %2726 = vadd.xlane.f32.xlu0 %v2725_v60  ;;  %v2602_v60 = vlaneseq }
 0xdb2   :  { %v8654_v57 = vshrl.u32 %v2602_v60, 7  ;;  %v2980_v60 = vsel %vm193_vm0, %v8604_v19, 0 }
 0xdbc   :  { %v6560_v14 = vpop.f32.mrf.mxu1 }
 0xdbd   :  { %v2537_v51 = vadd.f32 %v6560_v14, %v8465_v58 }
 0xdbe   :  { %v2528_v23 = vpop.f32.mrf.mxu1 }
 0xdbf   :  { %v2529_v10 = vadd.f32 %v2528_v23, %v8465_v58  ;;  %v8587_v35 = vadd.f32 %v7406_v9, %v2537_v51  ;;  %v2604_v9 = vsub.s32 0, %v8654_v57 }
 0xdc0   :  { %v6561_v28 = vpop.f32.mrf.mxu1 }
 0xdc1   :  { %v8582_v16 = vadd.f32 %v7405_v11, %v2529_v10  ;;  %v2540_v22 = vadd.f32 %v6561_v28, %v8465_v58  ;;  %v2644_v4 = vsel %vm193_vm0, %v8587_v35, 0.0 }
 0xdc2   :  { %v2531_v40 = vpop.f32.mrf.mxu1 }
 0xdc3   :  { %v2532_v34 = vadd.f32 %v2531_v40, %v8465_v58  ;;  %v2638_v59 = vsel %vm193_vm0, %v8582_v16, 0.0  ;;  %v8609_v39 = vadd.f32 %v7408_v43, %v2540_v22 }
 0xdc4   :  { %v6564_v25 = vpop.f32.mrf.mxu1  ;;  %2639 = vadd.xlane.f32.xlu1 %v2638_v59 }
 0xdc5   :  { %v8596_v17 = vadd.f32 %v7407_v38, %v2532_v34  ;;  %v2553_v63 = vadd.f32 %v6564_v25, %v8465_v58  ;;  %v2647_v44 = vsel %vm193_vm0, %v8609_v39, 0.0  ;;  %v162_v34 = vld [vmem:[%s10127_s14] sm:$0x1f] }
 0xdc6   :  { %v2544_v30 = vpop.f32.mrf.mxu1  ;;  %v163_v25 = vld [vmem:[%s10128_s15] sm:$0x1f] }
 0xdc7   :  { %v2545_v2 = vadd.f32 %v2544_v30, %v8465_v58  ;;  %v2641_v41 = vsel %vm193_vm0, %v8596_v17, 0.0  ;;  %v8632_v27 = vadd.f32 %v7410_v12, %v2553_v63  ;;  %v2605_v30 = vrot.slane %v162_v34, %v2604_v9 }
 0xdc8   :  { %v6565_v33 = vpop.f32.mrf.mxu1  ;;  %2645 = vadd.xlane.f32.xlu1 %v2644_v4  ;;  %2642 = vadd.xlane.f32.xlu0 %v2641_v41  ;;  %v2611_v21 = vrot.slane %v163_v25, %v2604_v9 }
 0xdc9   :  { %v8624_v42 = vadd.f32 %v7409_v45, %v2545_v2  ;;  %v2556_v3 = vadd.f32 %v6565_v33, %v8465_v58 }
 0xdca   :  { %v2547_v46 = vpop.f32.mrf.mxu1 }
 0xdcb   :  { %v2548_v62 = vadd.f32 %v2547_v46, %v8465_v58  ;;  %v2650_v37 = vsel %vm193_vm0, %v8624_v42, 0.0  ;;  %v8646_v55 = vadd.f32 %v7412_v18, %v2556_v3  ;;  %v2656_v58 = vsel %vm193_vm0, %v8632_v27, 0.0 }
 0xdcc   :  { %2651 = vadd.xlane.f32.xlu1 %v2650_v37  ;;  %2648 = vadd.xlane.f32.xlu0 %v2647_v44 }
 0xdcd   :  { %v8641_v49 = vadd.f32 %v7411_v26, %v2548_v62  ;;  %v2659_v0 = vsel %vm193_vm0, %v8646_v55, 0.0 }
 0xdcf   :  { %v2653_v47 = vsel %vm193_vm0, %v8641_v49, 0.0 }
 0xdd0   :  { %2657 = vadd.xlane.f32.xlu1 %v2656_v58  ;;  %2654 = vadd.xlane.f32.xlu0 %v2653_v47 }
 0xdd4   :  { %2660 = vadd.xlane.f32.xlu0 %v2659_v0 }
 0xe21   :  { %v2590_v32 = vpop.xlane.xlu1 %2589  ;;  %v2593_v24 = vpop.xlane.xlu0 %2592 }
 0xe22   :  { %v2594_v15 = vmul.f32 0.03125, %v2590_v32  ;;  %v2595_v5 = vmul.f32 0.03125, %v2593_v24  ;;  %v7414_v24 = vld [vmem:[%s10115_s2 + $0x8] sm:$0xff] }
 0xe24   :  { %v2596_v20 = vadd.f32 1e-05, %v2594_v15  ;;  %v2597_v7 = vadd.f32 1e-05, %v2595_v5  ;;  %v2824_v5 = vsub.s32 1, %v8654_v57 }
 0xe25   :  { %v2718_v8 = vpop.xlane.xlu1 %2717 }
 0xe26   :  { %7173 = vrsqrt.f32 %v2596_v20  ;;  %v2760_v56 = vmul.f32 0.03125, %v2718_v8 }
 0xe27   :  { %7175 = vrsqrt.f32 %v2597_v7 }
 0xe28   :  { %v2776_v23 = vadd.f32 1e-05, %v2760_v56 }
 0xe29   :  { %v2712_v14 = vpop.xlane.xlu1 %2711 }
 0xe2a   :  { %v2758_v51 = vmul.f32 0.03125, %v2712_v14 }
 0xe2c   :  { %v2774_v10 = vadd.f32 1e-05, %v2758_v51  ;;  %v8682_v51 = vrot.slane %v162_v34, %v2824_v5 }
 0xe2d   :  { %v2730_v28 = vpop.xlane.xlu1 %2729  ;;  %v2721_v11 = vpop.xlane.xlu0 %2720 }
 0xe2e   :  { %7177 = vrsqrt.f32 %v2774_v10  ;;  %v2764_v22 = vmul.f32 0.03125, %v2730_v28  ;;  %v2761_v40 = vmul.f32 0.03125, %v2721_v11 }
 0xe2f   :  { %7179 = vrsqrt.f32 %v2776_v23 }
 0xe30   :  { %v2777_v59 = vadd.f32 1e-05, %v2761_v40  ;;  %v2780_v38 = vadd.f32 1e-05, %v2764_v22 }
 0xe31   :  { %v2724_v6 = vpop.xlane.xlu1 %2723  ;;  %v2715_v43 = vpop.xlane.xlu0 %2714 }
 0xe32   :  { %v2762_v4 = vmul.f32 0.03125, %v2724_v6  ;;  %v2759_v63 = vmul.f32 0.03125, %v2715_v43  ;;  %7181 = vrsqrt.f32 %v2777_v59 }
 0xe33   :  { %v7174_v2 = vpop.eup %7173  ;;  %7183 = vrsqrt.f32 %v2780_v38 }
 0xe34   :  { %v7176_v41 = vpop.eup %7175  ;;  %v2600_v33 = vmul.f32 %v7174_v2, %v8525_v31  ;;  %v2778_v45 = vadd.f32 1e-05, %v2762_v4  ;;  %v2775_v46 = vadd.f32 1e-05, %v2759_v63  ;;  %v7413_v31 = vld [vmem:[%s10115_s2] sm:$0xff] }
 0xe35   :  { %v2601_v44 = vmul.f32 %v7176_v41, %v8523_v50  ;;  %v2733_v12 = vpop.xlane.xlu0 %2732  ;;  %v7415_v4 = vld [vmem:[%s10116_s3] sm:$0xff] }
 0xe36   :  { %v2606_v3 = vmul.f32 %v2605_v30, %v2600_v33  ;;  %7185 = vrsqrt.f32 %v2778_v45  ;;  %v2765_v62 = vmul.f32 0.03125, %v2733_v12  ;;  %v7418_v12 = vld [vmem:[%s10116_s3 + $0x10] sm:$0xff] }
 0xe37   :  { %v2607_v37 = vmul.f32 %v2605_v30, %v2601_v44  ;;  %7187 = vrsqrt.f32 %v2775_v46 }
 0xe38   :  { %v8665_v26 = vadd.f32 %v2611_v21, %v2606_v3  ;;  %v2781_v18 = vadd.f32 1e-05, %v2765_v62 }
 0xe39   :  { %v8667_v58 = vadd.f32 %v2611_v21, %v2607_v37  ;;  %v2727_v47 = vpop.xlane.xlu0 %2726  ;;  %v7417_v21 = vld [vmem:[%s10116_s3 + $0x8] sm:$0xff] }
 0xe3a   :  { %7189 = vrsqrt.f32 %v2781_v18  ;;  %v2763_v0 = vmul.f32 0.03125, %v2727_v47  ;;  %v2862_v50 = vadd.f32 %v7413_v31, %v8665_v26 }
 0xe3b   :  { %v7178_v32 = vpop.eup %7177  ;;  %v2863_v15 = vadd.f32 %v7414_v24, %v8667_v58 }
 0xe3c   :  { %v2779_v20 = vadd.f32 1e-05, %v2763_v0  ;;  %v7180_v7 = vpop.eup %7179  ;;  %v2806_v56 = vmul.f32 %v7178_v32, %v8533_v54  ;;  %v8689_v54 = vrot.slane %v163_v25, %v2824_v5 }
 0xe3d   :  { %v2880_v8 = vpack.c.bf16 %v2863_v15, %v2862_v50  ;;  %v2808_v23 = vmul.f32 %v7180_v7, %v8531_v48  ;;  %v7419_v7 = vld [vmem:[%s10116_s3 + $0x38] sm:$0xff] }
 0xe3e   :  { %7191 = vrsqrt.f32 %v2779_v20  ;;  %v2826_v11 = vmul.f32 %v8682_v51, %v2806_v56 }
 0xe3f   :  { %6569 = vmatmul.mubr.msk.bf16.vlgmr.msra.gmra.mxu0 %vm193_vm0, %v2880_v8  ;;  %v7182_v14 = vpop.eup %7181  ;;  %v2828_v40 = vmul.f32 %v8682_v51, %v2808_v23  ;;  %v7420_v23 = vld [vmem:[%s10116_s3 + $0x20] sm:$0xff] }
 0xe40   :  { %6573 = vmatpush3.bf16.xpose.msra.mxu0 %v2980_v60  ;;  %v2809_v10 = vmul.f32 %v7182_v14, %v8548_v61  ;;  %v7184_v28 = vpop.eup %7183  ;;  %v8697_v61 = vadd.f32 %v8689_v54, %v2826_v11 }
 0xe41   :  { %6608 = vmatprep.subr.bf16.mxu0 %v10135_v1  ;;  %v2812_v43 = vmul.f32 %v7184_v28, %v8546_v53  ;;  %v8703_v25 = vadd.f32 %v8689_v54, %v2828_v40  ;;  %v7421_v28 = vld [vmem:[%s10116_s3 + $0x28] sm:$0xff] }
 0xe42   :  { %v2829_v19 = vmul.f32 %v8682_v51, %v2809_v10  ;;  %v2864_v63 = vadd.f32 %v7415_v4, %v8697_v61 }
 0xe43   :  { %v7186_v9 = vpop.eup %7185  ;;  %v2832_v46 = vmul.f32 %v8682_v51, %v2812_v43  ;;  %v2866_v3 = vadd.f32 %v7418_v12, %v8703_v25 }
 0xe44   :  { %v7188_v22 = vpop.eup %7187  ;;  %v8694_v48 = vadd.f32 %v8689_v54, %v2829_v19  ;;  %v2810_v6 = vmul.f32 %v7186_v9, %v8542_v36  ;;  %v7416_v36 = vld [vmem:[%s10116_s3 + $0x18] sm:$0xff]  ;;  %v7422_v9 = vld [vmem:[%s10116_s3 + $0x30] sm:$0xff] }
 0xe45   :  { %v2807_v34 = vmul.f32 %v7188_v22, %v8544_v29  ;;  %v8749_v32 = vadd.f32 %v8689_v54, %v2832_v46 }
 0xe46   :  { %v2867_v53 = vadd.f32 %v7416_v36, %v8694_v48  ;;  %v2830_v45 = vmul.f32 %v8682_v51, %v2810_v6  ;;  %v3080_v44 = vpack.c.bf16 %v8694_v48, %v8703_v25 }
 0xe47   :  { %v7190_v59 = vpop.eup %7189  ;;  %v2827_v38 = vmul.f32 %v8682_v51, %v2807_v34  ;;  %v2870_v19 = vadd.f32 %v7422_v9, %v8749_v32 }
 0xe48   :  { %v2813_v30 = vmul.f32 %v7190_v59, %v8563_v52  ;;  %v8740_v31 = vpack.c.bf16 %v2867_v53, %v2866_v3 }
 0xe49   :  { %v8707_v29 = vadd.f32 %v8689_v54, %v2827_v38 }
 0xe4a   :  { %v2833_v2 = vmul.f32 %v8682_v51, %v2813_v30 }
 0xe4b   :  { %v7192_v41 = vpop.eup %7191  ;;  %v3079_v52 = vpack.c.bf16 %v8707_v29, %v8697_v61  ;;  %v2865_v33 = vadd.f32 %v7417_v21, %v8707_v29 }
 0xe4c   :  { %v2811_v62 = vmul.f32 %v7192_v41, %v8561_v13  ;;  %v8737_v47 = vadd.f32 %v8689_v54, %v2833_v2  ;;  %v8746_v13 = vadd.f32 %v8689_v54, %v2830_v45 }
 0xe4d   :  { %6592 = vmatprep.mubr.msk.bf16.mxu1 %vm193_vm0, %v3079_v52  ;;  %v2640_v37 = vpop.xlane.xlu1 %2639  ;;  %v8734_v18 = vpack.c.bf16 %v2865_v33, %v2864_v63 }
 0xe4e   :  { %v2670_v0 = vmul.f32 0.03125, %v2640_v37  ;;  %6593 = vmatmul.mubr.msk.bf16.vlgmr.msra.gmra.mxu1 %vm193_vm0, %v3080_v44  ;;  %v2831_v50 = vmul.f32 %v8682_v51, %v2811_v62  ;;  %v2871_v8 = vadd.f32 %v7419_v7, %v8737_v47  ;;  %v2868_v10 = vadd.f32 %v7420_v23, %v8746_v13 }
 0xe4f   :  { %6574 = vmatprep.mubr.msk.bf16.mxu0 %vm193_vm0, %v8734_v18  ;;  %v3082_v59 = vpack.c.bf16 %v8737_v47, %v8749_v32 }
 0xe50   :  { %v8752_v24 = vsub.f32 %v8582_v16, %v2670_v0  ;;  %6575 = vmatmul.mubr.msk.bf16.vlgmr.msra.gmra.mxu0 %vm193_vm0, %v8740_v31  ;;  %v8757_v15 = vadd.f32 %v8689_v54, %v2831_v50  ;;  %v8791_v30 = vpack.c.bf16 %v2871_v8, %v2870_v19  ;;  %v8837_v8 = vld [vmem:[%s10122_s9] ss:$0 sm:$0xff] }
 0xe51   :  { %v2646_v5 = vpop.xlane.xlu1 %2645  ;;  %v2643_v20 = vpop.xlane.xlu0 %2642 }
 0xe52   :  { %v2672_v60 = vmul.f32 0.03125, %v2646_v5  ;;  %v2671_v56 = vmul.f32 0.03125, %v2643_v20  ;;  %v3081_v16 = vpack.c.bf16 %v8757_v15, %v8746_v13  ;;  %v2702_v14 = vmul.f32 %v8752_v24, %v8752_v24 }
 0xe53   :  { %v2869_v11 = vadd.f32 %v7421_v28, %v8757_v15 }
 0xe54   :  { %v8780_v22 = vsub.f32 %v8587_v35, %v2672_v60  ;;  %v8783_v40 = vsub.f32 %v8596_v17, %v2671_v56  ;;  %6596 = vmatprep.mubr.msk.bf16.mxu1 %vm193_vm0, %v3081_v16  ;;  %v2734_v34 = vsel %vm193_vm0, %v2702_v14, 0.0 }
 0xe55   :  { %2735 = vadd.xlane.f32.xlu1 %v2734_v34  ;;  %v2652_v38 = vpop.xlane.xlu1 %2651  ;;  %v2649_v6 = vpop.xlane.xlu0 %2648  ;;  %v8789_v43 = vpack.c.bf16 %v2869_v11, %v2868_v10 }
 0xe56   :  { %v2674_v4 = vmul.f32 0.03125, %v2652_v38  ;;  %6597 = vmatmul.mubr.msk.bf16.gmra.mxu1 %vm193_vm0, %v3082_v59  ;;  %v2673_v35 = vmul.f32 0.03125, %v2649_v6  ;;  %v2704_v17 = vmul.f32 %v8780_v22, %v8780_v22  ;;  %v2703_v63 = vmul.f32 %v8783_v40, %v8783_v40 }
 0xe57   :  { %6578 = vmatprep.mubr.msk.bf16.mxu0 %vm193_vm0, %v8789_v43 }
 0xe58   :  { %v8801_v36 = vsub.f32 %v8624_v42, %v2674_v4  ;;  %v8804_v53 = vsub.f32 %v8609_v39, %v2673_v35  ;;  %6579 = vmatmul.mubr.msk.bf16.gmra.mxu0 %vm193_vm0, %v8791_v30  ;;  %v2740_v2 = vsel %vm193_vm0, %v2704_v17, 0.0  ;;  %v2737_v41 = vsel %vm193_vm0, %v2703_v63, 0.0 }
 0xe59   :  { %2741 = vadd.xlane.f32.xlu1 %v2740_v2  ;;  %v2658_v52 = vpop.xlane.xlu1 %2657  ;;  %2738 = vadd.xlane.f32.xlu0 %v2737_v41  ;;  %v2655_v21 = vpop.xlane.xlu0 %2654 }
 0xe5a   :  { %v2676_v33 = vmul.f32 0.03125, %v2658_v52  ;;  %v2675_v45 = vmul.f32 0.03125, %v2655_v21  ;;  %v2706_v42 = vmul.f32 %v8801_v36, %v8801_v36  ;;  %v2705_v39 = vmul.f32 %v8804_v53, %v8804_v53 }
 0xe5c   :  { %v8815_v46 = vsub.f32 %v8632_v27, %v2676_v33  ;;  %v8818_v44 = vsub.f32 %v8641_v49, %v2675_v45  ;;  %v2746_v12 = vsel %vm193_vm0, %v2706_v42, 0.0  ;;  %v2743_v3 = vsel %vm193_vm0, %v2705_v39, 0.0 }
 0xe5d   :  { %2747 = vadd.xlane.f32.xlu1 %v2746_v12  ;;  %2744 = vadd.xlane.f32.xlu0 %v2743_v3  ;;  %v2661_v62 = vpop.xlane.xlu0 %2660 }
 0xe5e   :  { %v2677_v37 = vmul.f32 0.03125, %v2661_v62  ;;  %v2708_v0 = vmul.f32 %v8815_v46, %v8815_v46  ;;  %v2707_v50 = vmul.f32 %v8818_v44, %v8818_v44 }
 0xe60   :  { %v8827_v27 = vsub.f32 %v8646_v55, %v2677_v37  ;;  %v2752_v49 = vsel %vm193_vm0, %v2708_v0, 0.0  ;;  %v2749_v5 = vsel %vm193_vm0, %v2707_v50, 0.0 }
 0xe61   :  { %2753 = vadd.xlane.f32.xlu1 %v2752_v49  ;;  %2750 = vadd.xlane.f32.xlu0 %v2749_v5 }
 0xe62   :  { %v2709_v20 = vmul.f32 %v8827_v27, %v8827_v27 }
 0xe64   :  { %v2755_v7 = vsel %vm193_vm0, %v2709_v20, 0.0 }
 0xe65   :  { %2756 = vadd.xlane.f32.xlu0 %v2755_v7 }
 0xe72   :  { %2952 = vrot.lane.b32.xlu1 %v8837_v8, %s7463_s19 }
 0xede   :  { %v2736_v55 = vpop.xlane.xlu1 %2735 }
 0xedf   :  { %v2766_v60 = vmul.f32 0.03125, %v2736_v55 }
 0xee1   :  { %v2782_v56 = vadd.f32 1e-05, %v2766_v60 }
 0xee2   :  { %v2742_v16 = vpop.xlane.xlu1 %2741  ;;  %v2739_v14 = vpop.xlane.xlu0 %2738 }
 0xee3   :  { %7193 = vrsqrt.f32 %v2782_v56  ;;  %v2768_v23 = vmul.f32 0.03125, %v2742_v16  ;;  %v2767_v10 = vmul.f32 0.03125, %v2739_v14 }
 0xee5   :  { %v2784_v28 = vadd.f32 1e-05, %v2768_v23  ;;  %v2783_v11 = vadd.f32 1e-05, %v2767_v10 }
 0xee6   :  { %v2748_v9 = vpop.xlane.xlu1 %2747  ;;  %v2745_v19 = vpop.xlane.xlu0 %2744 }
 0xee7   :  { %7195 = vrsqrt.f32 %v2784_v28  ;;  %v2770_v34 = vmul.f32 0.03125, %v2748_v9  ;;  %v2769_v59 = vmul.f32 0.03125, %v2745_v19 }
 0xee8   :  { %7197 = vrsqrt.f32 %v2783_v11 }
 0xee9   :  { %v2786_v38 = vadd.f32 1e-05, %v2770_v34  ;;  %v2785_v6 = vadd.f32 1e-05, %v2769_v59  ;;  %v7425_v59 = vld [vmem:[%s10116_s3 + $0x50] sm:$0xff] }
 0xeea   :  { %v2754_v4 = vpop.xlane.xlu1 %2753  ;;  %v2751_v35 = vpop.xlane.xlu0 %2750 }
 0xeeb   :  { %7199 = vrsqrt.f32 %v2786_v38  ;;  %v2772_v17 = vmul.f32 0.03125, %v2754_v4  ;;  %v2771_v63 = vmul.f32 0.03125, %v2751_v35 }
 0xeec   :  { %7201 = vrsqrt.f32 %v2785_v6 }
 0xeed   :  { %v2788_v2 = vadd.f32 1e-05, %v2772_v17  ;;  %v2787_v41 = vadd.f32 1e-05, %v2771_v63 }
 0xeee   :  { %v2757_v52 = vpop.xlane.xlu0 %2756 }
 0xeef   :  { %7203 = vrsqrt.f32 %v2788_v2  ;;  %v2773_v21 = vmul.f32 0.03125, %v2757_v52 }
 0xef0   :  { %v7194_v33 = vpop.eup %7193  ;;  %7205 = vrsqrt.f32 %v2787_v41 }
 0xef1   :  { %v2789_v45 = vadd.f32 1e-05, %v2773_v21  ;;  %v2814_v42 = vmul.f32 %v7194_v33, %v8752_v24 }
 0xef3   :  { %7207 = vrsqrt.f32 %v2789_v45  ;;  %v2834_v39 = vmul.f32 %v8682_v51, %v2814_v42 }
 0xef4   :  { %v7196_v12 = vpop.eup %7195 }
 0xef5   :  { %v7198_v3 = vpop.eup %7197  ;;  %v2816_v62 = vmul.f32 %v7196_v12, %v8780_v22  ;;  %v8846_v0 = vadd.f32 %v8689_v54, %v2834_v39  ;;  %v7423_v22 = vld [vmem:[%s10116_s3 + $0x40] sm:$0xff] }
 0xef6   :  { %v2815_v37 = vmul.f32 %v7198_v3, %v8783_v40  ;;  %v7427_v39 = vld [vmem:[%s10116_s3 + $0x60] sm:$0xff]  ;;  %v7428_v3 = vld [vmem:[%s10116_s3 + $0x68] sm:$0xff] }
 0xef7   :  { %v2836_v50 = vmul.f32 %v8682_v51, %v2816_v62  ;;  %v2872_v40 = vadd.f32 %v7423_v22, %v8846_v0 }
 0xef8   :  { %v7200_v49 = vpop.eup %7199  ;;  %v2835_v5 = vmul.f32 %v8682_v51, %v2815_v37 }
 0xef9   :  { %v7202_v20 = vpop.eup %7201  ;;  %v2818_v24 = vmul.f32 %v7200_v49, %v8801_v36  ;;  %v8860_v60 = vadd.f32 %v8689_v54, %v2836_v50  ;;  %v7424_v36 = vld [vmem:[%s10116_s3 + $0x48] sm:$0xff] }
 0xefa   :  { %v8852_v7 = vadd.f32 %v8689_v54, %v2835_v5  ;;  %v2817_v55 = vmul.f32 %v7202_v20, %v8804_v53  ;;  %v7429_v5 = vld [vmem:[%s10116_s3 + $0x70] sm:$0xff] }
 0xefb   :  { %v2838_v23 = vmul.f32 %v8682_v51, %v2818_v24  ;;  %v2874_v38 = vadd.f32 %v7425_v59, %v8860_v60  ;;  %v7430_v24 = vld [vmem:[%s10116_s3 + $0x78] sm:$0xff] }
 0xefc   :  { %v7204_v56 = vpop.eup %7203  ;;  %v3083_v16 = vpack.c.bf16 %v8852_v7, %v8846_v0  ;;  %v2873_v14 = vadd.f32 %v7424_v36, %v8852_v7  ;;  %v2837_v53 = vmul.f32 %v8682_v51, %v2817_v55 }
 0xefd   :  { %v7206_v10 = vpop.eup %7205  ;;  %v2820_v28 = vmul.f32 %v7204_v56, %v8815_v46  ;;  %v8893_v63 = vadd.f32 %v8689_v54, %v2838_v23 }
 0xefe   :  { %6600 = vmatprep.mubr.msk.bf16.mxu1 %vm193_vm0, %v3083_v16  ;;  %v8872_v11 = vpack.c.bf16 %v2873_v14, %v2872_v40  ;;  %v8875_v9 = vadd.f32 %v8689_v54, %v2837_v53  ;;  %v2819_v19 = vmul.f32 %v7206_v10, %v8818_v44  ;;  %v7426_v44 = vld [vmem:[%s10116_s3 + $0x58] sm:$0xff]  ;;  %v8947_v53 = vpop.permute.xlu1 %2952  ;;  %s7468_s3 = smov 120  }
 0xeff   :  { %v2932_v34 = vpop.f32.mrf.mxu0  ;;  %v2840_v6 = vmul.f32 %v8682_v51, %v2820_v28  ;;  %v2876_v12 = vadd.f32 %v7427_v39, %v8893_v63 }
 0xf00   :  { %v7208_v4 = vpop.eup %7207  ;;  %6582 = vmatprep.mubr.msk.bf16.mxu0 %vm193_vm0, %v8872_v11  ;;  %v3084_v46 = vpack.c.bf16 %v8875_v9, %v8860_v60  ;;  %v2875_v35 = vadd.f32 %v7426_v44, %v8875_v9  ;;  %v2839_v17 = vmul.f32 %v8682_v51, %v2819_v19 }
 0xf01   :  { %v6570_v2 = vpop.f32.mrf.mxu0  ;;  %v2821_v41 = vmul.f32 %v7208_v4, %v8827_v27  ;;  %v8906_v42 = vadd.f32 %v8689_v54, %v2840_v6 }
 0xf02   :  { %6601 = vmatmul.mubr.msk.bf16.gmra.mxu1 %vm193_vm0, %v3084_v46  ;;  %v8897_v52 = vpack.c.bf16 %v2875_v35, %v2874_v38  ;;  %v8900_v21 = vadd.f32 %v8689_v54, %v2839_v17  ;;  %v2933_v46 = vadd.f32 %v8837_v8, %v2932_v34 }
 0xf03   :  { %v8902_v33 = vpop.f32.mrf.mxu0  ;;  %v2841_v45 = vmul.f32 %v8682_v51, %v2821_v41  ;;  %v2878_v20 = vadd.f32 %v7429_v5, %v8906_v42 }
 0xf04   :  { %6583 = vmatmul.mubr.msk.bf16.gmra.mxu0 %vm193_vm0, %v8897_v52  ;;  %v3085_v27 = vpack.c.bf16 %v8900_v21, %v8893_v63  ;;  %v2877_v51 = vadd.f32 %v7428_v3, %v8900_v21 }
 0xf05   :  { %v6571_v62 = vpop.f32.mrf.mxu0  ;;  %v8921_v37 = vadd.f32 %v8689_v54, %v2841_v45 }
 0xf06   :  { %6604 = vmatprep.mubr.msk.bf16.mxu1 %vm193_vm0, %v3085_v27  ;;  %v8924_v50 = vpack.c.bf16 %v2877_v51, %v2876_v12  ;;  %v3219_v27 = vmul.f32 0.35355338, %v2933_v46 }
 0xf07   :  { %10143 = vst [vmem:[#allocation5_spill] sm:$0xff] %v8921_v37  ;;  %v3086_v49 = vpack.c.bf16 %v8921_v37, %v8906_v42  ;;  %v2879_v54 = vadd.f32 %v7430_v24, %v8921_v37 }
 0xf08   :  { %6586 = vmatprep.mubr.msk.bf16.mxu0 %vm193_vm0, %v8924_v50  ;;  %v3225_v39 = vpack.c.bf16 %v3219_v27, %v3219_v27 }
 0xf09   :  { %v8938_v55 = vpack.c.bf16 %v2879_v54, %v2878_v20 }
 0xf0a   :  { %6605 = vmatmul.mubr.msk.bf16.gmra.mxu1 %vm193_vm0, %v3086_v49 }
 0xf0b   :  { %6640 = vmatprep.mubr.msk.bf16.mxu1 %vm7461_vm1, %v10135_v1 }
 0xf0c   :  { %6587 = vmatmul.mubr.msk.bf16.gmra.mxu0 %vm193_vm0, %v8938_v55 }
 0xf0d   :  { %6616 = vmatprep.mubr.msk.bf16.mxu0 %vm7461_vm1, %v10135_v1 }
 0xf10   :  { %v6576_v22 = vpop.f32.mrf.mxu0 }
 0xf11   :  { %v3025_v41 = vadd.f32 %v6576_v22, %v8947_v53 }
 0xf12   :  { %v3016_v40 = vpop.f32.mrf.mxu0 }
 0xf13   :  { %v3017_v44 = vadd.f32 %v3016_v40, %v8947_v53 }
 0xf14   :  { %v6577_v56 = vpop.f32.mrf.mxu0 }
 0xf15   :  { %v3028_v35 = vadd.f32 %v6577_v56, %v8947_v53 }
 0xf16   :  { %v3019_v16 = vpop.f32.mrf.mxu0 }
 0xf17   :  { %v3020_v59 = vadd.f32 %v3019_v16, %v8947_v53  ;;  %v3227_v34 = vpack.c.bf16 %v3028_v35, %v3025_v41 }
 0xf18   :  { %v6580_v36 = vpop.f32.mrf.mxu0 }
 0xf19   :  { %v3041_v10 = vadd.f32 %v6580_v36, %v8947_v53  ;;  %v3226_v45 = vpack.c.bf16 %v3020_v59, %v3017_v44  ;;  %v3237_v3 = vsel %vm369_vm3, %v3227_v34, 0 }
 0xf1a   :  { %v3032_v14 = vpop.f32.mrf.mxu0 }
 0xf1b   :  { %v3033_v38 = vadd.f32 %v3032_v14, %v8947_v53  ;;  %v3234_v51 = vsel %vm369_vm3, %v3226_v45, 0 }
 0xf1c   :  { %v6581_v23 = vpop.f32.mrf.mxu0 }
 0xf1d   :  { %v3044_v28 = vadd.f32 %v6581_v23, %v8947_v53 }
 0xf1e   :  { %v3035_v19 = vpop.f32.mrf.mxu0 }
 0xf1f   :  { %v3229_v6 = vpack.c.bf16 %v3044_v28, %v3041_v10  ;;  %v3036_v4 = vadd.f32 %v3035_v19, %v8947_v53 }
 0xf21   :  { %v3228_v17 = vpack.c.bf16 %v3036_v4, %v3033_v38  ;;  %3353 = vrot.lane.b32.xlu0 %v3229_v6, %s7468_s3  ;;  %v3243_v2 = vsel %vm369_vm3, %v3229_v6, 0 }
 0xf22   :  { %6609 = vmatpush3.bf16.xpose.msra.mxu0 %v3243_v2 }
 0xf23   :  { %3351 = vrot.lane.b32.xlu1 %v3228_v17, %s7468_s3  ;;  %6610 = vmatprep.subr.bf16.mxu0 %v10135_v1  ;;  %v3240_v12 = vsel %vm369_vm3, %v3228_v17, 0 }
 0xf25   :  { %3347 = vrot.lane.b32.xlu0 %v3226_v45, %s7468_s3 }
 0xf27   :  { %3349 = vrot.lane.b32.xlu1 %v3227_v34, %s7468_s3 }
 0xf2a   :  { %6611 = vmatpush3.bf16.xpose.msra.mxu0 %v3240_v12 }
 0xf2b   :  { %3341 = vrot.lane.b32.xlu1 %v3225_v39, %s7468_s3  ;;  %6612 = vmatprep.subr.bf16.mxu0 %v10135_v1 }
 0xf32   :  { %6613 = vmatpush3.bf16.xpose.msra.mxu0 %v3237_v3 }
 0xf33   :  { %6614 = vmatprep.subr.bf16.mxu0 %v10135_v1 }
 0xf3a   :  { %6615 = vmatpush3.bf16.xpose.msra.mxu0 %v3234_v51  ;;  %v2936_v51 = vadd.f32 %v8837_v8, %v8902_v33 }
 0xf3b   :  { %6620 = vmatprep.subr.bf16.mxu0 %v10135_v1 }
 0xf41   :  { %6617 = vmatmul.mubr.msk.bf16.vlgmr.msra.gmra.mxu0 %vm369_vm3, %v3225_v39 }
 0xf42   :  { %6628 = vmatprep.mubr.msk.bf16.mxu0 %vm7461_vm1, %v10135_v1 }
 0xf93   :  { %v3354_v62 = vpop.permute.xlu0 %3353 }
 0xf94   :  { %v3368_v49 = vsel %vm369_vm3, %v3354_v62, 0 }
 0xf95   :  { %6633 = vmatpush3.bf16.xpose.msra.mxu1 %v3368_v49  ;;  %v3352_v5 = vpop.permute.xlu1 %3351  ;;  %v3220_v49 = vmul.f32 0.35355338, %v2936_v51 }
 0xf96   :  { %6634 = vmatprep.subr.bf16.mxu1 %v10135_v1  ;;  %v3365_v20 = vsel %vm369_vm3, %v3352_v5, 0 }
 0xf97   :  { %v3348_v22 = vpop.permute.xlu0 %3347  ;;  %v9015_v5 = vpack.c.bf16 %v3220_v49, %v3220_v49 }
 0xf98   :  { %v3359_v40 = vsel %vm369_vm3, %v3348_v22, 0  ;;  %v6594_v22 = vpop.f32.mrf.mxu1 }
 0xf99   :  { %v3350_v24 = vpop.permute.xlu1 %3349 }
 0xf9a   :  { %v3362_v54 = vsel %vm369_vm3, %v3350_v24, 0 }
 0xf9d   :  { %6635 = vmatpush3.bf16.xpose.msra.mxu1 %v3365_v20  ;;  %v3342_v56 = vpop.permute.xlu1 %3341 }
 0xf9e   :  { %6636 = vmatprep.subr.bf16.mxu1 %v10135_v1 }
 0xfa5   :  { %6637 = vmatpush3.bf16.xpose.msra.mxu1 %v3362_v54 }
 0xfa6   :  { %6638 = vmatprep.subr.bf16.mxu1 %v10135_v1 }
 0xfad   :  { %6639 = vmatpush3.bf16.xpose.msra.mxu1 %v3359_v40  ;;  %v9022_v40 = vpop.f32.mrf.mxu1 }
 0xfae   :  { %6656 = vmatprep.subr.bf16.mxu1 %v10135_v1 }
 0xfb4   :  { %6641 = vmatmul.mubr.msk.bf16.vlgmr.msra.gmra.mxu1 %vm369_vm3, %v3342_v56  ;;  %v6595_v56 = vpop.f32.mrf.mxu1 }
 0xfb5   :  { %6664 = vmatprep.mubr.msk.bf16.mxu1 %vm7461_vm1, %v10135_v1 }
 0xfc4   :  { %v6584_v16 = vpop.f32.mrf.mxu0 }
 0xfc5   :  { %v3057_v45 = vadd.f32 %v6584_v16, %v8947_v53  ;;  %v9024_v16 = vpop.f32.mrf.mxu1 }
 0xfc6   :  { %v3048_v36 = vpop.f32.mrf.mxu0 }
 0xfc7   :  { %v3049_v12 = vadd.f32 %v3048_v36, %v8947_v53  ;;  %v6598_v36 = vpop.f32.mrf.mxu1 }
 0xfc8   :  { %v6585_v14 = vpop.f32.mrf.mxu0 }
 0xfc9   :  { %v3060_v2 = vadd.f32 %v6585_v14, %v8947_v53  ;;  %v3172_v14 = vpop.f32.mrf.mxu1 }
 0xfca   :  { %v3051_v23 = vpop.f32.mrf.mxu0 }
 0xfcb   :  { %v9001_v27 = vpack.c.bf16 %v3060_v2, %v3057_v45  ;;  %v3052_v34 = vadd.f32 %v3051_v23, %v8947_v53  ;;  %v6599_v23 = vpop.f32.mrf.mxu1 }
 0xfcc   :  { %v6588_v10 = vpop.f32.mrf.mxu0 }
 0xfcd   :  { %v3073_v59 = vadd.f32 %v6588_v10, %v8947_v53  ;;  %v3502_v39 = vsel %vm369_vm3, %v9001_v27, 0  ;;  %v9008_v3 = vpack.c.bf16 %v3052_v34, %v3049_v12  ;;  %v3175_v10 = vpop.f32.mrf.mxu1 }
 0xfce   :  { %v3064_v28 = vpop.f32.mrf.mxu0 }
 0xfcf   :  { %v3065_v35 = vadd.f32 %v3064_v28, %v8947_v53  ;;  %v3499_v62 = vsel %vm369_vm3, %v9008_v3, 0  ;;  %v9026_v28 = vpop.f32.mrf.mxu1 }
 0xfd0   :  { %v6589_v19 = vpop.f32.mrf.mxu0 }
 0xfd1   :  { %v3076_v38 = vadd.f32 %v6589_v19, %v8947_v53  ;;  %v9028_v19 = vpop.f32.mrf.mxu1 }
 0xfd2   :  { %v3067_v6 = vpop.f32.mrf.mxu0 }
 0xfd3   :  { %v8987_v4 = vpack.c.bf16 %v3076_v38, %v3073_v59  ;;  %v3068_v46 = vadd.f32 %v3067_v6, %v8947_v53  ;;  %v9030_v59 = vpop.f32.mrf.mxu1 }
 0xfd5   :  { %v3508_v44 = vsel %vm369_vm3, %v8987_v4, 0  ;;  %v8994_v17 = vpack.c.bf16 %v3068_v46, %v3065_v35  ;;  %v9032_v38 = vpop.f32.mrf.mxu1 }
 0xfd6   :  { %6657 = vmatpush3.bf16.xpose.msra.mxu1 %v3508_v44 }
 0xfd7   :  { %6658 = vmatprep.subr.bf16.mxu1 %v10135_v1  ;;  %v3505_v41 = vsel %vm369_vm3, %v8994_v17, 0  ;;  %v9034_v6 = vpop.f32.mrf.mxu1 }
 0xfd9   :  { %v9036_v46 = vpop.f32.mrf.mxu1 }
 0xfdb   :  { %v9038_v44 = vpop.f32.mrf.mxu1 }
 0xfdd   :  { %v9040_v35 = vpop.f32.mrf.mxu1 }
 0xfde   :  { %6659 = vmatpush3.bf16.xpose.msra.mxu1 %v3505_v41 }
 0xfdf   :  { %6660 = vmatprep.subr.bf16.mxu1 %v10135_v1 }
 0xfe6   :  { %6661 = vmatpush3.bf16.xpose.msra.mxu1 %v3502_v39 }
 0xfe7   :  { %6662 = vmatprep.subr.bf16.mxu1 %v10135_v1 }
 0xfee   :  { %6663 = vmatpush3.bf16.xpose.msra.mxu1 %v3499_v62 }
 0xfef   :  { %6692 = vmatprep.subr.bf16.mxu1 %v10135_v1 }
 0xff5   :  { %6665 = vmatmul.mubr.msk.bf16.vlgmr.msra.gmra.mxu1 %vm369_vm3, %v9015_v5 }
 0xff6   :  { %6700 = vmatprep.mubr.msk.bf16.mxu1 %vm7461_vm1, %v10135_v1 }
0x1001   :  { %v3279_v53 = vpop.f32.mrf.mxu0 }
0x1002   :  { %v3285_v20 = vsel %vm1295_vm5, %v3279_v53, -inf }
0x1003   :  { %3286 = vmax.xlane.f32.xlu0 %v3285_v20  ;;  %v6618_v33 = vpop.f32.mrf.mxu0 }
0x1005   :  { %v3282_v24 = vpop.f32.mrf.mxu0 }
0x1007   :  { %v6619_v54 = vpop.f32.mrf.mxu0 }
0x1074   :  { %v3404_v2 = vpop.f32.mrf.mxu1 }
0x1075   :  { %v3410_v41 = vsel %vm1295_vm5, %v3404_v2, -inf }
0x1076   :  { %3411 = vmax.xlane.f32.xlu1 %v3410_v41  ;;  %v6642_v45 = vpop.f32.mrf.mxu1 }
0x1078   :  { %v3407_v34 = vpop.f32.mrf.mxu1 }
0x107a   :  { %v6643_v39 = vpop.f32.mrf.mxu1 }
0x108c   :  { %v3287_v12 = vpop.xlane.xlu0 %3286 }
0x108d   :  { %v3288_v51 = vsub.f32 %v3279_v53, %v3287_v12 }
0x108f   :  { %v3289_v62 = vmul.f32 1.442695, %v3288_v51 }
0x1091   :  { %7209 = vpow2.f32 %v3289_v62 }
0x109e   :  { %v7210_v49 = vpop.eup %7209 }
0x109f   :  { %v3291_v20 = vsel %vm1295_vm5, %v7210_v49, 0.0 }
0x10a0   :  { %3292 = vadd.xlane.f32.xlu1 %v3291_v20 }
0x10b5   :  { %v3544_v33 = vpop.f32.mrf.mxu1 }
0x10b6   :  { %v3550_v24 = vsel %vm1295_vm5, %v3544_v33, -inf }
0x10b7   :  { %3551 = vmax.xlane.f32.xlu0 %v3550_v24  ;;  %v6666_v54 = vpop.f32.mrf.mxu1 }
0x10b9   :  { %v3547_v1 = vpop.f32.mrf.mxu1 }
0x10bb   :  { %v6667_v37 = vpop.f32.mrf.mxu1 }
0x10cd   :  { %3092 = vrot.lane.b32.xlu0 %v8837_v8, %s7462_s18 }
0x10ff   :  { %v3412_v41 = vpop.xlane.xlu1 %3411 }
0x1100   :  { %v3413_v45 = vsub.f32 %v3404_v2, %v3412_v41 }
0x1102   :  { %v3414_v34 = vmul.f32 1.442695, %v3413_v45  ;;  %v10144_v45 = vmov 0.0  }
0x1104   :  { %7211 = vpow2.f32 %v3414_v34 }
0x1111   :  { %v7212_v53 = vpop.eup %7211 }
0x1112   :  { %v3416_v39 = vsel %vm1295_vm5, %v7212_v53, 0.0 }
0x1113   :  { %3417 = vadd.xlane.f32.xlu1 %v3416_v39 }
0x1129   :  { %v3293_v12 = vpop.xlane.xlu1 %3292 }
0x112a   :  { %7213 = vrcp.f32 %v3293_v12 }
0x1140   :  { %v3552_v51 = vpop.xlane.xlu0 %3551 }
0x1141   :  { %v3553_v62 = vsub.f32 %v3544_v33, %v3552_v51 }
0x1143   :  { %v3554_v20 = vmul.f32 1.442695, %v3553_v62 }
0x1144   :  { %v9048_v24 = vpop.permute.xlu0 %3092 }
0x1145   :  { %7215 = vpow2.f32 %v3554_v20  ;;  %v3181_v1 = vadd.f32 %v6598_v36, %v9048_v24  ;;  %v3184_v37 = vadd.f32 %v6599_v23, %v9048_v24  ;;  %v3173_v2 = vadd.f32 %v3172_v14, %v9048_v24  ;;  %v7214_v36 = vpop.eup %7213 }
0x1146   :  { %v3176_v41 = vadd.f32 %v3175_v10, %v9048_v24  ;;  %v3165_v34 = vadd.f32 %v6594_v22, %v9048_v24  ;;  %v3168_v39 = vadd.f32 %v6595_v56, %v9048_v24  ;;  %v3157_v14 = vadd.f32 %v9022_v40, %v9048_v24 }
0x1147   :  { %v3224_v54 = vpack.c.bf16 %v3184_v37, %v3181_v1  ;;  %v3160_v10 = vadd.f32 %v9024_v16, %v9048_v24  ;;  %v3295_v22 = vmul.f32 %v7214_v36, %v7210_v49 }
0x1148   :  { %v3223_v33 = vpack.c.bf16 %v3176_v41, %v3173_v2  ;;  %v3222_v23 = vpack.c.bf16 %v3168_v39, %v3165_v34  ;;  %v3208_v2 = vadd.f32 %v9040_v35, %v9048_v24  ;;  %v3192_v41 = vadd.f32 %v9032_v38, %v9048_v24 }
0x1149   :  { %3432 = vrot.lane.b32.xlu1 %v3224_v54, %s7468_s3  ;;  %6621 = vmatpush3.bf16.msra.mxu0 %v3224_v54  ;;  %v3221_v51 = vpack.c.bf16 %v3160_v10, %v3157_v14  ;;  %v3296_v62 = vpack.c.bf16 %v3295_v22, %v3295_v22  ;;  %v3205_v54 = vadd.f32 %v9036_v46, %v9048_v24 }
0x114a   :  { %6622 = vmatprep.subr.bf16.mxu0 %v10144_v45  ;;  %v3200_v46 = vadd.f32 %v9030_v59, %v9048_v24 }
0x114d   :  { %3430 = vrot.lane.b32.xlu1 %v3223_v33, %s7468_s3  ;;  %6623 = vmatpush3.bf16.msra.mxu0 %v3223_v33 }
0x114e   :  { %6624 = vmatprep.subr.bf16.mxu0 %v10144_v45 }
0x1151   :  { %3428 = vrot.lane.b32.xlu1 %v3222_v23, %s7468_s3  ;;  %6625 = vmatpush3.bf16.msra.mxu0 %v3222_v23 }
0x1152   :  { %v7216_v12 = vpop.eup %7215  ;;  %6626 = vmatprep.subr.bf16.mxu0 %v10144_v45 }
0x1153   :  { %v3556_v56 = vsel %vm1295_vm5, %v7216_v12, 0.0 }
0x1154   :  { %3557 = vadd.xlane.f32.xlu0 %v3556_v56 }
0x1155   :  { %3426 = vrot.lane.b32.xlu1 %v3221_v51, %s7468_s3  ;;  %6627 = vmatpush3.bf16.msra.mxu0 %v3221_v51 }
0x1156   :  { %6644 = vmatprep.subr.bf16.mxu0 %v10144_v45 }
0x1158   :  { %6629 = vmatmul.mubr.msk.bf16.vlgmr.msra.gmra.mxu0 %vm1295_vm5, %v3296_v62 }
0x1159   :  { %3618 = vrot.lane.b32.xlu1 %v8987_v4, %s7468_s3  ;;  %6652 = vmatprep.mubr.msk.bf16.mxu0 %vm7461_vm1, %v10144_v45 }
0x115d   :  { %3616 = vrot.lane.b32.xlu1 %v8994_v17, %s7468_s3 }
0x1161   :  { %3614 = vrot.lane.b32.xlu1 %v9001_v27, %s7468_s3 }
0x1165   :  { %3612 = vrot.lane.b32.xlu1 %v9008_v3, %s7468_s3  ;;  %v3213_v3 = vadd.f32 %v9034_v6, %v9048_v24  ;;  %v9101_v6 = vpack.c.bf16 %v3208_v2, %v3205_v54 }
0x116a   :  { %3606 = vrot.lane.b32.xlu0 %v9015_v5, %s7468_s3  ;;  %v3216_v5 = vadd.f32 %v9038_v44, %v9048_v24  ;;  %v3197_v44 = vadd.f32 %v9026_v28, %v9048_v24 }
0x116c   :  { %v9090_v37 = vpack.c.bf16 %v3216_v5, %v3213_v3  ;;  %v3487_v35 = vpack.c.bf16 %v3200_v46, %v3197_v44 }
0x119c   :  { %v3418_v40 = vpop.xlane.xlu1 %3417 }
0x119d   :  { %7217 = vrcp.f32 %v3418_v40 }
0x11aa   :  { %v7218_v17 = vpop.eup %7217 }
0x11ab   :  { %v3420_v27 = vmul.f32 %v7218_v17, %v7212_v53  ;;  %v3189_v53 = vadd.f32 %v9028_v19, %v9048_v24 }
0x11ad   :  { %v3421_v1 = vpack.c.bf16 %v3420_v27, %v3420_v27  ;;  %v3486_v33 = vpack.c.bf16 %v3192_v41, %v3189_v53 }
0x11bb   :  { %v3433_v16 = vpop.permute.xlu1 %3432 }
0x11bc   :  { %6645 = vmatpush3.bf16.msra.mxu0 %v3433_v16 }
0x11bd   :  { %6646 = vmatprep.subr.bf16.mxu0 %v10144_v45 }
0x11bf   :  { %v3431_v4 = vpop.permute.xlu1 %3430 }
0x11c0   :  { %6647 = vmatpush3.bf16.msra.mxu0 %v3431_v4 }
0x11c1   :  { %6648 = vmatprep.subr.bf16.mxu0 %v10144_v45 }
0x11c3   :  { %v3429_v49 = vpop.permute.xlu1 %3428 }
0x11c4   :  { %6649 = vmatpush3.bf16.msra.mxu0 %v3429_v49 }
0x11c5   :  { %6650 = vmatprep.subr.bf16.mxu0 %v10144_v45 }
0x11c7   :  { %v3427_v20 = vpop.permute.xlu1 %3426 }
0x11c8   :  { %6651 = vmatpush3.bf16.msra.mxu0 %v3427_v20 }
0x11c9   :  { %6668 = vmatprep.subr.bf16.mxu0 %v10144_v45 }
0x11cb   :  { %6653 = vmatmul.mubr.msk.bf16.vlgmr.msra.gmra.mxu0 %vm1295_vm5, %v3421_v1  ;;  %v3619_v39 = vpop.permute.xlu1 %3618 }
0x11cc   :  { %6669 = vmatpush3.bf16.msra.mxu0 %v9090_v37  ;;  %6676 = vmatprep.mubr.msk.bf16.mxu0 %vm7461_vm1, %v10144_v45  ;;  %v3633_v23 = vsel %vm369_vm3, %v3619_v39, 0 }
0x11cd   :  { %6670 = vmatprep.subr.bf16.mxu0 %v10144_v45 }
0x11cf   :  { %v3617_v19 = vpop.permute.xlu1 %3616 }
0x11d0   :  { %6671 = vmatpush3.bf16.msra.mxu0 %v9101_v6  ;;  %v3630_v38 = vsel %vm369_vm3, %v3617_v19, 0 }
0x11d1   :  { %6672 = vmatprep.subr.bf16.mxu0 %v10144_v45 }
0x11d3   :  { %v3615_v24 = vpop.permute.xlu1 %3614 }
0x11d4   :  { %6673 = vmatpush3.bf16.msra.mxu0 %v3487_v35  ;;  %v3627_v14 = vsel %vm369_vm3, %v3615_v24, 0 }
0x11d5   :  { %6674 = vmatprep.subr.bf16.mxu0 %v10144_v45 }
0x11d7   :  { %v3613_v10 = vpop.permute.xlu1 %3612 }
0x11d8   :  { %6675 = vmatpush3.bf16.msra.mxu0 %v3486_v33 }
0x11d9   :  { %6680 = vmatprep.subr.bf16.mxu0 %v10144_v45 }
0x11dd   :  { %v3558_v28 = vpop.xlane.xlu0 %3557 }
0x11de   :  { %7219 = vrcp.f32 %v3558_v28 }
0x11e1   :  { %v3607_v22 = vpop.permute.xlu0 %3606 }
0x11eb   :  { %v7220_v59 = vpop.eup %7219 }
0x11ec   :  { %v3560_v34 = vmul.f32 %v7220_v59, %v7216_v12  ;;  %v3624_v12 = vsel %vm369_vm3, %v3613_v10, 0 }
0x11ee   :  { %v3561_v36 = vpack.c.bf16 %v3560_v34, %v3560_v34 }
0x11f0   :  { %6677 = vmatmul.mubr.msk.bf16.vlgmr.msra.gmra.mxu0 %vm1295_vm5, %v3561_v36 }
0x11f1   :  { %6681 = vmatpush3.bf16.xpose.msra.mxu0 %v3633_v23  ;;  %6688 = vmatprep.mubr.msk.bf16.mxu0 %vm7461_vm1, %v10144_v45 }
0x11f2   :  { %6682 = vmatprep.subr.bf16.mxu0 %v10144_v45 }
0x11f9   :  { %6683 = vmatpush3.bf16.xpose.msra.mxu0 %v3630_v38 }
0x11fa   :  { %6684 = vmatprep.subr.bf16.mxu0 %v10144_v45 }
0x1201   :  { %6685 = vmatpush3.bf16.xpose.msra.mxu0 %v3627_v14 }
0x1202   :  { %6686 = vmatprep.subr.bf16.mxu0 %v10144_v45 }
0x1209   :  { %6687 = vmatpush3.bf16.xpose.msra.mxu0 %v3624_v12 }
0x120a   :  { %6722 = vmatprep.subr.bf16.mxu0 %v10144_v45 }
0x1210   :  { %6689 = vmatmul.mubr.msk.bf16.vlgmr.msra.gmra.mxu0 %vm369_vm3, %v3607_v22 }
0x1211   :  { %6730 = vmatprep.mubr.msk.bf16.mxu0 %vm7461_vm1, %v10144_v45 }
0x1218   :  { %v9129_v56 = vpop.f32.mrf.mxu0 }
0x121a   :  { %v6630_v51 = vpop.f32.mrf.mxu0 }
0x121c   :  { %v3337_v62 = vpop.f32.mrf.mxu0 }
0x121e   :  { %v6631_v40 = vpop.f32.mrf.mxu0 }
0x128b   :  { %v3475_v16 = vpop.f32.mrf.mxu0 }
0x128d   :  { %v6654_v4 = vpop.f32.mrf.mxu0 }
0x128f   :  { %v3478_v17 = vpop.f32.mrf.mxu0 }
0x1291   :  { %v6655_v49 = vpop.f32.mrf.mxu0 }
0x12b0   :  { %v3599_v27 = vpop.f32.mrf.mxu0 }
0x12b2   :  { %v6678_v3 = vpop.f32.mrf.mxu0 }
0x12b4   :  { %v3602_v5 = vpop.f32.mrf.mxu0 }
0x12b6   :  { %v6679_v20 = vpop.f32.mrf.mxu0 }
0x12d0   :  { %v3669_v1 = vpop.f32.mrf.mxu0 }
0x12d1   :  { %v3675_v54 = vsel %vm1295_vm5, %v3669_v1, -inf }
0x12d2   :  { %3676 = vmax.xlane.f32.xlu1 %v3675_v54  ;;  %v6690_v2 = vpop.f32.mrf.mxu0 }
0x12d4   :  { %v3672_v44 = vpop.f32.mrf.mxu0 }
0x12d6   :  { %v6691_v46 = vpop.f32.mrf.mxu0 }
0x12d7   :  { %v7017_v46 = vld [vmem:[%s10125_s12 + $0x18] sm:$0xff]  }
0x12e3   :  { %3697 = vrot.lane.b32.xlu1 %v9090_v37, %s7468_s3 }
0x12e7   :  { %3693 = vrot.lane.b32.xlu1 %v3487_v35, %s7468_s3 }
0x12eb   :  { %3691 = vrot.lane.b32.xlu1 %v3486_v33, %s7468_s3 }
0x135b   :  { %v3677_v53 = vpop.xlane.xlu1 %3676 }
0x135c   :  { %v3678_v41 = vsub.f32 %v3669_v1, %v3677_v53  ;;  %v3885_v53 = vsel %vm193_vm0, %v7017_v46, 0 }
0x135e   :  { %v3679_v28 = vmul.f32 1.442695, %v3678_v41 }
0x135f   :  { %v3698_v59 = vpop.permute.xlu1 %3697 }
0x1360   :  { %7221 = vpow2.f32 %v3679_v28  ;;  %6693 = vmatpush3.bf16.msra.mxu1 %v3698_v59 }
0x1361   :  { %6694 = vmatprep.subr.bf16.mxu1 %v10144_v45 }
0x1363   :  { %v3694_v33 = vpop.permute.xlu1 %3693 }
0x1367   :  { %v3692_v36 = vpop.permute.xlu1 %3691 }
0x136d   :  { %v7222_v34 = vpop.eup %7221 }
0x136e   :  { %v3681_v39 = vsel %vm1295_vm5, %v7222_v34, 0.0 }
0x136f   :  { %3682 = vadd.xlane.f32.xlu0 %v3681_v39 }
0x1385   :  { %3695 = vrot.lane.b32.xlu0 %v9101_v6, %s7468_s3  ;;  %v7016_v6 = vld [vmem:[%s10121_s8 + $0x18] sm:$0xff]  }
0x13f8   :  { %v3683_v37 = vpop.xlane.xlu0 %3682 }
0x13f9   :  { %7223 = vrcp.f32 %v3683_v37 }
0x13fc   :  { %v3696_v35 = vpop.permute.xlu0 %3695 }
0x13fd   :  { %6695 = vmatpush3.bf16.msra.mxu1 %v3696_v35 }
0x13fe   :  { %6696 = vmatprep.subr.bf16.mxu1 %v10144_v45 }
0x1401   :  { %6697 = vmatpush3.bf16.msra.mxu1 %v3694_v33 }
0x1402   :  { %6698 = vmatprep.subr.bf16.mxu1 %v10144_v45 }
0x1405   :  { %6699 = vmatpush3.bf16.msra.mxu1 %v3692_v36  ;;  %v7018_v36 = vld [vmem:[%s10125_s12 + $0x10] sm:$0xff]  }
0x1406   :  { %v7224_v23 = vpop.eup %7223  ;;  %6704 = vmatprep.subr.bf16.mxu1 %v10144_v45 }
0x1407   :  { %v3685_v19 = vmul.f32 %v7224_v23, %v7222_v34  ;;  %v3882_v23 = vsel %vm193_vm0, %v7018_v36, 0 }
0x1409   :  { %v3686_v38 = vpack.c.bf16 %v3685_v19, %v3685_v19  ;;  %v7019_v19 = vld [vmem:[%s10125_s12 + $0x8] sm:$0xff]  }
0x140b   :  { %6701 = vmatmul.mubr.msk.bf16.vlgmr.msra.gmra.mxu1 %vm1295_vm5, %v3686_v38  ;;  %v3879_v38 = vsel %vm193_vm0, %v7019_v19, 0 }
0x140c   :  { %6706 = vmatprep.mubr.msk.bf16.mxu1 %vm7461_vm1, %v10144_v45  ;;  %6705 = vmatpush3.bf16.msra.mxu1 %v7016_v6  ;;  %v7020_v6 = vld [vmem:[%s10125_s12] sm:$0xff]  }
0x140d   :  { %6710 = vmatprep.subr.bf16.mxu1 %v10144_v45 }
0x14cb   :  { %v3740_v24 = vpop.f32.mrf.mxu1 }
0x14cc   :  { %v6952_v14 = vpack.i.bf16 %v3740_v24, %v3475_v16  ;;  %v3876_v24 = vsel %vm193_vm0, %v7020_v6, 0 }
0x14cd   :  { %v6702_v10 = vpop.f32.mrf.mxu1 }
0x14ce   :  { %6953 = vrot.lane.b32.xlu1 %v6952_v14, %s7469_s23  ;;  %v7021_v14 = vld [vmem:[%s10125_s12 + $0x38] sm:$0xff]   ;;  %v5975_v10 = vld [vmem:[%s10126_s13] ss:$0 sm:$0xff] }
0x14cf   :  { %v3743_v12 = vpop.f32.mrf.mxu1  ;;  %6723 = vmatpush3.bf16.msra.mxu0 %v7021_v14 }
0x14d0   :  { %6724 = vmatprep.subr.bf16.mxu0 %v10144_v45 }
0x14d1   :  { %v6703_v22 = vpop.f32.mrf.mxu1 }
0x14d2   :  { %3758 = vrot.lane.b32.xlu1 %v8837_v8, %s7464_s20 }
0x1540   :  { %v6954_v51 = vpop.permute.xlu1 %6953 }
0x1541   :  { %v6956_v62 = vunpack.i.h.bf16 %v6954_v51  ;;  %v6955_v40 = vunpack.i.l.bf16 %v6954_v51 }
0x1543   :  { %v3750_v4 = vsel %vm369_vm3, %v3599_v27, %v6956_v62  ;;  %v3485_v17 = vsel %vm369_vm3, %v9129_v56, %v6955_v40 }
0x1544   :  { %v3751_v49 = vpack.c.bf16 %v3750_v4, %v3485_v17  ;;  %v3759_v16 = vpop.permute.xlu1 %3758  ;;  %v3835_v17 = vsub.s32 2, %v8654_v57 }
0x1546   :  { %6707 = vmatmul.mubr.msk.bf16.vlgmr.msra.gmra.mxu1 %vm322_vm2, %v3751_v49 }
0x1547   :  { %6718 = vmatprep.mubr.msk.bf16.mxu1 %vm7461_vm1, %v10144_v45  ;;  %6711 = vmatpush3.bf16.xpose.msra.mxu1 %v3885_v53  ;;  %v7022_v53 = vld [vmem:[%s10125_s12 + $0x30] sm:$0xff]  }
0x1548   :  { %6712 = vmatprep.subr.bf16.mxu1 %v10144_v45  ;;  %6725 = vmatpush3.bf16.msra.mxu0 %v7022_v53 }
0x1549   :  { %6726 = vmatprep.subr.bf16.mxu0 %v10144_v45 }
0x154f   :  { %6713 = vmatpush3.bf16.xpose.msra.mxu1 %v3882_v23 }
0x1550   :  { %6714 = vmatprep.subr.bf16.mxu1 %v10144_v45 }
0x1557   :  { %6715 = vmatpush3.bf16.xpose.msra.mxu1 %v3879_v38 }
0x1558   :  { %6716 = vmatprep.subr.bf16.mxu1 %v10144_v45 }
0x155f   :  { %6717 = vmatpush3.bf16.xpose.msra.mxu1 %v3876_v24 }
0x1560   :  { %6752 = vmatprep.subr.bf16.mxu1 %v10144_v45 }
0x1606   :  { %v3798_v3 = vpop.f32.mrf.mxu1 }
0x1607   :  { %v3799_v5 = vadd.f32 %v3798_v3, %v3759_v16 }
0x1608   :  { %v6708_v20 = vpop.f32.mrf.mxu1 }
0x1609   :  { %v3805_v8 = vadd.f32 %v3799_v5, %v8665_v26 }
0x160a   :  { %v3801_v1 = vpop.f32.mrf.mxu1 }
0x160b   :  { %v3802_v54 = vadd.f32 %v3801_v1, %v3759_v16  ;;  %v3807_v2 = vsel %vm193_vm0, %v3805_v8, 0.0  ;;  %v9197_v16 = vld [vmem:[%s10127_s14] sm:$0x1f] }
0x160c   :  { %3808 = vadd.xlane.f32.xlu1 %v3807_v2  ;;  %v6709_v27 = vpop.f32.mrf.mxu1  ;;  %v3836_v3 = vrot.slane %v9197_v16, %v3835_v17 }
0x160d   :  { %v3806_v56 = vadd.f32 %v3802_v54, %v8667_v58  ;;  %v9203_v54 = vld [vmem:[%s10128_s15] sm:$0x1f] }
0x160e   :  { %v3842_v2 = vrot.slane %v9203_v54, %v3835_v17 }
0x160f   :  { %v3810_v44 = vsel %vm193_vm0, %v3806_v56, 0.0 }
0x1610   :  { %3811 = vadd.xlane.f32.xlu0 %v3810_v44 }
0x1695   :  { %v3809_v26 = vpop.xlane.xlu1 %3808 }
0x1696   :  { %v3813_v41 = vmul.f32 0.03125, %v3809_v26  ;;  %v7023_v26 = vld [vmem:[%s10125_s12 + $0x28] sm:$0xff]  }
0x1697   :  { %6727 = vmatpush3.bf16.msra.mxu0 %v7023_v26 }
0x1698   :  { %v3815_v28 = vsub.f32 %v3805_v8, %v3813_v41  ;;  %6728 = vmatprep.subr.bf16.mxu0 %v10144_v45  ;;  %v7024_v41 = vld [vmem:[%s10125_s12 + $0x20] sm:$0xff]  }
0x1699   :  { %v3812_v59 = vpop.xlane.xlu0 %3811 }
0x169a   :  { %v3814_v34 = vmul.f32 0.03125, %v3812_v59  ;;  %v3817_v39 = vmul.f32 %v3815_v28, %v3815_v28 }
0x169b   :  { %6729 = vmatpush3.bf16.msra.mxu0 %v7024_v41 }
0x169c   :  { %v3816_v37 = vsub.f32 %v3806_v56, %v3814_v34  ;;  %v3819_v58 = vsel %vm193_vm0, %v3817_v39, 0.0 }
0x169d   :  { %3820 = vadd.xlane.f32.xlu0 %v3819_v58 }
0x169e   :  { %v3818_v35 = vmul.f32 %v3816_v37, %v3816_v37 }
0x16a0   :  { %v3822_v33 = vsel %vm193_vm0, %v3818_v35, 0.0 }
0x16a1   :  { %3823 = vadd.xlane.f32.xlu1 %v3822_v33 }
0x16b3   :  { %3955 = vrot.lane.b32.xlu0 %v5975_v10, %s10142_s0 }
0x1726   :  { %v3821_v12 = vpop.xlane.xlu0 %3820 }
0x1727   :  { %v3825_v22 = vmul.f32 0.03125, %v3821_v12 }
0x1729   :  { %v3827_v51 = vadd.f32 1e-05, %v3825_v22 }
0x172a   :  { %v3824_v62 = vpop.xlane.xlu1 %3823 }
0x172b   :  { %7225 = vrsqrt.f32 %v3827_v51  ;;  %v3826_v40 = vmul.f32 0.03125, %v3824_v62 }
0x172d   :  { %v3828_v4 = vadd.f32 1e-05, %v3826_v40 }
0x172f   :  { %7227 = vrsqrt.f32 %v3828_v4 }
0x1738   :  { %v7226_v49 = vpop.eup %7225 }
0x1739   :  { %v3831_v5 = vmul.f32 %v7226_v49, %v3815_v28  ;;  %v7025_v28 = vld [vmem:[%s10123_s10] sm:$0xff]  }
0x173a   :  { %6886 = vmatprep.subr.msk.bf16.mxu0 %vm193_vm0, %v7025_v28  ;;  %v4056_v19 = vsel %vm193_vm0, %v7025_v28, 0 }
0x173b   :  { %v3837_v8 = vmul.f32 %v3836_v3, %v3831_v5 }
0x173c   :  { %v7228_v20 = vpop.eup %7227 }
0x173d   :  { %v3832_v1 = vmul.f32 %v7228_v20, %v3816_v37  ;;  %v3843_v56 = vadd.f32 %v3842_v2, %v3837_v8 }
0x173f   :  { %v3838_v27 = vmul.f32 %v3836_v3, %v3832_v1 }
0x1741   :  { %v3844_v44 = vadd.f32 %v3842_v2, %v3838_v27 }
0x1743   :  { %v3845_v46 = vpack.c.bf16 %v3844_v44, %v3843_v56 }
0x1745   :  { %6719 = vmatmul.mubr.msk.bf16.vlgmr.msra.gmra.mxu1 %vm193_vm0, %v3845_v46 }
0x1746   :  { %6754 = vmatprep.mubr.msk.bf16.mxu1 %vm7461_vm1, %v10144_v45 }
0x1805   :  { %v3921_v59 = vpop.f32.mrf.mxu1 }
0x1806   :  { %v3922_v39 = vadd.f32 %v5975_v10, %v3921_v59 }
0x1807   :  { %v6720_v34 = vpop.f32.mrf.mxu1 }
0x1808   :  { %v3928_v33 = vmax.f32 %v3922_v39, 0.0 }
0x1809   :  { %v3924_v37 = vpop.f32.mrf.mxu1 }
0x180a   :  { %v3925_v58 = vadd.f32 %v5975_v10, %v3924_v37 }
0x180b   :  { %v6721_v35 = vpop.f32.mrf.mxu1 }
0x180c   :  { %v3929_v36 = vmax.f32 %v3925_v58, 0.0 }
0x180e   :  { %v3930_v23 = vpack.c.bf16 %v3929_v36, %v3928_v33 }
0x1810   :  { %6731 = vmatmul.mubr.msk.bf16.vlgmr.msra.gmra.mxu0 %vm1295_vm5, %v3930_v23 }
0x1811   :  { %6735 = vmatpush3.bf16.xpose.msra.mxu0 %v4056_v19  ;;  %6736 = vmatprep.mubr.msk.bf16.mxu0 %vm193_vm0, %v8734_v18  ;;  %v3956_v18 = vpop.permute.xlu0 %3955 }
0x1818   :  { %6737 = vmatmul.mubr.msk.bf16.vlgmr.msra.gmra.mxu0 %vm193_vm0, %v8740_v31 }
0x1819   :  { %6740 = vmatprep.mubr.msk.bf16.mxu0 %vm193_vm0, %v8789_v43 }
0x1820   :  { %6741 = vmatmul.mubr.msk.bf16.gmra.mxu0 %vm193_vm0, %v8791_v30 }
0x1821   :  { %6744 = vmatprep.mubr.msk.bf16.mxu0 %vm193_vm0, %v8872_v11 }
0x1828   :  { %6745 = vmatmul.mubr.msk.bf16.gmra.mxu0 %vm193_vm0, %v8897_v52  ;;  %v9246_v52 = vld [vmem:[%s10124_s11] ss:$0 sm:$0xff] }
0x1829   :  { %6748 = vmatprep.mubr.msk.bf16.mxu0 %vm193_vm0, %v8924_v50 }
0x1830   :  { %6749 = vmatmul.mubr.msk.bf16.gmra.mxu0 %vm193_vm0, %v8938_v55 }
0x18d0   :  { %v3995_v31 = vpop.f32.mrf.mxu0 }
0x18d1   :  { %v3996_v38 = vadd.f32 %v3995_v31, %v3956_v18 }
0x18d2   :  { %v6732_v6 = vpop.f32.mrf.mxu0 }
0x18d3   :  { %v4002_v43 = vadd.f32 %v3996_v38, %v3843_v56 }
0x18d4   :  { %v3998_v24 = vpop.f32.mrf.mxu0 }
0x18d5   :  { %v3999_v14 = vadd.f32 %v3998_v24, %v3956_v18  ;;  %v4004_v30 = vsel %vm193_vm0, %v4002_v43, 0.0 }
0x18d6   :  { %4005 = vadd.xlane.f32.xlu1 %v4004_v30  ;;  %v6733_v11 = vpop.f32.mrf.mxu0 }
0x18d7   :  { %v4003_v10 = vadd.f32 %v3999_v14, %v3844_v44 }
0x18d8   :  { %v6738_v12 = vpop.f32.mrf.mxu0 }
0x18d9   :  { %v4007_v50 = vsel %vm193_vm0, %v4003_v10, 0.0  ;;  %v4101_v22 = vadd.f32 %v6738_v12, %v9246_v52 }
0x18da   :  { %4008 = vadd.xlane.f32.xlu1 %v4007_v50  ;;  %v4092_v55 = vpop.f32.mrf.mxu0 }
0x18db   :  { %v4093_v62 = vadd.f32 %v9246_v52, %v4092_v55  ;;  %v4269_v17 = vmul.f32 0.35355338, %v4101_v22 }
0x18dc   :  { %v6739_v51 = vpop.f32.mrf.mxu0 }
0x18dd   :  { %v4104_v40 = vadd.f32 %v6739_v51, %v9246_v52  ;;  %v4267_v20 = vmul.f32 0.35355338, %v4093_v62 }
0x18de   :  { %v4095_v4 = vpop.f32.mrf.mxu0 }
0x18df   :  { %v4270_v49 = vmul.f32 0.35355338, %v4104_v40  ;;  %v4096_v3 = vadd.f32 %v9246_v52, %v4095_v4 }
0x18e0   :  { %v6742_v5 = vpop.f32.mrf.mxu0 }
0x18e1   :  { %v9253_v8 = vpack.c.bf16 %v4270_v49, %v4269_v17  ;;  %v4268_v1 = vmul.f32 0.35355338, %v4096_v3  ;;  %v4117_v3 = vadd.f32 %v6742_v5, %v9246_v52 }
0x18e2   :  { %v4108_v2 = vpop.f32.mrf.mxu0 }
0x18e3   :  { %v9255_v27 = vpack.c.bf16 %v4268_v1, %v4267_v20  ;;  %v4109_v44 = vadd.f32 %v9246_v52, %v4108_v2 }
0x18e4   :  { %v6743_v56 = vpop.f32.mrf.mxu0 }
0x18e5   :  { %v4271_v41 = vmul.f32 0.35355338, %v4109_v44  ;;  %v4120_v49 = vadd.f32 %v6743_v56, %v9246_v52 }
0x18e6   :  { %v4111_v46 = vpop.f32.mrf.mxu0 }
0x18e7   :  { %v4112_v53 = vadd.f32 %v9246_v52, %v4111_v46  ;;  %v4274_v20 = vmul.f32 0.35355338, %v4120_v49 }
0x18e8   :  { %v6746_v26 = vpop.f32.mrf.mxu0 }
0x18e9   :  { %v4272_v28 = vmul.f32 0.35355338, %v4112_v53  ;;  %v4133_v39 = vadd.f32 %v6746_v26, %v9246_v52 }
0x18ea   :  { %v4124_v59 = vpop.f32.mrf.mxu0 }
0x18eb   :  { %v9259_v34 = vpack.c.bf16 %v4272_v28, %v4271_v41  ;;  %v4277_v33 = vmul.f32 0.35355338, %v4133_v39  ;;  %v4125_v44 = vadd.f32 %v9246_v52, %v4124_v59  ;;  %v7026_v39 = vld [vmem:[%s10123_s10 + $0x8] sm:$0xff]  }
0x18ec   :  { %v6747_v37 = vpop.f32.mrf.mxu0 }
0x18ed   :  { %v4136_v58 = vadd.f32 %v6747_v37, %v9246_v52  ;;  %v4275_v26 = vmul.f32 0.35355338, %v4125_v44  ;;  %v4168_v37 = vsel %vm193_vm0, %v7026_v39, 0 }
0x18ee   :  { %v4127_v35 = vpop.f32.mrf.mxu0  ;;  %6753 = vmatpush3.bf16.xpose.msra.mxu1 %v4168_v37 }
0x18ef   :  { %v4278_v36 = vmul.f32 0.35355338, %v4136_v58  ;;  %v4128_v1 = vadd.f32 %v9246_v52, %v4127_v35  ;;  %6758 = vmatprep.subr.bf16.mxu1 %v10144_v45 }
0x18f0   :  { %v6750_v23 = vpop.f32.mrf.mxu0 }
0x18f1   :  { %v9263_v19 = vpack.c.bf16 %v4278_v36, %v4277_v33  ;;  %v4149_v31 = vadd.f32 %v6750_v23, %v9246_v52  ;;  %v4276_v46 = vmul.f32 0.35355338, %v4128_v1 }
0x18f2   :  { %v4140_v18 = vpop.f32.mrf.mxu0 }
0x18f3   :  { %v4281_v24 = vmul.f32 0.35355338, %v4149_v31  ;;  %v4141_v56 = vadd.f32 %v9246_v52, %v4140_v18  ;;  %v9283_v5 = vpack.c.bf16 %v4276_v46, %v4275_v26  ;;  %v4032_v31 = vsub.s32 3, %v8654_v57 }
0x18f4   :  { %v6751_v38 = vpop.f32.mrf.mxu0 }
0x18f5   :  { %v4152_v6 = vadd.f32 %v6751_v38, %v9246_v52  ;;  %v4279_v28 = vmul.f32 0.35355338, %v4141_v56  ;;  %v4033_v38 = vrot.slane %v9197_v16, %v4032_v31  ;;  %v7433_v16 = vld [vmem:[%s10115_s2] sm:$0xff] }
0x18f6   :  { %v4143_v2 = vpop.f32.mrf.mxu0 }
0x18f7   :  { %v4282_v14 = vmul.f32 0.35355338, %v4152_v6  ;;  %v4144_v53 = vadd.f32 %v9246_v52, %v4143_v2 }
0x18f9   :  { %v9267_v30 = vpack.c.bf16 %v4282_v14, %v4281_v24  ;;  %v4280_v41 = vmul.f32 0.35355338, %v4144_v53  ;;  %v4039_v24 = vrot.slane %v9203_v54, %v4032_v31 }
0x18fb   :  { %v9287_v59 = vpack.c.bf16 %v4280_v41, %v4279_v28 }
0x195f   :  { %v4006_v11 = vpop.xlane.xlu1 %4005 }
0x1960   :  { %v4010_v12 = vmul.f32 0.03125, %v4006_v11 }
0x1962   :  { %v4012_v50 = vsub.f32 %v4002_v43, %v4010_v12  ;;  %v4273_v43 = vmul.f32 0.35355338, %v4117_v3 }
0x1963   :  { %v4009_v55 = vpop.xlane.xlu1 %4008 }
0x1964   :  { %v4011_v22 = vmul.f32 0.03125, %v4009_v55  ;;  %v4014_v51 = vmul.f32 %v4012_v50, %v4012_v50 }
0x1966   :  { %v4013_v62 = vsub.f32 %v4003_v10, %v4011_v22  ;;  %v4016_v40 = vsel %vm193_vm0, %v4014_v51, 0.0  ;;  %v9277_v10 = vpack.c.bf16 %v4274_v20, %v4273_v43 }
0x1967   :  { %4017 = vadd.xlane.f32.xlu1 %v4016_v40 }
0x1968   :  { %v4015_v4 = vmul.f32 %v4013_v62, %v4013_v62 }
0x196a   :  { %v4019_v17 = vsel %vm193_vm0, %v4015_v4, 0.0  ;;  %v7027_v4 = vld [vmem:[%s10123_s10 + $0x10] sm:$0xff]  }
0x196b   :  { %4020 = vadd.xlane.f32.xlu1 %v4019_v17  ;;  %v4224_v49 = vsel %vm193_vm0, %v7027_v4, 0 }
0x197c   :  { %4161 = vrot.lane.b32.xlu1 %v9246_v52, %s7463_s19 }
0x1980   :  { %4551 = vrot.lane.b32.xlu1 %v9277_v10, %s7468_s3 }
0x1984   :  { %5113 = vrot.lane.b32.xlu1 %v9283_v5, %s7468_s3 }
0x1988   :  { %5117 = vrot.lane.b32.xlu1 %v9287_v59, %s7468_s3 }
0x19f0   :  { %v4018_v58 = vpop.xlane.xlu1 %4017 }
0x19f1   :  { %v4022_v35 = vmul.f32 0.03125, %v4018_v58 }
0x19f3   :  { %v4024_v33 = vadd.f32 1e-05, %v4022_v35 }
0x19f4   :  { %v4021_v36 = vpop.xlane.xlu1 %4020 }
0x19f5   :  { %7229 = vrsqrt.f32 %v4024_v33  ;;  %v4023_v23 = vmul.f32 0.03125, %v4021_v36 }
0x19f7   :  { %v4025_v18 = vadd.f32 1e-05, %v4023_v23 }
0x19f8   :  { %v4162_v20 = vpop.permute.xlu1 %4161 }
0x19f9   :  { %7231 = vrsqrt.f32 %v4025_v18 }
0x19fc   :  { %v4552_v33 = vpop.permute.xlu1 %4551 }
0x1a00   :  { %v5114_v18 = vpop.permute.xlu1 %5113 }
0x1a02   :  { %v7230_v6 = vpop.eup %7229 }
0x1a03   :  { %v4028_v14 = vmul.f32 %v7230_v6, %v4012_v50  ;;  %v7434_v50 = vld [vmem:[%s10115_s2 + $0x8] sm:$0xff] }
0x1a05   :  { %v4034_v11 = vmul.f32 %v4033_v38, %v4028_v14 }
0x1a06   :  { %v7232_v12 = vpop.eup %7231 }
0x1a07   :  { %v4040_v55 = vadd.f32 %v4039_v24, %v4034_v11  ;;  %v4029_v22 = vmul.f32 %v7232_v12, %v4013_v62 }
0x1a09   :  { %5821 = vst.msk [vmem:[#allocation2] sm:$0xff] %vm193_vm0, %v4040_v55  ;;  %v4035_v51 = vmul.f32 %v4033_v38, %v4029_v22  ;;  %v4042_v54 = vadd.f32 %v7433_v16, %v4040_v55  ;;  %v5118_v38 = vpop.permute.xlu1 %5117 }
0x1a0b   :  { %v4041_v40 = vadd.f32 %v4039_v24, %v4035_v51 }
0x1a0d   :  { %5822 = vst.msk [vmem:[#allocation2 + $0x8] sm:$0xff] %vm193_vm0, %v4041_v40  ;;  %v4043_v62 = vadd.f32 %v7434_v50, %v4041_v40  ;;  %v4211_v3 = vpack.c.bf16 %v4041_v40, %v4040_v55 }
0x1a0f   :  { %v4155_v17 = vpack.c.bf16 %v4043_v62, %v4042_v54 }
0x1a11   :  { %6755 = vmatmul.mubr.msk.bf16.vlgmr.msra.gmra.mxu1 %vm193_vm0, %v4155_v17 }
0x1a12   :  { %6759 = vmatpush3.bf16.xpose.msra.mxu1 %v4224_v49  ;;  %6760 = vmatprep.mubr.msk.bf16.mxu1 %vm7461_vm1, %v10144_v45 }
0x1a19   :  { %6761 = vmatmul.mubr.msk.bf16.vlgmr.msra.gmra.mxu1 %vm193_vm0, %v4211_v3 }
0x1a1a   :  { %6766 = vmatprep.mubr.msk.bf16.mxu1 %vm369_vm3, %v9255_v27 }
0x1ad1   :  { %v4204_v1 = vpop.f32.mrf.mxu1 }
0x1ad2   :  { %v4205_v2 = vadd.f32 %v4204_v1, %v4162_v20 }
0x1ad3   :  { %v6756_v43 = vpop.f32.mrf.mxu1 }
0x1ad4   :  { %v4288_v44 = vpack.c.bf16 %v4205_v2, %v4205_v2 }
0x1ad5   :  { %v4207_v46 = vpop.f32.mrf.mxu1 }
0x1ad6   :  { %4554 = vrot.lane.b32.xlu0 %v4288_v44, %s7468_s3  ;;  %6887 = vmatprep.subr.msk.bf16.mxu1 %vm369_vm3, %v4288_v44  ;;  %v4302_v53 = vsel %vm369_vm3, %v4288_v44, 0  ;;  %v4208_v39 = vadd.f32 %v4207_v46, %v4162_v20 }
0x1ad7   :  { %v6757_v26 = vpop.f32.mrf.mxu1  ;;  %6765 = vmatpush3.bf16.xpose.msra.mxu1 %v4302_v53 }
0x1ad8   :  { %v4856_v37 = vpack.c.bf16 %v4208_v39, %v4208_v39 }
0x1ad9   :  { %v9320_v45 = vpop.f32.mrf.mxu1 }
0x1ada   :  { %4545 = vrot.lane.b32.xlu0 %v9255_v27, %s7468_s3 }
0x1adb   :  { %v6762_v56 = vpop.f32.mrf.mxu1 }
0x1add   :  { %v9324_v41 = vpop.f32.mrf.mxu1 }
0x1ade   :  { %4547 = vrot.lane.b32.xlu0 %v9253_v8, %s7468_s3  ;;  %6767 = vmatmul.mubr.msk.bf16.vlgmr.msra.gmra.mxu1 %vm369_vm3, %v9253_v8 }
0x1adf   :  { %v6763_v28 = vpop.f32.mrf.mxu1  ;;  %6770 = vmatprep.mubr.msk.bf16.mxu1 %vm369_vm3, %v9259_v34 }
0x1ae2   :  { %4549 = vrot.lane.b32.xlu0 %v9259_v34, %s7468_s3 }
0x1ae6   :  { %5122 = vrot.lane.b32.xlu0 %v4856_v37, %s7468_s3  ;;  %6771 = vmatmul.mubr.msk.bf16.gmra.mxu1 %vm369_vm3, %v9277_v10  ;;  %v4870_v10 = vsel %vm369_vm3, %v4856_v37, 0 }
0x1aea   :  { %5115 = vrot.lane.b32.xlu0 %v9263_v19, %s7468_s3 }
0x1aee   :  { %5119 = vrot.lane.b32.xlu0 %v9267_v30, %s7468_s3 }
0x1b48   :  { %v4555_v8 = vpop.permute.xlu0 %4554 }
0x1b49   :  { %6889 = vmatprep.subr.msk.bf16.mxu1 %vm369_vm3, %v4555_v8  ;;  %v4569_v27 = vsel %vm369_vm3, %v4555_v8, 0 }
0x1b4a   :  { %6785 = vmatpush3.bf16.xpose.msra.mxu1 %v4569_v27 }
0x1b4b   :  { %6891 = vmatprep.subr.msk.bf16.mxu1 %vm369_vm3, %v4856_v37 }
0x1b4c   :  { %v4546_v34 = vpop.permute.xlu0 %4545 }
0x1b4d   :  { %6786 = vmatprep.mubr.msk.bf16.mxu1 %vm369_vm3, %v4546_v34 }
0x1b50   :  { %v4548_v58 = vpop.permute.xlu0 %4547 }
0x1b51   :  { %6787 = vmatmul.mubr.msk.bf16.vlgmr.msra.gmra.mxu1 %vm369_vm3, %v4548_v58 }
0x1b52   :  { %6805 = vmatpush3.bf16.xpose.msra.mxu1 %v4870_v10 }
0x1b54   :  { %v4550_v35 = vpop.permute.xlu0 %4549 }
0x1b55   :  { %6790 = vmatprep.mubr.msk.bf16.mxu1 %vm369_vm3, %v4550_v35 }
0x1b58   :  { %v5123_v36 = vpop.permute.xlu0 %5122 }
0x1b59   :  { %6791 = vmatmul.mubr.msk.bf16.gmra.mxu1 %vm369_vm3, %v4552_v33  ;;  %6893 = vmatprep.subr.msk.bf16.mxu1 %vm369_vm3, %v5123_v36  ;;  %v5137_v23 = vsel %vm369_vm3, %v5123_v36, 0 }
0x1b5a   :  { %6806 = vmatprep.mubr.msk.bf16.mxu1 %vm369_vm3, %v9283_v5 }
0x1b5c   :  { %v5116_v31 = vpop.permute.xlu0 %5115 }
0x1b60   :  { %v5120_v5 = vpop.permute.xlu0 %5119 }
0x1b61   :  { %6807 = vmatmul.mubr.msk.bf16.vlgmr.msra.gmra.mxu1 %vm369_vm3, %v9263_v19 }
0x1b62   :  { %6825 = vmatpush3.bf16.xpose.msra.mxu1 %v5137_v23  ;;  %6810 = vmatprep.mubr.msk.bf16.mxu1 %vm369_vm3, %v9287_v59 }
0x1b69   :  { %6811 = vmatmul.mubr.msk.bf16.gmra.mxu1 %vm369_vm3, %v9267_v30 }
0x1b6a   :  { %6826 = vmatprep.mubr.msk.bf16.mxu1 %vm369_vm3, %v5114_v18 }
0x1b71   :  { %6827 = vmatmul.mubr.msk.bf16.vlgmr.msra.gmra.mxu1 %vm369_vm3, %v5116_v31 }
0x1b72   :  { %6830 = vmatprep.mubr.msk.bf16.mxu1 %vm369_vm3, %v5118_v38 }
0x1b79   :  { %6831 = vmatmul.mubr.msk.bf16.gmra.mxu1 %vm369_vm3, %v5120_v5 }
0x1b9e   :  { %v9363_v19 = vpop.f32.mrf.mxu1 }
0x1b9f   :  { %v4375_v59 = vsel %vm369_vm3, %v9363_v19, -inf }
0x1ba0   :  { %4376 = vmax.xlane.f32.xlu0 %v4375_v59  ;;  %v9367_v6 = vpop.f32.mrf.mxu1 }
0x1ba1   :  { %v4369_v30 = vsel %vm369_vm3, %v9367_v6, -inf }
0x1ba2   :  { %4370 = vmax.xlane.f32.xlu1 %v4369_v30  ;;  %v9371_v24 = vpop.f32.mrf.mxu1 }
0x1ba3   :  { %v4378_v11 = vsel %vm369_vm3, %v9371_v24, -inf }
0x1ba4   :  { %v9373_v14 = vpop.f32.mrf.mxu1 }
0x1ba5   :  { %v4372_v12 = vsel %vm369_vm3, %v9373_v14, -inf }
0x1ba6   :  { %4379 = vmax.xlane.f32.xlu1 %v4378_v11  ;;  %4373 = vmax.xlane.f32.xlu0 %v4372_v12  ;;  %v9379_v55 = vpop.f32.mrf.mxu1 }
0x1ba7   :  { %v4387_v51 = vsel %vm369_vm3, %v9379_v55, -inf }
0x1ba8   :  { %v9381_v22 = vpop.f32.mrf.mxu1 }
0x1ba9   :  { %v4381_v54 = vsel %vm369_vm3, %v9381_v22, -inf }
0x1baa   :  { %4388 = vmax.xlane.f32.xlu0 %v4387_v51  ;;  %v9385_v40 = vpop.f32.mrf.mxu1 }
0x1bab   :  { %v4390_v4 = vsel %vm369_vm3, %v9385_v40, -inf }
0x1bac   :  { %4391 = vmax.xlane.f32.xlu1 %v4390_v4  ;;  %v9389_v16 = vpop.f32.mrf.mxu1 }
0x1bad   :  { %v4384_v50 = vsel %vm369_vm3, %v9389_v16, -inf }
0x1bae   :  { %4382 = vmax.xlane.f32.xlu0 %v4381_v54 }
0x1bb0   :  { %4385 = vmax.xlane.f32.xlu1 %v4384_v50 }
0x1c11   :  { %v9395_v62 = vpop.f32.mrf.mxu1 }
0x1c12   :  { %v4642_v17 = vsel %vm369_vm3, %v9395_v62, -inf }
0x1c13   :  { %4643 = vmax.xlane.f32.xlu0 %v4642_v17  ;;  %v9399_v49 = vpop.f32.mrf.mxu1 }
0x1c14   :  { %v4636_v20 = vsel %vm369_vm3, %v9399_v49, -inf }
0x1c15   :  { %v9401_v3 = vpop.f32.mrf.mxu1 }
0x1c16   :  { %v4645_v1 = vsel %vm369_vm3, %v9401_v3, -inf }
0x1c17   :  { %4637 = vmax.xlane.f32.xlu0 %v4636_v20  ;;  %v9407_v2 = vpop.f32.mrf.mxu1  ;;  %4646 = vmax.xlane.f32.xlu1 %v4645_v1 }
0x1c18   :  { %v4639_v46 = vsel %vm369_vm3, %v9407_v2, -inf }
0x1c19   :  { %v9409_v43 = vpop.f32.mrf.mxu1 }
0x1c1a   :  { %v4654_v44 = vsel %vm369_vm3, %v9409_v43, -inf }
0x1c1b   :  { %4655 = vmax.xlane.f32.xlu0 %v4654_v44  ;;  %v9415_v53 = vpop.f32.mrf.mxu1  ;;  %4640 = vmax.xlane.f32.xlu1 %v4639_v46 }
0x1c1c   :  { %v4648_v56 = vsel %vm369_vm3, %v9415_v53, -inf }
0x1c1d   :  { %v9417_v26 = vpop.f32.mrf.mxu1 }
0x1c1e   :  { %v4657_v28 = vsel %vm369_vm3, %v9417_v26, -inf }
0x1c1f   :  { %4649 = vmax.xlane.f32.xlu0 %v4648_v56  ;;  %v9423_v39 = vpop.f32.mrf.mxu1  ;;  %4658 = vmax.xlane.f32.xlu1 %v4657_v28 }
0x1c20   :  { %v4651_v27 = vsel %vm369_vm3, %v9423_v39, -inf }
0x1c21   :  { %v9425_v37 = vpop.f32.mrf.mxu1 }
0x1c22   :  { %v4943_v8 = vsel %vm369_vm3, %v9425_v37, -inf }
0x1c23   :  { %4944 = vmax.xlane.f32.xlu0 %v4943_v8  ;;  %v9431_v34 = vpop.f32.mrf.mxu1  ;;  %4652 = vmax.xlane.f32.xlu1 %v4651_v27 }
0x1c24   :  { %v4937_v10 = vsel %vm369_vm3, %v9431_v34, -inf }
0x1c25   :  { %v9433_v58 = vpop.f32.mrf.mxu1 }
0x1c26   :  { %v4946_v35 = vsel %vm369_vm3, %v9433_v58, -inf }
0x1c27   :  { %4938 = vmax.xlane.f32.xlu0 %v4937_v10  ;;  %v9439_v33 = vpop.f32.mrf.mxu1  ;;  %4947 = vmax.xlane.f32.xlu1 %v4946_v35 }
0x1c28   :  { %v4940_v38 = vsel %vm369_vm3, %v9439_v33, -inf }
0x1c29   :  { %v4377_v36 = vpop.xlane.xlu0 %4376  ;;  %v9441_v23 = vpop.f32.mrf.mxu1 }
0x1c2a   :  { %v4395_v18 = vsub.f32 %v9363_v19, %v4377_v36  ;;  %v4955_v31 = vsel %vm369_vm3, %v9441_v23, -inf }
0x1c2b   :  { %4956 = vmax.xlane.f32.xlu0 %v4955_v31  ;;  %v9448_v5 = vpop.f32.mrf.mxu1  ;;  %4941 = vmax.xlane.f32.xlu1 %v4940_v38  ;;  %v4371_v30 = vpop.xlane.xlu1 %4370 }
0x1c2c   :  { %v4405_v59 = vmul.f32 1.442695, %v4395_v18  ;;  %v4949_v12 = vsel %vm369_vm3, %v9448_v5, -inf  ;;  %v4393_v51 = vsub.f32 %v9367_v6, %v4371_v30 }
0x1c2d   :  { %v9450_v11 = vpop.f32.mrf.mxu1 }
0x1c2e   :  { %v4958_v19 = vsel %vm369_vm3, %v9450_v11, -inf  ;;  %7233 = vpow2.f32 %v4405_v59  ;;  %v4401_v20 = vmul.f32 1.442695, %v4393_v51 }
0x1c2f   :  { %4950 = vmax.xlane.f32.xlu0 %v4949_v12  ;;  %4959 = vmax.xlane.f32.xlu1 %v4958_v19  ;;  %v4374_v4 = vpop.xlane.xlu0 %4373  ;;  %v9457_v54 = vpop.f32.mrf.mxu1 }
0x1c30   :  { %v4952_v17 = vsel %vm369_vm3, %v9457_v54, -inf  ;;  %v4380_v44 = vpop.xlane.xlu1 %4379  ;;  %7235 = vpow2.f32 %v4401_v20  ;;  %v4394_v35 = vsub.f32 %v9373_v14, %v4374_v4 }
0x1c31   :  { %v9459_v50 = vpop.f32.mrf.mxu1  ;;  %v4396_v28 = vsub.f32 %v9371_v24, %v4380_v44 }
0x1c32   :  { %v5210_v1 = vsel %vm369_vm3, %v9459_v50, -inf  ;;  %v4403_v12 = vmul.f32 1.442695, %v4394_v35 }
0x1c33   :  { %4953 = vmax.xlane.f32.xlu1 %v4952_v17  ;;  %5211 = vmax.xlane.f32.xlu0 %v5210_v1  ;;  %v9465_v46 = vpop.f32.mrf.mxu1  ;;  %v4389_v6 = vpop.xlane.xlu0 %4388  ;;  %v4407_v18 = vmul.f32 1.442695, %v4396_v28 }
0x1c34   :  { %v5204_v8 = vsel %vm369_vm3, %v9465_v46, -inf }
0x1c35   :  { %v9467_v56 = vpop.f32.mrf.mxu1  ;;  %v4392_v19 = vpop.xlane.xlu1 %4391  ;;  %7237 = vpow2.f32 %v4407_v18 }
0x1c36   :  { %v5213_v27 = vsel %vm369_vm3, %v9467_v56, -inf  ;;  %7239 = vpow2.f32 %v4403_v12  ;;  %v4400_v20 = vsub.f32 %v9385_v40, %v4392_v19 }
0x1c37   :  { %5205 = vmax.xlane.f32.xlu0 %v5204_v8  ;;  %v9474_v10 = vpop.f32.mrf.mxu1  ;;  %5214 = vmax.xlane.f32.xlu1 %v5213_v27  ;;  %v4383_v59 = vpop.xlane.xlu0 %4382 }
0x1c38   :  { %v5207_v24 = vsel %vm369_vm3, %v9474_v10, -inf  ;;  %v4397_v14 = vsub.f32 %v9381_v22, %v4383_v59  ;;  %v4415_v8 = vmul.f32 1.442695, %v4400_v20 }
0x1c39   :  { %v9477_v36 = vpop.f32.mrf.mxu1  ;;  %v4386_v22 = vpop.xlane.xlu1 %4385 }
0x1c3a   :  { %v5222_v31 = vsel %vm369_vm3, %v9477_v36, -inf  ;;  %v4409_v1 = vmul.f32 1.442695, %v4397_v14  ;;  %v4398_v27 = vsub.f32 %v9389_v16, %v4386_v22 }
0x1c3b   :  { %v9483_v38 = vpop.eup %7233  ;;  %5223 = vmax.xlane.f32.xlu0 %v5222_v31  ;;  %v9485_v30 = vpop.f32.mrf.mxu1  ;;  %5208 = vmax.xlane.f32.xlu1 %v5207_v24 }
0x1c3c   :  { %v5216_v51 = vsel %vm369_vm3, %v9485_v30, -inf  ;;  %v4423_v4 = vsel %vm369_vm3, %v9483_v38, 0.0  ;;  %7241 = vpow2.f32 %v4409_v1  ;;  %v4411_v40 = vmul.f32 1.442695, %v4398_v27 }
0x1c3d   :  { %v9492_v17 = vpop.f32.mrf.mxu1  ;;  %v9497_v28 = vpop.eup %7235  ;;  %7243 = vpow2.f32 %v4415_v8  ;;  %v4399_v1 = vsub.f32 %v9379_v55, %v4389_v6 }
0x1c3e   :  { %v5225_v44 = vsel %vm369_vm3, %v9492_v17, -inf  ;;  %v4417_v35 = vsel %vm369_vm3, %v9497_v28, 0.0  ;;  %7245 = vpow2.f32 %v4411_v40 }
0x1c3f   :  { %5217 = vmax.xlane.f32.xlu0 %v5216_v51  ;;  %4424 = vadd.xlane.f32.xlu1 %v4423_v4  ;;  %v9502_v18 = vpop.f32.mrf.mxu1  ;;  %v4413_v22 = vmul.f32 1.442695, %v4399_v1 }
0x1c40   :  { %v5219_v31 = vsel %vm369_vm3, %v9502_v18, -inf }
0x1c41   :  { %7247 = vpow2.f32 %v4413_v22 }
0x1c42   :  { %v9506_v24 = vpop.eup %7237 }
0x1c43   :  { %5226 = vmax.xlane.f32.xlu1 %v5225_v44  ;;  %v4426_v59 = vsel %vm369_vm3, %v9506_v24, 0.0  ;;  %v9510_v12 = vpop.eup %7239 }
0x1c44   :  { %v4420_v16 = vsel %vm369_vm3, %v9510_v12, 0.0 }
0x1c47   :  { %4418 = vadd.xlane.f32.xlu1 %v4417_v35 }
0x1c49   :  { %v9514_v19 = vpop.eup %7241 }
0x1c4a   :  { %v4429_v14 = vsel %vm369_vm3, %v9514_v19, 0.0  ;;  %v9520_v51 = vpop.eup %7243 }
0x1c4b   :  { %5220 = vmax.xlane.f32.xlu1 %v5219_v31  ;;  %v4438_v4 = vsel %vm369_vm3, %v9520_v51, 0.0  ;;  %v9524_v20 = vpop.eup %7245 }
0x1c4c   :  { %v4432_v44 = vsel %vm369_vm3, %v9524_v20, 0.0 }
0x1c4f   :  { %4427 = vadd.xlane.f32.xlu1 %v4426_v59 }
0x1c53   :  { %4421 = vadd.xlane.f32.xlu1 %v4420_v16 }
0x1c55   :  { %4217 = vrot.lane.b32.xlu0 %v9246_v52, %s7462_s18  ;;  %v9529_v52 = vpop.eup %7247 }
0x1c56   :  { %v4435_v8 = vsel %vm369_vm3, %v9529_v52, 0.0 }
0x1c57   :  { %4430 = vadd.xlane.f32.xlu1 %v4429_v14 }
0x1c5b   :  { %4439 = vadd.xlane.f32.xlu1 %v4438_v4 }
0x1c5f   :  { %4433 = vadd.xlane.f32.xlu1 %v4432_v44 }
0x1c74   :  { %4436 = vadd.xlane.f32.xlu0 %v4435_v8 }
0x1c9c   :  { %v4644_v27 = vpop.xlane.xlu0 %4643 }
0x1c9d   :  { %v4662_v35 = vsub.f32 %v9395_v62, %v4644_v27 }
0x1c9f   :  { %v4672_v40 = vmul.f32 1.442695, %v4662_v35 }
0x1ca0   :  { %v4638_v31 = vpop.xlane.xlu0 %4637  ;;  %v4647_v59 = vpop.xlane.xlu1 %4646 }
0x1ca1   :  { %7249 = vpow2.f32 %v4672_v40  ;;  %v4660_v55 = vsub.f32 %v9399_v49, %v4638_v31  ;;  %v4663_v6 = vsub.f32 %v9401_v3, %v4647_v59 }
0x1ca3   :  { %v4668_v16 = vmul.f32 1.442695, %v4660_v55  ;;  %v4674_v14 = vmul.f32 1.442695, %v4663_v6 }
0x1ca4   :  { %v4656_v4 = vpop.xlane.xlu0 %4655  ;;  %v4641_v1 = vpop.xlane.xlu1 %4640 }
0x1ca5   :  { %7251 = vpow2.f32 %v4668_v16  ;;  %v4666_v44 = vsub.f32 %v9409_v43, %v4656_v4  ;;  %v4661_v22 = vsub.f32 %v9407_v2, %v4641_v1 }
0x1ca6   :  { %7253 = vpow2.f32 %v4674_v14 }
0x1ca7   :  { %v4680_v8 = vmul.f32 1.442695, %v4666_v44  ;;  %v4670_v62 = vmul.f32 1.442695, %v4661_v22 }
0x1ca8   :  { %v4650_v27 = vpop.xlane.xlu0 %4649  ;;  %v4659_v35 = vpop.xlane.xlu1 %4658 }
0x1ca9   :  { %7255 = vpow2.f32 %v4680_v8  ;;  %v4664_v40 = vsub.f32 %v9415_v53, %v4650_v27  ;;  %v4667_v3 = vsub.f32 %v9417_v26, %v4659_v35 }
0x1caa   :  { %7257 = vpow2.f32 %v4670_v62 }
0x1cab   :  { %v4676_v49 = vmul.f32 1.442695, %v4664_v40  ;;  %v4682_v43 = vmul.f32 1.442695, %v4667_v3 }
0x1cac   :  { %v4945_v31 = vpop.xlane.xlu0 %4944  ;;  %v4653_v59 = vpop.xlane.xlu1 %4652 }
0x1cad   :  { %v4963_v55 = vsub.f32 %v9425_v37, %v4945_v31  ;;  %v4665_v2 = vsub.f32 %v9423_v39, %v4653_v59  ;;  %7259 = vpow2.f32 %v4676_v49 }
0x1cae   :  { %v9541_v6 = vpop.eup %7249 }
0x1caf   :  { %v4973_v16 = vmul.f32 1.442695, %v4963_v55  ;;  %v4690_v14 = vsel %vm369_vm3, %v9541_v6, 0.0  ;;  %v4678_v44 = vmul.f32 1.442695, %v4665_v2 }
0x1cb0   :  { %v4939_v4 = vpop.xlane.xlu0 %4938  ;;  %4691 = vadd.xlane.f32.xlu1 %v4690_v14  ;;  %v4948_v53 = vpop.xlane.xlu1 %4947 }
0x1cb1   :  { %7261 = vpow2.f32 %v4973_v16  ;;  %v4961_v26 = vsub.f32 %v9431_v34, %v4939_v4  ;;  %v4964_v22 = vsub.f32 %v9433_v58, %v4948_v53 }
0x1cb2   :  { %v9547_v1 = vpop.eup %7251  ;;  %7263 = vpow2.f32 %v4682_v43 }
0x1cb3   :  { %v4969_v37 = vmul.f32 1.442695, %v4961_v26  ;;  %v4684_v39 = vsel %vm369_vm3, %v9547_v1, 0.0  ;;  %v9552_v8 = vpop.eup %7253  ;;  %v4975_v49 = vmul.f32 1.442695, %v4964_v22 }
0x1cb4   :  { %v4957_v62 = vpop.xlane.xlu0 %4956  ;;  %4685 = vadd.xlane.f32.xlu1 %v4684_v39  ;;  %v4942_v27 = vpop.xlane.xlu1 %4941  ;;  %v4693_v31 = vsel %vm369_vm3, %v9552_v8, 0.0 }
0x1cb5   :  { %7265 = vpow2.f32 %v4969_v37  ;;  %v4967_v35 = vsub.f32 %v9441_v23, %v4957_v62  ;;  %v4962_v34 = vsub.f32 %v9439_v33, %v4942_v27 }
0x1cb6   :  { %v9555_v40 = vpop.eup %7255  ;;  %7267 = vpow2.f32 %v4678_v44 }
0x1cb7   :  { %v4981_v3 = vmul.f32 1.442695, %v4967_v35  ;;  %v4702_v58 = vsel %vm369_vm3, %v9555_v40, 0.0  ;;  %v9562_v59 = vpop.eup %7257  ;;  %v4971_v43 = vmul.f32 1.442695, %v4962_v34 }
0x1cb8   :  { %v4951_v55 = vpop.xlane.xlu0 %4950  ;;  %4703 = vadd.xlane.f32.xlu0 %v4702_v58  ;;  %4694 = vadd.xlane.f32.xlu1 %v4693_v31  ;;  %v4960_v2 = vpop.xlane.xlu1 %4959  ;;  %v4687_v14 = vsel %vm369_vm3, %v9562_v59, 0.0 }
0x1cb9   :  { %7269 = vpow2.f32 %v4981_v3  ;;  %v4965_v23 = vsub.f32 %v9448_v5, %v4951_v55  ;;  %v4968_v16 = vsub.f32 %v9450_v11, %v4960_v2 }
0x1cba   :  { %7271 = vpow2.f32 %v4975_v49  ;;  %v9568_v4 = vpop.eup %7259 }
0x1cbb   :  { %v4977_v33 = vmul.f32 1.442695, %v4965_v23  ;;  %v4983_v37 = vmul.f32 1.442695, %v4968_v16  ;;  %v4696_v11 = vsel %vm369_vm3, %v9568_v4, 0.0 }
0x1cbc   :  { %4688 = vadd.xlane.f32.xlu1 %v4687_v14  ;;  %v4954_v53 = vpop.xlane.xlu1 %4953  ;;  %v5212_v26 = vpop.xlane.xlu0 %5211 }
0x1cbd   :  { %7273 = vpow2.f32 %v4977_v33  ;;  %v4966_v5 = vsub.f32 %v9457_v54, %v4954_v53  ;;  %v5230_v34 = vsub.f32 %v9459_v50, %v5212_v26 }
0x1cbe   :  { %v9570_v44 = vpop.eup %7261  ;;  %7275 = vpow2.f32 %v4971_v43 }
0x1cbf   :  { %v4991_v22 = vsel %vm369_vm3, %v9570_v44, 0.0  ;;  %v9577_v39 = vpop.eup %7263  ;;  %7277 = vpow2.f32 %v4983_v37  ;;  %v4979_v54 = vmul.f32 1.442695, %v4966_v5  ;;  %v5240_v23 = vmul.f32 1.442695, %v5230_v34 }
0x1cc0   :  { %4992 = vadd.xlane.f32.xlu0 %v4991_v22  ;;  %4697 = vadd.xlane.f32.xlu1 %v4696_v11  ;;  %v5206_v62 = vpop.xlane.xlu0 %5205  ;;  %v5215_v27 = vpop.xlane.xlu1 %5214  ;;  %v4705_v58 = vsel %vm369_vm3, %v9577_v39, 0.0 }
0x1cc1   :  { %7279 = vpow2.f32 %v4979_v54  ;;  %v5228_v50 = vsub.f32 %v9465_v46, %v5206_v62  ;;  %v5231_v46 = vsub.f32 %v9467_v56, %v5215_v27 }
0x1cc2   :  { %v9579_v35 = vpop.eup %7265  ;;  %7281 = vpow2.f32 %v5240_v23 }
0x1cc3   :  { %v9582_v49 = vpop.eup %7267  ;;  %v4985_v3 = vsel %vm369_vm3, %v9579_v35, 0.0  ;;  %v5236_v5 = vmul.f32 1.442695, %v5228_v50 }
0x1cc4   :  { %4986 = vadd.xlane.f32.xlu0 %v4985_v3  ;;  %4706 = vadd.xlane.f32.xlu1 %v4705_v58  ;;  %v9588_v31 = vpop.xlane.xlu0 %5223  ;;  %v5209_v55 = vpop.xlane.xlu1 %5208  ;;  %v4699_v33 = vsel %vm369_vm3, %v9582_v49, 0.0  ;;  %v5242_v3 = vmul.f32 1.442695, %v5231_v46 }
0x1cc5   :  { %7283 = vpow2.f32 %v5236_v5  ;;  %v5229_v58 = vsub.f32 %v9474_v10, %v5209_v55 }
0x1cc6   :  { %v9590_v2 = vpop.eup %7269  ;;  %7285 = vpow2.f32 %v5242_v3 }
0x1cc7   :  { %v5003_v43 = vsel %vm369_vm3, %v9590_v2, 0.0  ;;  %v9597_v16 = vpop.eup %7271 }
0x1cc8   :  { %5004 = vadd.xlane.f32.xlu0 %v5003_v43  ;;  %4700 = vadd.xlane.f32.xlu1 %v4699_v33  ;;  %v5218_v14 = vpop.xlane.xlu0 %5217  ;;  %v4425_v53 = vpop.xlane.xlu1 %4424  ;;  %v4994_v11 = vsel %vm369_vm3, %v9597_v16, 0.0 }
0x1cc9   :  { %v5232_v43 = vsub.f32 %v9485_v30, %v5218_v14 }
0x1cca   :  { %v9599_v26 = vpop.eup %7273 }
0x1ccb   :  { %v9601_v37 = vpop.eup %7275  ;;  %v4997_v22 = vsel %vm369_vm3, %v9599_v26, 0.0  ;;  %v5244_v46 = vmul.f32 1.442695, %v5232_v43 }
0x1ccc   :  { %4998 = vadd.xlane.f32.xlu0 %v4997_v22  ;;  %4995 = vadd.xlane.f32.xlu1 %v4994_v11  ;;  %v9608_v62 = vpop.permute.xlu0 %4217  ;;  %v5227_v34 = vpop.xlane.xlu1 %5226  ;;  %v4988_v56 = vsel %vm369_vm3, %v9601_v37, 0.0 }
0x1ccd   :  { %v4261_v54 = vadd.f32 %v9320_v45, %v9608_v62  ;;  %v9615_v27 = vpop.eup %7277  ;;  %v5238_v45 = vmul.f32 1.442695, %v5229_v58  ;;  %v5235_v30 = vsub.f32 %v9492_v17, %v5227_v34 }
0x1cce   :  { %v5006_v10 = vsel %vm369_vm3, %v9615_v27, 0.0  ;;  %v9622_v55 = vpop.eup %7279 }
0x1ccf   :  { %v4283_v23 = vpack.c.bf16 %v4261_v54, %v4261_v54  ;;  %v9624_v22 = vpop.eup %7281  ;;  %7287 = vpow2.f32 %v5238_v45  ;;  %v5000_v14 = vsel %vm369_vm3, %v9622_v55, 0.0  ;;  %v5250_v54 = vmul.f32 1.442695, %v5235_v30 }
0x1cd0   :  { %4989 = vadd.xlane.f32.xlu1 %v4988_v56  ;;  %v4419_v50 = vpop.xlane.xlu1 %4418  ;;  %7289 = vpow2.f32 %v5244_v46  ;;  %v5258_v58 = vsel %vm369_vm3, %v9624_v22, 0.0  ;;  %v5234_v30 = vsub.f32 %v9477_v36, %v9588_v31 }
0x1cd1   :  { %6888 = vmatprep.subr.msk.bf16.mxu0 %vm385_vm4, %v4283_v23  ;;  %v4474_v33 = vsel %vm385_vm4, %v4283_v23, 0 }
0x1cd2   :  { %6775 = vmatpush3.bf16.msra.mxu0 %v4474_v33  ;;  %v9632_v56 = vpop.eup %7283 }
0x1cd3   :  { %v5252_v34 = vsel %vm369_vm3, %v9632_v56, 0.0  ;;  %v9636_v33 = vpop.eup %7285 }
0x1cd4   :  { %5007 = vadd.xlane.f32.xlu1 %v5006_v10  ;;  %v5221_v5 = vpop.xlane.xlu1 %5220  ;;  %v5261_v45 = vsel %vm369_vm3, %v9636_v33, 0.0 }
0x1cd5   :  { %v5233_v3 = vsub.f32 %v9502_v18, %v5221_v5 }
0x1cd7   :  { %v5246_v17 = vmul.f32 1.442695, %v5233_v3 }
0x1cd8   :  { %5001 = vadd.xlane.f32.xlu1 %v5000_v14  ;;  %v4428_v11 = vpop.xlane.xlu1 %4427 }
0x1cd9   :  { %7291 = vrcp.f32 %v4428_v11 }
0x1cda   :  { %7293 = vrcp.f32 %v4419_v50 }
0x1cdb   :  { %7295 = vrcp.f32 %v4425_v53 }
0x1cdc   :  { %5259 = vadd.xlane.f32.xlu1 %v5258_v58  ;;  %v4422_v43 = vpop.xlane.xlu1 %4421  ;;  %v9641_v50 = vpop.eup %7287 }
0x1cdd   :  { %7297 = vrcp.f32 %v4422_v43  ;;  %v9643_v10 = vpop.eup %7289  ;;  %v5255_v5 = vsel %vm369_vm3, %v9641_v50, 0.0 }
0x1cde   :  { %7299 = vpow2.f32 %v5250_v54  ;;  %v5264_v58 = vsel %vm369_vm3, %v9643_v10, 0.0 }
0x1cdf   :  { %7301 = vpow2.f32 %v5246_v17  ;;  %v5248_v17 = vmul.f32 1.442695, %v5234_v30 }
0x1ce0   :  { %5253 = vadd.xlane.f32.xlu1 %v5252_v34  ;;  %v4431_v18 = vpop.xlane.xlu1 %4430 }
0x1ce1   :  { %7303 = vrcp.f32 %v4431_v18 }
0x1ce2   :  { %4729 = vrot.lane.b32.xlu0 %v4283_v23, %s7468_s3 }
0x1ce4   :  { %5262 = vadd.xlane.f32.xlu1 %v5261_v45  ;;  %v4440_v53 = vpop.xlane.xlu1 %4439 }
0x1ce6   :  { %v7292_v46 = vpop.eup %7291 }
0x1ce7   :  { %v7294_v23 = vpop.eup %7293  ;;  %v4448_v3 = vmul.f32 %v7292_v46, %v9506_v24 }
0x1ce8   :  { %5256 = vadd.xlane.f32.xlu1 %v5255_v5  ;;  %v4434_v14 = vpop.xlane.xlu1 %4433  ;;  %v7296_v11 = vpop.eup %7295  ;;  %v4442_v34 = vmul.f32 %v7294_v23, %v9497_v28 }
0x1ce9   :  { %7305 = vrcp.f32 %v4434_v14  ;;  %v4446_v31 = vmul.f32 %v7296_v11, %v9483_v38 }
0x1cea   :  { %v7298_v54 = vpop.eup %7297  ;;  %7307 = vpow2.f32 %v5248_v17 }
0x1ceb   :  { %v9652_v43 = vpop.eup %7299  ;;  %v4444_v36 = vmul.f32 %v7298_v54, %v9510_v12  ;;  %v4458_v45 = vpack.c.bf16 %v4448_v3, %v4446_v31  ;;  %7309 = vrcp.f32 %v4440_v53  ;;  %v4264_v54 = vadd.f32 %v9324_v41, %v9608_v62 }
0x1cec   :  { %5265 = vadd.xlane.f32.xlu1 %v5264_v58  ;;  %v5273_v5 = vsel %vm369_vm3, %v9652_v43, 0.0  ;;  %v9659_v14 = vpop.eup %7301 }
0x1ced   :  { %v4457_v18 = vpack.c.bf16 %v4444_v36, %v4442_v34  ;;  %v5267_v28 = vsel %vm369_vm3, %v9659_v14, 0.0  ;;  %v4851_v58 = vpack.c.bf16 %v4264_v54, %v4264_v54 }
0x1cee   :  { %v7304_v24 = vpop.eup %7303 }
0x1cef   :  { %6776 = vmatprep.mubr.msk.bf16.mxu0 %vm369_vm3, %v4457_v18  ;;  %v4450_v38 = vmul.f32 %v7304_v24, %v9514_v19 }
0x1cf0   :  { %5274 = vadd.xlane.f32.xlu1 %v5273_v5  ;;  %6777 = vmatmul.mubr.msk.bf16.vlgmr.msra.gmra.mxu0 %vm369_vm3, %v4458_v45 }
0x1cf4   :  { %5268 = vadd.xlane.f32.xlu1 %v5267_v28 }
0x1cf6   :  { %v7306_v12 = vpop.eup %7305 }
0x1cf7   :  { %v4452_v46 = vmul.f32 %v7306_v12, %v9524_v20  ;;  %v9668_v23 = vpop.eup %7307 }
0x1cf8   :  { %v5270_v3 = vsel %vm369_vm3, %v9668_v23, 0.0  ;;  %v7310_v19 = vpop.eup %7309 }
0x1cf9   :  { %v4459_v30 = vpack.c.bf16 %v4452_v46, %v4450_v38  ;;  %v4456_v34 = vmul.f32 %v7310_v19, %v9520_v51 }
0x1cfb   :  { %6780 = vmatprep.mubr.msk.bf16.mxu0 %vm369_vm3, %v4459_v30 }
0x1cfd   :  { %v4437_v11 = vpop.xlane.xlu0 %4436 }
0x1cfe   :  { %7311 = vrcp.f32 %v4437_v11 }
0x1d01   :  { %5271 = vadd.xlane.f32.xlu0 %v5270_v3 }
0x1d05   :  { %5297 = vrot.lane.b32.xlu1 %v4851_v58, %s7468_s3 }
0x1d0b   :  { %v7312_v20 = vpop.eup %7311 }
0x1d0c   :  { %v4454_v17 = vmul.f32 %v7312_v20, %v9529_v52 }
0x1d0e   :  { %v4460_v36 = vpack.c.bf16 %v4456_v34, %v4454_v17 }
0x1d10   :  { %6781 = vmatmul.mubr.msk.bf16.gmra.mxu0 %vm369_vm3, %v4460_v36 }
0x1d39   :  { %v4692_v53 = vpop.xlane.xlu1 %4691 }
0x1d3d   :  { %v4686_v31 = vpop.xlane.xlu1 %4685 }
0x1d3e   :  { %7313 = vrcp.f32 %v4686_v31 }
0x1d41   :  { %v4695_v41 = vpop.xlane.xlu1 %4694  ;;  %v4704_v62 = vpop.xlane.xlu0 %4703 }
0x1d45   :  { %v4689_v18 = vpop.xlane.xlu1 %4688 }
0x1d46   :  { %7315 = vrcp.f32 %v4689_v18 }
0x1d47   :  { %7317 = vrcp.f32 %v4695_v41 }
0x1d48   :  { %7319 = vrcp.f32 %v4692_v53 }
0x1d49   :  { %v4993_v45 = vpop.xlane.xlu0 %4992  ;;  %v4698_v5 = vpop.xlane.xlu1 %4697 }
0x1d4b   :  { %v7314_v52 = vpop.eup %7313 }
0x1d4c   :  { %v4709_v46 = vmul.f32 %v7314_v52, %v9547_v1 }
0x1d4d   :  { %v4987_v28 = vpop.xlane.xlu0 %4986  ;;  %v4707_v24 = vpop.xlane.xlu1 %4706 }
0x1d4e   :  { %7321 = vrcp.f32 %v4707_v24 }
0x1d4f   :  { %7323 = vrcp.f32 %v4698_v5 }
0x1d50   :  { %7325 = vrcp.f32 %v4704_v62  ;;  %v5042_v62 = vsel %vm385_vm4, %v4851_v58, 0 }
0x1d51   :  { %v5005_v51 = vpop.xlane.xlu0 %5004  ;;  %v4701_v12 = vpop.xlane.xlu1 %4700 }
0x1d52   :  { %7327 = vrcp.f32 %v4701_v12 }
0x1d53   :  { %v7316_v38 = vpop.eup %7315  ;;  %7329 = vrcp.f32 %v4987_v28 }
0x1d54   :  { %v4711_v30 = vmul.f32 %v7316_v38, %v9562_v59  ;;  %v7318_v11 = vpop.eup %7317 }
0x1d55   :  { %v4999_v54 = vpop.xlane.xlu0 %4998  ;;  %v4996_v3 = vpop.xlane.xlu1 %4995  ;;  %v4715_v17 = vmul.f32 %v7318_v11, %v9552_v8 }
0x1d56   :  { %v4724_v19 = vpack.c.bf16 %v4711_v30, %v4709_v46  ;;  %v7320_v20 = vpop.eup %7319  ;;  %7331 = vrcp.f32 %v4996_v3 }
0x1d57   :  { %7333 = vrcp.f32 %v4993_v45  ;;  %v4713_v53 = vmul.f32 %v7320_v20, %v9541_v6 }
0x1d58   :  { %6796 = vmatprep.mubr.msk.bf16.mxu0 %vm369_vm3, %v4724_v19 }
0x1d59   :  { %v4730_v34 = vpop.permute.xlu0 %4729  ;;  %v4990_v36 = vpop.xlane.xlu1 %4989  ;;  %v4725_v59 = vpack.c.bf16 %v4715_v17, %v4713_v53 }
0x1d5a   :  { %v4744_v1 = vsel %vm385_vm4, %v4730_v34, 0  ;;  %7335 = vrcp.f32 %v4990_v36  ;;  %6890 = vmatprep.subr.msk.bf16.mxu0 %vm385_vm4, %v4730_v34 }
0x1d5b   :  { %6795 = vmatpush3.bf16.msra.mxu0 %v4744_v1  ;;  %v7322_v31 = vpop.eup %7321  ;;  %7337 = vrcp.f32 %v4999_v54 }
0x1d5c   :  { %6892 = vmatprep.subr.msk.bf16.mxu0 %vm385_vm4, %v4851_v58  ;;  %v7324_v8 = vpop.eup %7323  ;;  %v4723_v45 = vmul.f32 %v7322_v31, %v9577_v39 }
0x1d5d   :  { %v5008_v41 = vpop.xlane.xlu1 %5007  ;;  %v7326_v18 = vpop.eup %7325  ;;  %v4717_v28 = vmul.f32 %v7324_v8, %v9568_v4 }
0x1d5e   :  { %6797 = vmatmul.mubr.msk.bf16.vlgmr.msra.gmra.mxu0 %vm369_vm3, %v4725_v59  ;;  %7339 = vrcp.f32 %v5008_v41  ;;  %v4721_v52 = vmul.f32 %v7326_v18, %v9555_v40 }
0x1d5f   :  { %6815 = vmatpush3.bf16.msra.mxu0 %v5042_v62  ;;  %v7328_v6 = vpop.eup %7327  ;;  %7341 = vrcp.f32 %v5005_v51 }
0x1d60   :  { %v4719_v24 = vmul.f32 %v7328_v6, %v9582_v49  ;;  %v7330_v38 = vpop.eup %7329  ;;  %v4727_v46 = vpack.c.bf16 %v4723_v45, %v4721_v52 }
0x1d61   :  { %v5002_v5 = vpop.xlane.xlu1 %5001  ;;  %v5010_v4 = vmul.f32 %v7330_v38, %v9579_v35 }
0x1d62   :  { %7343 = vrcp.f32 %v5002_v5  ;;  %v4726_v12 = vpack.c.bf16 %v4719_v24, %v4717_v28 }
0x1d63   :  { %v7332_v58 = vpop.eup %7331 }
0x1d64   :  { %6800 = vmatprep.mubr.msk.bf16.mxu0 %vm369_vm3, %v4726_v12  ;;  %v7334_v11 = vpop.eup %7333  ;;  %v5016_v51 = vmul.f32 %v7332_v58, %v9597_v16 }
0x1d65   :  { %v5260_v30 = vpop.xlane.xlu1 %5259  ;;  %v5014_v40 = vmul.f32 %v7334_v11, %v9570_v44 }
0x1d66   :  { %6801 = vmatmul.mubr.msk.bf16.gmra.mxu0 %vm369_vm3, %v4727_v46 }
0x1d67   :  { %v7336_v39 = vpop.eup %7335  ;;  %v5026_v20 = vpack.c.bf16 %v5016_v51, %v5014_v40 }
0x1d68   :  { %v5012_v49 = vmul.f32 %v7336_v39, %v9601_v37  ;;  %v7338_v19 = vpop.eup %7337 }
0x1d69   :  { %v5254_v54 = vpop.xlane.xlu1 %5253  ;;  %v5018_v35 = vmul.f32 %v7338_v19, %v9599_v26 }
0x1d6a   :  { %v5025_v3 = vpack.c.bf16 %v5012_v49, %v5010_v4  ;;  %7345 = vrcp.f32 %v5254_v54 }
0x1d6b   :  { %v7340_v17 = vpop.eup %7339 }
0x1d6c   :  { %6816 = vmatprep.mubr.msk.bf16.mxu0 %vm369_vm3, %v5025_v3  ;;  %v7342_v36 = vpop.eup %7341  ;;  %v5024_v37 = vmul.f32 %v7340_v17, %v9615_v27 }
0x1d6d   :  { %v5263_v34 = vpop.xlane.xlu1 %5262  ;;  %v5022_v59 = vmul.f32 %v7342_v36, %v9590_v2 }
0x1d6e   :  { %6817 = vmatmul.mubr.msk.bf16.vlgmr.msra.gmra.mxu0 %vm369_vm3, %v5026_v20  ;;  %7347 = vrcp.f32 %v5263_v34 }
0x1d6f   :  { %v7344_v53 = vpop.eup %7343  ;;  %7349 = vrcp.f32 %v5260_v30  ;;  %v5028_v31 = vpack.c.bf16 %v5024_v37, %v5022_v59 }
0x1d70   :  { %v5020_v16 = vmul.f32 %v7344_v53, %v9622_v55 }
0x1d71   :  { %v5257_v44 = vpop.xlane.xlu1 %5256 }
0x1d72   :  { %7351 = vrcp.f32 %v5257_v44  ;;  %v5027_v1 = vpack.c.bf16 %v5020_v16, %v5018_v35 }
0x1d74   :  { %6820 = vmatprep.mubr.msk.bf16.mxu0 %vm369_vm3, %v5027_v1 }
0x1d75   :  { %v5266_v41 = vpop.xlane.xlu1 %5265 }
0x1d76   :  { %6821 = vmatmul.mubr.msk.bf16.gmra.mxu0 %vm369_vm3, %v5028_v31  ;;  %7353 = vrcp.f32 %v5266_v41 }
0x1d77   :  { %v7346_v62 = vpop.eup %7345 }
0x1d78   :  { %v5277_v45 = vmul.f32 %v7346_v62, %v9632_v56 }
0x1d79   :  { %v5275_v8 = vpop.xlane.xlu1 %5274 }
0x1d7b   :  { %v7348_v26 = vpop.eup %7347 }
0x1d7c   :  { %v7350_v55 = vpop.eup %7349  ;;  %v5283_v6 = vmul.f32 %v7348_v26, %v9636_v33 }
0x1d7d   :  { %v5269_v18 = vpop.xlane.xlu1 %5268  ;;  %v5281_v28 = vmul.f32 %v7350_v55, %v9624_v22 }
0x1d7e   :  { %7355 = vrcp.f32 %v5269_v18 }
0x1d7f   :  { %v7352_v27 = vpop.eup %7351  ;;  %v5293_v12 = vpack.c.bf16 %v5283_v6, %v5281_v28  ;;  %7357 = vrcp.f32 %v5275_v8 }
0x1d80   :  { %v5279_v2 = vmul.f32 %v7352_v27, %v9641_v50 }
0x1d81   :  { %v5298_v5 = vpop.permute.xlu1 %5297 }
0x1d82   :  { %v5312_v24 = vsel %vm385_vm4, %v5298_v5, 0  ;;  %6894 = vmatprep.subr.msk.bf16.mxu0 %vm385_vm4, %v5298_v5  ;;  %v5292_v52 = vpack.c.bf16 %v5279_v2, %v5277_v45 }
0x1d83   :  { %6835 = vmatpush3.bf16.msra.mxu0 %v5312_v24  ;;  %v7354_v38 = vpop.eup %7353 }
0x1d84   :  { %6836 = vmatprep.mubr.msk.bf16.mxu0 %vm369_vm3, %v5292_v52  ;;  %v5285_v50 = vmul.f32 %v7354_v38, %v9643_v10 }
0x1d86   :  { %6837 = vmatmul.mubr.msk.bf16.vlgmr.msra.gmra.mxu0 %vm369_vm3, %v5293_v12 }
0x1d8a   :  { %v5272_v33 = vpop.xlane.xlu0 %5271 }
0x1d8b   :  { %v7356_v56 = vpop.eup %7355  ;;  %7359 = vrcp.f32 %v5272_v33 }
0x1d8c   :  { %v5287_v22 = vmul.f32 %v7356_v56, %v9659_v14  ;;  %v7358_v58 = vpop.eup %7357 }
0x1d8d   :  { %v5291_v39 = vmul.f32 %v7358_v58, %v9652_v43  ;;  %v7028_v43 = vld [vmem:[%s10123_s10 + $0x18] sm:$0xff]  }
0x1d8e   :  { %v5294_v46 = vpack.c.bf16 %v5287_v22, %v5285_v50  ;;  %6844 = vmatprep.subr.bf16.mxu1 %v7028_v43  ;;  %v7435_v22 = vld [vmem:[%s10124_s11] ss:$0 sm:$0xff]  ;;  %s7470_s11 = smov [#allocation2]  }
0x1d8f   :  { %6845 = vmatpush3.bf16.msra.mxu1 %v7028_v43 }
0x1d90   :  { %6840 = vmatprep.mubr.msk.bf16.mxu0 %vm369_vm3, %v5294_v46 }
0x1d98   :  { %v7360_v30 = vpop.eup %7359 }
0x1d99   :  { %v5289_v11 = vmul.f32 %v7360_v30, %v9668_v23 }
0x1d9b   :  { %v5295_v51 = vpack.c.bf16 %v5291_v39, %v5289_v11 }
0x1d9d   :  { %6841 = vmatmul.mubr.msk.bf16.gmra.mxu0 %vm369_vm3, %v5295_v51 }
0x1db0   :  { %v9720_v4 = vpop.f32.mrf.mxu0 }
0x1db2   :  { %v4510_v49 = vpop.f32.mrf.mxu0 }
0x1db4   :  { %v6779_v54 = vpop.f32.mrf.mxu0 }
0x1db6   :  { %v4513_v40 = vpop.f32.mrf.mxu0 }
0x1dd0   :  { %v9722_v10 = vpop.f32.mrf.mxu0 }
0x1dd2   :  { %v9724_v14 = vpop.f32.mrf.mxu0 }
0x1dd4   :  { %v9726_v3 = vpop.f32.mrf.mxu0 }
0x1dd6   :  { %v9728_v19 = vpop.f32.mrf.mxu0 }
0x1e1e   :  { %v6798_v20 = vpop.f32.mrf.mxu0 }
0x1e20   :  { %v4780_v23 = vpop.f32.mrf.mxu0 }
0x1e22   :  { %v6799_v17 = vpop.f32.mrf.mxu0 }
0x1e23   :  { %v6962_v16 = vpack.i.bf16 %v6799_v17, %v6798_v20 }
0x1e24   :  { %v4783_v34 = vpop.f32.mrf.mxu0 }
0x1e25   :  { %v6957_v36 = vpack.i.bf16 %v4783_v34, %v4780_v23 }
0x1e26   :  { %v6802_v53 = vpop.f32.mrf.mxu0 }
0x1e27   :  { %6958 = vrot.lane.b32.xlu1 %v6957_v36, %s7469_s23 }
0x1e28   :  { %v4796_v35 = vpop.f32.mrf.mxu0 }
0x1e2a   :  { %v6803_v37 = vpop.f32.mrf.mxu0 }
0x1e2b   :  { %6963 = vrot.lane.b32.xlu1 %v6962_v16, %s7469_s23  ;;  %v6972_v1 = vpack.i.bf16 %v6803_v37, %v6802_v53 }
0x1e2c   :  { %v4799_v44 = vpop.f32.mrf.mxu0 }
0x1e2d   :  { %v6967_v59 = vpack.i.bf16 %v4799_v44, %v4796_v35 }
0x1e2e   :  { %v9735_v31 = vpop.f32.mrf.mxu0 }
0x1e2f   :  { %6973 = vrot.lane.b32.xlu1 %v6972_v1, %s7469_s23  ;;  %6968 = vrot.lane.b32.xlu0 %v6967_v59, %s7469_s23 }
0x1e30   :  { %v5078_v41 = vpop.f32.mrf.mxu0 }
0x1e32   :  { %v9739_v8 = vpop.f32.mrf.mxu0 }
0x1e34   :  { %v5081_v62 = vpop.f32.mrf.mxu0 }
0x1e36   :  { %v9741_v26 = vpop.f32.mrf.mxu0 }
0x1e38   :  { %v9743_v18 = vpop.f32.mrf.mxu0 }
0x1e3a   :  { %v9745_v55 = vpop.f32.mrf.mxu0 }
0x1e3c   :  { %v9747_v27 = vpop.f32.mrf.mxu0 }
0x1e46   :  { %v6838_v6 = vpop.f32.mrf.mxu0 }
0x1e48   :  { %v5348_v45 = vpop.f32.mrf.mxu0 }
0x1e4a   :  { %v6839_v2 = vpop.f32.mrf.mxu0 }
0x1e4b   :  { %v6982_v24 = vpack.i.bf16 %v6839_v2, %v6838_v6 }
0x1e4c   :  { %v5351_v5 = vpop.f32.mrf.mxu0 }
0x1e4d   :  { %v6977_v28 = vpack.i.bf16 %v5351_v5, %v5348_v45 }
0x1e4f   :  { %6978 = vrot.lane.b32.xlu1 %v6977_v28, %s7469_s23 }
0x1e53   :  { %6983 = vrot.lane.b32.xlu1 %v6982_v24, %s7469_s23 }
0x1e5d   :  { %v6842_v52 = vpop.f32.mrf.mxu0 }
0x1e5f   :  { %v5364_v12 = vpop.f32.mrf.mxu0 }
0x1e61   :  { %v6843_v38 = vpop.f32.mrf.mxu0 }
0x1e62   :  { %v6992_v50 = vpack.i.bf16 %v6843_v38, %v6842_v52 }
0x1e63   :  { %v5367_v33 = vpop.f32.mrf.mxu0 }
0x1e64   :  { %v6987_v56 = vpack.i.bf16 %v5367_v33, %v5364_v12 }
0x1e66   :  { %6988 = vrot.lane.b32.xlu1 %v6987_v56, %s7469_s23 }
0x1e6a   :  { %6993 = vrot.lane.b32.xlu1 %v6992_v50, %s7469_s23 }
0x1e6e   :  { %5433 = vrot.lane.b32.xlu1 %v7435_v22, %s7464_s20  ;;  %s5844_s20 = sshll.u32 %s7470_s11, 4  ;;  %s5845_s20 = int_to_ptr.vmem [resolvable:$true] %s5844_s20 }
0x1e6f   :  { %s7438_s13 = scalar_lea.vmem %s5845_s20, 256  ;;  %p7443_p1 = scmp.lt.s32.totalorder %s5845_s20, %s5845_s20 }
0x1e70   :  { %p7439_p0 = scmp.ne.s32.totalorder %s5845_s20, %s7438_s13  ;;  %p7444_p2 = scmp.lt.s32.totalorder %s7438_s13, %s7438_s13 }
0x1e72   :  { %p7445_p3 = por %p7444_p2, %p7443_p1 }
0x1e74   :  { %p7446_p4 = pnand %p7445_p3, %p7439_p0 }
0x1e99   :  { %v6959_v46 = vpop.permute.xlu1 %6958 }
0x1e9a   :  { %v6961_v58 = vunpack.i.h.bf16 %v6959_v46  ;;  %v6960_v30 = vunpack.i.l.bf16 %v6959_v46 }
0x1e9c   :  { %v4844_v11 = vsel %vm369_vm3, %v4513_v40, %v6961_v58  ;;  %v4843_v39 = vsel %vm369_vm3, %v4510_v49, %v6960_v30 }
0x1e9d   :  { %v5419_v51 = vpack.c.bf16 %v4844_v11, %v4843_v39  ;;  %v6964_v20 = vpop.permute.xlu1 %6963 }
0x1e9e   :  { %v6966_v23 = vunpack.i.h.bf16 %v6964_v20  ;;  %v6965_v43 = vunpack.i.l.bf16 %v6964_v20 }
0x1e9f   :  { %6846 = vmatprep.mubr.msk.bf16.mxu1 %vm322_vm2, %v5419_v51 }
0x1ea0   :  { %v4846_v17 = vsel %vm369_vm3, %v6779_v54, %v6966_v23  ;;  %v4845_v34 = vsel %vm369_vm3, %v9720_v4, %v6965_v43 }
0x1ea1   :  { %v5420_v36 = vpack.c.bf16 %v4846_v17, %v4845_v34  ;;  %v6969_v53 = vpop.permute.xlu0 %6968  ;;  %v6974_v35 = vpop.permute.xlu1 %6973 }
0x1ea2   :  { %v6971_v16 = vunpack.i.h.bf16 %v6969_v53  ;;  %v6970_v37 = vunpack.i.l.bf16 %v6969_v53  ;;  %v6976_v44 = vunpack.i.h.bf16 %v6974_v35  ;;  %v6975_v40 = vunpack.i.l.bf16 %v6974_v35 }
0x1ea3   :  { %6847 = vmatmul.mubr.msk.bf16.vlgmr.msra.gmra.mxu1 %vm322_vm2, %v5420_v36 }
0x1ea4   :  { %v4848_v49 = vsel %vm369_vm3, %v9728_v19, %v6971_v16  ;;  %v4847_v1 = vsel %vm369_vm3, %v9724_v14, %v6970_v37  ;;  %v4850_v54 = vsel %vm369_vm3, %v9726_v3, %v6976_v44  ;;  %v4849_v4 = vsel %vm369_vm3, %v9722_v10, %v6975_v40 }
0x1ea5   :  { %v5421_v59 = vpack.c.bf16 %v4848_v49, %v4847_v1  ;;  %v5422_v6 = vpack.c.bf16 %v4850_v54, %v4849_v4 }
0x1ea7   :  { %6850 = vmatprep.mubr.msk.bf16.mxu1 %vm322_vm2, %v5421_v59 }
0x1eab   :  { %6851 = vmatmul.mubr.msk.bf16.gmra.mxu1 %vm322_vm2, %v5422_v6 }
0x1ec1   :  { %v6979_v45 = vpop.permute.xlu1 %6978 }
0x1ec2   :  { %v6981_v2 = vunpack.i.h.bf16 %v6979_v45  ;;  %v6980_v5 = vunpack.i.l.bf16 %v6979_v45 }
0x1ec4   :  { %v5412_v19 = vsel %vm369_vm3, %v5081_v62, %v6981_v2  ;;  %v5411_v28 = vsel %vm369_vm3, %v5078_v41, %v6980_v5 }
0x1ec5   :  { %v5423_v14 = vpack.c.bf16 %v5412_v19, %v5411_v28  ;;  %v6984_v24 = vpop.permute.xlu1 %6983 }
0x1ec6   :  { %v6986_v52 = vunpack.i.h.bf16 %v6984_v24  ;;  %v6985_v12 = vunpack.i.l.bf16 %v6984_v24 }
0x1ec7   :  { %6854 = vmatprep.mubr.msk.bf16.mxu1 %vm322_vm2, %v5423_v14 }
0x1ec8   :  { %v5414_v10 = vsel %vm369_vm3, %v9739_v8, %v6986_v52  ;;  %v5413_v3 = vsel %vm369_vm3, %v9735_v31, %v6985_v12 }
0x1ec9   :  { %v5424_v38 = vpack.c.bf16 %v5414_v10, %v5413_v3 }
0x1ecb   :  { %6855 = vmatmul.mubr.msk.bf16.gmra.mxu1 %vm322_vm2, %v5424_v38 }
0x1ed8   :  { %v6989_v33 = vpop.permute.xlu1 %6988 }
0x1ed9   :  { %v6991_v56 = vunpack.i.h.bf16 %v6989_v33  ;;  %v6990_v62 = vunpack.i.l.bf16 %v6989_v33 }
0x1edb   :  { %v5416_v41 = vsel %vm369_vm3, %v9747_v27, %v6991_v56  ;;  %v5415_v50 = vsel %vm369_vm3, %v9743_v18, %v6990_v62 }
0x1edc   :  { %v5425_v22 = vpack.c.bf16 %v5416_v41, %v5415_v50  ;;  %v6994_v46 = vpop.permute.xlu1 %6993 }
0x1edd   :  { %v6996_v58 = vunpack.i.h.bf16 %v6994_v46  ;;  %v6995_v30 = vunpack.i.l.bf16 %v6994_v46 }
0x1ede   :  { %6858 = vmatprep.mubr.msk.bf16.mxu1 %vm322_vm2, %v5425_v22 }
0x1edf   :  { %v5418_v31 = vsel %vm369_vm3, %v9745_v55, %v6996_v58  ;;  %v5417_v8 = vsel %vm369_vm3, %v9741_v26, %v6995_v30 }
0x1ee0   :  { %v5426_v11 = vpack.c.bf16 %v5418_v31, %v5417_v8  ;;  %v9792_v39 = vpop.permute.xlu1 %5433 }
0x1ee2   :  { %6859 = vmatmul.mubr.msk.bf16.gmra.mxu1 %vm322_vm2, %v5426_v11 }
0x1f63   :  { %v6848_v27 = vpop.f32.mrf.mxu1 }
0x1f64   :  { %v5503_v18 = vadd.f32 %v6848_v27, %v9792_v39 }
0x1f65   :  { %v5494_v51 = vpop.f32.mrf.mxu1 }
0x1f66   :  { %v9796_v20 = vadd.f32 %v5503_v18, %v8703_v25  ;;  %v5495_v23 = vadd.f32 %v5494_v51, %v9792_v39  ;;  %v10145_v18 = vld [vmem:[#allocation5_spill] sm:$0xff] }
0x1f67   :  { %v6849_v43 = vpop.f32.mrf.mxu1 }
0x1f68   :  { %v9800_v55 = vadd.f32 %v5495_v23, %v8697_v61  ;;  %v5506_v26 = vadd.f32 %v6849_v43, %v9792_v39  ;;  %v5579_v17 = vsel %vm193_vm0, %v9796_v20, 0.0 }
0x1f69   :  { %5580 = vadd.xlane.f32.xlu0 %v5579_v17  ;;  %v5497_v34 = vpop.f32.mrf.mxu1 }
0x1f6a   :  { %v5498_v36 = vadd.f32 %v5497_v34, %v9792_v39  ;;  %v9807_v35 = vadd.f32 %v5506_v26, %v8694_v48  ;;  %v5573_v61 = vsel %vm193_vm0, %v9800_v55, 0.0 }
0x1f6b   :  { %v6852_v53 = vpop.f32.mrf.mxu1 }
0x1f6c   :  { %v9810_v25 = vadd.f32 %v5498_v36, %v8707_v29  ;;  %v5519_v16 = vadd.f32 %v6852_v53, %v9792_v39  ;;  %v5582_v1 = vsel %vm193_vm0, %v9807_v35, 0.0 }
0x1f6d   :  { %v5510_v37 = vpop.f32.mrf.mxu1  ;;  %5574 = vadd.xlane.f32.xlu0 %v5573_v61 }
0x1f6e   :  { %v9816_v44 = vadd.f32 %v5519_v16, %v8749_v32  ;;  %v5511_v40 = vadd.f32 %v5510_v37, %v9792_v39  ;;  %v5576_v49 = vsel %vm193_vm0, %v9810_v25, 0.0 }
0x1f6f   :  { %v6853_v48 = vpop.f32.mrf.mxu1  ;;  %5577 = vadd.xlane.f32.xlu1 %v5576_v49 }
0x1f70   :  { %v5522_v29 = vadd.f32 %v6853_v48, %v9792_v39  ;;  %v9825_v54 = vadd.f32 %v5511_v40, %v8746_v13  ;;  %v5591_v6 = vsel %vm193_vm0, %v9816_v44, 0.0 }
0x1f71   :  { %v5513_v59 = vpop.f32.mrf.mxu1  ;;  %5583 = vadd.xlane.f32.xlu0 %v5582_v1 }
0x1f72   :  { %v9828_v32 = vadd.f32 %v5522_v29, %v8737_v47  ;;  %v5514_v4 = vadd.f32 %v5513_v59, %v9792_v39  ;;  %v5585_v13 = vsel %vm193_vm0, %v9825_v54, 0.0 }
0x1f73   :  { %5592 = vadd.xlane.f32.xlu1 %v5591_v6 }
0x1f74   :  { %v9834_v45 = vadd.f32 %v5514_v4, %v8757_v15  ;;  %v5594_v2 = vsel %vm193_vm0, %v9828_v32, 0.0 }
0x1f75   :  { %5595 = vadd.xlane.f32.xlu0 %v5594_v2 }
0x1f76   :  { %v5588_v47 = vsel %vm193_vm0, %v9834_v45, 0.0 }
0x1f77   :  { %5586 = vadd.xlane.f32.xlu1 %v5585_v13 }
0x1f79   :  { %5589 = vadd.xlane.f32.xlu0 %v5588_v47 }
0x1f8b   :  { %v6856_v5 = vpop.f32.mrf.mxu1 }
0x1f8c   :  { %v5535_v19 = vadd.f32 %v6856_v5, %v9792_v39 }
0x1f8d   :  { %v5526_v28 = vpop.f32.mrf.mxu1 }
0x1f8e   :  { %v9844_v14 = vadd.f32 %v5535_v19, %v8860_v60  ;;  %v5527_v15 = vadd.f32 %v5526_v28, %v9792_v39 }
0x1f8f   :  { %v6857_v24 = vpop.f32.mrf.mxu1 }
0x1f90   :  { %v9848_v52 = vadd.f32 %v5527_v15, %v8846_v0  ;;  %v5538_v12 = vadd.f32 %v6857_v24, %v9792_v39  ;;  %v5603_v10 = vsel %vm193_vm0, %v9844_v14, 0.0 }
0x1f91   :  { %v5529_v3 = vpop.f32.mrf.mxu1  ;;  %5604 = vadd.xlane.f32.xlu1 %v5603_v10 }
0x1f92   :  { %v9854_v38 = vadd.f32 %v5538_v12, %v8875_v9  ;;  %v5530_v33 = vadd.f32 %v5529_v3, %v9792_v39  ;;  %v5597_v56 = vsel %vm193_vm0, %v9848_v52, 0.0 }
0x1f94   :  { %v9858_v60 = vadd.f32 %v5530_v33, %v8852_v7  ;;  %v5606_v0 = vsel %vm193_vm0, %v9854_v38, 0.0 }
0x1f95   :  { %5598 = vadd.xlane.f32.xlu1 %v5597_v56  ;;  %5607 = vadd.xlane.f32.xlu0 %v5606_v0 }
0x1f96   :  { %v5600_v62 = vsel %vm193_vm0, %v9858_v60, 0.0 }
0x1f99   :  { %5601 = vadd.xlane.f32.xlu0 %v5600_v62 }
0x1fa2   :  { %v6860_v41 = vpop.f32.mrf.mxu1 }
0x1fa3   :  { %v5551_v50 = vadd.f32 %v6860_v41, %v9792_v39 }
0x1fa4   :  { %v5542_v9 = vpop.f32.mrf.mxu1 }
0x1fa5   :  { %v5543_v22 = vadd.f32 %v5542_v9, %v9792_v39  ;;  %v9872_v30 = vadd.f32 %v5551_v50, %v8906_v42 }
0x1fa6   :  { %v6861_v7 = vpop.f32.mrf.mxu1 }
0x1fa7   :  { %v9869_v46 = vadd.f32 %v5543_v22, %v8893_v63  ;;  %v5554_v31 = vadd.f32 %v6861_v7, %v9792_v39  ;;  %v5615_v63 = vsel %vm193_vm0, %v9872_v30, 0.0 }
0x1fa8   :  { %v5545_v58 = vpop.f32.mrf.mxu1 }
0x1fa9   :  { %v5546_v8 = vadd.f32 %v5545_v58, %v9792_v39  ;;  %v5609_v11 = vsel %vm193_vm0, %v9869_v46, 0.0  ;;  %v9882_v51 = vadd.f32 %v5554_v31, %v10145_v18 }
0x1faa   :  { %5610 = vadd.xlane.f32.xlu1 %v5609_v11 }
0x1fab   :  { %v9879_v27 = vadd.f32 %v5546_v8, %v8900_v21  ;;  %v5618_v39 = vsel %vm193_vm0, %v9882_v51, 0.0 }
0x1fad   :  { %v5612_v42 = vsel %vm193_vm0, %v9879_v27, 0.0 }
0x1fae   :  { %5616 = vadd.xlane.f32.xlu1 %v5615_v63  ;;  %5613 = vadd.xlane.f32.xlu0 %v5612_v42 }
0x1fb2   :  { %5619 = vadd.xlane.f32.xlu0 %v5618_v39 }
0x1ff2   :  { %v5581_v23 = vpop.xlane.xlu0 %5580 }
0x1ff3   :  { %v5623_v43 = vmul.f32 0.03125, %v5581_v23 }
0x1ff5   :  { %v9891_v21 = vsub.f32 %v9796_v20, %v5623_v43 }
0x1ff6   :  { %v5575_v26 = vpop.xlane.xlu0 %5574 }
0x1ff7   :  { %v5621_v17 = vmul.f32 0.03125, %v5575_v26  ;;  %v5655_v34 = vmul.f32 %v9891_v21, %v9891_v21 }
0x1ff8   :  { %v5578_v36 = vpop.xlane.xlu1 %5577 }
0x1ff9   :  { %v9896_v53 = vsub.f32 %v9800_v55, %v5621_v17  ;;  %v5622_v16 = vmul.f32 0.03125, %v5578_v36  ;;  %v5675_v61 = vsel %vm193_vm0, %v5655_v34, 0.0 }
0x1ffa   :  { %5676 = vadd.xlane.f32.xlu1 %v5675_v61  ;;  %v5584_v37 = vpop.xlane.xlu0 %5583 }
0x1ffb   :  { %v5624_v40 = vmul.f32 0.03125, %v5584_v37  ;;  %v5653_v49 = vmul.f32 %v9896_v53, %v9896_v53  ;;  %v9902_v20 = vsub.f32 %v9810_v25, %v5622_v16 }
0x1ffc   :  { %v5593_v48 = vpop.xlane.xlu1 %5592 }
0x1ffd   :  { %v9905_v29 = vsub.f32 %v9807_v35, %v5624_v40  ;;  %v5627_v1 = vmul.f32 0.03125, %v5593_v48  ;;  %v5669_v55 = vsel %vm193_vm0, %v5653_v49, 0.0  ;;  %v5654_v25 = vmul.f32 %v9902_v20, %v9902_v20 }
0x1ffe   :  { %5670 = vadd.xlane.f32.xlu1 %v5669_v55  ;;  %v5596_v59 = vpop.xlane.xlu0 %5595 }
0x1fff   :  { %v9909_v4 = vsub.f32 %v9816_v44, %v5627_v1  ;;  %v5628_v6 = vmul.f32 0.03125, %v5596_v59  ;;  %v5656_v2 = vmul.f32 %v9905_v29, %v9905_v29 }
0x2000   :  { %v5587_v13 = vpop.xlane.xlu1 %5586 }
0x2001   :  { %v9916_v47 = vsub.f32 %v9828_v32, %v5628_v6  ;;  %v5625_v35 = vmul.f32 0.03125, %v5587_v13  ;;  %v5678_v5 = vsel %vm193_vm0, %v5656_v2, 0.0  ;;  %v5659_v19 = vmul.f32 %v9909_v4, %v9909_v4 }
0x2002   :  { %5679 = vadd.xlane.f32.xlu0 %v5678_v5  ;;  %v5590_v44 = vpop.xlane.xlu0 %5589  ;;  %v5672_v32 = vsel %vm193_vm0, %v5654_v25, 0.0 }
0x2003   :  { %v9922_v28 = vsub.f32 %v9825_v54, %v5625_v35  ;;  %v5626_v15 = vmul.f32 0.03125, %v5590_v44  ;;  %v5687_v24 = vsel %vm193_vm0, %v5659_v19, 0.0  ;;  %v5660_v3 = vmul.f32 %v9916_v47, %v9916_v47 }
0x2004   :  { %5688 = vadd.xlane.f32.xlu1 %v5687_v24 }
0x2005   :  { %v9926_v12 = vsub.f32 %v9834_v45, %v5626_v15  ;;  %v5657_v10 = vmul.f32 %v9922_v28, %v9922_v28  ;;  %v5690_v54 = vsel %vm193_vm0, %v5660_v3, 0.0 }
0x2006   :  { %5673 = vadd.xlane.f32.xlu0 %v5672_v32 }
0x2007   :  { %v5681_v33 = vsel %vm193_vm0, %v5657_v10, 0.0  ;;  %v5658_v56 = vmul.f32 %v9926_v12, %v9926_v12 }
0x2008   :  { %5682 = vadd.xlane.f32.xlu1 %v5681_v33 }
0x2009   :  { %v5684_v45 = vsel %vm193_vm0, %v5658_v56, 0.0 }
0x200a   :  { %5691 = vadd.xlane.f32.xlu0 %v5690_v54 }
0x200e   :  { %5685 = vadd.xlane.f32.xlu0 %v5684_v45 }
0x201a   :  { %v5605_v0 = vpop.xlane.xlu1 %5604 }
0x201b   :  { %v5631_v62 = vmul.f32 0.03125, %v5605_v0 }
0x201d   :  { %v9939_v41 = vsub.f32 %v9844_v14, %v5631_v62 }
0x201e   :  { %v5599_v9 = vpop.xlane.xlu1 %5598  ;;  %v5608_v50 = vpop.xlane.xlu0 %5607 }
0x201f   :  { %v5629_v22 = vmul.f32 0.03125, %v5599_v9  ;;  %v5632_v7 = vmul.f32 0.03125, %v5608_v50  ;;  %v5663_v58 = vmul.f32 %v9939_v41, %v9939_v41 }
0x2021   :  { %v9944_v31 = vsub.f32 %v9848_v52, %v5629_v22  ;;  %v9947_v8 = vsub.f32 %v9854_v38, %v5632_v7  ;;  %v5699_v11 = vsel %vm193_vm0, %v5663_v58, 0.0 }
0x2022   :  { %5700 = vadd.xlane.f32.xlu1 %v5699_v11  ;;  %v5602_v18 = vpop.xlane.xlu0 %5601 }
0x2023   :  { %v5630_v63 = vmul.f32 0.03125, %v5602_v18  ;;  %v5661_v14 = vmul.f32 %v9944_v31, %v9944_v31  ;;  %v5664_v42 = vmul.f32 %v9947_v8, %v9947_v8 }
0x2025   :  { %v9955_v39 = vsub.f32 %v9858_v60, %v5630_v63  ;;  %v5693_v52 = vsel %vm193_vm0, %v5661_v14, 0.0  ;;  %v5702_v23 = vsel %vm193_vm0, %v5664_v42, 0.0 }
0x2026   :  { %5694 = vadd.xlane.f32.xlu1 %v5693_v52  ;;  %5703 = vadd.xlane.f32.xlu0 %v5702_v23 }
0x2027   :  { %v5662_v38 = vmul.f32 %v9955_v39, %v9955_v39 }
0x2029   :  { %v5696_v43 = vsel %vm193_vm0, %v5662_v38, 0.0 }
0x202a   :  { %5697 = vadd.xlane.f32.xlu0 %v5696_v43 }
0x2033   :  { %v5611_v26 = vpop.xlane.xlu1 %5610 }
0x2034   :  { %v5633_v17 = vmul.f32 0.03125, %v5611_v26 }
0x2036   :  { %v9963_v34 = vsub.f32 %v9869_v46, %v5633_v17 }
0x2037   :  { %v5617_v36 = vpop.xlane.xlu1 %5616  ;;  %v5614_v60 = vpop.xlane.xlu0 %5613 }
0x2038   :  { %v5635_v16 = vmul.f32 0.03125, %v5617_v36  ;;  %v5634_v61 = vmul.f32 0.03125, %v5614_v60  ;;  %v5665_v37 = vmul.f32 %v9963_v34, %v9963_v34 }
0x203a   :  { %v9968_v40 = vsub.f32 %v9872_v30, %v5635_v16  ;;  %v9971_v49 = vsub.f32 %v9879_v27, %v5634_v61  ;;  %v5705_v48 = vsel %vm193_vm0, %v5665_v37, 0.0 }
0x203b   :  { %5706 = vadd.xlane.f32.xlu1 %v5705_v48  ;;  %v5620_v1 = vpop.xlane.xlu0 %5619 }
0x203c   :  { %v5636_v55 = vmul.f32 0.03125, %v5620_v1  ;;  %v5667_v46 = vmul.f32 %v9968_v40, %v9968_v40  ;;  %v5666_v59 = vmul.f32 %v9971_v49, %v9971_v49 }
0x203e   :  { %v9979_v6 = vsub.f32 %v9882_v51, %v5636_v55  ;;  %v5711_v30 = vsel %vm193_vm0, %v5667_v46, 0.0  ;;  %v5708_v2 = vsel %vm193_vm0, %v5666_v59, 0.0 }
0x203f   :  { %5712 = vadd.xlane.f32.xlu1 %v5711_v30  ;;  %5709 = vadd.xlane.f32.xlu0 %v5708_v2 }
0x2040   :  { %v5668_v27 = vmul.f32 %v9979_v6, %v9979_v6 }
0x2042   :  { %v5714_v13 = vsel %vm193_vm0, %v5668_v27, 0.0 }
0x2043   :  { %5715 = vadd.xlane.f32.xlu0 %v5714_v13 }
0x2044   :  { %7449 = shalt.err (!%p7446_p4)
}
0x2045   :  { %s7471_s0 = smov 128   ;;  %v5783_v54 = vsub.s32 4, %v8654_v57  ;;  %v7436_v22 = vld [vmem:[%s10127_s14] sm:$0x1f] }
0x2046   :  { %5850 = dma.vmem_to_hbm [thread:$0]  %s5845_s20, 256, %s10129_s16, [#allocation3], %s7471_s0, %s7471_s0, %s7469_s23  }
0x2047   :  { %v9994_v7 = vrot.slane %v7436_v22, %v5783_v54  ;;  %v7437_v57 = vld [vmem:[%s10128_s15] sm:$0x1f] }
0x2048   :  { %v9999_v63 = vrot.slane %v7437_v57, %v5783_v54 }
0x2083   :  { %v5677_v51 = vpop.xlane.xlu1 %5676 }
0x2084   :  { %v5719_v25 = vmul.f32 0.03125, %v5677_v51 }
0x2086   :  { %v5735_v35 = vadd.f32 1e-05, %v5719_v25 }
0x2087   :  { %v5671_v5 = vpop.xlane.xlu1 %5670 }
0x2088   :  { %7361 = vrsqrt.f32 %v5735_v35  ;;  %v5717_v19 = vmul.f32 0.03125, %v5671_v5 }
0x208a   :  { %v5733_v44 = vadd.f32 1e-05, %v5717_v19 }
0x208b   :  { %v5680_v15 = vpop.xlane.xlu0 %5679 }
0x208c   :  { %7363 = vrsqrt.f32 %v5733_v44  ;;  %v5720_v24 = vmul.f32 0.03125, %v5680_v15 }
0x208d   :  { %v5689_v32 = vpop.xlane.xlu1 %5688 }
0x208e   :  { %v5736_v10 = vadd.f32 1e-05, %v5720_v24  ;;  %v5723_v3 = vmul.f32 0.03125, %v5689_v32 }
0x208f   :  { %v5674_v33 = vpop.xlane.xlu0 %5673 }
0x2090   :  { %7365 = vrsqrt.f32 %v5736_v10  ;;  %v5739_v56 = vadd.f32 1e-05, %v5723_v3  ;;  %v5718_v45 = vmul.f32 0.03125, %v5674_v33 }
0x2091   :  { %v5683_v0 = vpop.xlane.xlu1 %5682 }
0x2092   :  { %7367 = vrsqrt.f32 %v5739_v56  ;;  %v5734_v62 = vadd.f32 1e-05, %v5718_v45  ;;  %v5721_v9 = vmul.f32 0.03125, %v5683_v0 }
0x2093   :  { %v5692_v50 = vpop.xlane.xlu0 %5691 }
0x2094   :  { %7369 = vrsqrt.f32 %v5734_v62  ;;  %v5737_v58 = vadd.f32 1e-05, %v5721_v9  ;;  %v5724_v11 = vmul.f32 0.03125, %v5692_v50 }
0x2095   :  { %v7362_v18 = vpop.eup %7361 }
0x2096   :  { %v5767_v14 = vmul.f32 %v7362_v18, %v9891_v21  ;;  %7371 = vrsqrt.f32 %v5737_v58  ;;  %v5740_v42 = vadd.f32 1e-05, %v5724_v11 }
0x2097   :  { %v5686_v52 = vpop.xlane.xlu0 %5685 }
0x2098   :  { %v5787_v23 = vmul.f32 %v9994_v7, %v5767_v14  ;;  %7373 = vrsqrt.f32 %v5740_v42  ;;  %v5722_v38 = vmul.f32 0.03125, %v5686_v52 }
0x2099   :  { %v7364_v43 = vpop.eup %7363 }
0x209a   :  { %v5807_v26 = vadd.f32 %v9999_v63, %v5787_v23  ;;  %v5765_v17 = vmul.f32 %v7364_v43, %v9896_v53  ;;  %v5738_v36 = vadd.f32 1e-05, %v5722_v38 }
0x209c   :  { %5825 = vst.msk [vmem:[%s10130_s17 + $0x10] sm:$0xff] %vm193_vm0, %v5807_v26  ;;  %v5785_v21 = vmul.f32 %v9994_v7, %v5765_v17  ;;  %7375 = vrsqrt.f32 %v5738_v36 }
0x209d   :  { %v7366_v60 = vpop.eup %7365 }
0x209e   :  { %v5805_v16 = vadd.f32 %v9999_v63, %v5785_v21  ;;  %v5768_v61 = vmul.f32 %v7366_v60, %v9905_v29 }
0x209f   :  { %v7368_v37 = vpop.eup %7367 }
0x20a0   :  { %5823 = vst.msk [vmem:[%s10130_s17] sm:$0xff] %vm193_vm0, %v5805_v16  ;;  %v5788_v53 = vmul.f32 %v9994_v7, %v5768_v61  ;;  %v5771_v48 = vmul.f32 %v7368_v37, %v9909_v4 }
0x20a1   :  { %v7370_v1 = vpop.eup %7369 }
0x20a2   :  { %v5808_v55 = vadd.f32 %v9999_v63, %v5788_v53  ;;  %v5791_v46 = vmul.f32 %v9994_v7, %v5771_v48  ;;  %v5766_v59 = vmul.f32 %v7370_v1, %v9902_v20 }
0x20a3   :  { %v7372_v30 = vpop.eup %7371 }
0x20a4   :  { %5826 = vst.msk [vmem:[%s10130_s17 + $0x18] sm:$0xff] %vm193_vm0, %v5808_v55  ;;  %v5811_v29 = vadd.f32 %v9999_v63, %v5791_v46  ;;  %v5786_v2 = vmul.f32 %v9994_v7, %v5766_v59  ;;  %v5769_v27 = vmul.f32 %v7372_v30, %v9922_v28 }
0x20a5   :  { %v7374_v4 = vpop.eup %7373 }
0x20a6   :  { %5829 = vst.msk [vmem:[%s10130_s17 + $0x30] sm:$0xff] %vm193_vm0, %v5811_v29  ;;  %v5806_v20 = vadd.f32 %v9999_v63, %v5786_v2  ;;  %v5789_v13 = vmul.f32 %v9994_v7, %v5769_v27  ;;  %v5772_v51 = vmul.f32 %v7374_v4, %v9916_v47 }
0x20a8   :  { %5824 = vst.msk [vmem:[%s10130_s17 + $0x8] sm:$0xff] %vm193_vm0, %v5806_v20  ;;  %v5809_v25 = vadd.f32 %v9999_v63, %v5789_v13  ;;  %v5792_v28 = vmul.f32 %v9994_v7, %v5772_v51 }
0x20a9   :  { %v7376_v35 = vpop.eup %7375 }
0x20aa   :  { %5827 = vst.msk [vmem:[%s10130_s17 + $0x20] sm:$0xff] %vm193_vm0, %v5809_v25  ;;  %v5812_v5 = vadd.f32 %v9999_v63, %v5792_v28  ;;  %v5770_v19 = vmul.f32 %v7376_v35, %v9926_v12 }
0x20ab   :  { %v5701_v47 = vpop.xlane.xlu1 %5700 }
0x20ac   :  { %5830 = vst.msk [vmem:[%s10130_s17 + $0x38] sm:$0xff] %vm193_vm0, %v5812_v5  ;;  %v5790_v44 = vmul.f32 %v9994_v7, %v5770_v19  ;;  %v5727_v15 = vmul.f32 0.03125, %v5701_v47 }
0x20ae   :  { %v5810_v24 = vadd.f32 %v9999_v63, %v5790_v44  ;;  %v5743_v32 = vadd.f32 1e-05, %v5727_v15 }
0x20af   :  { %v5695_v10 = vpop.xlane.xlu1 %5694  ;;  %v5704_v3 = vpop.xlane.xlu0 %5703 }
0x20b0   :  { %5828 = vst.msk [vmem:[%s10130_s17 + $0x28] sm:$0xff] %vm193_vm0, %v5810_v24  ;;  %7377 = vrsqrt.f32 %v5743_v32  ;;  %v5725_v12 = vmul.f32 0.03125, %v5695_v10  ;;  %v5728_v33 = vmul.f32 0.03125, %v5704_v3 }
0x20b2   :  { %v5741_v54 = vadd.f32 1e-05, %v5725_v12  ;;  %v5744_v56 = vadd.f32 1e-05, %v5728_v33 }
0x20b3   :  { %v5698_v45 = vpop.xlane.xlu0 %5697 }
0x20b4   :  { %7379 = vrsqrt.f32 %v5741_v54  ;;  %v5726_v0 = vmul.f32 0.03125, %v5698_v45 }
0x20b5   :  { %7381 = vrsqrt.f32 %v5744_v56 }
0x20b6   :  { %v5742_v62 = vadd.f32 1e-05, %v5726_v0 }
0x20b8   :  { %7383 = vrsqrt.f32 %v5742_v62 }
0x20bd   :  { %v7378_v9 = vpop.eup %7377 }
0x20be   :  { %v5775_v50 = vmul.f32 %v7378_v9, %v9939_v41 }
0x20c0   :  { %v5795_v22 = vmul.f32 %v9994_v7, %v5775_v50 }
0x20c1   :  { %v7380_v58 = vpop.eup %7379 }
0x20c2   :  { %v7382_v11 = vpop.eup %7381  ;;  %v5815_v18 = vadd.f32 %v9999_v63, %v5795_v22  ;;  %v5773_v57 = vmul.f32 %v7380_v58, %v9944_v31 }
0x20c3   :  { %v5776_v14 = vmul.f32 %v7382_v11, %v9947_v8 }
0x20c4   :  { %5833 = vst.msk [vmem:[%s10130_s17 + $0x50] sm:$0xff] %vm193_vm0, %v5815_v18  ;;  %v5793_v42 = vmul.f32 %v9994_v7, %v5773_v57  ;;  %v5707_v52 = vpop.xlane.xlu1 %5706 }
0x20c5   :  { %v7384_v23 = vpop.eup %7383  ;;  %v5796_v41 = vmul.f32 %v9994_v7, %v5776_v14  ;;  %v5729_v38 = vmul.f32 0.03125, %v5707_v52 }
0x20c6   :  { %v5813_v43 = vadd.f32 %v9999_v63, %v5793_v42  ;;  %v5774_v26 = vmul.f32 %v7384_v23, %v9955_v39 }
0x20c7   :  { %v5816_v31 = vadd.f32 %v9999_v63, %v5796_v41  ;;  %v5745_v17 = vadd.f32 1e-05, %v5729_v38 }
0x20c8   :  { %5831 = vst.msk [vmem:[%s10130_s17 + $0x40] sm:$0xff] %vm193_vm0, %v5813_v43  ;;  %v5794_v8 = vmul.f32 %v9994_v7, %v5774_v26  ;;  %v5713_v36 = vpop.xlane.xlu1 %5712  ;;  %v5710_v21 = vpop.xlane.xlu0 %5709 }
0x20c9   :  { %5834 = vst.msk [vmem:[%s10130_s17 + $0x58] sm:$0xff] %vm193_vm0, %v5816_v31  ;;  %7385 = vrsqrt.f32 %v5745_v17  ;;  %v5731_v60 = vmul.f32 0.03125, %v5713_v36  ;;  %v5730_v39 = vmul.f32 0.03125, %v5710_v21 }
0x20ca   :  { %v5814_v16 = vadd.f32 %v9999_v63, %v5794_v8 }
0x20cb   :  { %v5747_v61 = vadd.f32 1e-05, %v5731_v60  ;;  %v5746_v37 = vadd.f32 1e-05, %v5730_v39 }
0x20cc   :  { %5832 = vst.msk [vmem:[%s10130_s17 + $0x48] sm:$0xff] %vm193_vm0, %v5814_v16  ;;  %v5716_v53 = vpop.xlane.xlu0 %5715 }
0x20cd   :  { %7387 = vrsqrt.f32 %v5747_v61  ;;  %v5732_v48 = vmul.f32 0.03125, %v5716_v53 }
0x20ce   :  { %7389 = vrsqrt.f32 %v5746_v37 }
0x20cf   :  { %v5748_v1 = vadd.f32 1e-05, %v5732_v48 }
0x20d1   :  { %7391 = vrsqrt.f32 %v5748_v1 }
0x20d6   :  { %v7386_v55 = vpop.eup %7385 }
0x20d7   :  { %v5777_v46 = vmul.f32 %v7386_v55, %v9963_v34 }
0x20d9   :  { %v5797_v59 = vmul.f32 %v9994_v7, %v5777_v46 }
0x20da   :  { %v7388_v30 = vpop.eup %7387 }
0x20db   :  { %v7390_v29 = vpop.eup %7389  ;;  %v5817_v2 = vadd.f32 %v9999_v63, %v5797_v59  ;;  %v5779_v27 = vmul.f32 %v7388_v30, %v9968_v40 }
0x20dc   :  { %v5778_v4 = vmul.f32 %v7390_v29, %v9971_v49 }
0x20dd   :  { %5835 = vst.msk [vmem:[%s10130_s17 + $0x60] sm:$0xff] %vm193_vm0, %v5817_v2  ;;  %v5799_v20 = vmul.f32 %v9994_v7, %v5779_v27 }
0x20de   :  { %v7392_v13 = vpop.eup %7391  ;;  %v5798_v34 = vmul.f32 %v9994_v7, %v5778_v4 }
0x20df   :  { %v5819_v51 = vadd.f32 %v9999_v63, %v5799_v20  ;;  %v5780_v25 = vmul.f32 %v7392_v13, %v9979_v6 }
0x20e0   :  { %v5818_v28 = vadd.f32 %v9999_v63, %v5798_v34 }
0x20e1   :  { %5837 = vst.msk [vmem:[%s10130_s17 + $0x70] sm:$0xff] %vm193_vm0, %v5819_v51  ;;  %v5800_v40 = vmul.f32 %v9994_v7, %v5780_v25 }
0x20e2   :  { %5836 = vst.msk [vmem:[%s10130_s17 + $0x68] sm:$0xff] %vm193_vm0, %v5818_v28 }
0x20e3   :  { %v5820_v49 = vadd.f32 %v9999_v63, %v5800_v40 }
0x20e5   :  { %5838 = vst.msk [vmem:[%s10130_s17 + $0x78] sm:$0xff] %vm193_vm0, %v5820_v49 }
0x20e6   :  { %7458 = dma.done.wait [#allocation3], 256  }
0x20e7   :  { %7459 = vsyncadd [#allocation3], 4294967040 }
0x20e8   :  { %5858 = vsyncpa [#allocation3], 1 }

</bundles_post_ra>
